<compile_context>
chip_gen: v7x
topology: tpu7x:2x2x1
jax: 0.10.0
libtpu: 0.0.40
codegen_flags: <defaults>
</compile_context>

<pallas_src>
import functools

import numpy as np
import jax
import jax.numpy as jnp
from jax import lax
from jax.experimental import pallas as pl
from jax.experimental.pallas import tpu as pltpu

CIN = 3     # RGB input
F = 128     # n_filters (module default) == full lane width -> lane-dense

# order of first use inside the kernel == order of the stacked HBM weights
W_RB2_C1, W_RB2_D1, W_RB3_C1, W_RB3_C2, W_RB4_C1, W_RB4_C2 = range(6)


def _round_up(x, m):
    return ((x + m - 1) // m) * m


# ---------------------------------------------------------------------------
# The fused Discriminator kernel (one grid step == one batch element)
# ---------------------------------------------------------------------------

def _discriminator_kernel(
        dims,
        # inputs ------------------------------------------------------------
        xcol1_ref, x_ref, s1_ref, s2_ref,
        rb1_w1, rb1_b1, rb1_wd1, rb1_bd1, rb1_wd2, rb1_bd2,
        rb2_b1, rb2_bd1, rb2_wd2, rb2_bd2,
        rb3_b1, rb3_b2, rb4_b1, rb4_b2,
        lin_w, lin_b,
        whbm_ref,                                   # (6, 1152, 128) bf16 in HBM
        # output -------------------------------------------------------------
        o_ref,
        # scratch ------------------------------------------------------------
        buf2, buf3, xcat, wbuf, wsem):
    (H2, W2, B2), (H3, W3, B3) = dims
    Wp2, Wp3 = W2 + 2, W3 + 2
    R2, R3 = H2 * Wp2, H3 * Wp3                     # conv operand rows (80, 24)

    # -- kick off HBM->VMEM DMAs for the rb2/rb3/rb4 3x3 weights; they are
    #    consumed later in the step, so the fetch hides behind rb1/rb2 compute.
    for i in range(6):
        pltpu.make_async_copy(whbm_ref.at[i], wbuf.at[i], wsem.at[i]).start()

    def wait_w(i):
        pltpu.make_async_copy(whbm_ref.at[i], wbuf.at[i], wsem.at[i]).wait()

    # -- zero only the rows that must read as zero: the padded top/bottom rows
    #    plus the single stale row above/below touched by corner taps of
    #    discarded border outputs.  Left/right border columns of the image
    #    region are rewritten with exact zeros by the pool-output store every
    #    step, and interior rows are fully overwritten before they are read.
    buf2[B2 - 1:B2 + Wp2, :] = jnp.zeros((Wp2 + 1, F), jnp.bfloat16)
    buf2[B2 + (H2 + 1) * Wp2:B2 + (H2 + 2) * Wp2 + 1, :] = \
        jnp.zeros((Wp2 + 1, F), jnp.bfloat16)
    buf3[B3 - 1:B3 + Wp3, :] = jnp.zeros((Wp3 + 1, F), jnp.bfloat16)
    buf3[B3 + (H3 + 1) * Wp3:B3 + (H3 + 2) * Wp3 + 1, :] = \
        jnp.zeros((Wp3 + 1, F), jnp.bfloat16)

    # ---- helpers (all offsets static, traced inline) -----------------------
    def conv3x3(buf, base, Wp, rows, w, b):
        """3x3 'same' conv: 9 statically shifted slices of the zero-bordered
        (H+2)x(W+2) row-major bf16 buffer are stored into the lane-dense
        (rows, 9*128) operand scratch, then contracted with ONE MXU matmul
        (bf16 operands, f32 accumulation).  Result is in the same padded row
        layout; its border-column rows are garbage and never used."""
        t = 0
        for dy in (-1, 0, 1):
            for dx in (-1, 0, 1):
                src = base + Wp + dy * Wp + dx
                xcat[0:rows, t * F:(t + 1) * F] = buf[src:src + rows, :]
                t += 1
        return jnp.dot(xcat[0:rows, :], w, preferred_element_type=jnp.float32) + b

    def store_pool(buf, base, Wp, rows, v):
        # pool outputs carry exact zeros in their border columns -> wholesale
        buf[base + Wp:base + Wp + rows, :] = v.astype(jnp.bfloat16)

    def store_relu_interior(buf, base, Wp, H, W, v):
        # ReLU at store time (relu of a zero border is still zero); write only
        # the W interior columns of each row so the buffer borders stay zero.
        vb = jnp.maximum(v, 0.0).astype(jnp.bfloat16)
        for i in range(H):
            buf[base + (i + 1) * Wp + 1:base + (i + 1) * Wp + 1 + W, :] = \
                vb[i * Wp + 1:i * Wp + 1 + W, :]

    # ===== ResBlockDown 1 : 16x16x3 -> 8x8x128 ===============================
    # conv1 on the host-built im2col of the 3-channel input
    # (relu(im2col(x)) == im2col(relu(x)) since the padding is zero).
    xc = jnp.maximum(xcol1_ref[0], 0.0).astype(jnp.bfloat16)              # (256, 27)
    r = jnp.dot(xc, rb1_w1[...], preferred_element_type=jnp.float32) + rb1_b1[...]
    r = jnp.maximum(r, 0.0).astype(jnp.bfloat16)                          # (256, 128)
    r = jnp.dot(s1_ref[...], r, preferred_element_type=jnp.float32)       # pool -> (80,128) padded
    store_pool(buf2, B2, Wp2, R2, r)
    res = conv3x3(buf2, B2, Wp2, R2, rb1_wd1[...], rb1_bd1[...])          # (80,128)
    xp = jnp.dot(s1_ref[...], x_ref[0].astype(jnp.bfloat16),
                 preferred_element_type=jnp.float32)                      # pool(x) -> (80,3)
    short = jnp.dot(xp.astype(jnp.bfloat16), rb1_wd2[...],
                    preferred_element_type=jnp.float32) + rb1_bd2[...]
    y2 = res + short                                                      # f32 (80,128)

    # ===== ResBlockDown 2 : 8x8 -> 4x4 =======================================
    store_relu_interior(buf2, B2, Wp2, H2, W2, y2)
    wait_w(W_RB2_C1)
    r = conv3x3(buf2, B2, Wp2, R2, wbuf[W_RB2_C1], rb2_b1[...])           # (80,128)
    r = jnp.maximum(r, 0.0).astype(jnp.bfloat16)
    r = jnp.dot(s2_ref[...], r, preferred_element_type=jnp.float32)       # pool -> (24,128) padded
    store_pool(buf3, B3, Wp3, R3, r)
    wait_w(W_RB2_D1)
    res = conv3x3(buf3, B3, Wp3, R3, wbuf[W_RB2_D1], rb2_bd1[...])        # (24,128)
    yp = jnp.dot(s2_ref[...], y2.astype(jnp.bfloat16),
                 preferred_element_type=jnp.float32)                      # pool(y2) -> (24,128)
    short = jnp.dot(yp.astype(jnp.bfloat16), rb2_wd2[...],
                    preferred_element_type=jnp.float32) + rb2_bd2[...]
    y3 = res + short                                                      # f32 (24,128)

    # ===== ResBlock 3 (4x4) ==================================================
    store_relu_interior(buf3, B3, Wp3, H3, W3, y3)
    wait_w(W_RB3_C1)
    r = conv3x3(buf3, B3, Wp3, R3, wbuf[W_RB3_C1], rb3_b1[...])
    store_relu_interior(buf3, B3, Wp3, H3, W3, r)
    wait_w(W_RB3_C2)
    y4 = y3 + conv3x3(buf3, B3, Wp3, R3, wbuf[W_RB3_C2], rb3_b2[...])

    # ===== ResBlock 4 (4x4) ==================================================
    store_relu_interior(buf3, B3, Wp3, H3, W3, y4)
    wait_w(W_RB4_C1)
    r = conv3x3(buf3, B3, Wp3, R3, wbuf[W_RB4_C1], rb4_b1[...])
    store_relu_interior(buf3, B3, Wp3, H3, W3, r)
    wait_w(W_RB4_C2)
    y5 = y4 + conv3x3(buf3, B3, Wp3, R3, wbuf[W_RB4_C2], rb4_b2[...])

    # ===== head : ReLU -> interior spatial sum -> Linear (VPU only) ==========
    col = lax.broadcasted_iota(jnp.int32, (R3, 1), 0) % Wp3
    interior = jnp.logical_and(col >= 1, col <= W3)        # mask border columns
    yr = jnp.where(interior, jnp.maximum(y5, 0.0), 0.0)
    s = jnp.sum(yr, axis=0, keepdims=True)                 # (1, 128)
    o_ref[0] = jnp.sum(s * lin_w[...], axis=1, keepdims=True) + lin_b[...]


# ---------------------------------------------------------------------------
# Host-side layout glue and the pallas_call wrapper
# ---------------------------------------------------------------------------

def _pool_matrix_c2p(H, W):
    """Compact (H*W) input -> padded (H/2 * (W/2+2)) output 2x2 avg pool."""
    Ho, Wo = H // 2, W // 2
    Wpo = Wo + 2
    S = np.zeros((Ho * Wpo, H * W), np.float32)
    for ho in range(Ho):
        for wo in range(Wo):
            q = ho * Wpo + wo + 1
            for r in range(2):
                for c in range(2):
                    S[q, (2 * ho + r) * W + 2 * wo + c] = 0.25
    return jnp.asarray(S, jnp.bfloat16)              # 0.25 exact in bf16


def _pool_matrix_p2p(H, W):
    """Padded (H*(W+2)) input -> padded (H/2 * (W/2+2)) output 2x2 avg pool."""
    Ho, Wo = H // 2, W // 2
    Wpi, Wpo = W + 2, Wo + 2
    S = np.zeros((Ho * Wpo, H * Wpi), np.float32)
    for ho in range(Ho):
        for wo in range(Wo):
            q = ho * Wpo + wo + 1
            for r in range(2):
                for c in range(2):
                    S[q, (2 * ho + r) * Wpi + 2 * wo + c + 1] = 0.25
    return jnp.asarray(S, jnp.bfloat16)


def _im2col3x3(x_nhwc):
    B, H, W, C = x_nhwc.shape
    xp = jnp.pad(x_nhwc, ((0, 0), (1, 1), (1, 1), (0, 0)))
    cols = [xp[:, dy:dy + H, dx:dx + W, :] for dy in range(3) for dx in range(3)]
    return jnp.concatenate(cols, axis=-1).reshape(B, H * W, 9 * C)


def discriminator_pallas(x_nchw, kp):
    B, C, H1, W1 = x_nchw.shape
    H2, W2 = H1 // 2, W1 // 2
    H3, W3 = H2 // 2, W2 // 2
    Wp2, Wp3 = W2 + 2, W3 + 2
    R2, R3 = H2 * Wp2, H3 * Wp3
    BASE2, BASE3 = 8, 8
    NB2 = _round_up(BASE2 + (H2 + 2) * Wp2 + 1, 8)
    NB3 = _round_up(BASE3 + (H3 + 2) * Wp3 + 1, 8)
    dims = ((H2, W2, BASE2), (H3, W3, BASE3))

    x = jnp.transpose(x_nchw, (0, 2, 3, 1)).astype(jnp.float32)   # NCHW -> NHWC
    x_flat = x.reshape(B, H1 * W1, C)
    xcol1 = _im2col3x3(x)                                         # (B, HW1, 27)

    S1 = _pool_matrix_c2p(H1, W1)                                 # (80, 256)
    S2 = _pool_matrix_p2p(H2, W2)                                 # (24, 80)

    inputs = [
        xcol1, x_flat, S1, S2,
        kp["rb1_w1"], kp["rb1_b1"], kp["rb1_wd1"], kp["rb1_bd1"],
        kp["rb1_wd2"], kp["rb1_bd2"],
        kp["rb2_b1"], kp["rb2_bd1"], kp["rb2_wd2"], kp["rb2_bd2"],
        kp["rb3_b1"], kp["rb3_b2"], kp["rb4_b1"], kp["rb4_b2"],
        kp["lin_w"], kp["lin_b"],
        kp["w_stack"],                                            # stays in HBM
    ]

    def _bcast(a):
        return pl.BlockSpec(a.shape, lambda b, _n=a.ndim: (0,) * _n)

    in_specs = [pl.BlockSpec((1, H1 * W1, 9 * C), lambda b: (b, 0, 0)),
                pl.BlockSpec((1, H1 * W1, C), lambda b: (b, 0, 0))]
    in_specs += [_bcast(a) for a in inputs[2:-1]]
    in_specs += [pl.BlockSpec(memory_space=pl.ANY)]   # stacked rb2/3/4 weights

    scratch_shapes = [
        pltpu.VMEM((NB2, F), jnp.bfloat16),        # buf2: padded 8x8 tap buffer
        pltpu.VMEM((NB3, F), jnp.bfloat16),        # buf3: padded 4x4 tap buffer
        pltpu.VMEM((R2, 9 * F), jnp.bfloat16),     # xcat: lane-dense conv operand
        pltpu.VMEM((6, 9 * F, F), jnp.bfloat16),   # wbuf: DMA'd 3x3 weights
        pltpu.SemaphoreType.DMA((6,)),             # wsem
    ]

    out = pl.pallas_call(
        functools.partial(_discriminator_kernel, dims),
        out_shape=jax.ShapeDtypeStruct((B, 1, 1), jnp.float32),
        grid=(B,),
        in_specs=in_specs,
        out_specs=pl.BlockSpec((1, 1, 1), lambda b: (b, 0, 0)),
        scratch_shapes=scratch_shapes,
        compiler_params=pltpu.CompilerParams(
            dimension_semantics=("parallel",),
            vmem_limit_bytes=32 * 1024 * 1024),
    )(*inputs)
    return out.reshape(B, 1)


# ---------------------------------------------------------------------------
# Parameters (synthetic, deterministic).  Conv weights snapped to
# bf16-representable values so the kernel's bf16 MXU operands are lossless.
# ---------------------------------------------------------------------------

def init_params(key, n_filters):
    ks = jax.random.split(key, 11)

    def conv(k, cin, cout, ksize):
        kw_, kb_ = jax.random.split(k)
        w = jax.random.normal(kw_, (cout, cin, ksize, ksize), jnp.float32)
        w = (w / np.sqrt(cin * ksize * ksize)).astype(jnp.bfloat16).astype(jnp.float32)
        b = jax.random.normal(kb_, (cout,), jnp.float32) * 0.05
        return {"w": w, "b": b}

    params = {
        "rb1": {"conv1": conv(ks[0], CIN, n_filters, 3),
                "d1":   conv(ks[1], n_filters, n_filters, 3),
                "d2":   conv(ks[2], CIN, n_filters, 1)},
        "rb2": {"conv1": conv(ks[3], n_filters, n_filters, 3),
                "d1":   conv(ks[4], n_filters, n_filters, 3),
                "d2":   conv(ks[5], n_filters, n_filters, 1)},
        "rb3": {"conv1": conv(ks[6], n_filters, n_filters, 3),
                "conv2": conv(ks[7], n_filters, n_filters, 3)},
        "rb4": {"conv1": conv(ks[8], n_filters, n_filters, 3),
                "conv2": conv(ks[9], n_filters, n_filters, 3)},
    }
    kw_, kb_ = jax.random.split(ks[10])
    params["lin_w"] = jax.random.normal(kw_, (1, n_filters), jnp.float32) / np.sqrt(n_filters)
    params["lin_b"] = jax.random.normal(kb_, (1,), jnp.float32) * 0.05
    return params


def _cat_w(w):
    """torch OIHW -> (kh*kw*Cin, Cout) bf16 MXU operand (tap-major, Cin-minor)."""
    cout, cin, kh, kw = w.shape
    return jnp.transpose(w, (2, 3, 1, 0)).reshape(kh * kw * cin, cout).astype(jnp.bfloat16)


def _b2d(b):
    return b[None, :].astype(jnp.float32)


def prep_kernel_params(p):
    return {
        "rb1_w1": _cat_w(p["rb1"]["conv1"]["w"]), "rb1_b1": _b2d(p["rb1"]["conv1"]["b"]),
        "rb1_wd1": _cat_w(p["rb1"]["d1"]["w"]),   "rb1_bd1": _b2d(p["rb1"]["d1"]["b"]),
        "rb1_wd2": _cat_w(p["rb1"]["d2"]["w"]),   "rb1_bd2": _b2d(p["rb1"]["d2"]["b"]),
        "rb2_b1": _b2d(p["rb2"]["conv1"]["b"]),
        "rb2_bd1": _b2d(p["rb2"]["d1"]["b"]),
        "rb2_wd2": _cat_w(p["rb2"]["d2"]["w"]),   "rb2_bd2": _b2d(p["rb2"]["d2"]["b"]),
        "rb3_b1": _b2d(p["rb3"]["conv1"]["b"]),   "rb3_b2": _b2d(p["rb3"]["conv2"]["b"]),
        "rb4_b1": _b2d(p["rb4"]["conv1"]["b"]),   "rb4_b2": _b2d(p["rb4"]["conv2"]["b"]),
        "lin_w": p["lin_w"].astype(jnp.float32),
        "lin_b": p["lin_b"].reshape(1, 1).astype(jnp.float32),
        # stacked in order of first use: rb2.c1, rb2.d1, rb3.c1, rb3.c2, rb4.c1, rb4.c2
        "w_stack": jnp.stack(
            [_cat_w(p["rb2"]["conv1"]["w"]), _cat_w(p["rb2"]["d1"]["w"]),
             _cat_w(p["rb3"]["conv1"]["w"]), _cat_w(p["rb3"]["conv2"]["w"]),
             _cat_w(p["rb4"]["conv1"]["w"]), _cat_w(p["rb4"]["conv2"]["w"])], axis=0),
    }


# ---------------------------------------------------------------------------
# Pure-JAX reference (mirrors the PyTorch forward in NCHW, with the same
# bf16-operand / f32-accumulation convention as the kernel).
# ---------------------------------------------------------------------------

def _rq(t):
    return t.astype(jnp.bfloat16).astype(jnp.float32)


def conv_ref(x, w, b, pad):
    out = lax.conv_general_dilated(
        _rq(x), w, window_strides=(1, 1), padding=[(pad, pad), (pad, pad)],
        dimension_numbers=("NCHW", "OIHW", "NCHW"),
        precision=lax.Precision.HIGHEST)
    return out + b[None, :, None, None]


def avgpool_ref(x):  # == SpaceToDepth(2) + chunk(4) + mean
    B, C, H, W = x.shape
    return _rq(x).reshape(B, C, H // 2, 2, W // 2, 2).mean(axis=(3, 5))


def resblock_down_ref(x, p):
    r = jax.nn.relu(x)
    r = conv_ref(r, p["conv1"]["w"], p["conv1"]["b"], 1)
    r = jax.nn.relu(r)
    r = conv_ref(avgpool_ref(r), p["d1"]["w"], p["d1"]["b"], 1)
    s = conv_ref(avgpool_ref(x), p["d2"]["w"], p["d2"]["b"], 0)
    return r + s


def resblock_ref(x, p):
    r = jax.nn.relu(x)
    r = conv_ref(r, p["conv1"]["w"], p["conv1"]["b"], 1)
    r = jax.nn.relu(r)
    r = conv_ref(r, p["conv2"]["w"], p["conv2"]["b"], 1)
    return x + r


def discriminator_ref(x, params):
    x = resblock_down_ref(x, params["rb1"])
    x = resblock_down_ref(x, params["rb2"])
    x = resblock_ref(x, params["rb3"])
    x = resblock_ref(x, params["rb4"])
    x = jax.nn.relu(x)
    x = jnp.sum(x, axis=(2, 3))
    return jnp.dot(x, params["lin_w"].T,
                   precision=lax.Precision.HIGHEST) + params["lin_b"]


# ---------------------------------------------------------------------------

if __name__ == "__main__":
    key = jax.random.PRNGKey(0)
    k_x, k_p = jax.random.split(key)

    B, C, H, W = 2, 3, 16, 16          # NCHW input, like the PyTorch module
    x = jax.random.normal(k_x, (B, C, H, W), jnp.float32)

    params = init_params(k_p, F)
    kparams = prep_kernel_params(params)

    disc = jax.jit(discriminator_pallas)
    out = jax.block_until_ready(disc(x, kparams))
    assert out.shape == (B, 1), out.shape

    ref = jax.block_until_ready(discriminator_ref(x, params))
    np.testing.assert_allclose(np.asarray(out), np.asarray(ref),
                               rtol=2e-2, atol=2e-2)

    print("KERNEL_OK")
</pallas_src>

<mosaic_0001>
module attributes {stable_mosaic.version = 11 : i64} {
  func.func @_discriminator_kernel(%arg0: i32, %arg1: memref<1x256x27xf32, #tpu.memory_space<vmem>>, %arg2: memref<1x256x3xf32, #tpu.memory_space<vmem>>, %arg3: memref<80x256xbf16, #tpu.memory_space<vmem>>, %arg4: memref<24x80xbf16, #tpu.memory_space<vmem>>, %arg5: memref<27x128xbf16, #tpu.memory_space<vmem>>, %arg6: memref<1x128xf32, #tpu.memory_space<vmem>>, %arg7: memref<1152x128xbf16, #tpu.memory_space<vmem>>, %arg8: memref<1x128xf32, #tpu.memory_space<vmem>>, %arg9: memref<3x128xbf16, #tpu.memory_space<vmem>>, %arg10: memref<1x128xf32, #tpu.memory_space<vmem>>, %arg11: memref<1x128xf32, #tpu.memory_space<vmem>>, %arg12: memref<1x128xf32, #tpu.memory_space<vmem>>, %arg13: memref<128x128xbf16, #tpu.memory_space<vmem>>, %arg14: memref<1x128xf32, #tpu.memory_space<vmem>>, %arg15: memref<1x128xf32, #tpu.memory_space<vmem>>, %arg16: memref<1x128xf32, #tpu.memory_space<vmem>>, %arg17: memref<1x128xf32, #tpu.memory_space<vmem>>, %arg18: memref<1x128xf32, #tpu.memory_space<vmem>>, %arg19: memref<1x128xf32, #tpu.memory_space<vmem>>, %arg20: memref<1x1xf32, #tpu.memory_space<vmem>>, %arg21: memref<6x1152x128xbf16, #tpu.memory_space<any>>, %arg22: memref<1x1x1xf32, #tpu.memory_space<vmem>>, %arg23: memref<112x128xbf16, #tpu.memory_space<vmem>>, %arg24: memref<48x128xbf16, #tpu.memory_space<vmem>>, %arg25: memref<80x1152xbf16, #tpu.memory_space<vmem>>, %arg26: memref<6x1152x128xbf16, #tpu.memory_space<vmem>>, %arg27: memref<6x!tpu.dma_semaphore, #tpu.memory_space<semaphore_mem>>) attributes {dimension_semantics = [#tpu.dimension_semantics<parallel>], iteration_bounds = array<i64: 2>, scalar_prefetch = 0 : i64, scratch_operands = 5 : i64, tpu.core_type = #tpu.core_type<tc>, window_params = [{transform_indices = @transform_0, window_bounds = array<i64: 1, 256, 27>}, {transform_indices = @transform_1, window_bounds = array<i64: 1, 256, 3>}, {pipeline_mode = #tpu.pipeline_mode<synchronous>, transform_indices = @transform_2, window_bounds = array<i64: 80, 256>}, {pipeline_mode = #tpu.pipeline_mode<synchronous>, transform_indices = @transform_3, window_bounds = array<i64: 24, 80>}, {pipeline_mode = #tpu.pipeline_mode<synchronous>, transform_indices = @transform_4, window_bounds = array<i64: 27, 128>}, {pipeline_mode = #tpu.pipeline_mode<synchronous>, transform_indices = @transform_5, window_bounds = array<i64: 1, 128>}, {pipeline_mode = #tpu.pipeline_mode<synchronous>, transform_indices = @transform_6, window_bounds = array<i64: 1152, 128>}, {pipeline_mode = #tpu.pipeline_mode<synchronous>, transform_indices = @transform_7, window_bounds = array<i64: 1, 128>}, {pipeline_mode = #tpu.pipeline_mode<synchronous>, transform_indices = @transform_8, window_bounds = array<i64: 3, 128>}, {pipeline_mode = #tpu.pipeline_mode<synchronous>, transform_indices = @transform_9, window_bounds = array<i64: 1, 128>}, {pipeline_mode = #tpu.pipeline_mode<synchronous>, transform_indices = @transform_10, window_bounds = array<i64: 1, 128>}, {pipeline_mode = #tpu.pipeline_mode<synchronous>, transform_indices = @transform_11, window_bounds = array<i64: 1, 128>}, {pipeline_mode = #tpu.pipeline_mode<synchronous>, transform_indices = @transform_12, window_bounds = array<i64: 128, 128>}, {pipeline_mode = #tpu.pipeline_mode<synchronous>, transform_indices = @transform_13, window_bounds = array<i64: 1, 128>}, {pipeline_mode = #tpu.pipeline_mode<synchronous>, transform_indices = @transform_14, window_bounds = array<i64: 1, 128>}, {pipeline_mode = #tpu.pipeline_mode<synchronous>, transform_indices = @transform_15, window_bounds = array<i64: 1, 128>}, {pipeline_mode = #tpu.pipeline_mode<synchronous>, transform_indices = @transform_16, window_bounds = array<i64: 1, 128>}, {pipeline_mode = #tpu.pipeline_mode<synchronous>, transform_indices = @transform_17, window_bounds = array<i64: 1, 128>}, {pipeline_mode = #tpu.pipeline_mode<synchronous>, transform_indices = @transform_18, window_bounds = array<i64: 1, 128>}, {pipeline_mode = #tpu.pipeline_mode<synchronous>, transform_indices = @transform_19, window_bounds = array<i64: 1, 1>}, {}, {transform_indices = @transform_21, window_bounds = array<i64: 1, 1, 1>}]} {
    %c0_i32 = arith.constant 0 : i32
    %c0_i32_0 = arith.constant 0 : i32
    %c0_i32_1 = arith.constant 0 : i32
    %c0_i32_2 = arith.constant 0 : i32
    %c0_i32_3 = arith.constant 0 : i32
    %0 = tpu.memref_slice %arg21[%c0_i32, %c0_i32_2, %c0_i32_3] : memref<6x1152x128xbf16, #tpu.memory_space<any>> -> memref<1x1152x128xbf16, #tpu.memory_space<any>>
    %1 = tpu.memref_squeeze %0 : memref<1x1152x128xbf16, #tpu.memory_space<any>> -> memref<1152x128xbf16, #tpu.memory_space<any>>
    %c0_i32_4 = arith.constant 0 : i32
    %c0_i32_5 = arith.constant 0 : i32
    %2 = tpu.memref_slice %arg26[%c0_i32_0, %c0_i32_4, %c0_i32_5] : memref<6x1152x128xbf16, #tpu.memory_space<vmem>> -> memref<1x1152x128xbf16, #tpu.memory_space<vmem>>
    %3 = tpu.memref_squeeze %2 : memref<1x1152x128xbf16, #tpu.memory_space<vmem>> -> memref<1152x128xbf16, #tpu.memory_space<vmem>>
    %4 = tpu.memref_slice %arg27[%c0_i32_1] : memref<6x!tpu.dma_semaphore, #tpu.memory_space<semaphore_mem>> -> memref<1x!tpu.dma_semaphore, #tpu.memory_space<semaphore_mem>>
    %5 = tpu.memref_squeeze %4 : memref<1x!tpu.dma_semaphore, #tpu.memory_space<semaphore_mem>> -> memref<!tpu.dma_semaphore, #tpu.memory_space<semaphore_mem>>
    tpu.enqueue_dma source(%1 : memref<1152x128xbf16, #tpu.memory_space<any>>) target(%3 : memref<1152x128xbf16, #tpu.memory_space<vmem>>) target_semaphore(%5 : memref<!tpu.dma_semaphore, #tpu.memory_space<semaphore_mem>>)
    %c1_i32 = arith.constant 1 : i32
    %c1_i32_6 = arith.constant 1 : i32
    %c1_i32_7 = arith.constant 1 : i32
    %c0_i32_8 = arith.constant 0 : i32
    %c0_i32_9 = arith.constant 0 : i32
    %6 = tpu.memref_slice %arg21[%c1_i32, %c0_i32_8, %c0_i32_9] : memref<6x1152x128xbf16, #tpu.memory_space<any>> -> memref<1x1152x128xbf16, #tpu.memory_space<any>>
    %7 = tpu.memref_squeeze %6 : memref<1x1152x128xbf16, #tpu.memory_space<any>> -> memref<1152x128xbf16, #tpu.memory_space<any>>
    %c0_i32_10 = arith.constant 0 : i32
    %c0_i32_11 = arith.constant 0 : i32
    %8 = tpu.memref_slice %arg26[%c1_i32_6, %c0_i32_10, %c0_i32_11] : memref<6x1152x128xbf16, #tpu.memory_space<vmem>> -> memref<1x1152x128xbf16, #tpu.memory_space<vmem>>
    %9 = tpu.memref_squeeze %8 : memref<1x1152x128xbf16, #tpu.memory_space<vmem>> -> memref<1152x128xbf16, #tpu.memory_space<vmem>>
    %10 = tpu.memref_slice %arg27[%c1_i32_7] : memref<6x!tpu.dma_semaphore, #tpu.memory_space<semaphore_mem>> -> memref<1x!tpu.dma_semaphore, #tpu.memory_space<semaphore_mem>>
    %11 = tpu.memref_squeeze %10 : memref<1x!tpu.dma_semaphore, #tpu.memory_space<semaphore_mem>> -> memref<!tpu.dma_semaphore, #tpu.memory_space<semaphore_mem>>
    tpu.enqueue_dma source(%7 : memref<1152x128xbf16, #tpu.memory_space<any>>) target(%9 : memref<1152x128xbf16, #tpu.memory_space<vmem>>) target_semaphore(%11 : memref<!tpu.dma_semaphore, #tpu.memory_space<semaphore_mem>>)
    %c2_i32 = arith.constant 2 : i32
    %c2_i32_12 = arith.constant 2 : i32
    %c2_i32_13 = arith.constant 2 : i32
    %c0_i32_14 = arith.constant 0 : i32
    %c0_i32_15 = arith.constant 0 : i32
    %12 = tpu.memref_slice %arg21[%c2_i32, %c0_i32_14, %c0_i32_15] : memref<6x1152x128xbf16, #tpu.memory_space<any>> -> memref<1x1152x128xbf16, #tpu.memory_space<any>>
    %13 = tpu.memref_squeeze %12 : memref<1x1152x128xbf16, #tpu.memory_space<any>> -> memref<1152x128xbf16, #tpu.memory_space<any>>
    %c0_i32_16 = arith.constant 0 : i32
    %c0_i32_17 = arith.constant 0 : i32
    %14 = tpu.memref_slice %arg26[%c2_i32_12, %c0_i32_16, %c0_i32_17] : memref<6x1152x128xbf16, #tpu.memory_space<vmem>> -> memref<1x1152x128xbf16, #tpu.memory_space<vmem>>
    %15 = tpu.memref_squeeze %14 : memref<1x1152x128xbf16, #tpu.memory_space<vmem>> -> memref<1152x128xbf16, #tpu.memory_space<vmem>>
    %16 = tpu.memref_slice %arg27[%c2_i32_13] : memref<6x!tpu.dma_semaphore, #tpu.memory_space<semaphore_mem>> -> memref<1x!tpu.dma_semaphore, #tpu.memory_space<semaphore_mem>>
    %17 = tpu.memref_squeeze %16 : memref<1x!tpu.dma_semaphore, #tpu.memory_space<semaphore_mem>> -> memref<!tpu.dma_semaphore, #tpu.memory_space<semaphore_mem>>
    tpu.enqueue_dma source(%13 : memref<1152x128xbf16, #tpu.memory_space<any>>) target(%15 : memref<1152x128xbf16, #tpu.memory_space<vmem>>) target_semaphore(%17 : memref<!tpu.dma_semaphore, #tpu.memory_space<semaphore_mem>>)
    %c3_i32 = arith.constant 3 : i32
    %c3_i32_18 = arith.constant 3 : i32
    %c3_i32_19 = arith.constant 3 : i32
    %c0_i32_20 = arith.constant 0 : i32
    %c0_i32_21 = arith.constant 0 : i32
    %18 = tpu.memref_slice %arg21[%c3_i32, %c0_i32_20, %c0_i32_21] : memref<6x1152x128xbf16, #tpu.memory_space<any>> -> memref<1x1152x128xbf16, #tpu.memory_space<any>>
    %19 = tpu.memref_squeeze %18 : memref<1x1152x128xbf16, #tpu.memory_space<any>> -> memref<1152x128xbf16, #tpu.memory_space<any>>
    %c0_i32_22 = arith.constant 0 : i32
    %c0_i32_23 = arith.constant 0 : i32
    %20 = tpu.memref_slice %arg26[%c3_i32_18, %c0_i32_22, %c0_i32_23] : memref<6x1152x128xbf16, #tpu.memory_space<vmem>> -> memref<1x1152x128xbf16, #tpu.memory_space<vmem>>
    %21 = tpu.memref_squeeze %20 : memref<1x1152x128xbf16, #tpu.memory_space<vmem>> -> memref<1152x128xbf16, #tpu.memory_space<vmem>>
    %22 = tpu.memref_slice %arg27[%c3_i32_19] : memref<6x!tpu.dma_semaphore, #tpu.memory_space<semaphore_mem>> -> memref<1x!tpu.dma_semaphore, #tpu.memory_space<semaphore_mem>>
    %23 = tpu.memref_squeeze %22 : memref<1x!tpu.dma_semaphore, #tpu.memory_space<semaphore_mem>> -> memref<!tpu.dma_semaphore, #tpu.memory_space<semaphore_mem>>
    tpu.enqueue_dma source(%19 : memref<1152x128xbf16, #tpu.memory_space<any>>) target(%21 : memref<1152x128xbf16, #tpu.memory_space<vmem>>) target_semaphore(%23 : memref<!tpu.dma_semaphore, #tpu.memory_space<semaphore_mem>>)
    %c4_i32 = arith.constant 4 : i32
    %c4_i32_24 = arith.constant 4 : i32
    %c4_i32_25 = arith.constant 4 : i32
    %c0_i32_26 = arith.constant 0 : i32
    %c0_i32_27 = arith.constant 0 : i32
    %24 = tpu.memref_slice %arg21[%c4_i32, %c0_i32_26, %c0_i32_27] : memref<6x1152x128xbf16, #tpu.memory_space<any>> -> memref<1x1152x128xbf16, #tpu.memory_space<any>>
    %25 = tpu.memref_squeeze %24 : memref<1x1152x128xbf16, #tpu.memory_space<any>> -> memref<1152x128xbf16, #tpu.memory_space<any>>
    %c0_i32_28 = arith.constant 0 : i32
    %c0_i32_29 = arith.constant 0 : i32
    %26 = tpu.memref_slice %arg26[%c4_i32_24, %c0_i32_28, %c0_i32_29] : memref<6x1152x128xbf16, #tpu.memory_space<vmem>> -> memref<1x1152x128xbf16, #tpu.memory_space<vmem>>
    %27 = tpu.memref_squeeze %26 : memref<1x1152x128xbf16, #tpu.memory_space<vmem>> -> memref<1152x128xbf16, #tpu.memory_space<vmem>>
    %28 = tpu.memref_slice %arg27[%c4_i32_25] : memref<6x!tpu.dma_semaphore, #tpu.memory_space<semaphore_mem>> -> memref<1x!tpu.dma_semaphore, #tpu.memory_space<semaphore_mem>>
    %29 = tpu.memref_squeeze %28 : memref<1x!tpu.dma_semaphore, #tpu.memory_space<semaphore_mem>> -> memref<!tpu.dma_semaphore, #tpu.memory_space<semaphore_mem>>
    tpu.enqueue_dma source(%25 : memref<1152x128xbf16, #tpu.memory_space<any>>) target(%27 : memref<1152x128xbf16, #tpu.memory_space<vmem>>) target_semaphore(%29 : memref<!tpu.dma_semaphore, #tpu.memory_space<semaphore_mem>>)
    %c5_i32 = arith.constant 5 : i32
    %c5_i32_30 = arith.constant 5 : i32
    %c5_i32_31 = arith.constant 5 : i32
    %c0_i32_32 = arith.constant 0 : i32
    %c0_i32_33 = arith.constant 0 : i32
    %30 = tpu.memref_slice %arg21[%c5_i32, %c0_i32_32, %c0_i32_33] : memref<6x1152x128xbf16, #tpu.memory_space<any>> -> memref<1x1152x128xbf16, #tpu.memory_space<any>>
    %31 = tpu.memref_squeeze %30 : memref<1x1152x128xbf16, #tpu.memory_space<any>> -> memref<1152x128xbf16, #tpu.memory_space<any>>
    %c0_i32_34 = arith.constant 0 : i32
    %c0_i32_35 = arith.constant 0 : i32
    %32 = tpu.memref_slice %arg26[%c5_i32_30, %c0_i32_34, %c0_i32_35] : memref<6x1152x128xbf16, #tpu.memory_space<vmem>> -> memref<1x1152x128xbf16, #tpu.memory_space<vmem>>
    %33 = tpu.memref_squeeze %32 : memref<1x1152x128xbf16, #tpu.memory_space<vmem>> -> memref<1152x128xbf16, #tpu.memory_space<vmem>>
    %34 = tpu.memref_slice %arg27[%c5_i32_31] : memref<6x!tpu.dma_semaphore, #tpu.memory_space<semaphore_mem>> -> memref<1x!tpu.dma_semaphore, #tpu.memory_space<semaphore_mem>>
    %35 = tpu.memref_squeeze %34 : memref<1x!tpu.dma_semaphore, #tpu.memory_space<semaphore_mem>> -> memref<!tpu.dma_semaphore, #tpu.memory_space<semaphore_mem>>
    tpu.enqueue_dma source(%31 : memref<1152x128xbf16, #tpu.memory_space<any>>) target(%33 : memref<1152x128xbf16, #tpu.memory_space<vmem>>) target_semaphore(%35 : memref<!tpu.dma_semaphore, #tpu.memory_space<semaphore_mem>>)
    %cst = arith.constant 0.000000e+00 : bf16
    %36 = vector.broadcast %cst : bf16 to vector<11x128xbf16>
    %c7 = arith.constant 7 : index
    %c0 = arith.constant 0 : index
    %37 = vector.load %arg23[%c7, %c0] : memref<112x128xbf16, #tpu.memory_space<vmem>>, vector<11x128xbf16>
    tpu.vector_store %arg23[%c7, %c0], %36 {strides = array<i32>} : memref<112x128xbf16, #tpu.memory_space<vmem>>, vector<11x128xbf16>,
    %cst_36 = arith.constant 0.000000e+00 : bf16
    %38 = vector.broadcast %cst_36 : bf16 to vector<11x128xbf16>
    %c98 = arith.constant 98 : index
    %c0_37 = arith.constant 0 : index
    %39 = vector.load %arg23[%c98, %c0_37] : memref<112x128xbf16, #tpu.memory_space<vmem>>, vector<11x128xbf16>
    tpu.vector_store %arg23[%c98, %c0_37], %38 {strides = array<i32>} : memref<112x128xbf16, #tpu.memory_space<vmem>>, vector<11x128xbf16>,
    %cst_38 = arith.constant 0.000000e+00 : bf16
    %40 = vector.broadcast %cst_38 : bf16 to vector<7x128xbf16>
    %c7_39 = arith.constant 7 : index
    %c0_40 = arith.constant 0 : index
    %41 = vector.load %arg24[%c7_39, %c0_40] : memref<48x128xbf16, #tpu.memory_space<vmem>>, vector<7x128xbf16>
    tpu.vector_store %arg24[%c7_39, %c0_40], %40 {strides = array<i32>} : memref<48x128xbf16, #tpu.memory_space<vmem>>, vector<7x128xbf16>,
    %cst_41 = arith.constant 0.000000e+00 : bf16
    %42 = vector.broadcast %cst_41 : bf16 to vector<7x128xbf16>
    %c38 = arith.constant 38 : index
    %c0_42 = arith.constant 0 : index
    %43 = vector.load %arg24[%c38, %c0_42] : memref<48x128xbf16, #tpu.memory_space<vmem>>, vector<7x128xbf16>
    tpu.vector_store %arg24[%c38, %c0_42], %42 {strides = array<i32>} : memref<48x128xbf16, #tpu.memory_space<vmem>>, vector<7x128xbf16>,
    %c0_43 = arith.constant 0 : index
    %c0_44 = arith.constant 0 : index
    %c0_45 = arith.constant 0 : index
    %44 = vector.load %arg1[%c0_43, %c0_44, %c0_45] : memref<1x256x27xf32, #tpu.memory_space<vmem>>, vector<1x256x27xf32>
    %45 = vector.shape_cast %44 : vector<1x256x27xf32> to vector<256x27xf32>
    %cst_46 = arith.constant 0.000000e+00 : f32
    %46 = vector.broadcast %cst_46 : f32 to vector<256x27xf32>
    %47 = arith.maximumf %45, %46 : vector<256x27xf32>
    %48 = arith.truncf %47 : vector<256x27xf32> to vector<256x27xbf16>
    %c0_47 = arith.constant 0 : index
    %c0_48 = arith.constant 0 : index
    %49 = vector.load %arg5[%c0_47, %c0_48] : memref<27x128xbf16, #tpu.memory_space<vmem>>, vector<27x128xbf16>
    %cst_49 = arith.constant dense<0.000000e+00> : vector<256x128xf32>
    %50 = tpu.matmul %48, %49, %cst_49 {dimension_numbers = #tpu.dot_dimension_numbers<[1], [0], [0], [1], [0, 0, 1, 1], [], []>} : vector<256x27xbf16>, vector<27x128xbf16>, vector<256x128xf32> -> vector<256x128xf32>
    %c0_50 = arith.constant 0 : index
    %c0_51 = arith.constant 0 : index
    %51 = vector.load %arg6[%c0_50, %c0_51] : memref<1x128xf32, #tpu.memory_space<vmem>>, vector<1x128xf32>
    %52 = vector.broadcast %51 : vector<1x128xf32> to vector<256x128xf32>
    %53 = arith.addf %50, %52 : vector<256x128xf32>
    %cst_52 = arith.constant 0.000000e+00 : f32
    %54 = vector.broadcast %cst_52 : f32 to vector<256x128xf32>
    %55 = arith.maximumf %53, %54 : vector<256x128xf32>
    %56 = arith.truncf %55 : vector<256x128xf32> to vector<256x128xbf16>
    %c0_53 = arith.constant 0 : index
    %c0_54 = arith.constant 0 : index
    %57 = vector.load %arg3[%c0_53, %c0_54] : memref<80x256xbf16, #tpu.memory_space<vmem>>, vector<80x256xbf16>
    %cst_55 = arith.constant dense<0.000000e+00> : vector<80x128xf32>
    %58 = tpu.matmul %57, %56, %cst_55 {dimension_numbers = #tpu.dot_dimension_numbers<[1], [0], [0], [1], [0, 0, 1, 1], [], []>} : vector<80x256xbf16>, vector<256x128xbf16>, vector<80x128xf32> -> vector<80x128xf32>
    %59 = arith.truncf %58 : vector<80x128xf32> to vector<80x128xbf16>
    %c18 = arith.constant 18 : index
    %c0_56 = arith.constant 0 : index
    %60 = vector.load %arg23[%c18, %c0_56] : memref<112x128xbf16, #tpu.memory_space<vmem>>, vector<80x128xbf16>
    tpu.vector_store %arg23[%c18, %c0_56], %59 {strides = array<i32>} : memref<112x128xbf16, #tpu.memory_space<vmem>>, vector<80x128xbf16>,
    %c0_57 = arith.constant 0 : index
    %c0_58 = arith.constant 0 : index
    %61 = vector.load %arg7[%c0_57, %c0_58] : memref<1152x128xbf16, #tpu.memory_space<vmem>>, vector<1152x128xbf16>
    %c0_59 = arith.constant 0 : index
    %c0_60 = arith.constant 0 : index
    %62 = vector.load %arg8[%c0_59, %c0_60] : memref<1x128xf32, #tpu.memory_space<vmem>>, vector<1x128xf32>
    %c7_61 = arith.constant 7 : index
    %c0_62 = arith.constant 0 : index
    %63 = vector.load %arg23[%c7_61, %c0_62] : memref<112x128xbf16, #tpu.memory_space<vmem>>, vector<80x128xbf16>
    %c0_63 = arith.constant 0 : index
    %c0_64 = arith.constant 0 : index
    %64 = vector.load %arg25[%c0_63, %c0_64] : memref<80x1152xbf16, #tpu.memory_space<vmem>>, vector<80x128xbf16>
    tpu.vector_store %arg25[%c0_63, %c0_64], %63 {strides = array<i32>} : memref<80x1152xbf16, #tpu.memory_space<vmem>>, vector<80x128xbf16>,
    %c8 = arith.constant 8 : index
    %c0_65 = arith.constant 0 : index
    %65 = vector.load %arg23[%c8, %c0_65] : memref<112x128xbf16, #tpu.memory_space<vmem>>, vector<80x128xbf16>
    %c0_66 = arith.constant 0 : index
    %c128 = arith.constant 128 : index
    %66 = vector.load %arg25[%c0_66, %c128] : memref<80x1152xbf16, #tpu.memory_space<vmem>>, vector<80x128xbf16>
    tpu.vector_store %arg25[%c0_66, %c128], %65 {strides = array<i32>} : memref<80x1152xbf16, #tpu.memory_space<vmem>>, vector<80x128xbf16>,
    %c9 = arith.constant 9 : index
    %c0_67 = arith.constant 0 : index
    %67 = vector.load %arg23[%c9, %c0_67] : memref<112x128xbf16, #tpu.memory_space<vmem>>, vector<80x128xbf16>
    %c0_68 = arith.constant 0 : index
    %c256 = arith.constant 256 : index
    %68 = vector.load %arg25[%c0_68, %c256] : memref<80x1152xbf16, #tpu.memory_space<vmem>>, vector<80x128xbf16>
    tpu.vector_store %arg25[%c0_68, %c256], %67 {strides = array<i32>} : memref<80x1152xbf16, #tpu.memory_space<vmem>>, vector<80x128xbf16>,
    %c17 = arith.constant 17 : index
    %c0_69 = arith.constant 0 : index
    %69 = vector.load %arg23[%c17, %c0_69] : memref<112x128xbf16, #tpu.memory_space<vmem>>, vector<80x128xbf16>
    %c0_70 = arith.constant 0 : index
    %c384 = arith.constant 384 : index
    %70 = vector.load %arg25[%c0_70, %c384] : memref<80x1152xbf16, #tpu.memory_space<vmem>>, vector<80x128xbf16>
    tpu.vector_store %arg25[%c0_70, %c384], %69 {strides = array<i32>} : memref<80x1152xbf16, #tpu.memory_space<vmem>>, vector<80x128xbf16>,
    %c18_71 = arith.constant 18 : index
    %c0_72 = arith.constant 0 : index
    %71 = vector.load %arg23[%c18_71, %c0_72] : memref<112x128xbf16, #tpu.memory_space<vmem>>, vector<80x128xbf16>
    %c0_73 = arith.constant 0 : index
    %c512 = arith.constant 512 : index
    %72 = vector.load %arg25[%c0_73, %c512] : memref<80x1152xbf16, #tpu.memory_space<vmem>>, vector<80x128xbf16>
    tpu.vector_store %arg25[%c0_73, %c512], %71 {strides = array<i32>} : memref<80x1152xbf16, #tpu.memory_space<vmem>>, vector<80x128xbf16>,
    %c19 = arith.constant 19 : index
    %c0_74 = arith.constant 0 : index
    %73 = vector.load %arg23[%c19, %c0_74] : memref<112x128xbf16, #tpu.memory_space<vmem>>, vector<80x128xbf16>
    %c0_75 = arith.constant 0 : index
    %c640 = arith.constant 640 : index
    %74 = vector.load %arg25[%c0_75, %c640] : memref<80x1152xbf16, #tpu.memory_space<vmem>>, vector<80x128xbf16>
    tpu.vector_store %arg25[%c0_75, %c640], %73 {strides = array<i32>} : memref<80x1152xbf16, #tpu.memory_space<vmem>>, vector<80x128xbf16>,
    %c27 = arith.constant 27 : index
    %c0_76 = arith.constant 0 : index
    %75 = vector.load %arg23[%c27, %c0_76] : memref<112x128xbf16, #tpu.memory_space<vmem>>, vector<80x128xbf16>
    %c0_77 = arith.constant 0 : index
    %c768 = arith.constant 768 : index
    %76 = vector.load %arg25[%c0_77, %c768] : memref<80x1152xbf16, #tpu.memory_space<vmem>>, vector<80x128xbf16>
    tpu.vector_store %arg25[%c0_77, %c768], %75 {strides = array<i32>} : memref<80x1152xbf16, #tpu.memory_space<vmem>>, vector<80x128xbf16>,
    %c28 = arith.constant 28 : index
    %c0_78 = arith.constant 0 : index
    %77 = vector.load %arg23[%c28, %c0_78] : memref<112x128xbf16, #tpu.memory_space<vmem>>, vector<80x128xbf16>
    %c0_79 = arith.constant 0 : index
    %c896 = arith.constant 896 : index
    %78 = vector.load %arg25[%c0_79, %c896] : memref<80x1152xbf16, #tpu.memory_space<vmem>>, vector<80x128xbf16>
    tpu.vector_store %arg25[%c0_79, %c896], %77 {strides = array<i32>} : memref<80x1152xbf16, #tpu.memory_space<vmem>>, vector<80x128xbf16>,
    %c29 = arith.constant 29 : index
    %c0_80 = arith.constant 0 : index
    %79 = vector.load %arg23[%c29, %c0_80] : memref<112x128xbf16, #tpu.memory_space<vmem>>, vector<80x128xbf16>
    %c0_81 = arith.constant 0 : index
    %c1024 = arith.constant 1024 : index
    %80 = vector.load %arg25[%c0_81, %c1024] : memref<80x1152xbf16, #tpu.memory_space<vmem>>, vector<80x128xbf16>
    tpu.vector_store %arg25[%c0_81, %c1024], %79 {strides = array<i32>} : memref<80x1152xbf16, #tpu.memory_space<vmem>>, vector<80x128xbf16>,
    %c0_82 = arith.constant 0 : index
    %c0_83 = arith.constant 0 : index
    %81 = vector.load %arg25[%c0_82, %c0_83] : memref<80x1152xbf16, #tpu.memory_space<vmem>>, vector<80x1152xbf16>
    %cst_84 = arith.constant dense<0.000000e+00> : vector<80x128xf32>
    %82 = tpu.matmul %81, %61, %cst_84 {dimension_numbers = #tpu.dot_dimension_numbers<[1], [0], [0], [1], [0, 0, 1, 1], [], []>} : vector<80x1152xbf16>, vector<1152x128xbf16>, vector<80x128xf32> -> vector<80x128xf32>
    %83 = vector.broadcast %62 : vector<1x128xf32> to vector<80x128xf32>
    %84 = arith.addf %82, %83 : vector<80x128xf32>
    %c0_85 = arith.constant 0 : index
    %c0_86 = arith.constant 0 : index
    %85 = vector.load %arg3[%c0_85, %c0_86] : memref<80x256xbf16, #tpu.memory_space<vmem>>, vector<80x256xbf16>
    %c0_87 = arith.constant 0 : index
    %c0_88 = arith.constant 0 : index
    %c0_89 = arith.constant 0 : index
    %86 = vector.load %arg2[%c0_87, %c0_88, %c0_89] : memref<1x256x3xf32, #tpu.memory_space<vmem>>, vector<1x256x3xf32>
    %87 = vector.shape_cast %86 : vector<1x256x3xf32> to vector<256x3xf32>
    %88 = arith.truncf %87 : vector<256x3xf32> to vector<256x3xbf16>
    %cst_90 = arith.constant dense<0.000000e+00> : vector<80x3xf32>
    %89 = tpu.matmul %85, %88, %cst_90 {dimension_numbers = #tpu.dot_dimension_numbers<[1], [0], [0], [1], [0, 0, 1, 1], [], []>} : vector<80x256xbf16>, vector<256x3xbf16>, vector<80x3xf32> -> vector<80x3xf32>
    %90 = arith.truncf %89 : vector<80x3xf32> to vector<80x3xbf16>
    %c0_91 = arith.constant 0 : index
    %c0_92 = arith.constant 0 : index
    %91 = vector.load %arg9[%c0_91, %c0_92] : memref<3x128xbf16, #tpu.memory_space<vmem>>, vector<3x128xbf16>
    %cst_93 = arith.constant dense<0.000000e+00> : vector<80x128xf32>
    %92 = tpu.matmul %90, %91, %cst_93 {dimension_numbers = #tpu.dot_dimension_numbers<[1], [0], [0], [1], [0, 0, 1, 1], [], []>} : vector<80x3xbf16>, vector<3x128xbf16>, vector<80x128xf32> -> vector<80x128xf32>
    %c0_94 = arith.constant 0 : index
    %c0_95 = arith.constant 0 : index
    %93 = vector.load %arg10[%c0_94, %c0_95] : memref<1x128xf32, #tpu.memory_space<vmem>>, vector<1x128xf32>
    %94 = vector.broadcast %93 : vector<1x128xf32> to vector<80x128xf32>
    %95 = arith.addf %92, %94 : vector<80x128xf32>
    %96 = arith.addf %84, %95 : vector<80x128xf32>
    %cst_96 = arith.constant 0.000000e+00 : f32
    %97 = vector.broadcast %cst_96 : f32 to vector<80x128xf32>
    %98 = arith.maximumf %96, %97 : vector<80x128xf32>
    %99 = arith.truncf %98 : vector<80x128xf32> to vector<80x128xbf16>
    %100 = vector.extract_strided_slice %99 {offsets = [1, 0], sizes = [8, 128], strides = [1, 1]} : vector<80x128xbf16> to vector<8x128xbf16>
    %c19_97 = arith.constant 19 : index
    %c0_98 = arith.constant 0 : index
    %101 = vector.load %arg23[%c19_97, %c0_98] : memref<112x128xbf16, #tpu.memory_space<vmem>>, vector<8x128xbf16>
    tpu.vector_store %arg23[%c19_97, %c0_98], %100 {strides = array<i32>} : memref<112x128xbf16, #tpu.memory_space<vmem>>, vector<8x128xbf16>,
    %102 = vector.extract_strided_slice %99 {offsets = [11, 0], sizes = [8, 128], strides = [1, 1]} : vector<80x128xbf16> to vector<8x128xbf16>
    %c29_99 = arith.constant 29 : index
    %c0_100 = arith.constant 0 : index
    %103 = vector.load %arg23[%c29_99, %c0_100] : memref<112x128xbf16, #tpu.memory_space<vmem>>, vector<8x128xbf16>
    tpu.vector_store %arg23[%c29_99, %c0_100], %102 {strides = array<i32>} : memref<112x128xbf16, #tpu.memory_space<vmem>>, vector<8x128xbf16>,
    %104 = vector.extract_strided_slice %99 {offsets = [21, 0], sizes = [8, 128], strides = [1, 1]} : vector<80x128xbf16> to vector<8x128xbf16>
    %c39 = arith.constant 39 : index
    %c0_101 = arith.constant 0 : index
    %105 = vector.load %arg23[%c39, %c0_101] : memref<112x128xbf16, #tpu.memory_space<vmem>>, vector<8x128xbf16>
    tpu.vector_store %arg23[%c39, %c0_101], %104 {strides = array<i32>} : memref<112x128xbf16, #tpu.memory_space<vmem>>, vector<8x128xbf16>,
    %106 = vector.extract_strided_slice %99 {offsets = [31, 0], sizes = [8, 128], strides = [1, 1]} : vector<80x128xbf16> to vector<8x128xbf16>
    %c49 = arith.constant 49 : index
    %c0_102 = arith.constant 0 : index
    %107 = vector.load %arg23[%c49, %c0_102] : memref<112x128xbf16, #tpu.memory_space<vmem>>, vector<8x128xbf16>
    tpu.vector_store %arg23[%c49, %c0_102], %106 {strides = array<i32>} : memref<112x128xbf16, #tpu.memory_space<vmem>>, vector<8x128xbf16>,
    %108 = vector.extract_strided_slice %99 {offsets = [41, 0], sizes = [8, 128], strides = [1, 1]} : vector<80x128xbf16> to vector<8x128xbf16>
    %c59 = arith.constant 59 : index
    %c0_103 = arith.constant 0 : index
    %109 = vector.load %arg23[%c59, %c0_103] : memref<112x128xbf16, #tpu.memory_space<vmem>>, vector<8x128xbf16>
    tpu.vector_store %arg23[%c59, %c0_103], %108 {strides = array<i32>} : memref<112x128xbf16, #tpu.memory_space<vmem>>, vector<8x128xbf16>,
    %110 = vector.extract_strided_slice %99 {offsets = [51, 0], sizes = [8, 128], strides = [1, 1]} : vector<80x128xbf16> to vector<8x128xbf16>
    %c69 = arith.constant 69 : index
    %c0_104 = arith.constant 0 : index
    %111 = vector.load %arg23[%c69, %c0_104] : memref<112x128xbf16, #tpu.memory_space<vmem>>, vector<8x128xbf16>
    tpu.vector_store %arg23[%c69, %c0_104], %110 {strides = array<i32>} : memref<112x128xbf16, #tpu.memory_space<vmem>>, vector<8x128xbf16>,
    %112 = vector.extract_strided_slice %99 {offsets = [61, 0], sizes = [8, 128], strides = [1, 1]} : vector<80x128xbf16> to vector<8x128xbf16>
    %c79 = arith.constant 79 : index
    %c0_105 = arith.constant 0 : index
    %113 = vector.load %arg23[%c79, %c0_105] : memref<112x128xbf16, #tpu.memory_space<vmem>>, vector<8x128xbf16>
    tpu.vector_store %arg23[%c79, %c0_105], %112 {strides = array<i32>} : memref<112x128xbf16, #tpu.memory_space<vmem>>, vector<8x128xbf16>,
    %114 = vector.extract_strided_slice %99 {offsets = [71, 0], sizes = [8, 128], strides = [1, 1]} : vector<80x128xbf16> to vector<8x128xbf16>
    %c89 = arith.constant 89 : index
    %c0_106 = arith.constant 0 : index
    %115 = vector.load %arg23[%c89, %c0_106] : memref<112x128xbf16, #tpu.memory_space<vmem>>, vector<8x128xbf16>
    tpu.vector_store %arg23[%c89, %c0_106], %114 {strides = array<i32>} : memref<112x128xbf16, #tpu.memory_space<vmem>>, vector<8x128xbf16>,
    %c0_i32_107 = arith.constant 0 : i32
    %c0_i32_108 = arith.constant 0 : i32
    %c0_i32_109 = arith.constant 0 : i32
    %c0_i32_110 = arith.constant 0 : i32
    %c0_i32_111 = arith.constant 0 : i32
    %116 = tpu.memref_slice %arg21[%c0_i32_107, %c0_i32_110, %c0_i32_111] : memref<6x1152x128xbf16, #tpu.memory_space<any>> -> memref<1x1152x128xbf16, #tpu.memory_space<any>>
    %117 = tpu.memref_squeeze %116 : memref<1x1152x128xbf16, #tpu.memory_space<any>> -> memref<1152x128xbf16, #tpu.memory_space<any>>
    %c0_i32_112 = arith.constant 0 : i32
    %c0_i32_113 = arith.constant 0 : i32
    %118 = tpu.memref_slice %arg26[%c0_i32_108, %c0_i32_112, %c0_i32_113] : memref<6x1152x128xbf16, #tpu.memory_space<vmem>> -> memref<1x1152x128xbf16, #tpu.memory_space<vmem>>
    %119 = tpu.memref_squeeze %118 : memref<1x1152x128xbf16, #tpu.memory_space<vmem>> -> memref<1152x128xbf16, #tpu.memory_space<vmem>>
    %120 = tpu.memref_slice %arg27[%c0_i32_109] : memref<6x!tpu.dma_semaphore, #tpu.memory_space<semaphore_mem>> -> memref<1x!tpu.dma_semaphore, #tpu.memory_space<semaphore_mem>>
    %121 = tpu.memref_squeeze %120 : memref<1x!tpu.dma_semaphore, #tpu.memory_space<semaphore_mem>> -> memref<!tpu.dma_semaphore, #tpu.memory_space<semaphore_mem>>
    tpu.wait_dma2 semaphore(%121 : memref<!tpu.dma_semaphore, #tpu.memory_space<semaphore_mem>>) src(%117 : memref<1152x128xbf16, #tpu.memory_space<any>>) dst(%119 : memref<1152x128xbf16, #tpu.memory_space<vmem>>)
    %c0_114 = arith.constant 0 : index
    %c0_115 = arith.constant 0 : index
    %c0_116 = arith.constant 0 : index
    %122 = vector.load %arg26[%c0_114, %c0_115, %c0_116] : memref<6x1152x128xbf16, #tpu.memory_space<vmem>>, vector<1x1152x128xbf16>
    %123 = vector.shape_cast %122 : vector<1x1152x128xbf16> to vector<1152x128xbf16>
    %c0_117 = arith.constant 0 : index
    %c0_118 = arith.constant 0 : index
    %124 = vector.load %arg11[%c0_117, %c0_118] : memref<1x128xf32, #tpu.memory_space<vmem>>, vector<1x128xf32>
    %c7_119 = arith.constant 7 : index
    %c0_120 = arith.constant 0 : index
    %125 = vector.load %arg23[%c7_119, %c0_120] : memref<112x128xbf16, #tpu.memory_space<vmem>>, vector<80x128xbf16>
    %c0_121 = arith.constant 0 : index
    %c0_122 = arith.constant 0 : index
    %126 = vector.load %arg25[%c0_121, %c0_122] : memref<80x1152xbf16, #tpu.memory_space<vmem>>, vector<80x128xbf16>
    tpu.vector_store %arg25[%c0_121, %c0_122], %125 {strides = array<i32>} : memref<80x1152xbf16, #tpu.memory_space<vmem>>, vector<80x128xbf16>,
    %c8_123 = arith.constant 8 : index
    %c0_124 = arith.constant 0 : index
    %127 = vector.load %arg23[%c8_123, %c0_124] : memref<112x128xbf16, #tpu.memory_space<vmem>>, vector<80x128xbf16>
    %c0_125 = arith.constant 0 : index
    %c128_126 = arith.constant 128 : index
    %128 = vector.load %arg25[%c0_125, %c128_126] : memref<80x1152xbf16, #tpu.memory_space<vmem>>, vector<80x128xbf16>
    tpu.vector_store %arg25[%c0_125, %c128_126], %127 {strides = array<i32>} : memref<80x1152xbf16, #tpu.memory_space<vmem>>, vector<80x128xbf16>,
    %c9_127 = arith.constant 9 : index
    %c0_128 = arith.constant 0 : index
    %129 = vector.load %arg23[%c9_127, %c0_128] : memref<112x128xbf16, #tpu.memory_space<vmem>>, vector<80x128xbf16>
    %c0_129 = arith.constant 0 : index
    %c256_130 = arith.constant 256 : index
    %130 = vector.load %arg25[%c0_129, %c256_130] : memref<80x1152xbf16, #tpu.memory_space<vmem>>, vector<80x128xbf16>
    tpu.vector_store %arg25[%c0_129, %c256_130], %129 {strides = array<i32>} : memref<80x1152xbf16, #tpu.memory_space<vmem>>, vector<80x128xbf16>,
    %c17_131 = arith.constant 17 : index
    %c0_132 = arith.constant 0 : index
    %131 = vector.load %arg23[%c17_131, %c0_132] : memref<112x128xbf16, #tpu.memory_space<vmem>>, vector<80x128xbf16>
    %c0_133 = arith.constant 0 : index
    %c384_134 = arith.constant 384 : index
    %132 = vector.load %arg25[%c0_133, %c384_134] : memref<80x1152xbf16, #tpu.memory_space<vmem>>, vector<80x128xbf16>
    tpu.vector_store %arg25[%c0_133, %c384_134], %131 {strides = array<i32>} : memref<80x1152xbf16, #tpu.memory_space<vmem>>, vector<80x128xbf16>,
    %c18_135 = arith.constant 18 : index
    %c0_136 = arith.constant 0 : index
    %133 = vector.load %arg23[%c18_135, %c0_136] : memref<112x128xbf16, #tpu.memory_space<vmem>>, vector<80x128xbf16>
    %c0_137 = arith.constant 0 : index
    %c512_138 = arith.constant 512 : index
    %134 = vector.load %arg25[%c0_137, %c512_138] : memref<80x1152xbf16, #tpu.memory_space<vmem>>, vector<80x128xbf16>
    tpu.vector_store %arg25[%c0_137, %c512_138], %133 {strides = array<i32>} : memref<80x1152xbf16, #tpu.memory_space<vmem>>, vector<80x128xbf16>,
    %c19_139 = arith.constant 19 : index
    %c0_140 = arith.constant 0 : index
    %135 = vector.load %arg23[%c19_139, %c0_140] : memref<112x128xbf16, #tpu.memory_space<vmem>>, vector<80x128xbf16>
    %c0_141 = arith.constant 0 : index
    %c640_142 = arith.constant 640 : index
    %136 = vector.load %arg25[%c0_141, %c640_142] : memref<80x1152xbf16, #tpu.memory_space<vmem>>, vector<80x128xbf16>
    tpu.vector_store %arg25[%c0_141, %c640_142], %135 {strides = array<i32>} : memref<80x1152xbf16, #tpu.memory_space<vmem>>, vector<80x128xbf16>,
    %c27_143 = arith.constant 27 : index
    %c0_144 = arith.constant 0 : index
    %137 = vector.load %arg23[%c27_143, %c0_144] : memref<112x128xbf16, #tpu.memory_space<vmem>>, vector<80x128xbf16>
    %c0_145 = arith.constant 0 : index
    %c768_146 = arith.constant 768 : index
    %138 = vector.load %arg25[%c0_145, %c768_146] : memref<80x1152xbf16, #tpu.memory_space<vmem>>, vector<80x128xbf16>
    tpu.vector_store %arg25[%c0_145, %c768_146], %137 {strides = array<i32>} : memref<80x1152xbf16, #tpu.memory_space<vmem>>, vector<80x128xbf16>,
    %c28_147 = arith.constant 28 : index
    %c0_148 = arith.constant 0 : index
    %139 = vector.load %arg23[%c28_147, %c0_148] : memref<112x128xbf16, #tpu.memory_space<vmem>>, vector<80x128xbf16>
    %c0_149 = arith.constant 0 : index
    %c896_150 = arith.constant 896 : index
    %140 = vector.load %arg25[%c0_149, %c896_150] : memref<80x1152xbf16, #tpu.memory_space<vmem>>, vector<80x128xbf16>
    tpu.vector_store %arg25[%c0_149, %c896_150], %139 {strides = array<i32>} : memref<80x1152xbf16, #tpu.memory_space<vmem>>, vector<80x128xbf16>,
    %c29_151 = arith.constant 29 : index
    %c0_152 = arith.constant 0 : index
    %141 = vector.load %arg23[%c29_151, %c0_152] : memref<112x128xbf16, #tpu.memory_space<vmem>>, vector<80x128xbf16>
    %c0_153 = arith.constant 0 : index
    %c1024_154 = arith.constant 1024 : index
    %142 = vector.load %arg25[%c0_153, %c1024_154] : memref<80x1152xbf16, #tpu.memory_space<vmem>>, vector<80x128xbf16>
    tpu.vector_store %arg25[%c0_153, %c1024_154], %141 {strides = array<i32>} : memref<80x1152xbf16, #tpu.memory_space<vmem>>, vector<80x128xbf16>,
    %c0_155 = arith.constant 0 : index
    %c0_156 = arith.constant 0 : index
    %143 = vector.load %arg25[%c0_155, %c0_156] : memref<80x1152xbf16, #tpu.memory_space<vmem>>, vector<80x1152xbf16>
    %cst_157 = arith.constant dense<0.000000e+00> : vector<80x128xf32>
    %144 = tpu.matmul %143, %123, %cst_157 {dimension_numbers = #tpu.dot_dimension_numbers<[1], [0], [0], [1], [0, 0, 1, 1], [], []>} : vector<80x1152xbf16>, vector<1152x128xbf16>, vector<80x128xf32> -> vector<80x128xf32>
    %145 = vector.broadcast %124 : vector<1x128xf32> to vector<80x128xf32>
    %146 = arith.addf %144, %145 : vector<80x128xf32>
    %cst_158 = arith.constant 0.000000e+00 : f32
    %147 = vector.broadcast %cst_158 : f32 to vector<80x128xf32>
    %148 = arith.maximumf %146, %147 : vector<80x128xf32>
    %149 = arith.truncf %148 : vector<80x128xf32> to vector<80x128xbf16>
    %c0_159 = arith.constant 0 : index
    %c0_160 = arith.constant 0 : index
    %150 = vector.load %arg4[%c0_159, %c0_160] : memref<24x80xbf16, #tpu.memory_space<vmem>>, vector<24x80xbf16>
    %cst_161 = arith.constant dense<0.000000e+00> : vector<24x128xf32>
    %151 = tpu.matmul %150, %149, %cst_161 {dimension_numbers = #tpu.dot_dimension_numbers<[1], [0], [0], [1], [0, 0, 1, 1], [], []>} : vector<24x80xbf16>, vector<80x128xbf16>, vector<24x128xf32> -> vector<24x128xf32>
    %152 = arith.truncf %151 : vector<24x128xf32> to vector<24x128xbf16>
    %c14 = arith.constant 14 : index
    %c0_162 = arith.constant 0 : index
    %153 = vector.load %arg24[%c14, %c0_162] : memref<48x128xbf16, #tpu.memory_space<vmem>>, vector<24x128xbf16>
    tpu.vector_store %arg24[%c14, %c0_162], %152 {strides = array<i32>} : memref<48x128xbf16, #tpu.memory_space<vmem>>, vector<24x128xbf16>,
    %c1_i32_163 = arith.constant 1 : i32
    %c1_i32_164 = arith.constant 1 : i32
    %c1_i32_165 = arith.constant 1 : i32
    %c0_i32_166 = arith.constant 0 : i32
    %c0_i32_167 = arith.constant 0 : i32
    %154 = tpu.memref_slice %arg21[%c1_i32_163, %c0_i32_166, %c0_i32_167] : memref<6x1152x128xbf16, #tpu.memory_space<any>> -> memref<1x1152x128xbf16, #tpu.memory_space<any>>
    %155 = tpu.memref_squeeze %154 : memref<1x1152x128xbf16, #tpu.memory_space<any>> -> memref<1152x128xbf16, #tpu.memory_space<any>>
    %c0_i32_168 = arith.constant 0 : i32
    %c0_i32_169 = arith.constant 0 : i32
    %156 = tpu.memref_slice %arg26[%c1_i32_164, %c0_i32_168, %c0_i32_169] : memref<6x1152x128xbf16, #tpu.memory_space<vmem>> -> memref<1x1152x128xbf16, #tpu.memory_space<vmem>>
    %157 = tpu.memref_squeeze %156 : memref<1x1152x128xbf16, #tpu.memory_space<vmem>> -> memref<1152x128xbf16, #tpu.memory_space<vmem>>
    %158 = tpu.memref_slice %arg27[%c1_i32_165] : memref<6x!tpu.dma_semaphore, #tpu.memory_space<semaphore_mem>> -> memref<1x!tpu.dma_semaphore, #tpu.memory_space<semaphore_mem>>
    %159 = tpu.memref_squeeze %158 : memref<1x!tpu.dma_semaphore, #tpu.memory_space<semaphore_mem>> -> memref<!tpu.dma_semaphore, #tpu.memory_space<semaphore_mem>>
    tpu.wait_dma2 semaphore(%159 : memref<!tpu.dma_semaphore, #tpu.memory_space<semaphore_mem>>) src(%155 : memref<1152x128xbf16, #tpu.memory_space<any>>) dst(%157 : memref<1152x128xbf16, #tpu.memory_space<vmem>>)
    %c1 = arith.constant 1 : index
    %c0_170 = arith.constant 0 : index
    %c0_171 = arith.constant 0 : index
    %160 = vector.load %arg26[%c1, %c0_170, %c0_171] : memref<6x1152x128xbf16, #tpu.memory_space<vmem>>, vector<1x1152x128xbf16>
    %161 = vector.shape_cast %160 : vector<1x1152x128xbf16> to vector<1152x128xbf16>
    %c0_172 = arith.constant 0 : index
    %c0_173 = arith.constant 0 : index
    %162 = vector.load %arg12[%c0_172, %c0_173] : memref<1x128xf32, #tpu.memory_space<vmem>>, vector<1x128xf32>
    %c7_174 = arith.constant 7 : index
    %c0_175 = arith.constant 0 : index
    %163 = vector.load %arg24[%c7_174, %c0_175] : memref<48x128xbf16, #tpu.memory_space<vmem>>, vector<24x128xbf16>
    %c0_176 = arith.constant 0 : index
    %c0_177 = arith.constant 0 : index
    %164 = vector.load %arg25[%c0_176, %c0_177] : memref<80x1152xbf16, #tpu.memory_space<vmem>>, vector<24x128xbf16>
    tpu.vector_store %arg25[%c0_176, %c0_177], %163 {strides = array<i32>} : memref<80x1152xbf16, #tpu.memory_space<vmem>>, vector<24x128xbf16>,
    %c8_178 = arith.constant 8 : index
    %c0_179 = arith.constant 0 : index
    %165 = vector.load %arg24[%c8_178, %c0_179] : memref<48x128xbf16, #tpu.memory_space<vmem>>, vector<24x128xbf16>
    %c0_180 = arith.constant 0 : index
    %c128_181 = arith.constant 128 : index
    %166 = vector.load %arg25[%c0_180, %c128_181] : memref<80x1152xbf16, #tpu.memory_space<vmem>>, vector<24x128xbf16>
    tpu.vector_store %arg25[%c0_180, %c128_181], %165 {strides = array<i32>} : memref<80x1152xbf16, #tpu.memory_space<vmem>>, vector<24x128xbf16>,
    %c9_182 = arith.constant 9 : index
    %c0_183 = arith.constant 0 : index
    %167 = vector.load %arg24[%c9_182, %c0_183] : memref<48x128xbf16, #tpu.memory_space<vmem>>, vector<24x128xbf16>
    %c0_184 = arith.constant 0 : index
    %c256_185 = arith.constant 256 : index
    %168 = vector.load %arg25[%c0_184, %c256_185] : memref<80x1152xbf16, #tpu.memory_space<vmem>>, vector<24x128xbf16>
    tpu.vector_store %arg25[%c0_184, %c256_185], %167 {strides = array<i32>} : memref<80x1152xbf16, #tpu.memory_space<vmem>>, vector<24x128xbf16>,
    %c13 = arith.constant 13 : index
    %c0_186 = arith.constant 0 : index
    %169 = vector.load %arg24[%c13, %c0_186] : memref<48x128xbf16, #tpu.memory_space<vmem>>, vector<24x128xbf16>
    %c0_187 = arith.constant 0 : index
    %c384_188 = arith.constant 384 : index
    %170 = vector.load %arg25[%c0_187, %c384_188] : memref<80x1152xbf16, #tpu.memory_space<vmem>>, vector<24x128xbf16>
    tpu.vector_store %arg25[%c0_187, %c384_188], %169 {strides = array<i32>} : memref<80x1152xbf16, #tpu.memory_space<vmem>>, vector<24x128xbf16>,
    %c14_189 = arith.constant 14 : index
    %c0_190 = arith.constant 0 : index
    %171 = vector.load %arg24[%c14_189, %c0_190] : memref<48x128xbf16, #tpu.memory_space<vmem>>, vector<24x128xbf16>
    %c0_191 = arith.constant 0 : index
    %c512_192 = arith.constant 512 : index
    %172 = vector.load %arg25[%c0_191, %c512_192] : memref<80x1152xbf16, #tpu.memory_space<vmem>>, vector<24x128xbf16>
    tpu.vector_store %arg25[%c0_191, %c512_192], %171 {strides = array<i32>} : memref<80x1152xbf16, #tpu.memory_space<vmem>>, vector<24x128xbf16>,
    %c15 = arith.constant 15 : index
    %c0_193 = arith.constant 0 : index
    %173 = vector.load %arg24[%c15, %c0_193] : memref<48x128xbf16, #tpu.memory_space<vmem>>, vector<24x128xbf16>
    %c0_194 = arith.constant 0 : index
    %c640_195 = arith.constant 640 : index
    %174 = vector.load %arg25[%c0_194, %c640_195] : memref<80x1152xbf16, #tpu.memory_space<vmem>>, vector<24x128xbf16>
    tpu.vector_store %arg25[%c0_194, %c640_195], %173 {strides = array<i32>} : memref<80x1152xbf16, #tpu.memory_space<vmem>>, vector<24x128xbf16>,
    %c19_196 = arith.constant 19 : index
    %c0_197 = arith.constant 0 : index
    %175 = vector.load %arg24[%c19_196, %c0_197] : memref<48x128xbf16, #tpu.memory_space<vmem>>, vector<24x128xbf16>
    %c0_198 = arith.constant 0 : index
    %c768_199 = arith.constant 768 : index
    %176 = vector.load %arg25[%c0_198, %c768_199] : memref<80x1152xbf16, #tpu.memory_space<vmem>>, vector<24x128xbf16>
    tpu.vector_store %arg25[%c0_198, %c768_199], %175 {strides = array<i32>} : memref<80x1152xbf16, #tpu.memory_space<vmem>>, vector<24x128xbf16>,
    %c20 = arith.constant 20 : index
    %c0_200 = arith.constant 0 : index
    %177 = vector.load %arg24[%c20, %c0_200] : memref<48x128xbf16, #tpu.memory_space<vmem>>, vector<24x128xbf16>
    %c0_201 = arith.constant 0 : index
    %c896_202 = arith.constant 896 : index
    %178 = vector.load %arg25[%c0_201, %c896_202] : memref<80x1152xbf16, #tpu.memory_space<vmem>>, vector<24x128xbf16>
    tpu.vector_store %arg25[%c0_201, %c896_202], %177 {strides = array<i32>} : memref<80x1152xbf16, #tpu.memory_space<vmem>>, vector<24x128xbf16>,
    %c21 = arith.constant 21 : index
    %c0_203 = arith.constant 0 : index
    %179 = vector.load %arg24[%c21, %c0_203] : memref<48x128xbf16, #tpu.memory_space<vmem>>, vector<24x128xbf16>
    %c0_204 = arith.constant 0 : index
    %c1024_205 = arith.constant 1024 : index
    %180 = vector.load %arg25[%c0_204, %c1024_205] : memref<80x1152xbf16, #tpu.memory_space<vmem>>, vector<24x128xbf16>
    tpu.vector_store %arg25[%c0_204, %c1024_205], %179 {strides = array<i32>} : memref<80x1152xbf16, #tpu.memory_space<vmem>>, vector<24x128xbf16>,
    %c0_206 = arith.constant 0 : index
    %c0_207 = arith.constant 0 : index
    %181 = vector.load %arg25[%c0_206, %c0_207] : memref<80x1152xbf16, #tpu.memory_space<vmem>>, vector<24x1152xbf16>
    %cst_208 = arith.constant dense<0.000000e+00> : vector<24x128xf32>
    %182 = tpu.matmul %181, %161, %cst_208 {dimension_numbers = #tpu.dot_dimension_numbers<[1], [0], [0], [1], [0, 0, 1, 1], [], []>} : vector<24x1152xbf16>, vector<1152x128xbf16>, vector<24x128xf32> -> vector<24x128xf32>
    %183 = vector.broadcast %162 : vector<1x128xf32> to vector<24x128xf32>
    %184 = arith.addf %182, %183 : vector<24x128xf32>
    %c0_209 = arith.constant 0 : index
    %c0_210 = arith.constant 0 : index
    %185 = vector.load %arg4[%c0_209, %c0_210] : memref<24x80xbf16, #tpu.memory_space<vmem>>, vector<24x80xbf16>
    %186 = arith.truncf %96 : vector<80x128xf32> to vector<80x128xbf16>
    %cst_211 = arith.constant dense<0.000000e+00> : vector<24x128xf32>
    %187 = tpu.matmul %185, %186, %cst_211 {dimension_numbers = #tpu.dot_dimension_numbers<[1], [0], [0], [1], [0, 0, 1, 1], [], []>} : vector<24x80xbf16>, vector<80x128xbf16>, vector<24x128xf32> -> vector<24x128xf32>
    %188 = arith.truncf %187 : vector<24x128xf32> to vector<24x128xbf16>
    %c0_212 = arith.constant 0 : index
    %c0_213 = arith.constant 0 : index
    %189 = vector.load %arg13[%c0_212, %c0_213] : memref<128x128xbf16, #tpu.memory_space<vmem>>, vector<128x128xbf16>
    %cst_214 = arith.constant dense<0.000000e+00> : vector<24x128xf32>
    %190 = tpu.matmul %188, %189, %cst_214 {dimension_numbers = #tpu.dot_dimension_numbers<[1], [0], [0], [1], [0, 0, 1, 1], [], []>} : vector<24x128xbf16>, vector<128x128xbf16>, vector<24x128xf32> -> vector<24x128xf32>
    %c0_215 = arith.constant 0 : index
    %c0_216 = arith.constant 0 : index
    %191 = vector.load %arg14[%c0_215, %c0_216] : memref<1x128xf32, #tpu.memory_space<vmem>>, vector<1x128xf32>
    %192 = vector.broadcast %191 : vector<1x128xf32> to vector<24x128xf32>
    %193 = arith.addf %190, %192 : vector<24x128xf32>
    %194 = arith.addf %184, %193 : vector<24x128xf32>
    %cst_217 = arith.constant 0.000000e+00 : f32
    %195 = vector.broadcast %cst_217 : f32 to vector<24x128xf32>
    %196 = arith.maximumf %194, %195 : vector<24x128xf32>
    %197 = arith.truncf %196 : vector<24x128xf32> to vector<24x128xbf16>
    %198 = vector.extract_strided_slice %197 {offsets = [1, 0], sizes = [4, 128], strides = [1, 1]} : vector<24x128xbf16> to vector<4x128xbf16>
    %c15_218 = arith.constant 15 : index
    %c0_219 = arith.constant 0 : index
    %199 = vector.load %arg24[%c15_218, %c0_219] : memref<48x128xbf16, #tpu.memory_space<vmem>>, vector<4x128xbf16>
    tpu.vector_store %arg24[%c15_218, %c0_219], %198 {strides = array<i32>} : memref<48x128xbf16, #tpu.memory_space<vmem>>, vector<4x128xbf16>,
    %200 = vector.extract_strided_slice %197 {offsets = [7, 0], sizes = [4, 128], strides = [1, 1]} : vector<24x128xbf16> to vector<4x128xbf16>
    %c21_220 = arith.constant 21 : index
    %c0_221 = arith.constant 0 : index
    %201 = vector.load %arg24[%c21_220, %c0_221] : memref<48x128xbf16, #tpu.memory_space<vmem>>, vector<4x128xbf16>
    tpu.vector_store %arg24[%c21_220, %c0_221], %200 {strides = array<i32>} : memref<48x128xbf16, #tpu.memory_space<vmem>>, vector<4x128xbf16>,
    %202 = vector.extract_strided_slice %197 {offsets = [13, 0], sizes = [4, 128], strides = [1, 1]} : vector<24x128xbf16> to vector<4x128xbf16>
    %c27_222 = arith.constant 27 : index
    %c0_223 = arith.constant 0 : index
    %203 = vector.load %arg24[%c27_222, %c0_223] : memref<48x128xbf16, #tpu.memory_space<vmem>>, vector<4x128xbf16>
    tpu.vector_store %arg24[%c27_222, %c0_223], %202 {strides = array<i32>} : memref<48x128xbf16, #tpu.memory_space<vmem>>, vector<4x128xbf16>,
    %204 = vector.extract_strided_slice %197 {offsets = [19, 0], sizes = [4, 128], strides = [1, 1]} : vector<24x128xbf16> to vector<4x128xbf16>
    %c33 = arith.constant 33 : index
    %c0_224 = arith.constant 0 : index
    %205 = vector.load %arg24[%c33, %c0_224] : memref<48x128xbf16, #tpu.memory_space<vmem>>, vector<4x128xbf16>
    tpu.vector_store %arg24[%c33, %c0_224], %204 {strides = array<i32>} : memref<48x128xbf16, #tpu.memory_space<vmem>>, vector<4x128xbf16>,
    %c2_i32_225 = arith.constant 2 : i32
    %c2_i32_226 = arith.constant 2 : i32
    %c2_i32_227 = arith.constant 2 : i32
    %c0_i32_228 = arith.constant 0 : i32
    %c0_i32_229 = arith.constant 0 : i32
    %206 = tpu.memref_slice %arg21[%c2_i32_225, %c0_i32_228, %c0_i32_229] : memref<6x1152x128xbf16, #tpu.memory_space<any>> -> memref<1x1152x128xbf16, #tpu.memory_space<any>>
    %207 = tpu.memref_squeeze %206 : memref<1x1152x128xbf16, #tpu.memory_space<any>> -> memref<1152x128xbf16, #tpu.memory_space<any>>
    %c0_i32_230 = arith.constant 0 : i32
    %c0_i32_231 = arith.constant 0 : i32
    %208 = tpu.memref_slice %arg26[%c2_i32_226, %c0_i32_230, %c0_i32_231] : memref<6x1152x128xbf16, #tpu.memory_space<vmem>> -> memref<1x1152x128xbf16, #tpu.memory_space<vmem>>
    %209 = tpu.memref_squeeze %208 : memref<1x1152x128xbf16, #tpu.memory_space<vmem>> -> memref<1152x128xbf16, #tpu.memory_space<vmem>>
    %210 = tpu.memref_slice %arg27[%c2_i32_227] : memref<6x!tpu.dma_semaphore, #tpu.memory_space<semaphore_mem>> -> memref<1x!tpu.dma_semaphore, #tpu.memory_space<semaphore_mem>>
    %211 = tpu.memref_squeeze %210 : memref<1x!tpu.dma_semaphore, #tpu.memory_space<semaphore_mem>> -> memref<!tpu.dma_semaphore, #tpu.memory_space<semaphore_mem>>
    tpu.wait_dma2 semaphore(%211 : memref<!tpu.dma_semaphore, #tpu.memory_space<semaphore_mem>>) src(%207 : memref<1152x128xbf16, #tpu.memory_space<any>>) dst(%209 : memref<1152x128xbf16, #tpu.memory_space<vmem>>)
    %c2 = arith.constant 2 : index
    %c0_232 = arith.constant 0 : index
    %c0_233 = arith.constant 0 : index
    %212 = vector.load %arg26[%c2, %c0_232, %c0_233] : memref<6x1152x128xbf16, #tpu.memory_space<vmem>>, vector<1x1152x128xbf16>
    %213 = vector.shape_cast %212 : vector<1x1152x128xbf16> to vector<1152x128xbf16>
    %c0_234 = arith.constant 0 : index
    %c0_235 = arith.constant 0 : index
    %214 = vector.load %arg15[%c0_234, %c0_235] : memref<1x128xf32, #tpu.memory_space<vmem>>, vector<1x128xf32>
    %c7_236 = arith.constant 7 : index
    %c0_237 = arith.constant 0 : index
    %215 = vector.load %arg24[%c7_236, %c0_237] : memref<48x128xbf16, #tpu.memory_space<vmem>>, vector<24x128xbf16>
    %c0_238 = arith.constant 0 : index
    %c0_239 = arith.constant 0 : index
    %216 = vector.load %arg25[%c0_238, %c0_239] : memref<80x1152xbf16, #tpu.memory_space<vmem>>, vector<24x128xbf16>
    tpu.vector_store %arg25[%c0_238, %c0_239], %215 {strides = array<i32>} : memref<80x1152xbf16, #tpu.memory_space<vmem>>, vector<24x128xbf16>,
    %c8_240 = arith.constant 8 : index
    %c0_241 = arith.constant 0 : index
    %217 = vector.load %arg24[%c8_240, %c0_241] : memref<48x128xbf16, #tpu.memory_space<vmem>>, vector<24x128xbf16>
    %c0_242 = arith.constant 0 : index
    %c128_243 = arith.constant 128 : index
    %218 = vector.load %arg25[%c0_242, %c128_243] : memref<80x1152xbf16, #tpu.memory_space<vmem>>, vector<24x128xbf16>
    tpu.vector_store %arg25[%c0_242, %c128_243], %217 {strides = array<i32>} : memref<80x1152xbf16, #tpu.memory_space<vmem>>, vector<24x128xbf16>,
    %c9_244 = arith.constant 9 : index
    %c0_245 = arith.constant 0 : index
    %219 = vector.load %arg24[%c9_244, %c0_245] : memref<48x128xbf16, #tpu.memory_space<vmem>>, vector<24x128xbf16>
    %c0_246 = arith.constant 0 : index
    %c256_247 = arith.constant 256 : index
    %220 = vector.load %arg25[%c0_246, %c256_247] : memref<80x1152xbf16, #tpu.memory_space<vmem>>, vector<24x128xbf16>
    tpu.vector_store %arg25[%c0_246, %c256_247], %219 {strides = array<i32>} : memref<80x1152xbf16, #tpu.memory_space<vmem>>, vector<24x128xbf16>,
    %c13_248 = arith.constant 13 : index
    %c0_249 = arith.constant 0 : index
    %221 = vector.load %arg24[%c13_248, %c0_249] : memref<48x128xbf16, #tpu.memory_space<vmem>>, vector<24x128xbf16>
    %c0_250 = arith.constant 0 : index
    %c384_251 = arith.constant 384 : index
    %222 = vector.load %arg25[%c0_250, %c384_251] : memref<80x1152xbf16, #tpu.memory_space<vmem>>, vector<24x128xbf16>
    tpu.vector_store %arg25[%c0_250, %c384_251], %221 {strides = array<i32>} : memref<80x1152xbf16, #tpu.memory_space<vmem>>, vector<24x128xbf16>,
    %c14_252 = arith.constant 14 : index
    %c0_253 = arith.constant 0 : index
    %223 = vector.load %arg24[%c14_252, %c0_253] : memref<48x128xbf16, #tpu.memory_space<vmem>>, vector<24x128xbf16>
    %c0_254 = arith.constant 0 : index
    %c512_255 = arith.constant 512 : index
    %224 = vector.load %arg25[%c0_254, %c512_255] : memref<80x1152xbf16, #tpu.memory_space<vmem>>, vector<24x128xbf16>
    tpu.vector_store %arg25[%c0_254, %c512_255], %223 {strides = array<i32>} : memref<80x1152xbf16, #tpu.memory_space<vmem>>, vector<24x128xbf16>,
    %c15_256 = arith.constant 15 : index
    %c0_257 = arith.constant 0 : index
    %225 = vector.load %arg24[%c15_256, %c0_257] : memref<48x128xbf16, #tpu.memory_space<vmem>>, vector<24x128xbf16>
    %c0_258 = arith.constant 0 : index
    %c640_259 = arith.constant 640 : index
    %226 = vector.load %arg25[%c0_258, %c640_259] : memref<80x1152xbf16, #tpu.memory_space<vmem>>, vector<24x128xbf16>
    tpu.vector_store %arg25[%c0_258, %c640_259], %225 {strides = array<i32>} : memref<80x1152xbf16, #tpu.memory_space<vmem>>, vector<24x128xbf16>,
    %c19_260 = arith.constant 19 : index
    %c0_261 = arith.constant 0 : index
    %227 = vector.load %arg24[%c19_260, %c0_261] : memref<48x128xbf16, #tpu.memory_space<vmem>>, vector<24x128xbf16>
    %c0_262 = arith.constant 0 : index
    %c768_263 = arith.constant 768 : index
    %228 = vector.load %arg25[%c0_262, %c768_263] : memref<80x1152xbf16, #tpu.memory_space<vmem>>, vector<24x128xbf16>
    tpu.vector_store %arg25[%c0_262, %c768_263], %227 {strides = array<i32>} : memref<80x1152xbf16, #tpu.memory_space<vmem>>, vector<24x128xbf16>,
    %c20_264 = arith.constant 20 : index
    %c0_265 = arith.constant 0 : index
    %229 = vector.load %arg24[%c20_264, %c0_265] : memref<48x128xbf16, #tpu.memory_space<vmem>>, vector<24x128xbf16>
    %c0_266 = arith.constant 0 : index
    %c896_267 = arith.constant 896 : index
    %230 = vector.load %arg25[%c0_266, %c896_267] : memref<80x1152xbf16, #tpu.memory_space<vmem>>, vector<24x128xbf16>
    tpu.vector_store %arg25[%c0_266, %c896_267], %229 {strides = array<i32>} : memref<80x1152xbf16, #tpu.memory_space<vmem>>, vector<24x128xbf16>,
    %c21_268 = arith.constant 21 : index
    %c0_269 = arith.constant 0 : index
    %231 = vector.load %arg24[%c21_268, %c0_269] : memref<48x128xbf16, #tpu.memory_space<vmem>>, vector<24x128xbf16>
    %c0_270 = arith.constant 0 : index
    %c1024_271 = arith.constant 1024 : index
    %232 = vector.load %arg25[%c0_270, %c1024_271] : memref<80x1152xbf16, #tpu.memory_space<vmem>>, vector<24x128xbf16>
    tpu.vector_store %arg25[%c0_270, %c1024_271], %231 {strides = array<i32>} : memref<80x1152xbf16, #tpu.memory_space<vmem>>, vector<24x128xbf16>,
    %c0_272 = arith.constant 0 : index
    %c0_273 = arith.constant 0 : index
    %233 = vector.load %arg25[%c0_272, %c0_273] : memref<80x1152xbf16, #tpu.memory_space<vmem>>, vector<24x1152xbf16>
    %cst_274 = arith.constant dense<0.000000e+00> : vector<24x128xf32>
    %234 = tpu.matmul %233, %213, %cst_274 {dimension_numbers = #tpu.dot_dimension_numbers<[1], [0], [0], [1], [0, 0, 1, 1], [], []>} : vector<24x1152xbf16>, vector<1152x128xbf16>, vector<24x128xf32> -> vector<24x128xf32>
    %235 = vector.broadcast %214 : vector<1x128xf32> to vector<24x128xf32>
    %236 = arith.addf %234, %235 : vector<24x128xf32>
    %cst_275 = arith.constant 0.000000e+00 : f32
    %237 = vector.broadcast %cst_275 : f32 to vector<24x128xf32>
    %238 = arith.maximumf %236, %237 : vector<24x128xf32>
    %239 = arith.truncf %238 : vector<24x128xf32> to vector<24x128xbf16>
    %240 = vector.extract_strided_slice %239 {offsets = [1, 0], sizes = [4, 128], strides = [1, 1]} : vector<24x128xbf16> to vector<4x128xbf16>
    %c15_276 = arith.constant 15 : index
    %c0_277 = arith.constant 0 : index
    %241 = vector.load %arg24[%c15_276, %c0_277] : memref<48x128xbf16, #tpu.memory_space<vmem>>, vector<4x128xbf16>
    tpu.vector_store %arg24[%c15_276, %c0_277], %240 {strides = array<i32>} : memref<48x128xbf16, #tpu.memory_space<vmem>>, vector<4x128xbf16>,
    %242 = vector.extract_strided_slice %239 {offsets = [7, 0], sizes = [4, 128], strides = [1, 1]} : vector<24x128xbf16> to vector<4x128xbf16>
    %c21_278 = arith.constant 21 : index
    %c0_279 = arith.constant 0 : index
    %243 = vector.load %arg24[%c21_278, %c0_279] : memref<48x128xbf16, #tpu.memory_space<vmem>>, vector<4x128xbf16>
    tpu.vector_store %arg24[%c21_278, %c0_279], %242 {strides = array<i32>} : memref<48x128xbf16, #tpu.memory_space<vmem>>, vector<4x128xbf16>,
    %244 = vector.extract_strided_slice %239 {offsets = [13, 0], sizes = [4, 128], strides = [1, 1]} : vector<24x128xbf16> to vector<4x128xbf16>
    %c27_280 = arith.constant 27 : index
    %c0_281 = arith.constant 0 : index
    %245 = vector.load %arg24[%c27_280, %c0_281] : memref<48x128xbf16, #tpu.memory_space<vmem>>, vector<4x128xbf16>
    tpu.vector_store %arg24[%c27_280, %c0_281], %244 {strides = array<i32>} : memref<48x128xbf16, #tpu.memory_space<vmem>>, vector<4x128xbf16>,
    %246 = vector.extract_strided_slice %239 {offsets = [19, 0], sizes = [4, 128], strides = [1, 1]} : vector<24x128xbf16> to vector<4x128xbf16>
    %c33_282 = arith.constant 33 : index
    %c0_283 = arith.constant 0 : index
    %247 = vector.load %arg24[%c33_282, %c0_283] : memref<48x128xbf16, #tpu.memory_space<vmem>>, vector<4x128xbf16>
    tpu.vector_store %arg24[%c33_282, %c0_283], %246 {strides = array<i32>} : memref<48x128xbf16, #tpu.memory_space<vmem>>, vector<4x128xbf16>,
    %c3_i32_284 = arith.constant 3 : i32
    %c3_i32_285 = arith.constant 3 : i32
    %c3_i32_286 = arith.constant 3 : i32
    %c0_i32_287 = arith.constant 0 : i32
    %c0_i32_288 = arith.constant 0 : i32
    %248 = tpu.memref_slice %arg21[%c3_i32_284, %c0_i32_287, %c0_i32_288] : memref<6x1152x128xbf16, #tpu.memory_space<any>> -> memref<1x1152x128xbf16, #tpu.memory_space<any>>
    %249 = tpu.memref_squeeze %248 : memref<1x1152x128xbf16, #tpu.memory_space<any>> -> memref<1152x128xbf16, #tpu.memory_space<any>>
    %c0_i32_289 = arith.constant 0 : i32
    %c0_i32_290 = arith.constant 0 : i32
    %250 = tpu.memref_slice %arg26[%c3_i32_285, %c0_i32_289, %c0_i32_290] : memref<6x1152x128xbf16, #tpu.memory_space<vmem>> -> memref<1x1152x128xbf16, #tpu.memory_space<vmem>>
    %251 = tpu.memref_squeeze %250 : memref<1x1152x128xbf16, #tpu.memory_space<vmem>> -> memref<1152x128xbf16, #tpu.memory_space<vmem>>
    %252 = tpu.memref_slice %arg27[%c3_i32_286] : memref<6x!tpu.dma_semaphore, #tpu.memory_space<semaphore_mem>> -> memref<1x!tpu.dma_semaphore, #tpu.memory_space<semaphore_mem>>
    %253 = tpu.memref_squeeze %252 : memref<1x!tpu.dma_semaphore, #tpu.memory_space<semaphore_mem>> -> memref<!tpu.dma_semaphore, #tpu.memory_space<semaphore_mem>>
    tpu.wait_dma2 semaphore(%253 : memref<!tpu.dma_semaphore, #tpu.memory_space<semaphore_mem>>) src(%249 : memref<1152x128xbf16, #tpu.memory_space<any>>) dst(%251 : memref<1152x128xbf16, #tpu.memory_space<vmem>>)
    %c3 = arith.constant 3 : index
    %c0_291 = arith.constant 0 : index
    %c0_292 = arith.constant 0 : index
    %254 = vector.load %arg26[%c3, %c0_291, %c0_292] : memref<6x1152x128xbf16, #tpu.memory_space<vmem>>, vector<1x1152x128xbf16>
    %255 = vector.shape_cast %254 : vector<1x1152x128xbf16> to vector<1152x128xbf16>
    %c0_293 = arith.constant 0 : index
    %c0_294 = arith.constant 0 : index
    %256 = vector.load %arg16[%c0_293, %c0_294] : memref<1x128xf32, #tpu.memory_space<vmem>>, vector<1x128xf32>
    %c7_295 = arith.constant 7 : index
    %c0_296 = arith.constant 0 : index
    %257 = vector.load %arg24[%c7_295, %c0_296] : memref<48x128xbf16, #tpu.memory_space<vmem>>, vector<24x128xbf16>
    %c0_297 = arith.constant 0 : index
    %c0_298 = arith.constant 0 : index
    %258 = vector.load %arg25[%c0_297, %c0_298] : memref<80x1152xbf16, #tpu.memory_space<vmem>>, vector<24x128xbf16>
    tpu.vector_store %arg25[%c0_297, %c0_298], %257 {strides = array<i32>} : memref<80x1152xbf16, #tpu.memory_space<vmem>>, vector<24x128xbf16>,
    %c8_299 = arith.constant 8 : index
    %c0_300 = arith.constant 0 : index
    %259 = vector.load %arg24[%c8_299, %c0_300] : memref<48x128xbf16, #tpu.memory_space<vmem>>, vector<24x128xbf16>
    %c0_301 = arith.constant 0 : index
    %c128_302 = arith.constant 128 : index
    %260 = vector.load %arg25[%c0_301, %c128_302] : memref<80x1152xbf16, #tpu.memory_space<vmem>>, vector<24x128xbf16>
    tpu.vector_store %arg25[%c0_301, %c128_302], %259 {strides = array<i32>} : memref<80x1152xbf16, #tpu.memory_space<vmem>>, vector<24x128xbf16>,
    %c9_303 = arith.constant 9 : index
    %c0_304 = arith.constant 0 : index
    %261 = vector.load %arg24[%c9_303, %c0_304] : memref<48x128xbf16, #tpu.memory_space<vmem>>, vector<24x128xbf16>
    %c0_305 = arith.constant 0 : index
    %c256_306 = arith.constant 256 : index
    %262 = vector.load %arg25[%c0_305, %c256_306] : memref<80x1152xbf16, #tpu.memory_space<vmem>>, vector<24x128xbf16>
    tpu.vector_store %arg25[%c0_305, %c256_306], %261 {strides = array<i32>} : memref<80x1152xbf16, #tpu.memory_space<vmem>>, vector<24x128xbf16>,
    %c13_307 = arith.constant 13 : index
    %c0_308 = arith.constant 0 : index
    %263 = vector.load %arg24[%c13_307, %c0_308] : memref<48x128xbf16, #tpu.memory_space<vmem>>, vector<24x128xbf16>
    %c0_309 = arith.constant 0 : index
    %c384_310 = arith.constant 384 : index
    %264 = vector.load %arg25[%c0_309, %c384_310] : memref<80x1152xbf16, #tpu.memory_space<vmem>>, vector<24x128xbf16>
    tpu.vector_store %arg25[%c0_309, %c384_310], %263 {strides = array<i32>} : memref<80x1152xbf16, #tpu.memory_space<vmem>>, vector<24x128xbf16>,
    %c14_311 = arith.constant 14 : index
    %c0_312 = arith.constant 0 : index
    %265 = vector.load %arg24[%c14_311, %c0_312] : memref<48x128xbf16, #tpu.memory_space<vmem>>, vector<24x128xbf16>
    %c0_313 = arith.constant 0 : index
    %c512_314 = arith.constant 512 : index
    %266 = vector.load %arg25[%c0_313, %c512_314] : memref<80x1152xbf16, #tpu.memory_space<vmem>>, vector<24x128xbf16>
    tpu.vector_store %arg25[%c0_313, %c512_314], %265 {strides = array<i32>} : memref<80x1152xbf16, #tpu.memory_space<vmem>>, vector<24x128xbf16>,
    %c15_315 = arith.constant 15 : index
    %c0_316 = arith.constant 0 : index
    %267 = vector.load %arg24[%c15_315, %c0_316] : memref<48x128xbf16, #tpu.memory_space<vmem>>, vector<24x128xbf16>
    %c0_317 = arith.constant 0 : index
    %c640_318 = arith.constant 640 : index
    %268 = vector.load %arg25[%c0_317, %c640_318] : memref<80x1152xbf16, #tpu.memory_space<vmem>>, vector<24x128xbf16>
    tpu.vector_store %arg25[%c0_317, %c640_318], %267 {strides = array<i32>} : memref<80x1152xbf16, #tpu.memory_space<vmem>>, vector<24x128xbf16>,
    %c19_319 = arith.constant 19 : index
    %c0_320 = arith.constant 0 : index
    %269 = vector.load %arg24[%c19_319, %c0_320] : memref<48x128xbf16, #tpu.memory_space<vmem>>, vector<24x128xbf16>
    %c0_321 = arith.constant 0 : index
    %c768_322 = arith.constant 768 : index
    %270 = vector.load %arg25[%c0_321, %c768_322] : memref<80x1152xbf16, #tpu.memory_space<vmem>>, vector<24x128xbf16>
    tpu.vector_store %arg25[%c0_321, %c768_322], %269 {strides = array<i32>} : memref<80x1152xbf16, #tpu.memory_space<vmem>>, vector<24x128xbf16>,
    %c20_323 = arith.constant 20 : index
    %c0_324 = arith.constant 0 : index
    %271 = vector.load %arg24[%c20_323, %c0_324] : memref<48x128xbf16, #tpu.memory_space<vmem>>, vector<24x128xbf16>
    %c0_325 = arith.constant 0 : index
    %c896_326 = arith.constant 896 : index
    %272 = vector.load %arg25[%c0_325, %c896_326] : memref<80x1152xbf16, #tpu.memory_space<vmem>>, vector<24x128xbf16>
    tpu.vector_store %arg25[%c0_325, %c896_326], %271 {strides = array<i32>} : memref<80x1152xbf16, #tpu.memory_space<vmem>>, vector<24x128xbf16>,
    %c21_327 = arith.constant 21 : index
    %c0_328 = arith.constant 0 : index
    %273 = vector.load %arg24[%c21_327, %c0_328] : memref<48x128xbf16, #tpu.memory_space<vmem>>, vector<24x128xbf16>
    %c0_329 = arith.constant 0 : index
    %c1024_330 = arith.constant 1024 : index
    %274 = vector.load %arg25[%c0_329, %c1024_330] : memref<80x1152xbf16, #tpu.memory_space<vmem>>, vector<24x128xbf16>
    tpu.vector_store %arg25[%c0_329, %c1024_330], %273 {strides = array<i32>} : memref<80x1152xbf16, #tpu.memory_space<vmem>>, vector<24x128xbf16>,
    %c0_331 = arith.constant 0 : index
    %c0_332 = arith.constant 0 : index
    %275 = vector.load %arg25[%c0_331, %c0_332] : memref<80x1152xbf16, #tpu.memory_space<vmem>>, vector<24x1152xbf16>
    %cst_333 = arith.constant dense<0.000000e+00> : vector<24x128xf32>
    %276 = tpu.matmul %275, %255, %cst_333 {dimension_numbers = #tpu.dot_dimension_numbers<[1], [0], [0], [1], [0, 0, 1, 1], [], []>} : vector<24x1152xbf16>, vector<1152x128xbf16>, vector<24x128xf32> -> vector<24x128xf32>
    %277 = vector.broadcast %256 : vector<1x128xf32> to vector<24x128xf32>
    %278 = arith.addf %276, %277 : vector<24x128xf32>
    %279 = arith.addf %194, %278 : vector<24x128xf32>
    %cst_334 = arith.constant 0.000000e+00 : f32
    %280 = vector.broadcast %cst_334 : f32 to vector<24x128xf32>
    %281 = arith.maximumf %279, %280 : vector<24x128xf32>
    %282 = arith.truncf %281 : vector<24x128xf32> to vector<24x128xbf16>
    %283 = vector.extract_strided_slice %282 {offsets = [1, 0], sizes = [4, 128], strides = [1, 1]} : vector<24x128xbf16> to vector<4x128xbf16>
    %c15_335 = arith.constant 15 : index
    %c0_336 = arith.constant 0 : index
    %284 = vector.load %arg24[%c15_335, %c0_336] : memref<48x128xbf16, #tpu.memory_space<vmem>>, vector<4x128xbf16>
    tpu.vector_store %arg24[%c15_335, %c0_336], %283 {strides = array<i32>} : memref<48x128xbf16, #tpu.memory_space<vmem>>, vector<4x128xbf16>,
    %285 = vector.extract_strided_slice %282 {offsets = [7, 0], sizes = [4, 128], strides = [1, 1]} : vector<24x128xbf16> to vector<4x128xbf16>
    %c21_337 = arith.constant 21 : index
    %c0_338 = arith.constant 0 : index
    %286 = vector.load %arg24[%c21_337, %c0_338] : memref<48x128xbf16, #tpu.memory_space<vmem>>, vector<4x128xbf16>
    tpu.vector_store %arg24[%c21_337, %c0_338], %285 {strides = array<i32>} : memref<48x128xbf16, #tpu.memory_space<vmem>>, vector<4x128xbf16>,
    %287 = vector.extract_strided_slice %282 {offsets = [13, 0], sizes = [4, 128], strides = [1, 1]} : vector<24x128xbf16> to vector<4x128xbf16>
    %c27_339 = arith.constant 27 : index
    %c0_340 = arith.constant 0 : index
    %288 = vector.load %arg24[%c27_339, %c0_340] : memref<48x128xbf16, #tpu.memory_space<vmem>>, vector<4x128xbf16>
    tpu.vector_store %arg24[%c27_339, %c0_340], %287 {strides = array<i32>} : memref<48x128xbf16, #tpu.memory_space<vmem>>, vector<4x128xbf16>,
    %289 = vector.extract_strided_slice %282 {offsets = [19, 0], sizes = [4, 128], strides = [1, 1]} : vector<24x128xbf16> to vector<4x128xbf16>
    %c33_341 = arith.constant 33 : index
    %c0_342 = arith.constant 0 : index
    %290 = vector.load %arg24[%c33_341, %c0_342] : memref<48x128xbf16, #tpu.memory_space<vmem>>, vector<4x128xbf16>
    tpu.vector_store %arg24[%c33_341, %c0_342], %289 {strides = array<i32>} : memref<48x128xbf16, #tpu.memory_space<vmem>>, vector<4x128xbf16>,
    %c4_i32_343 = arith.constant 4 : i32
    %c4_i32_344 = arith.constant 4 : i32
    %c4_i32_345 = arith.constant 4 : i32
    %c0_i32_346 = arith.constant 0 : i32
    %c0_i32_347 = arith.constant 0 : i32
    %291 = tpu.memref_slice %arg21[%c4_i32_343, %c0_i32_346, %c0_i32_347] : memref<6x1152x128xbf16, #tpu.memory_space<any>> -> memref<1x1152x128xbf16, #tpu.memory_space<any>>
    %292 = tpu.memref_squeeze %291 : memref<1x1152x128xbf16, #tpu.memory_space<any>> -> memref<1152x128xbf16, #tpu.memory_space<any>>
    %c0_i32_348 = arith.constant 0 : i32
    %c0_i32_349 = arith.constant 0 : i32
    %293 = tpu.memref_slice %arg26[%c4_i32_344, %c0_i32_348, %c0_i32_349] : memref<6x1152x128xbf16, #tpu.memory_space<vmem>> -> memref<1x1152x128xbf16, #tpu.memory_space<vmem>>
    %294 = tpu.memref_squeeze %293 : memref<1x1152x128xbf16, #tpu.memory_space<vmem>> -> memref<1152x128xbf16, #tpu.memory_space<vmem>>
    %295 = tpu.memref_slice %arg27[%c4_i32_345] : memref<6x!tpu.dma_semaphore, #tpu.memory_space<semaphore_mem>> -> memref<1x!tpu.dma_semaphore, #tpu.memory_space<semaphore_mem>>
    %296 = tpu.memref_squeeze %295 : memref<1x!tpu.dma_semaphore, #tpu.memory_space<semaphore_mem>> -> memref<!tpu.dma_semaphore, #tpu.memory_space<semaphore_mem>>
    tpu.wait_dma2 semaphore(%296 : memref<!tpu.dma_semaphore, #tpu.memory_space<semaphore_mem>>) src(%292 : memref<1152x128xbf16, #tpu.memory_space<any>>) dst(%294 : memref<1152x128xbf16, #tpu.memory_space<vmem>>)
    %c4 = arith.constant 4 : index
    %c0_350 = arith.constant 0 : index
    %c0_351 = arith.constant 0 : index
    %297 = vector.load %arg26[%c4, %c0_350, %c0_351] : memref<6x1152x128xbf16, #tpu.memory_space<vmem>>, vector<1x1152x128xbf16>
    %298 = vector.shape_cast %297 : vector<1x1152x128xbf16> to vector<1152x128xbf16>
    %c0_352 = arith.constant 0 : index
    %c0_353 = arith.constant 0 : index
    %299 = vector.load %arg17[%c0_352, %c0_353] : memref<1x128xf32, #tpu.memory_space<vmem>>, vector<1x128xf32>
    %c7_354 = arith.constant 7 : index
    %c0_355 = arith.constant 0 : index
    %300 = vector.load %arg24[%c7_354, %c0_355] : memref<48x128xbf16, #tpu.memory_space<vmem>>, vector<24x128xbf16>
    %c0_356 = arith.constant 0 : index
    %c0_357 = arith.constant 0 : index
    %301 = vector.load %arg25[%c0_356, %c0_357] : memref<80x1152xbf16, #tpu.memory_space<vmem>>, vector<24x128xbf16>
    tpu.vector_store %arg25[%c0_356, %c0_357], %300 {strides = array<i32>} : memref<80x1152xbf16, #tpu.memory_space<vmem>>, vector<24x128xbf16>,
    %c8_358 = arith.constant 8 : index
    %c0_359 = arith.constant 0 : index
    %302 = vector.load %arg24[%c8_358, %c0_359] : memref<48x128xbf16, #tpu.memory_space<vmem>>, vector<24x128xbf16>
    %c0_360 = arith.constant 0 : index
    %c128_361 = arith.constant 128 : index
    %303 = vector.load %arg25[%c0_360, %c128_361] : memref<80x1152xbf16, #tpu.memory_space<vmem>>, vector<24x128xbf16>
    tpu.vector_store %arg25[%c0_360, %c128_361], %302 {strides = array<i32>} : memref<80x1152xbf16, #tpu.memory_space<vmem>>, vector<24x128xbf16>,
    %c9_362 = arith.constant 9 : index
    %c0_363 = arith.constant 0 : index
    %304 = vector.load %arg24[%c9_362, %c0_363] : memref<48x128xbf16, #tpu.memory_space<vmem>>, vector<24x128xbf16>
    %c0_364 = arith.constant 0 : index
    %c256_365 = arith.constant 256 : index
    %305 = vector.load %arg25[%c0_364, %c256_365] : memref<80x1152xbf16, #tpu.memory_space<vmem>>, vector<24x128xbf16>
    tpu.vector_store %arg25[%c0_364, %c256_365], %304 {strides = array<i32>} : memref<80x1152xbf16, #tpu.memory_space<vmem>>, vector<24x128xbf16>,
    %c13_366 = arith.constant 13 : index
    %c0_367 = arith.constant 0 : index
    %306 = vector.load %arg24[%c13_366, %c0_367] : memref<48x128xbf16, #tpu.memory_space<vmem>>, vector<24x128xbf16>
    %c0_368 = arith.constant 0 : index
    %c384_369 = arith.constant 384 : index
    %307 = vector.load %arg25[%c0_368, %c384_369] : memref<80x1152xbf16, #tpu.memory_space<vmem>>, vector<24x128xbf16>
    tpu.vector_store %arg25[%c0_368, %c384_369], %306 {strides = array<i32>} : memref<80x1152xbf16, #tpu.memory_space<vmem>>, vector<24x128xbf16>,
    %c14_370 = arith.constant 14 : index
    %c0_371 = arith.constant 0 : index
    %308 = vector.load %arg24[%c14_370, %c0_371] : memref<48x128xbf16, #tpu.memory_space<vmem>>, vector<24x128xbf16>
    %c0_372 = arith.constant 0 : index
    %c512_373 = arith.constant 512 : index
    %309 = vector.load %arg25[%c0_372, %c512_373] : memref<80x1152xbf16, #tpu.memory_space<vmem>>, vector<24x128xbf16>
    tpu.vector_store %arg25[%c0_372, %c512_373], %308 {strides = array<i32>} : memref<80x1152xbf16, #tpu.memory_space<vmem>>, vector<24x128xbf16>,
    %c15_374 = arith.constant 15 : index
    %c0_375 = arith.constant 0 : index
    %310 = vector.load %arg24[%c15_374, %c0_375] : memref<48x128xbf16, #tpu.memory_space<vmem>>, vector<24x128xbf16>
    %c0_376 = arith.constant 0 : index
    %c640_377 = arith.constant 640 : index
    %311 = vector.load %arg25[%c0_376, %c640_377] : memref<80x1152xbf16, #tpu.memory_space<vmem>>, vector<24x128xbf16>
    tpu.vector_store %arg25[%c0_376, %c640_377], %310 {strides = array<i32>} : memref<80x1152xbf16, #tpu.memory_space<vmem>>, vector<24x128xbf16>,
    %c19_378 = arith.constant 19 : index
    %c0_379 = arith.constant 0 : index
    %312 = vector.load %arg24[%c19_378, %c0_379] : memref<48x128xbf16, #tpu.memory_space<vmem>>, vector<24x128xbf16>
    %c0_380 = arith.constant 0 : index
    %c768_381 = arith.constant 768 : index
    %313 = vector.load %arg25[%c0_380, %c768_381] : memref<80x1152xbf16, #tpu.memory_space<vmem>>, vector<24x128xbf16>
    tpu.vector_store %arg25[%c0_380, %c768_381], %312 {strides = array<i32>} : memref<80x1152xbf16, #tpu.memory_space<vmem>>, vector<24x128xbf16>,
    %c20_382 = arith.constant 20 : index
    %c0_383 = arith.constant 0 : index
    %314 = vector.load %arg24[%c20_382, %c0_383] : memref<48x128xbf16, #tpu.memory_space<vmem>>, vector<24x128xbf16>
    %c0_384 = arith.constant 0 : index
    %c896_385 = arith.constant 896 : index
    %315 = vector.load %arg25[%c0_384, %c896_385] : memref<80x1152xbf16, #tpu.memory_space<vmem>>, vector<24x128xbf16>
    tpu.vector_store %arg25[%c0_384, %c896_385], %314 {strides = array<i32>} : memref<80x1152xbf16, #tpu.memory_space<vmem>>, vector<24x128xbf16>,
    %c21_386 = arith.constant 21 : index
    %c0_387 = arith.constant 0 : index
    %316 = vector.load %arg24[%c21_386, %c0_387] : memref<48x128xbf16, #tpu.memory_space<vmem>>, vector<24x128xbf16>
    %c0_388 = arith.constant 0 : index
    %c1024_389 = arith.constant 1024 : index
    %317 = vector.load %arg25[%c0_388, %c1024_389] : memref<80x1152xbf16, #tpu.memory_space<vmem>>, vector<24x128xbf16>
    tpu.vector_store %arg25[%c0_388, %c1024_389], %316 {strides = array<i32>} : memref<80x1152xbf16, #tpu.memory_space<vmem>>, vector<24x128xbf16>,
    %c0_390 = arith.constant 0 : index
    %c0_391 = arith.constant 0 : index
    %318 = vector.load %arg25[%c0_390, %c0_391] : memref<80x1152xbf16, #tpu.memory_space<vmem>>, vector<24x1152xbf16>
    %cst_392 = arith.constant dense<0.000000e+00> : vector<24x128xf32>
    %319 = tpu.matmul %318, %298, %cst_392 {dimension_numbers = #tpu.dot_dimension_numbers<[1], [0], [0], [1], [0, 0, 1, 1], [], []>} : vector<24x1152xbf16>, vector<1152x128xbf16>, vector<24x128xf32> -> vector<24x128xf32>
    %320 = vector.broadcast %299 : vector<1x128xf32> to vector<24x128xf32>
    %321 = arith.addf %319, %320 : vector<24x128xf32>
    %cst_393 = arith.constant 0.000000e+00 : f32
    %322 = vector.broadcast %cst_393 : f32 to vector<24x128xf32>
    %323 = arith.maximumf %321, %322 : vector<24x128xf32>
    %324 = arith.truncf %323 : vector<24x128xf32> to vector<24x128xbf16>
    %325 = vector.extract_strided_slice %324 {offsets = [1, 0], sizes = [4, 128], strides = [1, 1]} : vector<24x128xbf16> to vector<4x128xbf16>
    %c15_394 = arith.constant 15 : index
    %c0_395 = arith.constant 0 : index
    %326 = vector.load %arg24[%c15_394, %c0_395] : memref<48x128xbf16, #tpu.memory_space<vmem>>, vector<4x128xbf16>
    tpu.vector_store %arg24[%c15_394, %c0_395], %325 {strides = array<i32>} : memref<48x128xbf16, #tpu.memory_space<vmem>>, vector<4x128xbf16>,
    %327 = vector.extract_strided_slice %324 {offsets = [7, 0], sizes = [4, 128], strides = [1, 1]} : vector<24x128xbf16> to vector<4x128xbf16>
    %c21_396 = arith.constant 21 : index
    %c0_397 = arith.constant 0 : index
    %328 = vector.load %arg24[%c21_396, %c0_397] : memref<48x128xbf16, #tpu.memory_space<vmem>>, vector<4x128xbf16>
    tpu.vector_store %arg24[%c21_396, %c0_397], %327 {strides = array<i32>} : memref<48x128xbf16, #tpu.memory_space<vmem>>, vector<4x128xbf16>,
    %329 = vector.extract_strided_slice %324 {offsets = [13, 0], sizes = [4, 128], strides = [1, 1]} : vector<24x128xbf16> to vector<4x128xbf16>
    %c27_398 = arith.constant 27 : index
    %c0_399 = arith.constant 0 : index
    %330 = vector.load %arg24[%c27_398, %c0_399] : memref<48x128xbf16, #tpu.memory_space<vmem>>, vector<4x128xbf16>
    tpu.vector_store %arg24[%c27_398, %c0_399], %329 {strides = array<i32>} : memref<48x128xbf16, #tpu.memory_space<vmem>>, vector<4x128xbf16>,
    %331 = vector.extract_strided_slice %324 {offsets = [19, 0], sizes = [4, 128], strides = [1, 1]} : vector<24x128xbf16> to vector<4x128xbf16>
    %c33_400 = arith.constant 33 : index
    %c0_401 = arith.constant 0 : index
    %332 = vector.load %arg24[%c33_400, %c0_401] : memref<48x128xbf16, #tpu.memory_space<vmem>>, vector<4x128xbf16>
    tpu.vector_store %arg24[%c33_400, %c0_401], %331 {strides = array<i32>} : memref<48x128xbf16, #tpu.memory_space<vmem>>, vector<4x128xbf16>,
    %c5_i32_402 = arith.constant 5 : i32
    %c5_i32_403 = arith.constant 5 : i32
    %c5_i32_404 = arith.constant 5 : i32
    %c0_i32_405 = arith.constant 0 : i32
    %c0_i32_406 = arith.constant 0 : i32
    %333 = tpu.memref_slice %arg21[%c5_i32_402, %c0_i32_405, %c0_i32_406] : memref<6x1152x128xbf16, #tpu.memory_space<any>> -> memref<1x1152x128xbf16, #tpu.memory_space<any>>
    %334 = tpu.memref_squeeze %333 : memref<1x1152x128xbf16, #tpu.memory_space<any>> -> memref<1152x128xbf16, #tpu.memory_space<any>>
    %c0_i32_407 = arith.constant 0 : i32
    %c0_i32_408 = arith.constant 0 : i32
    %335 = tpu.memref_slice %arg26[%c5_i32_403, %c0_i32_407, %c0_i32_408] : memref<6x1152x128xbf16, #tpu.memory_space<vmem>> -> memref<1x1152x128xbf16, #tpu.memory_space<vmem>>
    %336 = tpu.memref_squeeze %335 : memref<1x1152x128xbf16, #tpu.memory_space<vmem>> -> memref<1152x128xbf16, #tpu.memory_space<vmem>>
    %337 = tpu.memref_slice %arg27[%c5_i32_404] : memref<6x!tpu.dma_semaphore, #tpu.memory_space<semaphore_mem>> -> memref<1x!tpu.dma_semaphore, #tpu.memory_space<semaphore_mem>>
    %338 = tpu.memref_squeeze %337 : memref<1x!tpu.dma_semaphore, #tpu.memory_space<semaphore_mem>> -> memref<!tpu.dma_semaphore, #tpu.memory_space<semaphore_mem>>
    tpu.wait_dma2 semaphore(%338 : memref<!tpu.dma_semaphore, #tpu.memory_space<semaphore_mem>>) src(%334 : memref<1152x128xbf16, #tpu.memory_space<any>>) dst(%336 : memref<1152x128xbf16, #tpu.memory_space<vmem>>)
    %c5 = arith.constant 5 : index
    %c0_409 = arith.constant 0 : index
    %c0_410 = arith.constant 0 : index
    %339 = vector.load %arg26[%c5, %c0_409, %c0_410] : memref<6x1152x128xbf16, #tpu.memory_space<vmem>>, vector<1x1152x128xbf16>
    %340 = vector.shape_cast %339 : vector<1x1152x128xbf16> to vector<1152x128xbf16>
    %c0_411 = arith.constant 0 : index
    %c0_412 = arith.constant 0 : index
    %341 = vector.load %arg18[%c0_411, %c0_412] : memref<1x128xf32, #tpu.memory_space<vmem>>, vector<1x128xf32>
    %c7_413 = arith.constant 7 : index
    %c0_414 = arith.constant 0 : index
    %342 = vector.load %arg24[%c7_413, %c0_414] : memref<48x128xbf16, #tpu.memory_space<vmem>>, vector<24x128xbf16>
    %c0_415 = arith.constant 0 : index
    %c0_416 = arith.constant 0 : index
    %343 = vector.load %arg25[%c0_415, %c0_416] : memref<80x1152xbf16, #tpu.memory_space<vmem>>, vector<24x128xbf16>
    tpu.vector_store %arg25[%c0_415, %c0_416], %342 {strides = array<i32>} : memref<80x1152xbf16, #tpu.memory_space<vmem>>, vector<24x128xbf16>,
    %c8_417 = arith.constant 8 : index
    %c0_418 = arith.constant 0 : index
    %344 = vector.load %arg24[%c8_417, %c0_418] : memref<48x128xbf16, #tpu.memory_space<vmem>>, vector<24x128xbf16>
    %c0_419 = arith.constant 0 : index
    %c128_420 = arith.constant 128 : index
    %345 = vector.load %arg25[%c0_419, %c128_420] : memref<80x1152xbf16, #tpu.memory_space<vmem>>, vector<24x128xbf16>
    tpu.vector_store %arg25[%c0_419, %c128_420], %344 {strides = array<i32>} : memref<80x1152xbf16, #tpu.memory_space<vmem>>, vector<24x128xbf16>,
    %c9_421 = arith.constant 9 : index
    %c0_422 = arith.constant 0 : index
    %346 = vector.load %arg24[%c9_421, %c0_422] : memref<48x128xbf16, #tpu.memory_space<vmem>>, vector<24x128xbf16>
    %c0_423 = arith.constant 0 : index
    %c256_424 = arith.constant 256 : index
    %347 = vector.load %arg25[%c0_423, %c256_424] : memref<80x1152xbf16, #tpu.memory_space<vmem>>, vector<24x128xbf16>
    tpu.vector_store %arg25[%c0_423, %c256_424], %346 {strides = array<i32>} : memref<80x1152xbf16, #tpu.memory_space<vmem>>, vector<24x128xbf16>,
    %c13_425 = arith.constant 13 : index
    %c0_426 = arith.constant 0 : index
    %348 = vector.load %arg24[%c13_425, %c0_426] : memref<48x128xbf16, #tpu.memory_space<vmem>>, vector<24x128xbf16>
    %c0_427 = arith.constant 0 : index
    %c384_428 = arith.constant 384 : index
    %349 = vector.load %arg25[%c0_427, %c384_428] : memref<80x1152xbf16, #tpu.memory_space<vmem>>, vector<24x128xbf16>
    tpu.vector_store %arg25[%c0_427, %c384_428], %348 {strides = array<i32>} : memref<80x1152xbf16, #tpu.memory_space<vmem>>, vector<24x128xbf16>,
    %c14_429 = arith.constant 14 : index
    %c0_430 = arith.constant 0 : index
    %350 = vector.load %arg24[%c14_429, %c0_430] : memref<48x128xbf16, #tpu.memory_space<vmem>>, vector<24x128xbf16>
    %c0_431 = arith.constant 0 : index
    %c512_432 = arith.constant 512 : index
    %351 = vector.load %arg25[%c0_431, %c512_432] : memref<80x1152xbf16, #tpu.memory_space<vmem>>, vector<24x128xbf16>
    tpu.vector_store %arg25[%c0_431, %c512_432], %350 {strides = array<i32>} : memref<80x1152xbf16, #tpu.memory_space<vmem>>, vector<24x128xbf16>,
    %c15_433 = arith.constant 15 : index
    %c0_434 = arith.constant 0 : index
    %352 = vector.load %arg24[%c15_433, %c0_434] : memref<48x128xbf16, #tpu.memory_space<vmem>>, vector<24x128xbf16>
    %c0_435 = arith.constant 0 : index
    %c640_436 = arith.constant 640 : index
    %353 = vector.load %arg25[%c0_435, %c640_436] : memref<80x1152xbf16, #tpu.memory_space<vmem>>, vector<24x128xbf16>
    tpu.vector_store %arg25[%c0_435, %c640_436], %352 {strides = array<i32>} : memref<80x1152xbf16, #tpu.memory_space<vmem>>, vector<24x128xbf16>,
    %c19_437 = arith.constant 19 : index
    %c0_438 = arith.constant 0 : index
    %354 = vector.load %arg24[%c19_437, %c0_438] : memref<48x128xbf16, #tpu.memory_space<vmem>>, vector<24x128xbf16>
    %c0_439 = arith.constant 0 : index
    %c768_440 = arith.constant 768 : index
    %355 = vector.load %arg25[%c0_439, %c768_440] : memref<80x1152xbf16, #tpu.memory_space<vmem>>, vector<24x128xbf16>
    tpu.vector_store %arg25[%c0_439, %c768_440], %354 {strides = array<i32>} : memref<80x1152xbf16, #tpu.memory_space<vmem>>, vector<24x128xbf16>,
    %c20_441 = arith.constant 20 : index
    %c0_442 = arith.constant 0 : index
    %356 = vector.load %arg24[%c20_441, %c0_442] : memref<48x128xbf16, #tpu.memory_space<vmem>>, vector<24x128xbf16>
    %c0_443 = arith.constant 0 : index
    %c896_444 = arith.constant 896 : index
    %357 = vector.load %arg25[%c0_443, %c896_444] : memref<80x1152xbf16, #tpu.memory_space<vmem>>, vector<24x128xbf16>
    tpu.vector_store %arg25[%c0_443, %c896_444], %356 {strides = array<i32>} : memref<80x1152xbf16, #tpu.memory_space<vmem>>, vector<24x128xbf16>,
    %c21_445 = arith.constant 21 : index
    %c0_446 = arith.constant 0 : index
    %358 = vector.load %arg24[%c21_445, %c0_446] : memref<48x128xbf16, #tpu.memory_space<vmem>>, vector<24x128xbf16>
    %c0_447 = arith.constant 0 : index
    %c1024_448 = arith.constant 1024 : index
    %359 = vector.load %arg25[%c0_447, %c1024_448] : memref<80x1152xbf16, #tpu.memory_space<vmem>>, vector<24x128xbf16>
    tpu.vector_store %arg25[%c0_447, %c1024_448], %358 {strides = array<i32>} : memref<80x1152xbf16, #tpu.memory_space<vmem>>, vector<24x128xbf16>,
    %c0_449 = arith.constant 0 : index
    %c0_450 = arith.constant 0 : index
    %360 = vector.load %arg25[%c0_449, %c0_450] : memref<80x1152xbf16, #tpu.memory_space<vmem>>, vector<24x1152xbf16>
    %cst_451 = arith.constant dense<0.000000e+00> : vector<24x128xf32>
    %361 = tpu.matmul %360, %340, %cst_451 {dimension_numbers = #tpu.dot_dimension_numbers<[1], [0], [0], [1], [0, 0, 1, 1], [], []>} : vector<24x1152xbf16>, vector<1152x128xbf16>, vector<24x128xf32> -> vector<24x128xf32>
    %362 = vector.broadcast %341 : vector<1x128xf32> to vector<24x128xf32>
    %363 = arith.addf %361, %362 : vector<24x128xf32>
    %364 = arith.addf %279, %363 : vector<24x128xf32>
    %365 = tpu.iota {dimensions = array<i32: 0>} : vector<24x1xi32>
    %c6_i32 = arith.constant 6 : i32
    %c0_i32_452 = arith.constant 0 : i32
    %366 = arith.cmpi eq, %c6_i32, %c0_i32_452 : i32
    %c1_i32_453 = arith.constant 1 : i32
    %367 = arith.select %366, %c1_i32_453, %c6_i32 : i32
    %368 = vector.broadcast %367 : i32 to vector<24x1xi32>
    %369 = arith.remsi %365, %368 : vector<24x1xi32>
    %c0_i32_454 = arith.constant 0 : i32
    %370 = vector.broadcast %c0_i32_454 : i32 to vector<24x1xi32>
    %371 = arith.cmpi ne, %369, %370 : vector<24x1xi32>
    %c0_i32_455 = arith.constant 0 : i32
    %372 = vector.broadcast %c0_i32_455 : i32 to vector<24x1xi32>
    %373 = arith.cmpi slt, %369, %372 : vector<24x1xi32>
    %c0_i32_456 = arith.constant 0 : i32
    %374 = arith.cmpi slt, %367, %c0_i32_456 : i32
    %375 = vector.broadcast %374 : i1 to vector<24x1xi1>
    %376 = vector.broadcast %375 : vector<24x1xi1> to vector<24x1xi1>
    %377 = arith.xori %373, %376 : vector<24x1xi1>
    %378 = arith.andi %377, %371 : vector<24x1xi1>
    %379 = vector.broadcast %367 : i32 to vector<24x1xi32>
    %380 = arith.addi %369, %379 : vector<24x1xi32>
    %381 = arith.select %378, %380, %369 : vector<24x1xi1>, vector<24x1xi32>
    %c1_i32_457 = arith.constant 1 : i32
    %382 = vector.broadcast %c1_i32_457 : i32 to vector<24x1xi32>
    %383 = arith.cmpi sge, %381, %382 : vector<24x1xi32>
    %c4_i32_458 = arith.constant 4 : i32
    %384 = vector.broadcast %c4_i32_458 : i32 to vector<24x1xi32>
    %385 = arith.cmpi sle, %381, %384 : vector<24x1xi32>
    %386 = arith.andi %383, %385 : vector<24x1xi1>
    %cst_459 = arith.constant 0.000000e+00 : f32
    %387 = vector.broadcast %cst_459 : f32 to vector<24x128xf32>
    %388 = arith.maximumf %364, %387 : vector<24x128xf32>
    %cst_460 = arith.constant 0.000000e+00 : f32
    %389 = vector.shape_cast %386 : vector<24x1xi1> to vector<24x1xi1>
    %390 = vector.broadcast %389 : vector<24x1xi1> to vector<24x128xi1>
    %391 = vector.broadcast %cst_460 : f32 to vector<24x128xf32>
    %392 = arith.select %390, %388, %391 : vector<24x128xi1>, vector<24x128xf32>
    %cst_461 = arith.constant dense<0.000000e+00> : vector<128xf32>
    %393 = vector.multi_reduction <add>, %392, %cst_461 [0] : vector<24x128xf32> to vector<128xf32>
    %394 = vector.shape_cast %393 : vector<128xf32> to vector<1x128xf32>
    %c0_462 = arith.constant 0 : index
    %c0_463 = arith.constant 0 : index
    %395 = vector.load %arg19[%c0_462, %c0_463] : memref<1x128xf32, #tpu.memory_space<vmem>>, vector<1x128xf32>
    %396 = arith.mulf %394, %395 : vector<1x128xf32>
    %cst_464 = arith.constant dense<0.000000e+00> : vector<1xf32>
    %397 = vector.multi_reduction <add>, %396, %cst_464 [1] : vector<1x128xf32> to vector<1xf32>
    %398 = vector.shape_cast %397 : vector<1xf32> to vector<1x1xf32>
    %c0_465 = arith.constant 0 : index
    %c0_466 = arith.constant 0 : index
    %399 = vector.load %arg20[%c0_465, %c0_466] : memref<1x1xf32, #tpu.memory_space<vmem>>, vector<1x1xf32>
    %400 = arith.addf %398, %399 : vector<1x1xf32>
    %c0_467 = arith.constant 0 : index
    %c0_468 = arith.constant 0 : index
    %c0_469 = arith.constant 0 : index
    %401 = vector.load %arg22[%c0_467, %c0_468, %c0_469] : memref<1x1x1xf32, #tpu.memory_space<vmem>>, vector<1x1x1xf32>
    %402 = vector.shape_cast %401 : vector<1x1x1xf32> to vector<1x1xf32>
    %403 = vector.shape_cast %400 : vector<1x1xf32> to vector<1x1x1xf32>
    tpu.vector_store %arg22[%c0_467, %c0_468, %c0_469], %403 {strides = array<i32>} : memref<1x1x1xf32, #tpu.memory_space<vmem>>, vector<1x1x1xf32>,
    return
  }
  func.func @transform_0(%arg0: i32) -> (i32, i32, i32) {
    %c0_i32 = arith.constant 0 : i32
    %c0_i32_0 = arith.constant 0 : i32
    %c0_i32_1 = arith.constant 0 : i32
    return %arg0, %c0_i32, %c0_i32_0 : i32, i32, i32
  }
  func.func @transform_1(%arg0: i32) -> (i32, i32, i32) {
    %c0_i32 = arith.constant 0 : i32
    %c0_i32_0 = arith.constant 0 : i32
    %c0_i32_1 = arith.constant 0 : i32
    return %arg0, %c0_i32, %c0_i32_0 : i32, i32, i32
  }
  func.func @transform_2(%arg0: i32) -> (i32, i32) {
    %c0_i32 = arith.constant 0 : i32
    %c0_i32_0 = arith.constant 0 : i32
    %c0_i32_1 = arith.constant 0 : i32
    return %c0_i32, %c0_i32_0 : i32, i32
  }
  func.func @transform_3(%arg0: i32) -> (i32, i32) {
    %c0_i32 = arith.constant 0 : i32
    %c0_i32_0 = arith.constant 0 : i32
    %c0_i32_1 = arith.constant 0 : i32
    return %c0_i32, %c0_i32_0 : i32, i32
  }
  func.func @transform_4(%arg0: i32) -> (i32, i32) {
    %c0_i32 = arith.constant 0 : i32
    %c0_i32_0 = arith.constant 0 : i32
    %c0_i32_1 = arith.constant 0 : i32
    return %c0_i32, %c0_i32_0 : i32, i32
  }
  func.func @transform_5(%arg0: i32) -> (i32, i32) {
    %c0_i32 = arith.constant 0 : i32
    %c0_i32_0 = arith.constant 0 : i32
    %c0_i32_1 = arith.constant 0 : i32
    return %c0_i32, %c0_i32_0 : i32, i32
  }
  func.func @transform_6(%arg0: i32) -> (i32, i32) {
    %c0_i32 = arith.constant 0 : i32
    %c0_i32_0 = arith.constant 0 : i32
    %c0_i32_1 = arith.constant 0 : i32
    return %c0_i32, %c0_i32_0 : i32, i32
  }
  func.func @transform_7(%arg0: i32) -> (i32, i32) {
    %c0_i32 = arith.constant 0 : i32
    %c0_i32_0 = arith.constant 0 : i32
    %c0_i32_1 = arith.constant 0 : i32
    return %c0_i32, %c0_i32_0 : i32, i32
  }
  func.func @transform_8(%arg0: i32) -> (i32, i32) {
    %c0_i32 = arith.constant 0 : i32
    %c0_i32_0 = arith.constant 0 : i32
    %c0_i32_1 = arith.constant 0 : i32
    return %c0_i32, %c0_i32_0 : i32, i32
  }
  func.func @transform_9(%arg0: i32) -> (i32, i32) {
    %c0_i32 = arith.constant 0 : i32
    %c0_i32_0 = arith.constant 0 : i32
    %c0_i32_1 = arith.constant 0 : i32
    return %c0_i32, %c0_i32_0 : i32, i32
  }
  func.func @transform_10(%arg0: i32) -> (i32, i32) {
    %c0_i32 = arith.constant 0 : i32
    %c0_i32_0 = arith.constant 0 : i32
    %c0_i32_1 = arith.constant 0 : i32
    return %c0_i32, %c0_i32_0 : i32, i32
  }
  func.func @transform_11(%arg0: i32) -> (i32, i32) {
    %c0_i32 = arith.constant 0 : i32
    %c0_i32_0 = arith.constant 0 : i32
    %c0_i32_1 = arith.constant 0 : i32
    return %c0_i32, %c0_i32_0 : i32, i32
  }
  func.func @transform_12(%arg0: i32) -> (i32, i32) {
    %c0_i32 = arith.constant 0 : i32
    %c0_i32_0 = arith.constant 0 : i32
    %c0_i32_1 = arith.constant 0 : i32
    return %c0_i32, %c0_i32_0 : i32, i32
  }
  func.func @transform_13(%arg0: i32) -> (i32, i32) {
    %c0_i32 = arith.constant 0 : i32
    %c0_i32_0 = arith.constant 0 : i32
    %c0_i32_1 = arith.constant 0 : i32
    return %c0_i32, %c0_i32_0 : i32, i32
  }
  func.func @transform_14(%arg0: i32) -> (i32, i32) {
    %c0_i32 = arith.constant 0 : i32
    %c0_i32_0 = arith.constant 0 : i32
    %c0_i32_1 = arith.constant 0 : i32
    return %c0_i32, %c0_i32_0 : i32, i32
  }
  func.func @transform_15(%arg0: i32) -> (i32, i32) {
    %c0_i32 = arith.constant 0 : i32
    %c0_i32_0 = arith.constant 0 : i32
    %c0_i32_1 = arith.constant 0 : i32
    return %c0_i32, %c0_i32_0 : i32, i32
  }
  func.func @transform_16(%arg0: i32) -> (i32, i32) {
    %c0_i32 = arith.constant 0 : i32
    %c0_i32_0 = arith.constant 0 : i32
    %c0_i32_1 = arith.constant 0 : i32
    return %c0_i32, %c0_i32_0 : i32, i32
  }
  func.func @transform_17(%arg0: i32) -> (i32, i32) {
    %c0_i32 = arith.constant 0 : i32
    %c0_i32_0 = arith.constant 0 : i32
    %c0_i32_1 = arith.constant 0 : i32
    return %c0_i32, %c0_i32_0 : i32, i32
  }
  func.func @transform_18(%arg0: i32) -> (i32, i32) {
    %c0_i32 = arith.constant 0 : i32
    %c0_i32_0 = arith.constant 0 : i32
    %c0_i32_1 = arith.constant 0 : i32
    return %c0_i32, %c0_i32_0 : i32, i32
  }
  func.func @transform_19(%arg0: i32) -> (i32, i32) {
    %c0_i32 = arith.constant 0 : i32
    %c0_i32_0 = arith.constant 0 : i32
    %c0_i32_1 = arith.constant 0 : i32
    return %c0_i32, %c0_i32_0 : i32, i32
  }
  func.func @transform_21(%arg0: i32) -> (i32, i32, i32) {
    %c0_i32 = arith.constant 0 : i32
    %c0_i32_0 = arith.constant 0 : i32
    %c0_i32_1 = arith.constant 0 : i32
    return %arg0, %c0_i32, %c0_i32_0 : i32, i32, i32
  }
}

</mosaic_0001>

<bundles_post_ra>
// kernel: discriminator_pallas.1
= control target key start
LH: loop header
LB: loop body
LE: loop exit
PB: predicated region body
PF: predicated region fallthrough
CT: control target
= control target key end

     0   :  { %s15068_s0 = inlined_call_operand.vmem [shape: f32[2,256,27], index: 0, kind: input, shape index: {}]   ;;  %s15069_s1 = inlined_call_operand.vmem [shape: f32[2,256,3], index: 1, kind: input, shape index: {}]   ;;  %s15070_s2 = inlined_call_operand.vmem [shape: bf16[80,256], index: 2, kind: input, shape index: {}]   ;;  %s15071_s3 = inlined_call_operand.vmem [shape: bf16[24,80], index: 3, kind: input, shape index: {}]   ;;  %s15072_s4 = inlined_call_operand.vmem [shape: bf16[27,128], index: 4, kind: input, shape index: {}]   ;;  %s15073_s5 = inlined_call_operand.vmem [shape: f32[1,128], index: 5, kind: input, shape index: {}]   ;;  %s15074_s6 = inlined_call_operand.hbm [shape: bf16[1152,128], index: 6, kind: input, shape index: {}]   ;;  %s15075_s7 = inlined_call_operand.vmem [shape: f32[1,128], index: 7, kind: input, shape index: {}]   ;;  %s15076_s8 = inlined_call_operand.vmem [shape: bf16[3,128], index: 8, kind: input, shape index: {}]   ;;  %s15077_s9 = inlined_call_operand.vmem [shape: f32[1,128], index: 9, kind: input, shape index: {}]   ;;  %s15078_s10 = inlined_call_operand.vmem [shape: f32[1,128], index: 10, kind: input, shape index: {}]   ;;  %s15079_s11 = inlined_call_operand.vmem [shape: f32[1,128], index: 11, kind: input, shape index: {}]   ;;  %s15080_s12 = inlined_call_operand.vmem [shape: bf16[128,128], index: 12, kind: input, shape index: {}]   ;;  %s15081_s13 = inlined_call_operand.vmem [shape: f32[1,128], index: 13, kind: input, shape index: {}]   ;;  %s15082_s14 = inlined_call_operand.vmem [shape: f32[1,128], index: 14, kind: input, shape index: {}]   ;;  %s15083_s15 = inlined_call_operand.vmem [shape: f32[1,128], index: 15, kind: input, shape index: {}]   ;;  %s15084_s16 = inlined_call_operand.vmem [shape: f32[1,128], index: 16, kind: input, shape index: {}]   ;;  %s15085_s17 = inlined_call_operand.vmem [shape: f32[1,128], index: 17, kind: input, shape index: {}]   ;;  %s15086_s18 = inlined_call_operand.vmem [shape: f32[1,128], index: 18, kind: input, shape index: {}]   ;;  %s15087_s19 = inlined_call_operand.<no memory space> [shape: f32[1,1], index: 19, kind: input, shape index: {}]   ;;  %s15088_s20 = inlined_call_operand.vmem [shape: bf16[6,1152,128], index: 20, kind: input, shape index: {}]   ;;  %s15089_s21 = inlined_call_operand.vmem [shape: f32[2,1,1], index: 21, kind: output, shape index: {}]  }
   0x1   :  { %15158 = sst [smem:[#allocation454_spill]] %s15068_s0  ;;  %v26_v0 = vstv %s15087_s19 }
   0x2   :  { %15159 = sst [smem:[#allocation455_spill]] %s15069_s1  ;;  %27 = vst [vmem:[#allocation7] sm:$0x1] %v26_v0 }
   0x3   :  { %15160 = sst [smem:[#allocation456_spill]] %s15070_s2 }
   0x4   :  { %15161 = sst [smem:[#allocation457_spill]] %s15071_s3 }
   0x5   :  { %15162 = sst [smem:[#allocation458_spill]] %s15072_s4 }
   0x6   :  { %15163 = sst [smem:[#allocation459_spill]] %s15073_s5 }
   0x7   :  { %15164 = sst [smem:[#allocation460_spill]] %s15074_s6 }
   0x8   :  { %28 = vsyncpa [#allocation9], 0  ;;  %s10896_s26 = smov 0  }
   0x9 LB: > { %15165 = sst [smem:[#allocation23_spill]] %s10774_s26  ;;  %s10902_s27 = sadd.s32 4294967295, %s10774_s26   ;;  %s10774_s26 = sphi %s10896_s26, %s34_s26  }
   0xa   : > { %p8580_p0 = scmp.ge.s32.totalorder %s10774_s26, 1  ;;  %p495_p1 = scmp.lt.s32.totalorder %s10774_s26, 3 }
   0xb   : > { %s10776_s3 = smov [#allocation8]   ;;  %p15093_p3 = scmp.eq.s32.totalorder %s10902_s27, 0 }
   0xc   : > { %s519_s19 = sshll.u32 %s10776_s3, 4  ;;  %p10906_p2 = pnand %p8580_p0, %p495_p1  ;;  %s520_s19 = int_to_ptr.vmem [resolvable:$true] %s519_s19 }
   0xd   : > { %s15168_s6 = sld [smem:[#allocation460_spill]] }
   0xe   : > { %s15166_s28 = scalar_select %p10906_p2, 1, 0 }
   0xf   : > { %p10587_p4 = pneg %p10906_p2 }
  0x11   : > { %p10915_p5 = pnand %p15093_p3, %p10587_p4 }
  0x13   : > { %s10724_s30 = scalar_lea.hbm %s15168_s6, 9216  ;;  %p10726_p7 = pneg %p10915_p5 }
  0x14   : > { %p10725_p6 = scmp.ne.s32.totalorder %s15168_s6, %s10724_s30  ;;  %p10731_p10 = scmp.lt.u32.totalorder %s10724_s30, %s15168_s6 }
  0x16   : > { %p10727_p8 = pnand %p10726_p7, %p10725_p6 }
  0x18   : > { %p10728_p9 = pneg %p10727_p8 }
  0x1a   : > { %p10733_p11 = pnand %p10731_p10, %p10728_p9 }
  0x1c   : > { %10736 = shalt.err (!%p10733_p11)
}
  0x1d   : > { %s10737_s24 = scalar_lea.vmem %s520_s19, 9216  ;;  %p10745_p1 = scmp.lt.s32.totalorder %s520_s19, %s520_s19 }
  0x1e   : > { %p10738_p12 = scmp.ne.s32.totalorder %s520_s19, %s10737_s24  ;;  %p10746_p4 = scmp.lt.s32.totalorder %s10737_s24, %s10737_s24 }
  0x20   : > { %p10740_p13 = pnand %p10738_p12, %p10726_p7  ;;  %p10747_p3 = por %p10746_p4, %p10745_p1 }
  0x22   : > { %p10741_p0 = pneg %p10740_p13 }
  0x24   : > { %p10748_p2 = pnand %p10747_p3, %p10741_p0 }
  0x26   : > { %10751 = shalt.err (!%p10748_p2)
}
  0x27   : > { %s10777_s2 = smov 64   ;;  %s10778_s25 = smov 4  }
  0x28   : > { %10590 = dma.hbm_to_vmem [thread:$0]  (!%p10915_p5), %s15168_s6, 9216, %s520_s19, [#allocation9], %s10777_s2, %s10777_s2, %s10778_s25  }
  0x29   : > { %p15169_p6 = scmp.ne.s32.totalorder %s15166_s28, 0 }
  0x2b   : > { %590 = sbr.rel (%p15169_p6) target bundleno = 3947 (0xf6b), region = 100 }
  0x32   : > { %p15170_p8 = scmp.eq.s32.totalorder %s10902_s27, 0 }
  0x34   : > { %10757 = dma.done.wait (%p15170_p8), [#allocation9], 9216   ;;  %p15171_p7 = pmov %p15170_p8 }
  0x35   : > { %p651_p2 = scmp.lt.s32.totalorder %s10902_s27, 1  ;;  %s15172_s22 = sld [smem:[#allocation454_spill]]  ;;  %v10963_v1 = vld [vmem:[%s15088_s20] sm:$0xff]  ;;  %v10968_v2 = vld [vmem:[%s15088_s20 + $0x8] sm:$0xff]  ;;  %v10973_v3 = vld [vmem:[%s15088_s20 + $0x10] sm:$0xff] }
  0x36   : > { %10759 = vsyncadd (%p15171_p7), [#allocation9], 4294958080  ;;  %s15173_s2 = sld [smem:[#allocation455_spill]]  ;;  %15174 = vst [vmem:[#allocation24_spill] sm:$0xff] %v10973_v3  ;;  %v10978_v4 = vld [vmem:[%s15088_s20 + $0x18] sm:$0xff]  ;;  %v10983_v5 = vld [vmem:[%s15088_s20 + $0x20] sm:$0xff] }
  0x37   : > { %s16097_s27 = smov (!%p651_p2, %s10902_s27), 1  ;;  %15175 = vst [vmem:[#allocation25_spill] sm:$0xff] %v10978_v4  ;;  %15176 = vst [vmem:[#allocation26_spill] sm:$0xff] %v10983_v5  ;;  %v10988_v6 = vld [vmem:[%s15088_s20 + $0x28] sm:$0xff]  ;;  %v10993_v7 = vld [vmem:[%s15088_s20 + $0x30] sm:$0xff] }
  0x38   : > { %s9103_s29 = sshll.u32 %s16097_s27, 8  ;;  %s663_s19 = scalar_lea.vmem %s15089_s21, %s16097_s27  ;;  %15177 = vst [vmem:[#allocation27_spill] sm:$0xff] %v10988_v6  ;;  %15178 = vst [vmem:[#allocation28_spill] sm:$0xff] %v10993_v7  ;;  %v10998_v8 = vld [vmem:[%s15088_s20 + $0x38] sm:$0xff]  ;;  %v11003_v9 = vld [vmem:[%s15088_s20 + $0x40] sm:$0xff] }
  0x39   : > { %15179 = vst [vmem:[#allocation29_spill] sm:$0xff] %v10998_v8  ;;  %v11008_v10 = vld [vmem:[%s15088_s20 + $0x48] sm:$0xff]  ;;  %v11013_v11 = vld [vmem:[%s15088_s20 + $0x50] sm:$0xff]  ;;  %v11018_v12 = vld [vmem:[%s15088_s20 + $0x58] sm:$0xff] }
  0x3a   : > { %15180 = vst [vmem:[#allocation30_spill] sm:$0xff] %v11013_v11  ;;  %15181 = vst [vmem:[#allocation31_spill] sm:$0xff] %v11018_v12  ;;  %v11023_v13 = vld [vmem:[%s15088_s20 + $0x60] sm:$0xff]  ;;  %v11028_v14 = vld [vmem:[%s15088_s20 + $0x68] sm:$0xff] }
  0x3b   : > { %s10953_s23 = scalar_lea.vmem %s15172_s22, %s9103_s29  ;;  %15182 = vst [vmem:[#allocation32_spill] sm:$0xff] %v11023_v13  ;;  %15183 = vst [vmem:[#allocation33_spill] sm:$0xff] %v11028_v14  ;;  %v11033_v15 = vld [vmem:[%s15088_s20 + $0x70] sm:$0xff]  ;;  %v11038_v16 = vld [vmem:[%s15088_s20 + $0x78] sm:$0xff] }
  0x3c   : > { %s10958_s25 = scalar_lea.vmem %s15173_s2, %s9103_s29  ;;  %15184 = vst [vmem:[#allocation34_spill] sm:$0xff] %v11033_v15  ;;  %15185 = vst [vmem:[#allocation35_spill] sm:$0xff] %v11038_v16  ;;  %v11043_v17 = vld [vmem:[%s15088_s20 + $0x80] sm:$0xff]  ;;  %v11048_v18 = vld [vmem:[%s15088_s20 + $0x88] sm:$0xff] }
  0x3d   : > { %15186 = vst [vmem:[#allocation36_spill] sm:$0xff] %v11048_v18  ;;  %v11053_v19 = vld [vmem:[%s15088_s20 + $0x90] sm:$0xff]  ;;  %v11058_v20 = vld [vmem:[%s15088_s20 + $0x98] sm:$0xff]  ;;  %v11063_v21 = vld [vmem:[%s15088_s20 + $0xa0] sm:$0xff] }
  0x3e   : > { %15187 = vst [vmem:[#allocation37_spill] sm:$0xff] %v11053_v19  ;;  %15188 = vst [vmem:[#allocation38_spill] sm:$0xff] %v11058_v20  ;;  %v11068_v22 = vld [vmem:[%s15088_s20 + $0xa8] sm:$0xff]  ;;  %v11073_v23 = vld [vmem:[%s15088_s20 + $0xb0] sm:$0xff] }
  0x3f   : > { %15189 = vst [vmem:[#allocation39_spill] sm:$0xff] %v11063_v21  ;;  %15190 = vst [vmem:[#allocation40_spill] sm:$0xff] %v11068_v22  ;;  %v11078_v24 = vld [vmem:[%s15088_s20 + $0xb8] sm:$0xff]  ;;  %v11083_v25 = vld [vmem:[%s15088_s20 + $0xc0] sm:$0xff] }
  0x40   : > { %15191 = vst [vmem:[#allocation41_spill] sm:$0xff] %v11073_v23  ;;  %15192 = vst [vmem:[#allocation42_spill] sm:$0xff] %v11078_v24  ;;  %v11088_v26 = vld [vmem:[%s15088_s20 + $0xc8] sm:$0xff]  ;;  %v11093_v27 = vld [vmem:[%s15088_s20 + $0xd0] sm:$0xff] }
  0x41   : > { %15193 = vst [vmem:[#allocation43_spill] sm:$0xff] %v11093_v27  ;;  %v11098_v28 = vld [vmem:[%s15088_s20 + $0xd8] sm:$0xff]  ;;  %v11103_v29 = vld [vmem:[%s15088_s20 + $0xe0] sm:$0xff]  ;;  %v11108_v30 = vld [vmem:[%s15088_s20 + $0xe8] sm:$0xff] }
  0x42   : > { %15194 = vst [vmem:[#allocation44_spill] sm:$0xff] %v11098_v28  ;;  %15195 = vst [vmem:[#allocation45_spill] sm:$0xff] %v11103_v29  ;;  %v11113_v31 = vld [vmem:[%s15088_s20 + $0xf0] sm:$0xff]  ;;  %v11118_v32 = vld [vmem:[%s15088_s20 + $0xf8] sm:$0xff] }
  0x43   : > { %15196 = vst [vmem:[#allocation46_spill] sm:$0xff] %v11108_v30  ;;  %15197 = vst [vmem:[#allocation47_spill] sm:$0xff] %v11113_v31  ;;  %v11123_v33 = vld [vmem:[%s15088_s20 + $0x100] sm:$0xff]  ;;  %v11128_v34 = vld [vmem:[%s15088_s20 + $0x108] sm:$0xff] }
  0x44   : > { %15198 = vst [vmem:[#allocation48_spill] sm:$0xff] %v11118_v32  ;;  %15199 = vst [vmem:[#allocation49_spill] sm:$0xff] %v11123_v33  ;;  %v11133_v35 = vld [vmem:[%s15088_s20 + $0x110] sm:$0xff]  ;;  %v11138_v36 = vld [vmem:[%s15088_s20 + $0x118] sm:$0xff] }
  0x45   : > { %15200 = vst [vmem:[#allocation50_spill] sm:$0xff] %v11128_v34  ;;  %15201 = vst [vmem:[#allocation51_spill] sm:$0xff] %v11133_v35  ;;  %v11143_v37 = vld [vmem:[%s15088_s20 + $0x120] sm:$0xff]  ;;  %v11148_v38 = vld [vmem:[%s15088_s20 + $0x128] sm:$0xff] }
  0x46   : > { %15202 = vst [vmem:[#allocation52_spill] sm:$0xff] %v11138_v36  ;;  %15203 = vst [vmem:[#allocation53_spill] sm:$0xff] %v11143_v37  ;;  %v11153_v39 = vld [vmem:[%s15088_s20 + $0x130] sm:$0xff]  ;;  %v11158_v40 = vld [vmem:[%s15088_s20 + $0x138] sm:$0xff] }
  0x47   : > { %15204 = vst [vmem:[#allocation54_spill] sm:$0xff] %v11148_v38  ;;  %15205 = vst [vmem:[#allocation55_spill] sm:$0xff] %v11153_v39  ;;  %v11163_v41 = vld [vmem:[%s15088_s20 + $0x140] sm:$0xff]  ;;  %v11168_v42 = vld [vmem:[%s15088_s20 + $0x148] sm:$0xff] }
  0x48   : > { %15206 = vst [vmem:[#allocation56_spill] sm:$0xff] %v11158_v40  ;;  %15207 = vst [vmem:[#allocation57_spill] sm:$0xff] %v11163_v41  ;;  %v11173_v43 = vld [vmem:[%s15088_s20 + $0x150] sm:$0xff]  ;;  %v11178_v44 = vld [vmem:[%s15088_s20 + $0x158] sm:$0xff] }
  0x49   : > { %15208 = vst [vmem:[#allocation58_spill] sm:$0xff] %v11168_v42  ;;  %15209 = vst [vmem:[#allocation59_spill] sm:$0xff] %v11173_v43  ;;  %v11183_v45 = vld [vmem:[%s15088_s20 + $0x160] sm:$0xff]  ;;  %v11188_v46 = vld [vmem:[%s15088_s20 + $0x168] sm:$0xff] }
  0x4a   : > { %15210 = vst [vmem:[#allocation60_spill] sm:$0xff] %v11178_v44  ;;  %15211 = vst [vmem:[#allocation61_spill] sm:$0xff] %v11183_v45  ;;  %v11193_v47 = vld [vmem:[%s15088_s20 + $0x170] sm:$0xff]  ;;  %v11198_v48 = vld [vmem:[%s15088_s20 + $0x178] sm:$0xff] }
  0x4b   : > { %15212 = vst [vmem:[#allocation62_spill] sm:$0xff] %v11188_v46  ;;  %15213 = vst [vmem:[#allocation63_spill] sm:$0xff] %v11193_v47  ;;  %v11203_v49 = vld [vmem:[%s15088_s20 + $0x180] sm:$0xff]  ;;  %v11208_v50 = vld [vmem:[%s15088_s20 + $0x188] sm:$0xff] }
  0x4c   : > { %15214 = vst [vmem:[#allocation64_spill] sm:$0xff] %v11198_v48  ;;  %15215 = vst [vmem:[#allocation65_spill] sm:$0xff] %v11203_v49  ;;  %v11213_v51 = vld [vmem:[%s15088_s20 + $0x190] sm:$0xff]  ;;  %v11218_v52 = vld [vmem:[%s15088_s20 + $0x198] sm:$0xff] }
  0x4d   : > { %15216 = vst [vmem:[#allocation66_spill] sm:$0xff] %v11208_v50  ;;  %15217 = vst [vmem:[#allocation67_spill] sm:$0xff] %v11213_v51  ;;  %v11223_v53 = vld [vmem:[%s15088_s20 + $0x1a0] sm:$0xff]  ;;  %v11228_v54 = vld [vmem:[%s15088_s20 + $0x1a8] sm:$0xff] }
  0x4e   : > { %15218 = vst [vmem:[#allocation68_spill] sm:$0xff] %v11218_v52  ;;  %15219 = vst [vmem:[#allocation69_spill] sm:$0xff] %v11223_v53  ;;  %v11233_v55 = vld [vmem:[%s15088_s20 + $0x1b0] sm:$0xff]  ;;  %v11238_v56 = vld [vmem:[%s15088_s20 + $0x1b8] sm:$0xff] }
  0x4f   : > { %15220 = vst [vmem:[#allocation70_spill] sm:$0xff] %v11228_v54  ;;  %15221 = vst [vmem:[#allocation71_spill] sm:$0xff] %v11233_v55  ;;  %v11243_v57 = vld [vmem:[%s15088_s20 + $0x1c0] sm:$0xff]  ;;  %v11248_v58 = vld [vmem:[%s15088_s20 + $0x1c8] sm:$0xff] }
  0x50   : > { %15222 = vst [vmem:[#allocation72_spill] sm:$0xff] %v11238_v56  ;;  %15223 = vst [vmem:[#allocation73_spill] sm:$0xff] %v11243_v57  ;;  %v11253_v59 = vld [vmem:[%s15088_s20 + $0x1d0] sm:$0xff]  ;;  %v11258_v60 = vld [vmem:[%s15088_s20 + $0x1d8] sm:$0xff] }
  0x51   : > { %15224 = vst [vmem:[#allocation74_spill] sm:$0xff] %v11248_v58  ;;  %15225 = vst [vmem:[#allocation75_spill] sm:$0xff] %v11253_v59  ;;  %v11263_v61 = vld [vmem:[%s15088_s20 + $0x1e0] sm:$0xff]  ;;  %v11268_v62 = vld [vmem:[%s15088_s20 + $0x1e8] sm:$0xff] }
  0x52   : > { %15226 = vst [vmem:[#allocation76_spill] sm:$0xff] %v11258_v60  ;;  %15227 = vst [vmem:[#allocation77_spill] sm:$0xff] %v11263_v61  ;;  %v11273_v63 = vld [vmem:[%s15088_s20 + $0x1f0] sm:$0xff]  ;;  %v11278_v0 = vld [vmem:[%s15088_s20 + $0x1f8] sm:$0xff] }
  0x53   : > { %15228 = vst [vmem:[#allocation78_spill] sm:$0xff] %v11268_v62  ;;  %15229 = vst [vmem:[#allocation79_spill] sm:$0xff] %v11273_v63  ;;  %v11283_v56 = vld [vmem:[%s15088_s20 + $0x200] sm:$0xff]  ;;  %v11288_v40 = vld [vmem:[%s15088_s20 + $0x208] sm:$0xff] }
  0x54   : > { %15230 = vst [vmem:[#allocation80_spill] sm:$0xff] %v11278_v0  ;;  %15231 = vst [vmem:[#allocation81_spill] sm:$0xff] %v11283_v56  ;;  %v11293_v48 = vld [vmem:[%s15088_s20 + $0x210] sm:$0xff]  ;;  %v11298_v55 = vld [vmem:[%s15088_s20 + $0x218] sm:$0xff] }
  0x55   : > { %15232 = vst [vmem:[#allocation82_spill] sm:$0xff] %v11288_v40  ;;  %15233 = vst [vmem:[#allocation83_spill] sm:$0xff] %v11293_v48  ;;  %v11303_v0 = vld [vmem:[%s15088_s20 + $0x220] sm:$0xff]  ;;  %v11308_v56 = vld [vmem:[%s15088_s20 + $0x228] sm:$0xff] }
  0x56   : > { %15234 = vst [vmem:[#allocation84_spill] sm:$0xff] %v11298_v55  ;;  %15235 = vst [vmem:[#allocation85_spill] sm:$0xff] %v11303_v0  ;;  %v11313_v40 = vld [vmem:[%s15088_s20 + $0x230] sm:$0xff]  ;;  %v11318_v48 = vld [vmem:[%s15088_s20 + $0x238] sm:$0xff] }
  0x57   : > { %15236 = vst [vmem:[#allocation86_spill] sm:$0xff] %v11308_v56  ;;  %15237 = vst [vmem:[#allocation87_spill] sm:$0xff] %v11313_v40 }
  0x58   : > { %15238 = vst [vmem:[#allocation88_spill] sm:$0xff] %v11318_v48 }
  0x59   : > { %848 = vsyncadd [#allocation6], 9216  ;;  %v11323_v0 = vld [vmem:[%s15088_s20 + $0x240] sm:$0xff]  ;;  %v11328_v56 = vld [vmem:[%s15088_s20 + $0x248] sm:$0xff] }
  0x5a   : > { %15239 = vst [vmem:[#allocation89_spill] sm:$0xff] %v11323_v0  ;;  %15240 = vst [vmem:[#allocation90_spill] sm:$0xff] %v11328_v56  ;;  %v11333_v40 = vld [vmem:[%s15088_s20 + $0x250] sm:$0xff]  ;;  %v11338_v48 = vld [vmem:[%s15088_s20 + $0x258] sm:$0xff] }
  0x5b   : > { %15241 = vst [vmem:[#allocation91_spill] sm:$0xff] %v11333_v40  ;;  %15242 = vst [vmem:[#allocation92_spill] sm:$0xff] %v11338_v48  ;;  %v11343_v55 = vld [vmem:[%s15088_s20 + $0x260] sm:$0xff]  ;;  %v11348_v0 = vld [vmem:[%s15088_s20 + $0x268] sm:$0xff] }
  0x5c   : > { %15243 = vst [vmem:[#allocation93_spill] sm:$0xff] %v11343_v55  ;;  %15244 = vst [vmem:[#allocation94_spill] sm:$0xff] %v11348_v0  ;;  %v11353_v56 = vld [vmem:[%s15088_s20 + $0x270] sm:$0xff]  ;;  %v11358_v40 = vld [vmem:[%s15088_s20 + $0x278] sm:$0xff] }
  0x5d   : > { %15245 = vst [vmem:[#allocation95_spill] sm:$0xff] %v11353_v56  ;;  %15246 = vst [vmem:[#allocation96_spill] sm:$0xff] %v11358_v40  ;;  %v11363_v48 = vld [vmem:[%s15088_s20 + $0x280] sm:$0xff]  ;;  %v11368_v55 = vld [vmem:[%s15088_s20 + $0x288] sm:$0xff] }
  0x5e   : > { %15247 = vst [vmem:[#allocation97_spill] sm:$0xff] %v11363_v48  ;;  %15248 = vst [vmem:[#allocation98_spill] sm:$0xff] %v11368_v55  ;;  %v11373_v0 = vld [vmem:[%s15088_s20 + $0x290] sm:$0xff]  ;;  %v11378_v56 = vld [vmem:[%s15088_s20 + $0x298] sm:$0xff] }
  0x5f   : > { %15249 = vst [vmem:[#allocation99_spill] sm:$0xff] %v11373_v0  ;;  %15250 = vst [vmem:[#allocation100_spill] sm:$0xff] %v11378_v56  ;;  %v11383_v40 = vld [vmem:[%s15088_s20 + $0x2a0] sm:$0xff]  ;;  %v11388_v48 = vld [vmem:[%s15088_s20 + $0x2a8] sm:$0xff] }
  0x60   : > { %15251 = vst [vmem:[#allocation101_spill] sm:$0xff] %v11383_v40  ;;  %15252 = vst [vmem:[#allocation102_spill] sm:$0xff] %v11388_v48  ;;  %v11393_v55 = vld [vmem:[%s15088_s20 + $0x2b0] sm:$0xff]  ;;  %v11398_v0 = vld [vmem:[%s15088_s20 + $0x2b8] sm:$0xff] }
  0x61   : > { %15253 = vst [vmem:[#allocation103_spill] sm:$0xff] %v11393_v55  ;;  %15254 = vst [vmem:[#allocation104_spill] sm:$0xff] %v11398_v0  ;;  %v11403_v56 = vld [vmem:[%s15088_s20 + $0x2c0] sm:$0xff]  ;;  %v11408_v40 = vld [vmem:[%s15088_s20 + $0x2c8] sm:$0xff] }
  0x62   : > { %15255 = vst [vmem:[#allocation105_spill] sm:$0xff] %v11403_v56  ;;  %15256 = vst [vmem:[#allocation106_spill] sm:$0xff] %v11408_v40  ;;  %v11413_v48 = vld [vmem:[%s15088_s20 + $0x2d0] sm:$0xff]  ;;  %v11418_v55 = vld [vmem:[%s15088_s20 + $0x2d8] sm:$0xff] }
  0x63   : > { %15257 = vst [vmem:[#allocation107_spill] sm:$0xff] %v11413_v48  ;;  %15258 = vst [vmem:[#allocation108_spill] sm:$0xff] %v11418_v55  ;;  %v11423_v0 = vld [vmem:[%s15088_s20 + $0x2e0] sm:$0xff]  ;;  %v11428_v56 = vld [vmem:[%s15088_s20 + $0x2e8] sm:$0xff] }
  0x64   : > { %15259 = vst [vmem:[#allocation109_spill] sm:$0xff] %v11423_v0  ;;  %15260 = vst [vmem:[#allocation110_spill] sm:$0xff] %v11428_v56  ;;  %v11433_v40 = vld [vmem:[%s15088_s20 + $0x2f0] sm:$0xff]  ;;  %v11438_v48 = vld [vmem:[%s15088_s20 + $0x2f8] sm:$0xff] }
  0x65   : > { %15261 = vst [vmem:[#allocation111_spill] sm:$0xff] %v11433_v40  ;;  %15262 = vst [vmem:[#allocation112_spill] sm:$0xff] %v11438_v48  ;;  %v11443_v55 = vld [vmem:[%s15088_s20 + $0x300] sm:$0xff]  ;;  %v11448_v0 = vld [vmem:[%s15088_s20 + $0x308] sm:$0xff] }
  0x66   : > { %15263 = vst [vmem:[#allocation113_spill] sm:$0xff] %v11443_v55  ;;  %15264 = vst [vmem:[#allocation114_spill] sm:$0xff] %v11448_v0  ;;  %v11453_v56 = vld [vmem:[%s15088_s20 + $0x310] sm:$0xff]  ;;  %v11458_v40 = vld [vmem:[%s15088_s20 + $0x318] sm:$0xff] }
  0x67   : > { %15265 = vst [vmem:[#allocation115_spill] sm:$0xff] %v11453_v56  ;;  %15266 = vst [vmem:[#allocation116_spill] sm:$0xff] %v11458_v40  ;;  %v11463_v48 = vld [vmem:[%s15088_s20 + $0x320] sm:$0xff]  ;;  %v11468_v55 = vld [vmem:[%s15088_s20 + $0x328] sm:$0xff] }
  0x68   : > { %15267 = vst [vmem:[#allocation117_spill] sm:$0xff] %v11463_v48  ;;  %15268 = vst [vmem:[#allocation118_spill] sm:$0xff] %v11468_v55  ;;  %v11473_v0 = vld [vmem:[%s15088_s20 + $0x330] sm:$0xff]  ;;  %v11478_v56 = vld [vmem:[%s15088_s20 + $0x338] sm:$0xff] }
  0x69   : > { %15269 = vst [vmem:[#allocation119_spill] sm:$0xff] %v11473_v0  ;;  %15270 = vst [vmem:[#allocation120_spill] sm:$0xff] %v11478_v56  ;;  %v11483_v40 = vld [vmem:[%s15088_s20 + $0x340] sm:$0xff]  ;;  %v11488_v48 = vld [vmem:[%s15088_s20 + $0x348] sm:$0xff] }
  0x6a   : > { %15271 = vst [vmem:[#allocation121_spill] sm:$0xff] %v11483_v40  ;;  %15272 = vst [vmem:[#allocation122_spill] sm:$0xff] %v11488_v48  ;;  %v11493_v55 = vld [vmem:[%s15088_s20 + $0x350] sm:$0xff]  ;;  %v11498_v0 = vld [vmem:[%s15088_s20 + $0x358] sm:$0xff] }
  0x6b   : > { %15273 = vst [vmem:[#allocation123_spill] sm:$0xff] %v11493_v55  ;;  %15274 = vst [vmem:[#allocation124_spill] sm:$0xff] %v11498_v0  ;;  %v11503_v56 = vld [vmem:[%s15088_s20 + $0x360] sm:$0xff]  ;;  %v11508_v40 = vld [vmem:[%s15088_s20 + $0x368] sm:$0xff] }
  0x6c   : > { %15275 = vst [vmem:[#allocation125_spill] sm:$0xff] %v11503_v56  ;;  %15276 = vst [vmem:[#allocation126_spill] sm:$0xff] %v11508_v40  ;;  %v11513_v48 = vld [vmem:[%s15088_s20 + $0x370] sm:$0xff]  ;;  %v11518_v55 = vld [vmem:[%s15088_s20 + $0x378] sm:$0xff] }
  0x6d   : > { %15277 = vst [vmem:[#allocation127_spill] sm:$0xff] %v11513_v48  ;;  %15278 = vst [vmem:[#allocation128_spill] sm:$0xff] %v11518_v55  ;;  %v11523_v0 = vld [vmem:[%s15088_s20 + $0x380] sm:$0xff]  ;;  %v11528_v56 = vld [vmem:[%s15088_s20 + $0x388] sm:$0xff] }
  0x6e   : > { %15279 = vst [vmem:[#allocation129_spill] sm:$0xff] %v11523_v0  ;;  %15280 = vst [vmem:[#allocation130_spill] sm:$0xff] %v11528_v56  ;;  %v11533_v40 = vld [vmem:[%s15088_s20 + $0x390] sm:$0xff]  ;;  %v11538_v48 = vld [vmem:[%s15088_s20 + $0x398] sm:$0xff] }
  0x6f   : > { %15281 = vst [vmem:[#allocation131_spill] sm:$0xff] %v11533_v40  ;;  %15282 = vst [vmem:[#allocation132_spill] sm:$0xff] %v11538_v48  ;;  %v11543_v55 = vld [vmem:[%s15088_s20 + $0x3a0] sm:$0xff]  ;;  %v11548_v0 = vld [vmem:[%s15088_s20 + $0x3a8] sm:$0xff] }
  0x70   : > { %15283 = vst [vmem:[#allocation133_spill] sm:$0xff] %v11543_v55  ;;  %15284 = vst [vmem:[#allocation134_spill] sm:$0xff] %v11548_v0  ;;  %v11553_v56 = vld [vmem:[%s15088_s20 + $0x3b0] sm:$0xff]  ;;  %v11558_v40 = vld [vmem:[%s15088_s20 + $0x3b8] sm:$0xff] }
  0x71   : > { %15285 = vst [vmem:[#allocation135_spill] sm:$0xff] %v11553_v56  ;;  %15286 = vst [vmem:[#allocation136_spill] sm:$0xff] %v11558_v40  ;;  %v11563_v48 = vld [vmem:[%s15088_s20 + $0x3c0] sm:$0xff]  ;;  %v11568_v55 = vld [vmem:[%s15088_s20 + $0x3c8] sm:$0xff] }
  0x72   : > { %15287 = vst [vmem:[#allocation137_spill] sm:$0xff] %v11563_v48  ;;  %15288 = vst [vmem:[#allocation138_spill] sm:$0xff] %v11568_v55  ;;  %v11573_v0 = vld [vmem:[%s15088_s20 + $0x3d0] sm:$0xff]  ;;  %v11578_v56 = vld [vmem:[%s15088_s20 + $0x3d8] sm:$0xff] }
  0x73   : > { %15289 = vst [vmem:[#allocation139_spill] sm:$0xff] %v11573_v0  ;;  %15290 = vst [vmem:[#allocation140_spill] sm:$0xff] %v11578_v56  ;;  %v11583_v40 = vld [vmem:[%s15088_s20 + $0x3e0] sm:$0xff]  ;;  %v11588_v48 = vld [vmem:[%s15088_s20 + $0x3e8] sm:$0xff] }
  0x74   : > { %15291 = vst [vmem:[#allocation141_spill] sm:$0xff] %v11583_v40  ;;  %15292 = vst [vmem:[#allocation142_spill] sm:$0xff] %v11588_v48  ;;  %v11593_v55 = vld [vmem:[%s15088_s20 + $0x3f0] sm:$0xff]  ;;  %v11598_v0 = vld [vmem:[%s15088_s20 + $0x3f8] sm:$0xff] }
  0x75   : > { %15293 = vst [vmem:[#allocation143_spill] sm:$0xff] %v11593_v55  ;;  %15294 = vst [vmem:[#allocation144_spill] sm:$0xff] %v11598_v0  ;;  %v11603_v56 = vld [vmem:[%s15088_s20 + $0x400] sm:$0xff]  ;;  %v11608_v40 = vld [vmem:[%s15088_s20 + $0x408] sm:$0xff] }
  0x76   : > { %15295 = vst [vmem:[#allocation145_spill] sm:$0xff] %v11603_v56  ;;  %15296 = vst [vmem:[#allocation146_spill] sm:$0xff] %v11608_v40  ;;  %v11613_v48 = vld [vmem:[%s15088_s20 + $0x410] sm:$0xff]  ;;  %v11618_v55 = vld [vmem:[%s15088_s20 + $0x418] sm:$0xff] }
  0x77   : > { %15297 = vst [vmem:[#allocation147_spill] sm:$0xff] %v11613_v48  ;;  %15298 = vst [vmem:[#allocation148_spill] sm:$0xff] %v11618_v55  ;;  %v11623_v0 = vld [vmem:[%s15088_s20 + $0x420] sm:$0xff]  ;;  %v11628_v56 = vld [vmem:[%s15088_s20 + $0x428] sm:$0xff] }
  0x78   : > { %15299 = vst [vmem:[#allocation149_spill] sm:$0xff] %v11623_v0  ;;  %15300 = vst [vmem:[#allocation150_spill] sm:$0xff] %v11628_v56  ;;  %v11633_v40 = vld [vmem:[%s15088_s20 + $0x430] sm:$0xff]  ;;  %v11638_v48 = vld [vmem:[%s15088_s20 + $0x438] sm:$0xff] }
  0x79   : > { %15301 = vst [vmem:[#allocation151_spill] sm:$0xff] %v11633_v40  ;;  %15302 = vst [vmem:[#allocation152_spill] sm:$0xff] %v11638_v48  ;;  %v11643_v55 = vld [vmem:[%s15088_s20 + $0x440] sm:$0xff]  ;;  %v11648_v0 = vld [vmem:[%s15088_s20 + $0x448] sm:$0xff] }
  0x7a   : > { %15303 = vst [vmem:[#allocation153_spill] sm:$0xff] %v11643_v55  ;;  %15304 = vst [vmem:[#allocation154_spill] sm:$0xff] %v11648_v0  ;;  %v11653_v56 = vld [vmem:[%s15088_s20 + $0x450] sm:$0xff]  ;;  %v11658_v40 = vld [vmem:[%s15088_s20 + $0x458] sm:$0xff] }
  0x7b   : > { %15305 = vst [vmem:[#allocation155_spill] sm:$0xff] %v11653_v56  ;;  %15306 = vst [vmem:[#allocation156_spill] sm:$0xff] %v11658_v40  ;;  %v11663_v48 = vld [vmem:[%s15088_s20 + $0x460] sm:$0xff]  ;;  %v11668_v55 = vld [vmem:[%s15088_s20 + $0x468] sm:$0xff] }
  0x7c   : > { %15307 = vst [vmem:[#allocation157_spill] sm:$0xff] %v11663_v48  ;;  %15308 = vst [vmem:[#allocation158_spill] sm:$0xff] %v11668_v55  ;;  %v11673_v0 = vld [vmem:[%s15088_s20 + $0x470] sm:$0xff]  ;;  %v11678_v56 = vld [vmem:[%s15088_s20 + $0x478] sm:$0xff] }
  0x7d   : > { %15309 = vst [vmem:[#allocation159_spill] sm:$0xff] %v11673_v0  ;;  %15310 = vst [vmem:[#allocation160_spill] sm:$0xff] %v11678_v56 }
  0x7e   : > { %1035 = vsyncadd [#allocation6 + $0x1], 9216  ;;  %v11683_v48 = vld [vmem:[%s15088_s20 + $0x480] sm:$0xff]  ;;  %v11688_v55 = vld [vmem:[%s15088_s20 + $0x488] sm:$0xff] }
  0x7f   : > { %15311 = vst [vmem:[#allocation161_spill] sm:$0xff] %v11683_v48  ;;  %15312 = vst [vmem:[#allocation162_spill] sm:$0xff] %v11688_v55  ;;  %v11693_v0 = vld [vmem:[%s15088_s20 + $0x490] sm:$0xff]  ;;  %v11698_v56 = vld [vmem:[%s15088_s20 + $0x498] sm:$0xff] }
  0x80   : > { %15313 = vst [vmem:[#allocation163_spill] sm:$0xff] %v11693_v0  ;;  %15314 = vst [vmem:[#allocation164_spill] sm:$0xff] %v11698_v56  ;;  %v11703_v40 = vld [vmem:[%s15088_s20 + $0x4a0] sm:$0xff]  ;;  %v11708_v48 = vld [vmem:[%s15088_s20 + $0x4a8] sm:$0xff] }
  0x81   : > { %15315 = vst [vmem:[#allocation165_spill] sm:$0xff] %v11703_v40  ;;  %15316 = vst [vmem:[#allocation166_spill] sm:$0xff] %v11708_v48  ;;  %v11713_v55 = vld [vmem:[%s15088_s20 + $0x4b0] sm:$0xff]  ;;  %v11718_v0 = vld [vmem:[%s15088_s20 + $0x4b8] sm:$0xff] }
  0x82   : > { %15317 = vst [vmem:[#allocation167_spill] sm:$0xff] %v11713_v55  ;;  %15318 = vst [vmem:[#allocation168_spill] sm:$0xff] %v11718_v0  ;;  %v11723_v56 = vld [vmem:[%s15088_s20 + $0x4c0] sm:$0xff]  ;;  %v11728_v40 = vld [vmem:[%s15088_s20 + $0x4c8] sm:$0xff] }
  0x83   : > { %15319 = vst [vmem:[#allocation169_spill] sm:$0xff] %v11723_v56  ;;  %15320 = vst [vmem:[#allocation170_spill] sm:$0xff] %v11728_v40  ;;  %v11733_v48 = vld [vmem:[%s15088_s20 + $0x4d0] sm:$0xff]  ;;  %v11738_v55 = vld [vmem:[%s15088_s20 + $0x4d8] sm:$0xff] }
  0x84   : > { %15321 = vst [vmem:[#allocation171_spill] sm:$0xff] %v11733_v48  ;;  %15322 = vst [vmem:[#allocation172_spill] sm:$0xff] %v11738_v55  ;;  %v11743_v0 = vld [vmem:[%s15088_s20 + $0x4e0] sm:$0xff]  ;;  %v11748_v56 = vld [vmem:[%s15088_s20 + $0x4e8] sm:$0xff] }
  0x85   : > { %15323 = vst [vmem:[#allocation173_spill] sm:$0xff] %v11743_v0  ;;  %15324 = vst [vmem:[#allocation174_spill] sm:$0xff] %v11748_v56  ;;  %v11753_v40 = vld [vmem:[%s15088_s20 + $0x4f0] sm:$0xff]  ;;  %v11758_v48 = vld [vmem:[%s15088_s20 + $0x4f8] sm:$0xff] }
  0x86   : > { %15325 = vst [vmem:[#allocation175_spill] sm:$0xff] %v11753_v40  ;;  %15326 = vst [vmem:[#allocation176_spill] sm:$0xff] %v11758_v48  ;;  %v11763_v55 = vld [vmem:[%s15088_s20 + $0x500] sm:$0xff]  ;;  %v11768_v0 = vld [vmem:[%s15088_s20 + $0x508] sm:$0xff] }
  0x87   : > { %15327 = vst [vmem:[#allocation177_spill] sm:$0xff] %v11763_v55  ;;  %15328 = vst [vmem:[#allocation178_spill] sm:$0xff] %v11768_v0  ;;  %v11773_v56 = vld [vmem:[%s15088_s20 + $0x510] sm:$0xff]  ;;  %v11778_v40 = vld [vmem:[%s15088_s20 + $0x518] sm:$0xff] }
  0x88   : > { %15329 = vst [vmem:[#allocation179_spill] sm:$0xff] %v11773_v56  ;;  %15330 = vst [vmem:[#allocation180_spill] sm:$0xff] %v11778_v40  ;;  %v11783_v48 = vld [vmem:[%s15088_s20 + $0x520] sm:$0xff]  ;;  %v11788_v55 = vld [vmem:[%s15088_s20 + $0x528] sm:$0xff] }
  0x89   : > { %15331 = vst [vmem:[#allocation181_spill] sm:$0xff] %v11783_v48  ;;  %15332 = vst [vmem:[#allocation182_spill] sm:$0xff] %v11788_v55  ;;  %v11793_v0 = vld [vmem:[%s15088_s20 + $0x530] sm:$0xff]  ;;  %v11798_v56 = vld [vmem:[%s15088_s20 + $0x538] sm:$0xff] }
  0x8a   : > { %15333 = vst [vmem:[#allocation183_spill] sm:$0xff] %v11793_v0  ;;  %15334 = vst [vmem:[#allocation184_spill] sm:$0xff] %v11798_v56  ;;  %v11803_v40 = vld [vmem:[%s15088_s20 + $0x540] sm:$0xff]  ;;  %v11808_v48 = vld [vmem:[%s15088_s20 + $0x548] sm:$0xff] }
  0x8b   : > { %15335 = vst [vmem:[#allocation185_spill] sm:$0xff] %v11803_v40  ;;  %15336 = vst [vmem:[#allocation186_spill] sm:$0xff] %v11808_v48  ;;  %v11813_v55 = vld [vmem:[%s15088_s20 + $0x550] sm:$0xff]  ;;  %v11818_v0 = vld [vmem:[%s15088_s20 + $0x558] sm:$0xff] }
  0x8c   : > { %15337 = vst [vmem:[#allocation187_spill] sm:$0xff] %v11813_v55  ;;  %15338 = vst [vmem:[#allocation188_spill] sm:$0xff] %v11818_v0  ;;  %v11823_v56 = vld [vmem:[%s15088_s20 + $0x560] sm:$0xff]  ;;  %v11828_v40 = vld [vmem:[%s15088_s20 + $0x568] sm:$0xff] }
  0x8d   : > { %15339 = vst [vmem:[#allocation189_spill] sm:$0xff] %v11823_v56  ;;  %15340 = vst [vmem:[#allocation190_spill] sm:$0xff] %v11828_v40  ;;  %v11833_v48 = vld [vmem:[%s15088_s20 + $0x570] sm:$0xff]  ;;  %v11838_v55 = vld [vmem:[%s15088_s20 + $0x578] sm:$0xff] }
  0x8e   : > { %15341 = vst [vmem:[#allocation191_spill] sm:$0xff] %v11833_v48  ;;  %15342 = vst [vmem:[#allocation192_spill] sm:$0xff] %v11838_v55  ;;  %v11843_v0 = vld [vmem:[%s15088_s20 + $0x580] sm:$0xff]  ;;  %v11848_v56 = vld [vmem:[%s15088_s20 + $0x588] sm:$0xff] }
  0x8f   : > { %15343 = vst [vmem:[#allocation193_spill] sm:$0xff] %v11843_v0  ;;  %15344 = vst [vmem:[#allocation194_spill] sm:$0xff] %v11848_v56  ;;  %v11853_v40 = vld [vmem:[%s15088_s20 + $0x590] sm:$0xff]  ;;  %v11858_v48 = vld [vmem:[%s15088_s20 + $0x598] sm:$0xff] }
  0x90   : > { %15345 = vst [vmem:[#allocation195_spill] sm:$0xff] %v11853_v40  ;;  %15346 = vst [vmem:[#allocation196_spill] sm:$0xff] %v11858_v48  ;;  %v11863_v55 = vld [vmem:[%s15088_s20 + $0x5a0] sm:$0xff]  ;;  %v11868_v0 = vld [vmem:[%s15088_s20 + $0x5a8] sm:$0xff] }
  0x91   : > { %15347 = vst [vmem:[#allocation197_spill] sm:$0xff] %v11863_v55  ;;  %15348 = vst [vmem:[#allocation198_spill] sm:$0xff] %v11868_v0  ;;  %v11873_v56 = vld [vmem:[%s15088_s20 + $0x5b0] sm:$0xff]  ;;  %v11878_v40 = vld [vmem:[%s15088_s20 + $0x5b8] sm:$0xff] }
  0x92   : > { %15349 = vst [vmem:[#allocation199_spill] sm:$0xff] %v11873_v56  ;;  %15350 = vst [vmem:[#allocation200_spill] sm:$0xff] %v11878_v40  ;;  %v11883_v48 = vld [vmem:[%s15088_s20 + $0x5c0] sm:$0xff]  ;;  %v11888_v55 = vld [vmem:[%s15088_s20 + $0x5c8] sm:$0xff] }
  0x93   : > { %15351 = vst [vmem:[#allocation201_spill] sm:$0xff] %v11883_v48  ;;  %15352 = vst [vmem:[#allocation202_spill] sm:$0xff] %v11888_v55  ;;  %v11893_v0 = vld [vmem:[%s15088_s20 + $0x5d0] sm:$0xff]  ;;  %v11898_v56 = vld [vmem:[%s15088_s20 + $0x5d8] sm:$0xff] }
  0x94   : > { %15353 = vst [vmem:[#allocation203_spill] sm:$0xff] %v11893_v0  ;;  %15354 = vst [vmem:[#allocation204_spill] sm:$0xff] %v11898_v56  ;;  %v11903_v40 = vld [vmem:[%s15088_s20 + $0x5e0] sm:$0xff]  ;;  %v11908_v48 = vld [vmem:[%s15088_s20 + $0x5e8] sm:$0xff] }
  0x95   : > { %15355 = vst [vmem:[#allocation205_spill] sm:$0xff] %v11903_v40  ;;  %15356 = vst [vmem:[#allocation206_spill] sm:$0xff] %v11908_v48  ;;  %v11913_v55 = vld [vmem:[%s15088_s20 + $0x5f0] sm:$0xff]  ;;  %v11918_v0 = vld [vmem:[%s15088_s20 + $0x5f8] sm:$0xff] }
  0x96   : > { %15357 = vst [vmem:[#allocation207_spill] sm:$0xff] %v11913_v55  ;;  %15358 = vst [vmem:[#allocation208_spill] sm:$0xff] %v11918_v0  ;;  %v11923_v56 = vld [vmem:[%s15088_s20 + $0x600] sm:$0xff]  ;;  %v11928_v40 = vld [vmem:[%s15088_s20 + $0x608] sm:$0xff] }
  0x97   : > { %15359 = vst [vmem:[#allocation209_spill] sm:$0xff] %v11923_v56  ;;  %15360 = vst [vmem:[#allocation210_spill] sm:$0xff] %v11928_v40  ;;  %v11933_v48 = vld [vmem:[%s15088_s20 + $0x610] sm:$0xff]  ;;  %v11938_v55 = vld [vmem:[%s15088_s20 + $0x618] sm:$0xff] }
  0x98   : > { %15361 = vst [vmem:[#allocation211_spill] sm:$0xff] %v11933_v48  ;;  %15362 = vst [vmem:[#allocation212_spill] sm:$0xff] %v11938_v55  ;;  %v11943_v0 = vld [vmem:[%s15088_s20 + $0x620] sm:$0xff]  ;;  %v11948_v56 = vld [vmem:[%s15088_s20 + $0x628] sm:$0xff] }
  0x99   : > { %15363 = vst [vmem:[#allocation213_spill] sm:$0xff] %v11943_v0  ;;  %15364 = vst [vmem:[#allocation214_spill] sm:$0xff] %v11948_v56  ;;  %v11953_v40 = vld [vmem:[%s15088_s20 + $0x630] sm:$0xff]  ;;  %v11958_v48 = vld [vmem:[%s15088_s20 + $0x638] sm:$0xff] }
  0x9a   : > { %15365 = vst [vmem:[#allocation215_spill] sm:$0xff] %v11953_v40  ;;  %15366 = vst [vmem:[#allocation216_spill] sm:$0xff] %v11958_v48  ;;  %v11963_v55 = vld [vmem:[%s15088_s20 + $0x640] sm:$0xff]  ;;  %v11968_v0 = vld [vmem:[%s15088_s20 + $0x648] sm:$0xff] }
  0x9b   : > { %15367 = vst [vmem:[#allocation217_spill] sm:$0xff] %v11963_v55  ;;  %15368 = vst [vmem:[#allocation218_spill] sm:$0xff] %v11968_v0  ;;  %v11973_v56 = vld [vmem:[%s15088_s20 + $0x650] sm:$0xff]  ;;  %v11978_v40 = vld [vmem:[%s15088_s20 + $0x658] sm:$0xff] }
  0x9c   : > { %15369 = vst [vmem:[#allocation219_spill] sm:$0xff] %v11973_v56  ;;  %15370 = vst [vmem:[#allocation220_spill] sm:$0xff] %v11978_v40  ;;  %v11983_v48 = vld [vmem:[%s15088_s20 + $0x660] sm:$0xff]  ;;  %v11988_v55 = vld [vmem:[%s15088_s20 + $0x668] sm:$0xff] }
  0x9d   : > { %15371 = vst [vmem:[#allocation221_spill] sm:$0xff] %v11983_v48  ;;  %15372 = vst [vmem:[#allocation222_spill] sm:$0xff] %v11988_v55  ;;  %v11993_v0 = vld [vmem:[%s15088_s20 + $0x670] sm:$0xff]  ;;  %v11998_v56 = vld [vmem:[%s15088_s20 + $0x678] sm:$0xff] }
  0x9e   : > { %15373 = vst [vmem:[#allocation223_spill] sm:$0xff] %v11993_v0  ;;  %15374 = vst [vmem:[#allocation224_spill] sm:$0xff] %v11998_v56  ;;  %v12003_v40 = vld [vmem:[%s15088_s20 + $0x680] sm:$0xff]  ;;  %v12008_v48 = vld [vmem:[%s15088_s20 + $0x688] sm:$0xff] }
  0x9f   : > { %15375 = vst [vmem:[#allocation225_spill] sm:$0xff] %v12003_v40  ;;  %15376 = vst [vmem:[#allocation226_spill] sm:$0xff] %v12008_v48  ;;  %v12013_v55 = vld [vmem:[%s15088_s20 + $0x690] sm:$0xff]  ;;  %v12018_v0 = vld [vmem:[%s15088_s20 + $0x698] sm:$0xff] }
  0xa0   : > { %15377 = vst [vmem:[#allocation227_spill] sm:$0xff] %v12013_v55  ;;  %15378 = vst [vmem:[#allocation228_spill] sm:$0xff] %v12018_v0  ;;  %v12023_v56 = vld [vmem:[%s15088_s20 + $0x6a0] sm:$0xff]  ;;  %v12028_v40 = vld [vmem:[%s15088_s20 + $0x6a8] sm:$0xff] }
  0xa1   : > { %15379 = vst [vmem:[#allocation229_spill] sm:$0xff] %v12023_v56  ;;  %15380 = vst [vmem:[#allocation230_spill] sm:$0xff] %v12028_v40  ;;  %v12033_v48 = vld [vmem:[%s15088_s20 + $0x6b0] sm:$0xff]  ;;  %v12038_v55 = vld [vmem:[%s15088_s20 + $0x6b8] sm:$0xff] }
  0xa2   : > { %15381 = vst [vmem:[#allocation231_spill] sm:$0xff] %v12033_v48  ;;  %15382 = vst [vmem:[#allocation232_spill] sm:$0xff] %v12038_v55 }
  0xa3   : > { %1222 = vsyncadd [#allocation6 + $0x2], 9216  ;;  %v12043_v56 = vld [vmem:[%s15088_s20 + $0x6c0] sm:$0xff]  ;;  %v12048_v40 = vld [vmem:[%s15088_s20 + $0x6c8] sm:$0xff] }
  0xa4   : > { %15383 = vst [vmem:[#allocation233_spill] sm:$0xff] %v12043_v56  ;;  %15384 = vst [vmem:[#allocation234_spill] sm:$0xff] %v12048_v40  ;;  %v12053_v48 = vld [vmem:[%s15088_s20 + $0x6d0] sm:$0xff]  ;;  %v12058_v55 = vld [vmem:[%s15088_s20 + $0x6d8] sm:$0xff] }
  0xa5   : > { %15385 = vst [vmem:[#allocation235_spill] sm:$0xff] %v12053_v48  ;;  %15386 = vst [vmem:[#allocation236_spill] sm:$0xff] %v12058_v55  ;;  %v12063_v0 = vld [vmem:[%s15088_s20 + $0x6e0] sm:$0xff]  ;;  %v12068_v56 = vld [vmem:[%s15088_s20 + $0x6e8] sm:$0xff] }
  0xa6   : > { %15387 = vst [vmem:[#allocation237_spill] sm:$0xff] %v12063_v0  ;;  %15388 = vst [vmem:[#allocation238_spill] sm:$0xff] %v12068_v56  ;;  %v12073_v40 = vld [vmem:[%s15088_s20 + $0x6f0] sm:$0xff]  ;;  %v12078_v48 = vld [vmem:[%s15088_s20 + $0x6f8] sm:$0xff] }
  0xa7   : > { %15389 = vst [vmem:[#allocation239_spill] sm:$0xff] %v12073_v40  ;;  %15390 = vst [vmem:[#allocation240_spill] sm:$0xff] %v12078_v48  ;;  %v12083_v55 = vld [vmem:[%s15088_s20 + $0x700] sm:$0xff]  ;;  %v12088_v0 = vld [vmem:[%s15088_s20 + $0x708] sm:$0xff] }
  0xa8   : > { %15391 = vst [vmem:[#allocation241_spill] sm:$0xff] %v12083_v55  ;;  %15392 = vst [vmem:[#allocation242_spill] sm:$0xff] %v12088_v0  ;;  %v12093_v56 = vld [vmem:[%s15088_s20 + $0x710] sm:$0xff]  ;;  %v12098_v40 = vld [vmem:[%s15088_s20 + $0x718] sm:$0xff] }
  0xa9   : > { %15393 = vst [vmem:[#allocation243_spill] sm:$0xff] %v12093_v56  ;;  %15394 = vst [vmem:[#allocation244_spill] sm:$0xff] %v12098_v40  ;;  %v12103_v48 = vld [vmem:[%s15088_s20 + $0x720] sm:$0xff]  ;;  %v12108_v55 = vld [vmem:[%s15088_s20 + $0x728] sm:$0xff] }
  0xaa   : > { %15395 = vst [vmem:[#allocation245_spill] sm:$0xff] %v12103_v48  ;;  %15396 = vst [vmem:[#allocation246_spill] sm:$0xff] %v12108_v55  ;;  %v12113_v0 = vld [vmem:[%s15088_s20 + $0x730] sm:$0xff]  ;;  %v12118_v56 = vld [vmem:[%s15088_s20 + $0x738] sm:$0xff] }
  0xab   : > { %15397 = vst [vmem:[#allocation247_spill] sm:$0xff] %v12113_v0  ;;  %15398 = vst [vmem:[#allocation248_spill] sm:$0xff] %v12118_v56  ;;  %v12123_v40 = vld [vmem:[%s15088_s20 + $0x740] sm:$0xff]  ;;  %v12128_v48 = vld [vmem:[%s15088_s20 + $0x748] sm:$0xff] }
  0xac   : > { %15399 = vst [vmem:[#allocation249_spill] sm:$0xff] %v12123_v40  ;;  %15400 = vst [vmem:[#allocation250_spill] sm:$0xff] %v12128_v48  ;;  %v12133_v55 = vld [vmem:[%s15088_s20 + $0x750] sm:$0xff]  ;;  %v12138_v0 = vld [vmem:[%s15088_s20 + $0x758] sm:$0xff] }
  0xad   : > { %15401 = vst [vmem:[#allocation251_spill] sm:$0xff] %v12133_v55  ;;  %15402 = vst [vmem:[#allocation252_spill] sm:$0xff] %v12138_v0  ;;  %v12143_v56 = vld [vmem:[%s15088_s20 + $0x760] sm:$0xff]  ;;  %v12148_v40 = vld [vmem:[%s15088_s20 + $0x768] sm:$0xff] }
  0xae   : > { %15403 = vst [vmem:[#allocation253_spill] sm:$0xff] %v12143_v56  ;;  %15404 = vst [vmem:[#allocation254_spill] sm:$0xff] %v12148_v40  ;;  %v12153_v48 = vld [vmem:[%s15088_s20 + $0x770] sm:$0xff]  ;;  %v12158_v55 = vld [vmem:[%s15088_s20 + $0x778] sm:$0xff] }
  0xaf   : > { %15405 = vst [vmem:[#allocation255_spill] sm:$0xff] %v12153_v48  ;;  %15406 = vst [vmem:[#allocation256_spill] sm:$0xff] %v12158_v55  ;;  %v12163_v0 = vld [vmem:[%s15088_s20 + $0x780] sm:$0xff]  ;;  %v12168_v56 = vld [vmem:[%s15088_s20 + $0x788] sm:$0xff] }
  0xb0   : > { %15407 = vst [vmem:[#allocation257_spill] sm:$0xff] %v12163_v0  ;;  %15408 = vst [vmem:[#allocation258_spill] sm:$0xff] %v12168_v56  ;;  %v12173_v40 = vld [vmem:[%s15088_s20 + $0x790] sm:$0xff]  ;;  %v12178_v48 = vld [vmem:[%s15088_s20 + $0x798] sm:$0xff] }
  0xb1   : > { %15409 = vst [vmem:[#allocation259_spill] sm:$0xff] %v12173_v40  ;;  %15410 = vst [vmem:[#allocation260_spill] sm:$0xff] %v12178_v48  ;;  %v12183_v55 = vld [vmem:[%s15088_s20 + $0x7a0] sm:$0xff]  ;;  %v12188_v0 = vld [vmem:[%s15088_s20 + $0x7a8] sm:$0xff] }
  0xb2   : > { %15411 = vst [vmem:[#allocation261_spill] sm:$0xff] %v12183_v55  ;;  %15412 = vst [vmem:[#allocation262_spill] sm:$0xff] %v12188_v0  ;;  %v12193_v56 = vld [vmem:[%s15088_s20 + $0x7b0] sm:$0xff]  ;;  %v12198_v40 = vld [vmem:[%s15088_s20 + $0x7b8] sm:$0xff] }
  0xb3   : > { %15413 = vst [vmem:[#allocation263_spill] sm:$0xff] %v12193_v56  ;;  %15414 = vst [vmem:[#allocation264_spill] sm:$0xff] %v12198_v40  ;;  %v12203_v48 = vld [vmem:[%s15088_s20 + $0x7c0] sm:$0xff]  ;;  %v12208_v55 = vld [vmem:[%s15088_s20 + $0x7c8] sm:$0xff] }
  0xb4   : > { %15415 = vst [vmem:[#allocation265_spill] sm:$0xff] %v12203_v48  ;;  %15416 = vst [vmem:[#allocation266_spill] sm:$0xff] %v12208_v55  ;;  %v12213_v0 = vld [vmem:[%s15088_s20 + $0x7d0] sm:$0xff]  ;;  %v12218_v56 = vld [vmem:[%s15088_s20 + $0x7d8] sm:$0xff] }
  0xb5   : > { %15417 = vst [vmem:[#allocation267_spill] sm:$0xff] %v12213_v0  ;;  %15418 = vst [vmem:[#allocation268_spill] sm:$0xff] %v12218_v56  ;;  %v12223_v40 = vld [vmem:[%s15088_s20 + $0x7e0] sm:$0xff]  ;;  %v12228_v48 = vld [vmem:[%s15088_s20 + $0x7e8] sm:$0xff] }
  0xb6   : > { %15419 = vst [vmem:[#allocation269_spill] sm:$0xff] %v12223_v40  ;;  %15420 = vst [vmem:[#allocation270_spill] sm:$0xff] %v12228_v48  ;;  %v12233_v55 = vld [vmem:[%s15088_s20 + $0x7f0] sm:$0xff]  ;;  %v12238_v0 = vld [vmem:[%s15088_s20 + $0x7f8] sm:$0xff] }
  0xb7   : > { %15421 = vst [vmem:[#allocation271_spill] sm:$0xff] %v12233_v55  ;;  %15422 = vst [vmem:[#allocation272_spill] sm:$0xff] %v12238_v0  ;;  %v12243_v56 = vld [vmem:[%s15088_s20 + $0x800] sm:$0xff]  ;;  %v12248_v40 = vld [vmem:[%s15088_s20 + $0x808] sm:$0xff] }
  0xb8   : > { %15423 = vst [vmem:[#allocation273_spill] sm:$0xff] %v12243_v56  ;;  %15424 = vst [vmem:[#allocation274_spill] sm:$0xff] %v12248_v40  ;;  %v12253_v48 = vld [vmem:[%s15088_s20 + $0x810] sm:$0xff]  ;;  %v12258_v55 = vld [vmem:[%s15088_s20 + $0x818] sm:$0xff] }
  0xb9   : > { %15425 = vst [vmem:[#allocation275_spill] sm:$0xff] %v12253_v48  ;;  %15426 = vst [vmem:[#allocation276_spill] sm:$0xff] %v12258_v55  ;;  %v12263_v0 = vld [vmem:[%s15088_s20 + $0x820] sm:$0xff]  ;;  %v12268_v56 = vld [vmem:[%s15088_s20 + $0x828] sm:$0xff] }
  0xba   : > { %15427 = vst [vmem:[#allocation277_spill] sm:$0xff] %v12263_v0  ;;  %15428 = vst [vmem:[#allocation278_spill] sm:$0xff] %v12268_v56  ;;  %v12273_v40 = vld [vmem:[%s15088_s20 + $0x830] sm:$0xff]  ;;  %v12278_v48 = vld [vmem:[%s15088_s20 + $0x838] sm:$0xff] }
  0xbb   : > { %15429 = vst [vmem:[#allocation279_spill] sm:$0xff] %v12273_v40  ;;  %15430 = vst [vmem:[#allocation280_spill] sm:$0xff] %v12278_v48  ;;  %v12283_v55 = vld [vmem:[%s15088_s20 + $0x840] sm:$0xff]  ;;  %v12288_v0 = vld [vmem:[%s15088_s20 + $0x848] sm:$0xff] }
  0xbc   : > { %15431 = vst [vmem:[#allocation281_spill] sm:$0xff] %v12283_v55  ;;  %15432 = vst [vmem:[#allocation282_spill] sm:$0xff] %v12288_v0  ;;  %v12293_v56 = vld [vmem:[%s15088_s20 + $0x850] sm:$0xff]  ;;  %v12298_v40 = vld [vmem:[%s15088_s20 + $0x858] sm:$0xff] }
  0xbd   : > { %15433 = vst [vmem:[#allocation283_spill] sm:$0xff] %v12293_v56  ;;  %15434 = vst [vmem:[#allocation284_spill] sm:$0xff] %v12298_v40  ;;  %v12303_v48 = vld [vmem:[%s15088_s20 + $0x860] sm:$0xff]  ;;  %v12308_v55 = vld [vmem:[%s15088_s20 + $0x868] sm:$0xff] }
  0xbe   : > { %15435 = vst [vmem:[#allocation285_spill] sm:$0xff] %v12303_v48  ;;  %15436 = vst [vmem:[#allocation286_spill] sm:$0xff] %v12308_v55  ;;  %v12313_v0 = vld [vmem:[%s15088_s20 + $0x870] sm:$0xff]  ;;  %v12318_v56 = vld [vmem:[%s15088_s20 + $0x878] sm:$0xff] }
  0xbf   : > { %15437 = vst [vmem:[#allocation287_spill] sm:$0xff] %v12313_v0  ;;  %15438 = vst [vmem:[#allocation288_spill] sm:$0xff] %v12318_v56  ;;  %v12323_v40 = vld [vmem:[%s15088_s20 + $0x880] sm:$0xff]  ;;  %v12328_v48 = vld [vmem:[%s15088_s20 + $0x888] sm:$0xff] }
  0xc0   : > { %15439 = vst [vmem:[#allocation289_spill] sm:$0xff] %v12323_v40  ;;  %15440 = vst [vmem:[#allocation290_spill] sm:$0xff] %v12328_v48  ;;  %v12333_v55 = vld [vmem:[%s15088_s20 + $0x890] sm:$0xff]  ;;  %v12338_v0 = vld [vmem:[%s15088_s20 + $0x898] sm:$0xff] }
  0xc1   : > { %15441 = vst [vmem:[#allocation291_spill] sm:$0xff] %v12333_v55  ;;  %15442 = vst [vmem:[#allocation292_spill] sm:$0xff] %v12338_v0  ;;  %v12343_v56 = vld [vmem:[%s15088_s20 + $0x8a0] sm:$0xff]  ;;  %v12348_v40 = vld [vmem:[%s15088_s20 + $0x8a8] sm:$0xff] }
  0xc2   : > { %15443 = vst [vmem:[#allocation293_spill] sm:$0xff] %v12343_v56  ;;  %15444 = vst [vmem:[#allocation294_spill] sm:$0xff] %v12348_v40  ;;  %v12353_v48 = vld [vmem:[%s15088_s20 + $0x8b0] sm:$0xff]  ;;  %v12358_v55 = vld [vmem:[%s15088_s20 + $0x8b8] sm:$0xff] }
  0xc3   : > { %15445 = vst [vmem:[#allocation295_spill] sm:$0xff] %v12353_v48  ;;  %15446 = vst [vmem:[#allocation296_spill] sm:$0xff] %v12358_v55  ;;  %v12363_v0 = vld [vmem:[%s15088_s20 + $0x8c0] sm:$0xff]  ;;  %v12368_v56 = vld [vmem:[%s15088_s20 + $0x8c8] sm:$0xff] }
  0xc4   : > { %15447 = vst [vmem:[#allocation297_spill] sm:$0xff] %v12363_v0  ;;  %15448 = vst [vmem:[#allocation298_spill] sm:$0xff] %v12368_v56  ;;  %v12373_v40 = vld [vmem:[%s15088_s20 + $0x8d0] sm:$0xff]  ;;  %v12378_v48 = vld [vmem:[%s15088_s20 + $0x8d8] sm:$0xff] }
  0xc5   : > { %15449 = vst [vmem:[#allocation299_spill] sm:$0xff] %v12373_v40  ;;  %15450 = vst [vmem:[#allocation300_spill] sm:$0xff] %v12378_v48  ;;  %v12383_v55 = vld [vmem:[%s15088_s20 + $0x8e0] sm:$0xff]  ;;  %v12388_v0 = vld [vmem:[%s15088_s20 + $0x8e8] sm:$0xff] }
  0xc6   : > { %15451 = vst [vmem:[#allocation301_spill] sm:$0xff] %v12383_v55  ;;  %15452 = vst [vmem:[#allocation302_spill] sm:$0xff] %v12388_v0  ;;  %v12393_v56 = vld [vmem:[%s15088_s20 + $0x8f0] sm:$0xff]  ;;  %v12398_v40 = vld [vmem:[%s15088_s20 + $0x8f8] sm:$0xff] }
  0xc7   : > { %15453 = vst [vmem:[#allocation303_spill] sm:$0xff] %v12393_v56  ;;  %15454 = vst [vmem:[#allocation304_spill] sm:$0xff] %v12398_v40 }
  0xc8   : > { %1409 = vsyncadd [#allocation6 + $0x3], 9216  ;;  %v12403_v55 = vld [vmem:[%s15088_s20 + $0x900] sm:$0xff]  ;;  %v12408_v0 = vld [vmem:[%s15088_s20 + $0x908] sm:$0xff] }
  0xc9   : > { %15455 = vst [vmem:[#allocation305_spill] sm:$0xff] %v12403_v55  ;;  %15456 = vst [vmem:[#allocation306_spill] sm:$0xff] %v12408_v0  ;;  %v12413_v56 = vld [vmem:[%s15088_s20 + $0x910] sm:$0xff]  ;;  %v12418_v40 = vld [vmem:[%s15088_s20 + $0x918] sm:$0xff] }
  0xca   : > { %15457 = vst [vmem:[#allocation307_spill] sm:$0xff] %v12413_v56  ;;  %15458 = vst [vmem:[#allocation308_spill] sm:$0xff] %v12418_v40  ;;  %v12423_v48 = vld [vmem:[%s15088_s20 + $0x920] sm:$0xff]  ;;  %v12428_v55 = vld [vmem:[%s15088_s20 + $0x928] sm:$0xff] }
  0xcb   : > { %15459 = vst [vmem:[#allocation309_spill] sm:$0xff] %v12423_v48  ;;  %15460 = vst [vmem:[#allocation310_spill] sm:$0xff] %v12428_v55  ;;  %v12433_v0 = vld [vmem:[%s15088_s20 + $0x930] sm:$0xff]  ;;  %v12438_v56 = vld [vmem:[%s15088_s20 + $0x938] sm:$0xff] }
  0xcc   : > { %15461 = vst [vmem:[#allocation311_spill] sm:$0xff] %v12433_v0  ;;  %15462 = vst [vmem:[#allocation312_spill] sm:$0xff] %v12438_v56  ;;  %v12443_v40 = vld [vmem:[%s15088_s20 + $0x940] sm:$0xff]  ;;  %v12448_v48 = vld [vmem:[%s15088_s20 + $0x948] sm:$0xff] }
  0xcd   : > { %15463 = vst [vmem:[#allocation313_spill] sm:$0xff] %v12443_v40  ;;  %15464 = vst [vmem:[#allocation314_spill] sm:$0xff] %v12448_v48  ;;  %v12453_v55 = vld [vmem:[%s15088_s20 + $0x950] sm:$0xff]  ;;  %v12458_v0 = vld [vmem:[%s15088_s20 + $0x958] sm:$0xff] }
  0xce   : > { %15465 = vst [vmem:[#allocation315_spill] sm:$0xff] %v12453_v55  ;;  %15466 = vst [vmem:[#allocation316_spill] sm:$0xff] %v12458_v0  ;;  %v12463_v56 = vld [vmem:[%s15088_s20 + $0x960] sm:$0xff]  ;;  %v12468_v40 = vld [vmem:[%s15088_s20 + $0x968] sm:$0xff] }
  0xcf   : > { %15467 = vst [vmem:[#allocation317_spill] sm:$0xff] %v12463_v56  ;;  %15468 = vst [vmem:[#allocation318_spill] sm:$0xff] %v12468_v40  ;;  %v12473_v48 = vld [vmem:[%s15088_s20 + $0x970] sm:$0xff]  ;;  %v12478_v55 = vld [vmem:[%s15088_s20 + $0x978] sm:$0xff] }
  0xd0   : > { %15469 = vst [vmem:[#allocation319_spill] sm:$0xff] %v12473_v48  ;;  %15470 = vst [vmem:[#allocation320_spill] sm:$0xff] %v12478_v55  ;;  %v12483_v0 = vld [vmem:[%s15088_s20 + $0x980] sm:$0xff]  ;;  %v12488_v56 = vld [vmem:[%s15088_s20 + $0x988] sm:$0xff] }
  0xd1   : > { %15471 = vst [vmem:[#allocation321_spill] sm:$0xff] %v12483_v0  ;;  %15472 = vst [vmem:[#allocation322_spill] sm:$0xff] %v12488_v56  ;;  %v12493_v40 = vld [vmem:[%s15088_s20 + $0x990] sm:$0xff]  ;;  %v12498_v48 = vld [vmem:[%s15088_s20 + $0x998] sm:$0xff] }
  0xd2   : > { %15473 = vst [vmem:[#allocation323_spill] sm:$0xff] %v12493_v40  ;;  %15474 = vst [vmem:[#allocation324_spill] sm:$0xff] %v12498_v48  ;;  %v12503_v55 = vld [vmem:[%s15088_s20 + $0x9a0] sm:$0xff]  ;;  %v12508_v0 = vld [vmem:[%s15088_s20 + $0x9a8] sm:$0xff] }
  0xd3   : > { %15475 = vst [vmem:[#allocation325_spill] sm:$0xff] %v12503_v55  ;;  %15476 = vst [vmem:[#allocation326_spill] sm:$0xff] %v12508_v0  ;;  %v12513_v56 = vld [vmem:[%s15088_s20 + $0x9b0] sm:$0xff]  ;;  %v12518_v40 = vld [vmem:[%s15088_s20 + $0x9b8] sm:$0xff] }
  0xd4   : > { %15477 = vst [vmem:[#allocation327_spill] sm:$0xff] %v12513_v56  ;;  %15478 = vst [vmem:[#allocation328_spill] sm:$0xff] %v12518_v40  ;;  %v12523_v48 = vld [vmem:[%s15088_s20 + $0x9c0] sm:$0xff]  ;;  %v12528_v55 = vld [vmem:[%s15088_s20 + $0x9c8] sm:$0xff] }
  0xd5   : > { %15479 = vst [vmem:[#allocation329_spill] sm:$0xff] %v12523_v48  ;;  %15480 = vst [vmem:[#allocation330_spill] sm:$0xff] %v12528_v55  ;;  %v12533_v0 = vld [vmem:[%s15088_s20 + $0x9d0] sm:$0xff]  ;;  %v12538_v56 = vld [vmem:[%s15088_s20 + $0x9d8] sm:$0xff] }
  0xd6   : > { %15481 = vst [vmem:[#allocation331_spill] sm:$0xff] %v12533_v0  ;;  %15482 = vst [vmem:[#allocation332_spill] sm:$0xff] %v12538_v56  ;;  %v12543_v40 = vld [vmem:[%s15088_s20 + $0x9e0] sm:$0xff]  ;;  %v12548_v48 = vld [vmem:[%s15088_s20 + $0x9e8] sm:$0xff] }
  0xd7   : > { %15483 = vst [vmem:[#allocation333_spill] sm:$0xff] %v12543_v40  ;;  %15484 = vst [vmem:[#allocation334_spill] sm:$0xff] %v12548_v48  ;;  %v12553_v55 = vld [vmem:[%s15088_s20 + $0x9f0] sm:$0xff]  ;;  %v12558_v0 = vld [vmem:[%s15088_s20 + $0x9f8] sm:$0xff] }
  0xd8   : > { %15485 = vst [vmem:[#allocation335_spill] sm:$0xff] %v12553_v55  ;;  %15486 = vst [vmem:[#allocation336_spill] sm:$0xff] %v12558_v0  ;;  %v12563_v56 = vld [vmem:[%s15088_s20 + $0xa00] sm:$0xff]  ;;  %v12568_v40 = vld [vmem:[%s15088_s20 + $0xa08] sm:$0xff] }
  0xd9   : > { %15487 = vst [vmem:[#allocation337_spill] sm:$0xff] %v12563_v56  ;;  %15488 = vst [vmem:[#allocation338_spill] sm:$0xff] %v12568_v40  ;;  %v12573_v48 = vld [vmem:[%s15088_s20 + $0xa10] sm:$0xff]  ;;  %v12578_v55 = vld [vmem:[%s15088_s20 + $0xa18] sm:$0xff] }
  0xda   : > { %15489 = vst [vmem:[#allocation339_spill] sm:$0xff] %v12573_v48  ;;  %15490 = vst [vmem:[#allocation340_spill] sm:$0xff] %v12578_v55  ;;  %v12583_v0 = vld [vmem:[%s15088_s20 + $0xa20] sm:$0xff]  ;;  %v12588_v56 = vld [vmem:[%s15088_s20 + $0xa28] sm:$0xff] }
  0xdb   : > { %15491 = vst [vmem:[#allocation341_spill] sm:$0xff] %v12583_v0  ;;  %15492 = vst [vmem:[#allocation342_spill] sm:$0xff] %v12588_v56  ;;  %v12593_v40 = vld [vmem:[%s15088_s20 + $0xa30] sm:$0xff]  ;;  %v12598_v48 = vld [vmem:[%s15088_s20 + $0xa38] sm:$0xff] }
  0xdc   : > { %15493 = vst [vmem:[#allocation343_spill] sm:$0xff] %v12593_v40  ;;  %15494 = vst [vmem:[#allocation344_spill] sm:$0xff] %v12598_v48  ;;  %v12603_v55 = vld [vmem:[%s15088_s20 + $0xa40] sm:$0xff]  ;;  %v12608_v0 = vld [vmem:[%s15088_s20 + $0xa48] sm:$0xff] }
  0xdd   : > { %15495 = vst [vmem:[#allocation345_spill] sm:$0xff] %v12603_v55  ;;  %15496 = vst [vmem:[#allocation346_spill] sm:$0xff] %v12608_v0  ;;  %v12613_v56 = vld [vmem:[%s15088_s20 + $0xa50] sm:$0xff]  ;;  %v12618_v40 = vld [vmem:[%s15088_s20 + $0xa58] sm:$0xff] }
  0xde   : > { %15497 = vst [vmem:[#allocation347_spill] sm:$0xff] %v12613_v56  ;;  %15498 = vst [vmem:[#allocation348_spill] sm:$0xff] %v12618_v40  ;;  %v12623_v48 = vld [vmem:[%s15088_s20 + $0xa60] sm:$0xff]  ;;  %v12628_v55 = vld [vmem:[%s15088_s20 + $0xa68] sm:$0xff] }
  0xdf   : > { %15499 = vst [vmem:[#allocation349_spill] sm:$0xff] %v12623_v48  ;;  %15500 = vst [vmem:[#allocation350_spill] sm:$0xff] %v12628_v55  ;;  %v12633_v0 = vld [vmem:[%s15088_s20 + $0xa70] sm:$0xff]  ;;  %v12638_v56 = vld [vmem:[%s15088_s20 + $0xa78] sm:$0xff] }
  0xe0   : > { %15501 = vst [vmem:[#allocation351_spill] sm:$0xff] %v12633_v0  ;;  %15502 = vst [vmem:[#allocation352_spill] sm:$0xff] %v12638_v56  ;;  %v12643_v40 = vld [vmem:[%s15088_s20 + $0xa80] sm:$0xff]  ;;  %v12648_v48 = vld [vmem:[%s15088_s20 + $0xa88] sm:$0xff] }
  0xe1   : > { %15503 = vst [vmem:[#allocation353_spill] sm:$0xff] %v12643_v40  ;;  %15504 = vst [vmem:[#allocation354_spill] sm:$0xff] %v12648_v48  ;;  %v12653_v55 = vld [vmem:[%s15088_s20 + $0xa90] sm:$0xff]  ;;  %v12658_v0 = vld [vmem:[%s15088_s20 + $0xa98] sm:$0xff] }
  0xe2   : > { %15505 = vst [vmem:[#allocation355_spill] sm:$0xff] %v12653_v55  ;;  %15506 = vst [vmem:[#allocation356_spill] sm:$0xff] %v12658_v0  ;;  %v12663_v56 = vld [vmem:[%s15088_s20 + $0xaa0] sm:$0xff]  ;;  %v12668_v40 = vld [vmem:[%s15088_s20 + $0xaa8] sm:$0xff] }
  0xe3   : > { %15507 = vst [vmem:[#allocation357_spill] sm:$0xff] %v12663_v56  ;;  %15508 = vst [vmem:[#allocation358_spill] sm:$0xff] %v12668_v40  ;;  %v12673_v48 = vld [vmem:[%s15088_s20 + $0xab0] sm:$0xff]  ;;  %v12678_v55 = vld [vmem:[%s15088_s20 + $0xab8] sm:$0xff] }
  0xe4   : > { %15509 = vst [vmem:[#allocation359_spill] sm:$0xff] %v12673_v48  ;;  %15510 = vst [vmem:[#allocation360_spill] sm:$0xff] %v12678_v55  ;;  %v12683_v0 = vld [vmem:[%s15088_s20 + $0xac0] sm:$0xff]  ;;  %v12688_v56 = vld [vmem:[%s15088_s20 + $0xac8] sm:$0xff] }
  0xe5   : > { %15511 = vst [vmem:[#allocation361_spill] sm:$0xff] %v12683_v0  ;;  %15512 = vst [vmem:[#allocation362_spill] sm:$0xff] %v12688_v56  ;;  %v12693_v40 = vld [vmem:[%s15088_s20 + $0xad0] sm:$0xff]  ;;  %v12698_v48 = vld [vmem:[%s15088_s20 + $0xad8] sm:$0xff] }
  0xe6   : > { %15513 = vst [vmem:[#allocation363_spill] sm:$0xff] %v12693_v40  ;;  %15514 = vst [vmem:[#allocation364_spill] sm:$0xff] %v12698_v48  ;;  %v12703_v55 = vld [vmem:[%s15088_s20 + $0xae0] sm:$0xff]  ;;  %v12708_v0 = vld [vmem:[%s15088_s20 + $0xae8] sm:$0xff] }
  0xe7   : > { %15515 = vst [vmem:[#allocation365_spill] sm:$0xff] %v12703_v55  ;;  %15516 = vst [vmem:[#allocation366_spill] sm:$0xff] %v12708_v0  ;;  %v12713_v56 = vld [vmem:[%s15088_s20 + $0xaf0] sm:$0xff]  ;;  %v12718_v40 = vld [vmem:[%s15088_s20 + $0xaf8] sm:$0xff] }
  0xe8   : > { %15517 = vst [vmem:[#allocation367_spill] sm:$0xff] %v12713_v56  ;;  %15518 = vst [vmem:[#allocation368_spill] sm:$0xff] %v12718_v40  ;;  %v12723_v48 = vld [vmem:[%s15088_s20 + $0xb00] sm:$0xff]  ;;  %v12728_v55 = vld [vmem:[%s15088_s20 + $0xb08] sm:$0xff] }
  0xe9   : > { %15519 = vst [vmem:[#allocation369_spill] sm:$0xff] %v12723_v48  ;;  %15520 = vst [vmem:[#allocation370_spill] sm:$0xff] %v12728_v55  ;;  %v12733_v0 = vld [vmem:[%s15088_s20 + $0xb10] sm:$0xff]  ;;  %v12738_v56 = vld [vmem:[%s15088_s20 + $0xb18] sm:$0xff] }
  0xea   : > { %15521 = vst [vmem:[#allocation371_spill] sm:$0xff] %v12733_v0  ;;  %15522 = vst [vmem:[#allocation372_spill] sm:$0xff] %v12738_v56  ;;  %v12743_v40 = vld [vmem:[%s15088_s20 + $0xb20] sm:$0xff]  ;;  %v12748_v48 = vld [vmem:[%s15088_s20 + $0xb28] sm:$0xff] }
  0xeb   : > { %15523 = vst [vmem:[#allocation373_spill] sm:$0xff] %v12743_v40  ;;  %15524 = vst [vmem:[#allocation374_spill] sm:$0xff] %v12748_v48  ;;  %v12753_v55 = vld [vmem:[%s15088_s20 + $0xb30] sm:$0xff]  ;;  %v12758_v0 = vld [vmem:[%s15088_s20 + $0xb38] sm:$0xff] }
  0xec   : > { %15525 = vst [vmem:[#allocation375_spill] sm:$0xff] %v12753_v55  ;;  %15526 = vst [vmem:[#allocation376_spill] sm:$0xff] %v12758_v0 }
  0xed   : > { %1596 = vsyncadd [#allocation6 + $0x4], 9216  ;;  %v12763_v40 = vld [vmem:[%s15088_s20 + $0xb40] sm:$0xff]  ;;  %v12768_v48 = vld [vmem:[%s15088_s20 + $0xb48] sm:$0xff] }
  0xee   : > { %15527 = vst [vmem:[#allocation377_spill] sm:$0xff] %v12763_v40  ;;  %15528 = vst [vmem:[#allocation378_spill] sm:$0xff] %v12768_v48  ;;  %v12773_v55 = vld [vmem:[%s15088_s20 + $0xb50] sm:$0xff]  ;;  %v12778_v0 = vld [vmem:[%s15088_s20 + $0xb58] sm:$0xff] }
  0xef   : > { %15529 = vst [vmem:[#allocation379_spill] sm:$0xff] %v12773_v55  ;;  %15530 = vst [vmem:[#allocation380_spill] sm:$0xff] %v12778_v0  ;;  %v12783_v56 = vld [vmem:[%s15088_s20 + $0xb60] sm:$0xff]  ;;  %v12788_v40 = vld [vmem:[%s15088_s20 + $0xb68] sm:$0xff] }
  0xf0   : > { %15531 = vst [vmem:[#allocation381_spill] sm:$0xff] %v12783_v56  ;;  %15532 = vst [vmem:[#allocation382_spill] sm:$0xff] %v12788_v40  ;;  %v12793_v48 = vld [vmem:[%s15088_s20 + $0xb70] sm:$0xff]  ;;  %v12798_v55 = vld [vmem:[%s15088_s20 + $0xb78] sm:$0xff] }
  0xf1   : > { %15533 = vst [vmem:[#allocation383_spill] sm:$0xff] %v12793_v48  ;;  %15534 = vst [vmem:[#allocation384_spill] sm:$0xff] %v12798_v55  ;;  %v12803_v0 = vld [vmem:[%s15088_s20 + $0xb80] sm:$0xff]  ;;  %v12808_v56 = vld [vmem:[%s15088_s20 + $0xb88] sm:$0xff] }
  0xf2   : > { %15535 = vst [vmem:[#allocation385_spill] sm:$0xff] %v12803_v0  ;;  %15536 = vst [vmem:[#allocation386_spill] sm:$0xff] %v12808_v56  ;;  %v12813_v40 = vld [vmem:[%s15088_s20 + $0xb90] sm:$0xff]  ;;  %v12818_v48 = vld [vmem:[%s15088_s20 + $0xb98] sm:$0xff] }
  0xf3   : > { %15537 = vst [vmem:[#allocation387_spill] sm:$0xff] %v12813_v40  ;;  %15538 = vst [vmem:[#allocation388_spill] sm:$0xff] %v12818_v48  ;;  %v12823_v55 = vld [vmem:[%s15088_s20 + $0xba0] sm:$0xff]  ;;  %v12828_v0 = vld [vmem:[%s15088_s20 + $0xba8] sm:$0xff] }
  0xf4   : > { %15539 = vst [vmem:[#allocation389_spill] sm:$0xff] %v12823_v55  ;;  %15540 = vst [vmem:[#allocation390_spill] sm:$0xff] %v12828_v0  ;;  %v12833_v56 = vld [vmem:[%s15088_s20 + $0xbb0] sm:$0xff]  ;;  %v12838_v40 = vld [vmem:[%s15088_s20 + $0xbb8] sm:$0xff] }
  0xf5   : > { %15541 = vst [vmem:[#allocation391_spill] sm:$0xff] %v12833_v56  ;;  %15542 = vst [vmem:[#allocation392_spill] sm:$0xff] %v12838_v40  ;;  %v12843_v48 = vld [vmem:[%s15088_s20 + $0xbc0] sm:$0xff]  ;;  %v12848_v55 = vld [vmem:[%s15088_s20 + $0xbc8] sm:$0xff] }
  0xf6   : > { %15543 = vst [vmem:[#allocation393_spill] sm:$0xff] %v12843_v48  ;;  %15544 = vst [vmem:[#allocation394_spill] sm:$0xff] %v12848_v55  ;;  %v12853_v0 = vld [vmem:[%s15088_s20 + $0xbd0] sm:$0xff]  ;;  %v12858_v56 = vld [vmem:[%s15088_s20 + $0xbd8] sm:$0xff] }
  0xf7   : > { %15545 = vst [vmem:[#allocation395_spill] sm:$0xff] %v12853_v0  ;;  %15546 = vst [vmem:[#allocation396_spill] sm:$0xff] %v12858_v56  ;;  %v12863_v40 = vld [vmem:[%s15088_s20 + $0xbe0] sm:$0xff]  ;;  %v12868_v48 = vld [vmem:[%s15088_s20 + $0xbe8] sm:$0xff] }
  0xf8   : > { %15547 = vst [vmem:[#allocation397_spill] sm:$0xff] %v12863_v40  ;;  %15548 = vst [vmem:[#allocation398_spill] sm:$0xff] %v12868_v48  ;;  %v12873_v55 = vld [vmem:[%s15088_s20 + $0xbf0] sm:$0xff]  ;;  %v12878_v0 = vld [vmem:[%s15088_s20 + $0xbf8] sm:$0xff] }
  0xf9   : > { %15549 = vst [vmem:[#allocation399_spill] sm:$0xff] %v12873_v55  ;;  %15550 = vst [vmem:[#allocation400_spill] sm:$0xff] %v12878_v0  ;;  %v12883_v56 = vld [vmem:[%s15088_s20 + $0xc00] sm:$0xff]  ;;  %v12888_v40 = vld [vmem:[%s15088_s20 + $0xc08] sm:$0xff] }
  0xfa   : > { %15551 = vst [vmem:[#allocation401_spill] sm:$0xff] %v12883_v56  ;;  %15552 = vst [vmem:[#allocation402_spill] sm:$0xff] %v12888_v40  ;;  %v12893_v48 = vld [vmem:[%s15088_s20 + $0xc10] sm:$0xff]  ;;  %v12898_v55 = vld [vmem:[%s15088_s20 + $0xc18] sm:$0xff] }
  0xfb   : > { %15553 = vst [vmem:[#allocation403_spill] sm:$0xff] %v12893_v48  ;;  %15554 = vst [vmem:[#allocation404_spill] sm:$0xff] %v12898_v55  ;;  %v12903_v0 = vld [vmem:[%s15088_s20 + $0xc20] sm:$0xff]  ;;  %v12908_v56 = vld [vmem:[%s15088_s20 + $0xc28] sm:$0xff] }
  0xfc   : > { %15555 = vst [vmem:[#allocation405_spill] sm:$0xff] %v12903_v0  ;;  %15556 = vst [vmem:[#allocation406_spill] sm:$0xff] %v12908_v56  ;;  %v12913_v40 = vld [vmem:[%s15088_s20 + $0xc30] sm:$0xff]  ;;  %v12918_v48 = vld [vmem:[%s15088_s20 + $0xc38] sm:$0xff] }
  0xfd   : > { %15557 = vst [vmem:[#allocation407_spill] sm:$0xff] %v12913_v40  ;;  %15558 = vst [vmem:[#allocation408_spill] sm:$0xff] %v12918_v48  ;;  %v12923_v55 = vld [vmem:[%s15088_s20 + $0xc40] sm:$0xff]  ;;  %v12928_v0 = vld [vmem:[%s15088_s20 + $0xc48] sm:$0xff] }
  0xfe   : > { %15559 = vst [vmem:[#allocation409_spill] sm:$0xff] %v12923_v55  ;;  %15560 = vst [vmem:[#allocation410_spill] sm:$0xff] %v12928_v0  ;;  %v12933_v56 = vld [vmem:[%s15088_s20 + $0xc50] sm:$0xff]  ;;  %v12938_v40 = vld [vmem:[%s15088_s20 + $0xc58] sm:$0xff] }
  0xff   : > { %15561 = vst [vmem:[#allocation411_spill] sm:$0xff] %v12933_v56  ;;  %15562 = vst [vmem:[#allocation412_spill] sm:$0xff] %v12938_v40  ;;  %v12943_v48 = vld [vmem:[%s15088_s20 + $0xc60] sm:$0xff]  ;;  %v12948_v55 = vld [vmem:[%s15088_s20 + $0xc68] sm:$0xff] }
 0x100   : > { %15563 = vst [vmem:[#allocation413_spill] sm:$0xff] %v12943_v48  ;;  %15564 = vst [vmem:[#allocation414_spill] sm:$0xff] %v12948_v55  ;;  %v12953_v0 = vld [vmem:[%s15088_s20 + $0xc70] sm:$0xff]  ;;  %v12958_v56 = vld [vmem:[%s15088_s20 + $0xc78] sm:$0xff] }
 0x101   : > { %15565 = vst [vmem:[#allocation415_spill] sm:$0xff] %v12953_v0  ;;  %15566 = vst [vmem:[#allocation416_spill] sm:$0xff] %v12958_v56  ;;  %v12963_v40 = vld [vmem:[%s15088_s20 + $0xc80] sm:$0xff]  ;;  %v12968_v48 = vld [vmem:[%s15088_s20 + $0xc88] sm:$0xff] }
 0x102   : > { %15567 = vst [vmem:[#allocation417_spill] sm:$0xff] %v12963_v40  ;;  %15568 = vst [vmem:[#allocation418_spill] sm:$0xff] %v12968_v48  ;;  %v12973_v55 = vld [vmem:[%s15088_s20 + $0xc90] sm:$0xff]  ;;  %v12978_v0 = vld [vmem:[%s15088_s20 + $0xc98] sm:$0xff] }
 0x103   : > { %15569 = vst [vmem:[#allocation419_spill] sm:$0xff] %v12973_v55  ;;  %15570 = vst [vmem:[#allocation420_spill] sm:$0xff] %v12978_v0  ;;  %v12983_v56 = vld [vmem:[%s15088_s20 + $0xca0] sm:$0xff]  ;;  %v12988_v40 = vld [vmem:[%s15088_s20 + $0xca8] sm:$0xff] }
 0x104   : > { %15571 = vst [vmem:[#allocation421_spill] sm:$0xff] %v12983_v56  ;;  %15572 = vst [vmem:[#allocation422_spill] sm:$0xff] %v12988_v40  ;;  %v12993_v48 = vld [vmem:[%s15088_s20 + $0xcb0] sm:$0xff]  ;;  %v12998_v55 = vld [vmem:[%s15088_s20 + $0xcb8] sm:$0xff] }
 0x105   : > { %15573 = vst [vmem:[#allocation423_spill] sm:$0xff] %v12993_v48  ;;  %15574 = vst [vmem:[#allocation424_spill] sm:$0xff] %v12998_v55  ;;  %v13003_v0 = vld [vmem:[%s15088_s20 + $0xcc0] sm:$0xff]  ;;  %v13008_v56 = vld [vmem:[%s15088_s20 + $0xcc8] sm:$0xff] }
 0x106   : > { %15575 = vst [vmem:[#allocation425_spill] sm:$0xff] %v13003_v0  ;;  %15576 = vst [vmem:[#allocation426_spill] sm:$0xff] %v13008_v56  ;;  %v13013_v40 = vld [vmem:[%s15088_s20 + $0xcd0] sm:$0xff]  ;;  %v13018_v48 = vld [vmem:[%s15088_s20 + $0xcd8] sm:$0xff] }
 0x107   : > { %15577 = vst [vmem:[#allocation427_spill] sm:$0xff] %v13013_v40  ;;  %15578 = vst [vmem:[#allocation428_spill] sm:$0xff] %v13018_v48  ;;  %v13023_v55 = vld [vmem:[%s15088_s20 + $0xce0] sm:$0xff]  ;;  %v13028_v0 = vld [vmem:[%s15088_s20 + $0xce8] sm:$0xff] }
 0x108   : > { %15579 = vst [vmem:[#allocation429_spill] sm:$0xff] %v13023_v55  ;;  %15580 = vst [vmem:[#allocation430_spill] sm:$0xff] %v13028_v0  ;;  %v13033_v56 = vld [vmem:[%s15088_s20 + $0xcf0] sm:$0xff]  ;;  %v13038_v40 = vld [vmem:[%s15088_s20 + $0xcf8] sm:$0xff] }
 0x109   : > { %15581 = vst [vmem:[#allocation431_spill] sm:$0xff] %v13033_v56  ;;  %15582 = vst [vmem:[#allocation432_spill] sm:$0xff] %v13038_v40  ;;  %v13043_v48 = vld [vmem:[%s15088_s20 + $0xd00] sm:$0xff]  ;;  %v13048_v55 = vld [vmem:[%s15088_s20 + $0xd08] sm:$0xff] }
 0x10a   : > { %15583 = vst [vmem:[#allocation433_spill] sm:$0xff] %v13043_v48  ;;  %15584 = vst [vmem:[#allocation434_spill] sm:$0xff] %v13048_v55  ;;  %v13053_v0 = vld [vmem:[%s15088_s20 + $0xd10] sm:$0xff]  ;;  %v13058_v56 = vld [vmem:[%s15088_s20 + $0xd18] sm:$0xff] }
 0x10b   : > { %15585 = vst [vmem:[#allocation435_spill] sm:$0xff] %v13053_v0  ;;  %15586 = vst [vmem:[#allocation436_spill] sm:$0xff] %v13058_v56  ;;  %v13063_v40 = vld [vmem:[%s15088_s20 + $0xd20] sm:$0xff]  ;;  %v13068_v48 = vld [vmem:[%s15088_s20 + $0xd28] sm:$0xff] }
 0x10c   : > { %15587 = vst [vmem:[#allocation437_spill] sm:$0xff] %v13063_v40  ;;  %15588 = vst [vmem:[#allocation438_spill] sm:$0xff] %v13068_v48  ;;  %v13073_v55 = vld [vmem:[%s15088_s20 + $0xd30] sm:$0xff]  ;;  %v13078_v0 = vld [vmem:[%s15088_s20 + $0xd38] sm:$0xff] }
 0x10d   : > { %15589 = vst [vmem:[#allocation439_spill] sm:$0xff] %v13073_v55  ;;  %15590 = vst [vmem:[#allocation440_spill] sm:$0xff] %v13078_v0  ;;  %v13083_v56 = vld [vmem:[%s15088_s20 + $0xd40] sm:$0xff]  ;;  %v13088_v40 = vld [vmem:[%s15088_s20 + $0xd48] sm:$0xff] }
 0x10e   : > { %15591 = vst [vmem:[#allocation441_spill] sm:$0xff] %v13083_v56  ;;  %15592 = vst [vmem:[#allocation442_spill] sm:$0xff] %v13088_v40  ;;  %v13093_v48 = vld [vmem:[%s15088_s20 + $0xd50] sm:$0xff]  ;;  %v13098_v55 = vld [vmem:[%s15088_s20 + $0xd58] sm:$0xff] }
 0x10f   : > { %15593 = vst [vmem:[#allocation443_spill] sm:$0xff] %v13093_v48  ;;  %15594 = vst [vmem:[#allocation444_spill] sm:$0xff] %v13098_v55  ;;  %v13103_v0 = vld [vmem:[%s15088_s20 + $0xd60] sm:$0xff]  ;;  %v13108_v56 = vld [vmem:[%s15088_s20 + $0xd68] sm:$0xff] }
 0x110   : > { %15595 = vst [vmem:[#allocation445_spill] sm:$0xff] %v13103_v0  ;;  %15596 = vst [vmem:[#allocation446_spill] sm:$0xff] %v13108_v56  ;;  %v13113_v40 = vld [vmem:[%s15088_s20 + $0xd70] sm:$0xff]  ;;  %v13118_v48 = vld [vmem:[%s15088_s20 + $0xd78] sm:$0xff] }
 0x111   : > { %15597 = vst [vmem:[#allocation447_spill] sm:$0xff] %v13113_v40  ;;  %15598 = vst [vmem:[#allocation448_spill] sm:$0xff] %v13118_v48 }
 0x112   : > { %1783 = vsyncadd [#allocation6 + $0x5], 9216  ;;  %s15599_s29 = sld [smem:[#allocation458_spill]]  ;;  %vm1957_vm0 = vcmask 1044480   ;;  %vm15140_vm1 = vcmask 1045504   ;;  %v1806_v40 = vld [vmem:[%s10953_s23] sm:$0xff] }
 0x113   : > { %v15136_v48 = vmov 65535   ;;  %v1807_v63 = vld [vmem:[%s10953_s23 + $0x8] sm:$0xff]  ;;  %v1838_v39 = vmax.f32 %v1806_v40, 0.0  ;;  %v1808_v38 = vld [vmem:[%s10953_s23 + $0x10] sm:$0xff]  ;;  %v1809_v62 = vld [vmem:[%s10953_s23 + $0x18] sm:$0xff]  ;;  %vm1908_vm2 = vcmask 220160  }
 0x114   : > { %v1959_v55 = vsel %vm1957_vm0, 4294967295, %v15136_v48  ;;  %v1839_v54 = vmax.f32 %v1807_v63, 0.0  ;;  %v1840_v53 = vmax.f32 %v1808_v38, 0.0  ;;  %v1841_v61 = vmax.f32 %v1809_v62, 0.0  ;;  %v1810_v37 = vld [vmem:[%s10953_s23 + $0x20] sm:$0xff]  ;;  %v1811_v48 = vld [vmem:[%s10953_s23 + $0x28] sm:$0xff] }
 0x115   : > { %v1960_v47 = vsel %vm15140_vm1, %v1959_v55, 0  ;;  %v1812_v40 = vld [vmem:[%s10953_s23 + $0x30] sm:$0xff]  ;;  %v1842_v52 = vmax.f32 %v1810_v37, 0.0  ;;  %v1843_v55 = vmax.f32 %v1811_v48, 0.0  ;;  %v1813_v45 = vld [vmem:[%s10953_s23 + $0x38] sm:$0xff]  ;;  %v1814_v63 = vld [vmem:[%s10953_s23 + $0x40] sm:$0xff] }
 0x116   : > { %v1815_v36 = vld [vmem:[%s10953_s23 + $0x48] sm:$0xff]  ;;  %v1817_v38 = vld [vmem:[%s10953_s23 + $0x58] sm:$0xff]  ;;  %v1818_v62 = vld [vmem:[%s10953_s23 + $0x60] sm:$0xff]  ;;  %v1844_v60 = vmax.f32 %v1812_v40, 0.0  ;;  %v1845_v51 = vmax.f32 %v1813_v45, 0.0  ;;  %v1846_v44 = vmax.f32 %v1814_v63, 0.0 }
 0x117   : > { %v1819_v37 = vld [vmem:[%s10953_s23 + $0x68] sm:$0xff]  ;;  %v1820_v48 = vld [vmem:[%s10953_s23 + $0x70] sm:$0xff]  ;;  %v1847_v35 = vmax.f32 %v1815_v36, 0.0  ;;  %v1850_v40 = vmax.f32 %v1818_v62, 0.0  ;;  %v1829_v34 = vld [vmem:[%s10953_s23 + $0xb8] sm:$0xff]  ;;  %s15600_s6 = sld [smem:[#allocation456_spill]] }
 0x118   : > { %v10608_v0 = vld [vmem:[%s15599_s29] sm:$0xff]   ;;  %v10609_v56 = vld [vmem:[%s15599_s29 + $0x8] sm:$0x3f]   ;;  %v1824_v59 = vld [vmem:[%s10953_s23 + $0x90] sm:$0xff]  ;;  %v1851_v45 = vmax.f32 %v1819_v37, 0.0  ;;  %v1852_v63 = vmax.f32 %v1820_v48, 0.0  ;;  %v1873_v23 = vpack.c.bf16 %v1845_v51, %v1844_v60 }
 0x119   : > { %10249 = vmatprep.subr.bf16.mxu0 %v10608_v0  ;;  %v1962_v46 = vand.u32 %v10609_v56, %v1960_v47  ;;  %v1871_v47 = vpack.c.bf16 %v1841_v61, %v1840_v53  ;;  %v1816_v56 = vld [vmem:[%s10953_s23 + $0x50] sm:$0xff]  ;;  %v1822_v53 = vld [vmem:[%s10953_s23 + $0x80] sm:$0xff]  ;;  %v1823_v61 = vld [vmem:[%s10953_s23 + $0x88] sm:$0xff]  ;;  %v1856_v57 = vmax.f32 %v1824_v59, 0.0  ;;  %v1861_v32 = vmax.f32 %v1829_v34, 0.0  ;;  %s15601_s3 = sld [smem:[#allocation459_spill]] }
 0x11a   : > { %10250 = vmatpush3.bf16.msra.mxu0 %v10608_v0  ;;  %v1870_v0 = vpack.c.bf16 %v1839_v54, %v1838_v39  ;;  %v1872_v39 = vpack.c.bf16 %v1843_v55, %v1842_v52  ;;  %v1821_v54 = vld [vmem:[%s10953_s23 + $0x78] sm:$0xff]  ;;  %v1848_v50 = vmax.f32 %v1816_v56, 0.0  ;;  %v1826_v52 = vld [vmem:[%s10953_s23 + $0xa0] sm:$0xff]  ;;  %v1827_v55 = vld [vmem:[%s10953_s23 + $0xa8] sm:$0xff]  ;;  %v1854_v56 = vmax.f32 %v1822_v53, 0.0 }
 0x11b   : > { %10251 = vmatprep.subr.bf16.mxu0 %v1962_v46  ;;  %v1828_v43 = vld [vmem:[%s10953_s23 + $0xb0] sm:$0xff]  ;;  %v1830_v58 = vld [vmem:[%s10953_s23 + $0xc0] sm:$0xff]  ;;  %v1853_v36 = vmax.f32 %v1821_v54, 0.0  ;;  %v1831_v49 = vld [vmem:[%s10953_s23 + $0xc8] sm:$0xff]  ;;  %v1858_v62 = vmax.f32 %v1826_v52, 0.0  ;;  %v1859_v48 = vmax.f32 %v1827_v55, 0.0  ;;  %v1874_v54 = vpack.c.bf16 %v1847_v35, %v1846_v44 }
 0x11c   : > { %10253 = vmatprep.mubr.msk.bf16.mxu0 %vm1908_vm2, %v1870_v0  ;;  %v1825_v0 = vld [vmem:[%s10953_s23 + $0x98] sm:$0xff]  ;;  %v1832_v42 = vld [vmem:[%s10953_s23 + $0xd0] sm:$0xff]  ;;  %v1834_v41 = vld [vmem:[%s10953_s23 + $0xe0] sm:$0xff]  ;;  %v1860_v8 = vmax.f32 %v1828_v43, 0.0  ;;  %v1862_v7 = vmax.f32 %v1830_v58, 0.0  ;;  %vm1784_vm3 = vcmask 1047555  }
 0x11d   : > { %v1833_v33 = vld [vmem:[%s10953_s23 + $0xd8] sm:$0xff]  ;;  %v1835_v37 = vld [vmem:[%s10953_s23 + $0xe8] sm:$0xff]  ;;  %v1836_v24 = vld [vmem:[%s10953_s23 + $0xf0] sm:$0xff]  ;;  %v1864_v31 = vmax.f32 %v1832_v42, 0.0  ;;  %v1877_v34 = vpack.c.bf16 %v1853_v36, %v1852_v63  ;;  %v1880_v35 = vpack.c.bf16 %v1859_v48, %v1858_v62  ;;  %vm1785_vm4 = vsmask.f32 7950 }
 0x11e   : > { %10252 = vmatpush3.bf16.msra.mxu0 %v1962_v46  ;;  %v1849_v46 = vmax.f32 %v1817_v38, 0.0  ;;  %v1855_v38 = vmax.f32 %v1823_v61, 0.0  ;;  %v1837_v16 = vld [vmem:[%s10953_s23 + $0xf8] sm:$0xff]  ;;  %v1865_v53 = vmax.f32 %v1833_v33, 0.0  ;;  %v1866_v61 = vmax.f32 %v1834_v41, 0.0  ;;  %vm1786_vm5 = vmand %vm1784_vm3, %vm1785_vm4 }
 0x11f   : > { %v1867_v15 = vmax.f32 %v1835_v37, 0.0  ;;  %v1868_v22 = vmax.f32 %v1836_v24, 0.0  ;;  %v1869_v6 = vmax.f32 %v1837_v16, 0.0  ;;  %v1881_v16 = vpack.c.bf16 %v1861_v32, %v1860_v8  ;;  %v10612_v44 = vld [vmem:[%s15600_s6 + $0x4] ss:$8 sps:$4 sm:$0xff]   ;;  %v10687_v18 = vld [vmem:[#allocation8 + $0x1f8] sm:$0xff]  }
 0x120   : > { %v1875_v59 = vpack.c.bf16 %v1849_v46, %v1848_v50  ;;  %v1878_v43 = vpack.c.bf16 %v1855_v38, %v1854_v56  ;;  %v1883_v24 = vpack.c.bf16 %v1865_v53, %v1864_v31  ;;  %2265 = vmatprep.mubr.bf16.mxu1 %v10612_v44  ;;  %vm1797_vm6 = vcmask 1046531  }
 0x121   : > { %10254 = vmatmul.mubr.msk.bf16.vlgmr.msra.gmra.mrb[0].mxu0 %vm1908_vm2, %v1871_v47  ;;  %v1857_v47 = vmax.f32 %v1825_v0, 0.0  ;;  %v1876_v0 = vpack.c.bf16 %v1851_v45, %v1850_v40  ;;  %v1884_v41 = vpack.c.bf16 %v1867_v15, %v1866_v61  ;;  %v1885_v42 = vpack.c.bf16 %v1869_v6, %v1868_v22  ;;  %vm1798_vm8 = vmand %vm1797_vm6, %vm1785_vm4 }
 0x122   : > { %10257 = vmatprep.mubr.msk.bf16.mxu0 %vm1908_vm2, %v1872_v39  ;;  %v1863_v39 = vmax.f32 %v1831_v49, 0.0  ;;  %vm1791_vm7 = vcmask 1046529   ;;  %vm15143_vm9 = vsmask.f32 6400  ;;  %vm2316_vm12 = vcmask 1040384  }
 0x123   : > { %v1879_v33 = vpack.c.bf16 %v1857_v47, %v1856_v57  ;;  %vm1793_vm10 = vmand %vm1791_vm7, %vm15143_vm9  ;;  %vm2565_vm13 = vcmask 1043456   ;;  %vm2489_vm14 = vsmask.f32 4352  ;;  %vm2593_vm15 = vsmask.f32 3328 }
 0x124   : > { %vm1802_vm11 = vmand %vm1797_vm6, %vm15143_vm9  ;;  %vm15144_vm4 = vcmask 1046528   ;;  %vm2827_vm6 = vsmask.f32 2304  ;;  %vm2931_vm7 = vsmask.f32 1280  ;;  %vm4171_vm1 = vcmask 1047558  }
 0x129   : > { %10258 = vmatmul.mubr.msk.bf16.gmra.mrb[4].mxu0 %vm1908_vm2, %v1873_v23  ;;  %v1882_v23 = vpack.c.bf16 %v1863_v39, %v1862_v7  ;;  %v13183_v7 = vld [vmem:[%s15601_s3] ss:$0 sm:$0xff] }
 0x12a   : > { %10261 = vmatprep.mubr.msk.bf16.mxu0 %vm1908_vm2, %v1874_v54 }
 0x131   : > { %10262 = vmatmul.mubr.msk.bf16.gmra.mrb[8].mxu0 %vm1908_vm2, %v1875_v59 }
 0x132   : > { %10265 = vmatprep.mubr.msk.bf16.mxu0 %vm1908_vm2, %v1876_v0 }
 0x139   : > { %10266 = vmatmul.mubr.msk.bf16.gmra.mrb[12].mxu0 %vm1908_vm2, %v1877_v34 }
 0x13a   : > { %10269 = vmatprep.mubr.msk.bf16.mxu0 %vm1908_vm2, %v1878_v43 }
 0x141   : > { %10270 = vmatmul.mubr.msk.bf16.gmra.mrb[16].mxu0 %vm1908_vm2, %v1879_v33 }
 0x142   : > { %10273 = vmatprep.mubr.msk.bf16.mxu0 %vm1908_vm2, %v1880_v35 }
 0x149   : > { %10274 = vmatmul.mubr.msk.bf16.gmra.mrb[20].mxu0 %vm1908_vm2, %v1881_v16 }
 0x14a   : > { %10277 = vmatprep.mubr.msk.bf16.mxu0 %vm1908_vm2, %v1882_v23 }
 0x151   : > { %10278 = vmatmul.mubr.msk.bf16.gmra.mrb[24].mxu0 %vm1908_vm2, %v1883_v24 }
 0x152   : > { %10281 = vmatprep.mubr.msk.bf16.mxu0 %vm1908_vm2, %v1884_v41 }
 0x159   : > { %10282 = vmatmul.mubr.msk.bf16.gmra.mrb[28].mxu0 %vm1908_vm2, %v1885_v42  ;;  %vm2663_vm2 = vsmask.f32 7424 }
 0x1f4   : > { %v10255_v8 = vpop.f32.mrb[0].mxu0 }
 0x1f5   : > { %v2007_v15 = vadd.f32 %v10255_v8, %v13183_v7  ;;  %v1998_v31 = vpop.f32.mrb[1].mxu0 }
 0x1f6   : > { %v1999_v32 = vadd.f32 %v13183_v7, %v1998_v31  ;;  %v10256_v49 = vpop.f32.mrb[2].mxu0 }
 0x1f7   : > { %v2010_v6 = vadd.f32 %v10256_v49, %v13183_v7  ;;  %v2001_v22 = vpop.f32.mrb[3].mxu0  ;;  %v2127_v51 = vmax.f32 %v2007_v15, 0.0 }
 0x1f8   : > { %v2002_v50 = vadd.f32 %v13183_v7, %v2001_v22  ;;  %v2125_v58 = vmax.f32 %v1999_v32, 0.0 }
 0x1f9   : > { %v2128_v57 = vmax.f32 %v2010_v6, 0.0 }
 0x1fa   : > { %v2126_v60 = vmax.f32 %v2002_v50, 0.0 }
 0x1fb   : > { %v13189_v46 = vpack.c.bf16 %v2128_v57, %v2127_v51 }
 0x1fc   : > { %v10259_v52 = vpop.f32.mrb[4].mxu0  ;;  %v13191_v55 = vpack.c.bf16 %v2126_v60, %v2125_v58 }
 0x1fd   : > { %v2023_v40 = vadd.f32 %v10259_v52, %v13183_v7  ;;  %v2014_v45 = vpop.f32.mrb[5].mxu0 }
 0x1fe   : > { %v2015_v63 = vadd.f32 %v13183_v7, %v2014_v45  ;;  %v10260_v36 = vpop.f32.mrb[6].mxu0 }
 0x1ff   : > { %v2026_v56 = vadd.f32 %v10260_v36, %v13183_v7  ;;  %v2017_v38 = vpop.f32.mrb[7].mxu0  ;;  %v2131_v62 = vmax.f32 %v2023_v40, 0.0 }
 0x200   : > { %v2018_v47 = vadd.f32 %v13183_v7, %v2017_v38  ;;  %v2129_v48 = vmax.f32 %v2015_v63, 0.0 }
 0x201   : > { %v2132_v37 = vmax.f32 %v2026_v56, 0.0 }
 0x202   : > { %v2130_v39 = vmax.f32 %v2018_v47, 0.0 }
 0x203   : > { %v13197_v54 = vpack.c.bf16 %v2132_v37, %v2131_v62 }
 0x204   : > { %v13199_v53 = vpack.c.bf16 %v2130_v39, %v2129_v48  ;;  %v10263_v61 = vpop.f32.mrb[8].mxu0 }
 0x205   : > { %v2039_v59 = vadd.f32 %v10263_v61, %v13183_v7  ;;  %v2030_v0 = vpop.f32.mrb[9].mxu0 }
 0x206   : > { %v2031_v34 = vadd.f32 %v13183_v7, %v2030_v0  ;;  %v10264_v43 = vpop.f32.mrb[10].mxu0 }
 0x207   : > { %v2042_v33 = vadd.f32 %v10264_v43, %v13183_v7  ;;  %v2033_v35 = vpop.f32.mrb[11].mxu0  ;;  %v2135_v23 = vmax.f32 %v2039_v59, 0.0 }
 0x208   : > { %v2034_v16 = vadd.f32 %v13183_v7, %v2033_v35  ;;  %v2133_v41 = vmax.f32 %v2031_v34, 0.0 }
 0x209   : > { %v2136_v24 = vmax.f32 %v2042_v33, 0.0 }
 0x20a   : > { %v2134_v42 = vmax.f32 %v2034_v16, 0.0 }
 0x20b   : > { %v13205_v44 = vpack.c.bf16 %v2136_v24, %v2135_v23 }
 0x20c   : > { %v13207_v8 = vpack.c.bf16 %v2134_v42, %v2133_v41  ;;  %v10267_v15 = vpop.f32.mrb[12].mxu0 }
 0x20d   : > { %v2055_v31 = vadd.f32 %v10267_v15, %v13183_v7  ;;  %v2046_v32 = vpop.f32.mrb[13].mxu0 }
 0x20e   : > { %v2047_v49 = vadd.f32 %v13183_v7, %v2046_v32  ;;  %v10268_v6 = vpop.f32.mrb[14].mxu0 }
 0x20f   : > { %v2058_v22 = vadd.f32 %v10268_v6, %v13183_v7  ;;  %v2049_v50 = vpop.f32.mrb[15].mxu0  ;;  %v2139_v57 = vmax.f32 %v2055_v31, 0.0 }
 0x210   : > { %v2050_v51 = vadd.f32 %v13183_v7, %v2049_v50  ;;  %v2137_v60 = vmax.f32 %v2047_v49, 0.0 }
 0x211   : > { %v2140_v58 = vmax.f32 %v2058_v22, 0.0 }
 0x212   : > { %v2138_v52 = vmax.f32 %v2050_v51, 0.0 }
 0x213   : > { %v13213_v40 = vpack.c.bf16 %v2140_v58, %v2139_v57 }
 0x214   : > { %v13215_v45 = vpack.c.bf16 %v2138_v52, %v2137_v60  ;;  %v10271_v63 = vpop.f32.mrb[16].mxu0 }
 0x215   : > { %v2071_v36 = vadd.f32 %v10271_v63, %v13183_v7  ;;  %v2062_v56 = vpop.f32.mrb[17].mxu0 }
 0x216   : > { %v2063_v38 = vadd.f32 %v13183_v7, %v2062_v56  ;;  %v10272_v47 = vpop.f32.mrb[18].mxu0 }
 0x217   : > { %v2074_v62 = vadd.f32 %v10272_v47, %v13183_v7  ;;  %v2065_v37 = vpop.f32.mrb[19].mxu0  ;;  %v2143_v39 = vmax.f32 %v2071_v36, 0.0 }
 0x218   : > { %v2066_v48 = vadd.f32 %v13183_v7, %v2065_v37  ;;  %v2141_v59 = vmax.f32 %v2063_v38, 0.0 }
 0x219   : > { %v2144_v61 = vmax.f32 %v2074_v62, 0.0 }
 0x21a   : > { %v2142_v0 = vmax.f32 %v2066_v48, 0.0 }
 0x21b   : > { %v2166_v34 = vpack.c.bf16 %v2144_v61, %v2143_v39 }
 0x21c   : > { %v10275_v43 = vpop.f32.mrb[20].mxu0  ;;  %v2165_v33 = vpack.c.bf16 %v2142_v0, %v2141_v59 }
 0x21d   : > { %v2087_v35 = vadd.f32 %v10275_v43, %v13183_v7  ;;  %v2078_v16 = vpop.f32.mrb[21].mxu0 }
 0x21e   : > { %v2079_v23 = vadd.f32 %v13183_v7, %v2078_v16  ;;  %v10276_v24 = vpop.f32.mrb[22].mxu0  ;;  %9123 = vmatprep.subr.bf16.mxu1 %v2165_v33 }
 0x21f   : > { %v2090_v41 = vadd.f32 %v10276_v24, %v13183_v7  ;;  %v2081_v42 = vpop.f32.mrb[23].mxu0  ;;  %9124 = vmatpush3.bf16.msra.mxu1 %v13191_v55  ;;  %v2147_v31 = vmax.f32 %v2087_v35, 0.0 }
 0x220   : > { %v2082_v15 = vadd.f32 %v13183_v7, %v2081_v42  ;;  %9125 = vmatprep.subr.bf16.mxu1 %v2166_v34  ;;  %v2145_v49 = vmax.f32 %v2079_v23, 0.0  ;;  %v10621_v42 = vld [vmem:[%s15600_s6 + $0x30] ss:$8 sps:$4 sm:$0xff]  }
 0x221   : > { %v2148_v32 = vmax.f32 %v2090_v41, 0.0  ;;  %v10610_v41 = vld [vmem:[%s15600_s6] ss:$8 sps:$4 sm:$0xff]  }
 0x222   : > { %v2146_v6 = vmax.f32 %v2082_v15, 0.0  ;;  %v10622_v15 = vld [vmem:[%s15600_s6 + $0x44] ss:$8 sps:$4 sm:$0xff]  }
 0x223   : > { %v2168_v22 = vpack.c.bf16 %v2148_v32, %v2147_v31  ;;  %9126 = vmatpush3.bf16.msra.mxu1 %v13189_v46  ;;  %v10624_v31 = vld [vmem:[%s15600_s6 + $0x40] ss:$8 sps:$4 sm:$0xff]  }
 0x224   : > { %v2167_v50 = vpack.c.bf16 %v2146_v6, %v2145_v49  ;;  %v10279_v51 = vpop.f32.mrb[24].mxu0  ;;  %v10626_v32 = vld [vmem:[#allocation8 + $0x40] sm:$0xff]  }
 0x225   : > { %v2103_v57 = vadd.f32 %v10279_v51, %v13183_v7  ;;  %v2094_v58 = vpop.f32.mrb[25].mxu0  ;;  %v10625_v49 = vld [vmem:[#allocation8 + $0xc0] sm:$0xff]   ;;  %9169 = vmatprep.subr.bf16.mxu0 %v10626_v32  ;;  %v10630_v51 = vld [vmem:[#allocation8 + $0xc8] sm:$0xff]  }
 0x226   : > { %v2095_v60 = vadd.f32 %v13183_v7, %v2094_v58  ;;  %v10280_v52 = vpop.f32.mrb[26].mxu0  ;;  %9127 = vmatprep.subr.bf16.mxu1 %v2167_v50  ;;  %v10628_v6 = vld [vmem:[#allocation8] sm:$0xff]   ;;  %v10629_v50 = vld [vmem:[#allocation8 + $0x48] sm:$0xff]  }
 0x227   : > { %v2106_v55 = vadd.f32 %v10280_v52, %v13183_v7  ;;  %v2097_v63 = vpop.f32.mrb[27].mxu0  ;;  %9128 = vmatpush3.bf16.msra.mxu1 %v13199_v53  ;;  %v2151_v56 = vmax.f32 %v2103_v57, 0.0  ;;  %9170 = vmatpush3.bf16.msra.mxu0 %v10628_v6  ;;  %v10631_v57 = vld [vmem:[#allocation8 + $0x8] sm:$0xff]   ;;  %v10633_v52 = vld [vmem:[#allocation8 + $0x50] sm:$0xff]   ;;  %v10659_v32 = vld [vmem:[#allocation8 + $0x140] sm:$0xff]  }
 0x228   : > { %v2098_v36 = vadd.f32 %v13183_v7, %v2097_v63  ;;  %9129 = vmatprep.subr.bf16.mxu1 %v2168_v22  ;;  %v2149_v46 = vmax.f32 %v2095_v60, 0.0  ;;  %v10627_v22 = vld [vmem:[#allocation8 + $0x80] sm:$0xff]   ;;  %9171 = vmatprep.subr.bf16.mxu0 %v10629_v50  ;;  %v10632_v58 = vld [vmem:[#allocation8 + $0x88] sm:$0xff]   ;;  %v10780_v60 = vmov 0   ;;  %v10635_v63 = vld [vmem:[#allocation8 + $0xd0] sm:$0xff]  }
 0x229   : > { %v2152_v38 = vmax.f32 %v2106_v55, 0.0  ;;  %1790 = vst [vmem:[#allocation2 + $0x8] sm:$0x1] %v10780_v60  ;;  %v10634_v55 = vld [vmem:[#allocation8 + $0x10] sm:$0xff]  }
 0x22a   : > { %v2150_v47 = vmax.f32 %v2098_v36, 0.0  ;;  %v10636_v36 = vld [vmem:[#allocation8 + $0x90] sm:$0xff]  }
 0x22b   : > { %v2170_v62 = vpack.c.bf16 %v2152_v38, %v2151_v56  ;;  %9130 = vmatpush3.bf16.msra.mxu1 %v13197_v54  ;;  %9172 = vmatpush3.bf16.msra.mxu0 %v10631_v57  ;;  %v10637_v56 = vld [vmem:[#allocation8 + $0x58] sm:$0xff]  }
 0x22c   : > { %v2169_v37 = vpack.c.bf16 %v2150_v47, %v2149_v46  ;;  %v10283_v48 = vpop.f32.mrb[28].mxu0  ;;  %9173 = vmatprep.subr.bf16.mxu0 %v10633_v52  ;;  %v10638_v38 = vld [vmem:[#allocation8 + $0x18] sm:$0xff]  }
 0x22d   : > { %v2119_v39 = vadd.f32 %v10283_v48, %v13183_v7  ;;  %v2110_v61 = vpop.f32.mrb[29].mxu0  ;;  %v10639_v46 = vld [vmem:[#allocation8 + $0xd8] sm:$0xff]   ;;  %v10643_v48 = vld [vmem:[#allocation8 + $0xe0] sm:$0xff]  }
 0x22e   : > { %v2111_v59 = vadd.f32 %v13183_v7, %v2110_v61  ;;  %v10284_v0 = vpop.f32.mrb[30].mxu0  ;;  %9131 = vmatprep.subr.bf16.mxu1 %v2169_v37  ;;  %v10640_v47 = vld [vmem:[#allocation8 + $0x98] sm:$0xff]   ;;  %v10642_v37 = vld [vmem:[#allocation8 + $0x20] sm:$0xff]   ;;  %v1787_v61 = vld [vmem:[#allocation2] sm:$0xf8] }
 0x22f   : > { %v2122_v53 = vadd.f32 %v10284_v0, %v13183_v7  ;;  %v2113_v34 = vpop.f32.mrb[31].mxu0  ;;  %9132 = vmatpush3.bf16.msra.mxu1 %v13207_v8  ;;  %v2155_v33 = vmax.f32 %v2119_v39, 0.0  ;;  %v10616_v8 = vld [vmem:[%s15600_s6 + $0x24] ss:$8 sps:$4 sm:$0xff]   ;;  %9174 = vmatpush3.bf16.msra.mxu0 %v10634_v55  ;;  %v10645_v39 = vld [vmem:[#allocation8 + $0xa0] sm:$0xff]  }
 0x230   : > { %v2114_v43 = vadd.f32 %v13183_v7, %v2113_v34  ;;  %9133 = vmatprep.subr.bf16.mxu1 %v2170_v62  ;;  %v2153_v54 = vmax.f32 %v2111_v59, 0.0  ;;  %v10613_v7 = vld [vmem:[%s15600_s6 + $0x14] ss:$8 sps:$4 sm:$0xff]   ;;  %9175 = vmatprep.subr.bf16.mxu0 %v10637_v56  ;;  %v1788_v59 = vsel %vm1786_vm5, 0, %v1787_v61  ;;  %v10644_v0 = vld [vmem:[#allocation8 + $0x68] sm:$0xff]   ;;  %vm2903_vm5 = vcmask 1041408  }
 0x231   : > { %v2156_v35 = vmax.f32 %v2122_v53, 0.0  ;;  %v10641_v62 = vld [vmem:[#allocation8 + $0x60] sm:$0xff]   ;;  %1789 = vst [vmem:[#allocation2] sm:$0xf8] %v1788_v59  ;;  %v10646_v53 = vld [vmem:[#allocation8 + $0x28] sm:$0xff]  }
 0x232   : > { %v2154_v16 = vmax.f32 %v2114_v43, 0.0  ;;  %v10648_v34 = vld [vmem:[#allocation8 + $0xe8] sm:$0xff]  }
 0x233   : > { %v2172_v23 = vpack.c.bf16 %v2156_v35, %v2155_v33  ;;  %9134 = vmatpush3.bf16.msra.mxu1 %v13205_v44  ;;  %v10615_v44 = vld [vmem:[%s15600_s6 + $0x10] ss:$8 sps:$4 sm:$0xff]   ;;  %9176 = vmatpush3.bf16.msra.mxu0 %v10638_v38  ;;  %v10650_v43 = vld [vmem:[#allocation8 + $0xa8] sm:$0xff]  }
 0x234   : > { %v2171_v24 = vpack.c.bf16 %v2154_v16, %v2153_v54  ;;  %9177 = vmatprep.subr.bf16.mxu0 %v10641_v62  ;;  %v10647_v33 = vld [vmem:[#allocation8 + $0x70] sm:$0xff]  }
 0x235   : > { %v10649_v35 = vld [vmem:[#allocation8 + $0x30] sm:$0xff]  }
 0x236   : > { %9135 = vmatprep.subr.bf16.mxu1 %v2171_v24  ;;  %v10653_v54 = vld [vmem:[#allocation8 + $0xf0] sm:$0xff]   ;;  %v10652_v24 = vld [vmem:[#allocation8 + $0x38] sm:$0xff]  }
 0x237   : > { %9136 = vmatpush3.bf16.msra.mxu1 %v13215_v45  ;;  %v10619_v45 = vld [vmem:[%s15600_s6 + $0x34] ss:$8 sps:$4 sm:$0xff]   ;;  %9178 = vmatpush3.bf16.msra.mxu0 %v10642_v37  ;;  %v10654_v16 = vld [vmem:[#allocation8 + $0xb0] sm:$0xff]  }
 0x238   : > { %9137 = vmatprep.subr.bf16.mxu1 %v2172_v23  ;;  %9179 = vmatprep.subr.bf16.mxu0 %v10644_v0  ;;  %v10651_v23 = vld [vmem:[#allocation8 + $0x78] sm:$0xff]   ;;  %v2483_v60 = vld [vmem:[#allocation2] sm:$0xf8] }
 0x239   : > { %v2553_v61 = vld [vmem:[#allocation2] sm:$0xf0] }
 0x23b   : > { %9138 = vmatpush3.bf16.msra.mxu1 %v13213_v40  ;;  %v10618_v40 = vld [vmem:[%s15600_s6 + $0x20] ss:$8 sps:$4 sm:$0xff]   ;;  %9180 = vmatpush3.bf16.msra.mxu0 %v10646_v53 }
 0x23c   : > { %9215 = vmatprep.subr.bf16.mxu1 %v10625_v49  ;;  %9181 = vmatprep.subr.bf16.mxu0 %v10647_v33  ;;  %v2566_v33 = vrot.slane %v2553_v61, 4 }
 0x23e   : > { %2266 = vmatmul.mubr.bf16.vlgmr.msra.gmra.mrb[0].mxu1 %v10610_v41  ;;  %v10655_v41 = vld [vmem:[#allocation8 + $0xf8] sm:$0xff]  }
 0x23f   : > { %2273 = vmatprep.mubr.bf16.mxu1 %v10613_v7  ;;  %9216 = vmatpush3.bf16.msra.mxu1 %v10627_v22  ;;  %v10656_v7 = vld [vmem:[#allocation8 + $0xb8] sm:$0xff]  }
 0x240   : > { %9217 = vmatprep.subr.bf16.mxu1 %v10630_v51  ;;  %9182 = vmatpush3.bf16.msra.mxu0 %v10649_v35 }
 0x241   : > { %9183 = vmatprep.subr.bf16.mxu0 %v10651_v23 }
 0x243   : > { %9218 = vmatpush3.bf16.msra.mxu1 %v10632_v58 }
 0x244   : > { %9219 = vmatprep.subr.bf16.mxu1 %v10635_v63  ;;  %9184 = vmatpush3.bf16.msra.mxu0 %v10652_v24 }
 0x245   : > { %9261 = vmatprep.subr.bf16.mxu0 %v10659_v32 }
 0x246   : > { %2274 = vmatmul.mubr.bf16.gmra.mrb[4].mxu1 %v10615_v44  ;;  %v1799_v44 = vld [vmem:[#allocation3] sm:$0x78] }
 0x247   : > { %2281 = vmatprep.mubr.bf16.mxu1 %v10616_v8  ;;  %9220 = vmatpush3.bf16.msra.mxu1 %v10636_v36  ;;  %v1794_v8 = vld [vmem:[#allocation2 + $0x30] sm:$0x7e]  ;;  %v2587_v36 = vld [vmem:[#allocation2] sm:$0xf0] }
 0x248   : > { %9221 = vmatprep.subr.bf16.mxu1 %v10639_v46  ;;  %v2491_v46 = vshrl.u32 %v2483_v60, 16 }
 0x24a   : > { %v2493_v0 = vrot.slane %v2491_v46, 3 }
 0x24b   : > { %9222 = vmatpush3.bf16.msra.mxu1 %v10640_v47  ;;  %v2494_v47 = vshll.u32 %v2483_v60, 16 }
 0x24c   : > { %9223 = vmatprep.subr.bf16.mxu1 %v10643_v48  ;;  %v2595_v48 = vshrl.u32 %v2587_v36, 16 }
 0x24d   : > { %v2496_v53 = vrot.slane %v2494_v47, 4 }
 0x24e   : > { %2282 = vmatmul.mubr.bf16.gmra.mrb[8].mxu1 %v10618_v40  ;;  %v1803_v40 = vld [vmem:[#allocation3 + $0x10] sm:$0x78]  ;;  %v13275_v35 = vrot.slane %v2595_v48, 4 }
 0x24f   : > { %2289 = vmatprep.mubr.bf16.mxu1 %v10619_v45  ;;  %9224 = vmatpush3.bf16.msra.mxu1 %v10645_v39  ;;  %v1800_v45 = vsel %vm1798_vm8, 0, %v1799_v44  ;;  %v2598_v39 = vshll.u32 %v2587_v36, 16  ;;  %vm15141_vm8 = vmmov 0  }
 0x250   : > { %9225 = vmatprep.subr.bf16.mxu1 %v10648_v34  ;;  %1801 = vst [vmem:[#allocation3] sm:$0x78] %v1800_v45  ;;  %v2497_v45 = vor.u32 %v2496_v53, %v2493_v0  ;;  %v10660_v53 = vld [vmem:[#allocation8 + $0x100] sm:$0xff]  }
 0x253   : > { %9226 = vmatpush3.bf16.msra.mxu1 %v10650_v43 }
 0x254   : > { %9227 = vmatprep.subr.bf16.mxu1 %v10653_v54  ;;  %v13277_v54 = vrot.slane %v2598_v39, 5 }
 0x256   : > { %2290 = vmatmul.mubr.bf16.gmra.mrb[12].mxu1 %v10621_v42  ;;  %v1795_v42 = vsel %vm1793_vm10, 0, %v1794_v8  ;;  %vm4037_vm10 = vcmask 23552  }
 0x257   : > { %2297 = vmatprep.mubr.bf16.mxu1 %v10622_v15  ;;  %9228 = vmatpush3.bf16.msra.mxu1 %v10654_v16  ;;  %1796 = vst [vmem:[#allocation2 + $0x30] sm:$0x7e] %v1795_v42  ;;  %v1804_v15 = vsel %vm1802_vm11, 0, %v1803_v40  ;;  %vm4161_vm11 = vcmask 1045505  }
 0x258   : > { %9229 = vmatprep.subr.bf16.mxu1 %v10655_v41  ;;  %1805 = vst [vmem:[#allocation3 + $0x10] sm:$0x78] %v1804_v15 }
 0x25b   : > { %9230 = vmatpush3.bf16.msra.mxu1 %v10656_v7 }
 0x25e   : > { %2298 = vmatmul.mubr.bf16.gmra.mrb[16].mxu1 %v10624_v31  ;;  %v10657_v31 = vld [vmem:[#allocation8 + $0x1c0] sm:$0xff]  }
 0x25f   : > { %9307 = vmatprep.subr.bf16.mxu1 %v10657_v31 }
 0x311   : > { %v9139_v49 = vpop.f32.mrb[0].mxu1 }
 0x312   : > { %v9140_v6 = vpop.f32.mrb[1].mxu1 }
 0x313   : > { %v9141_v22 = vadd.f32 %v9140_v6, %v9139_v49  ;;  %v9142_v50 = vpop.f32.mrb[2].mxu1 }
 0x314   : > { %v9143_v51 = vpop.f32.mrb[3].mxu1 }
 0x315   : > { %v9144_v57 = vadd.f32 %v9143_v51, %v9142_v50 }
 0x317   : > { %v2306_v58 = vpack.c.bf16 %v9144_v57, %v9141_v22  ;;  %v2601_v57 = vor.u32 %v13277_v54, %v13275_v35 }
 0x319   : > { %v2317_v52 = vrot.slane %v2306_v58, 7  ;;  %v9145_v55 = vpop.f32.mrb[4].mxu1 }
 0x31a   : > { %v9146_v63 = vpop.f32.mrb[5].mxu1 }
 0x31b   : > { %2332 = vst [vmem:[#allocation2 + $0x8] sm:$0xfe] %v2317_v52  ;;  %v9147_v56 = vadd.f32 %v9146_v63, %v9145_v55  ;;  %v9148_v38 = vpop.f32.mrb[6].mxu1 }
 0x31c   : > { %v9149_v62 = vpop.f32.mrb[7].mxu1 }
 0x31d   : > { %v9150_v37 = vadd.f32 %v9149_v62, %v9148_v38 }
 0x31f   : > { %v2307_v59 = vpack.c.bf16 %v9150_v37, %v9147_v56 }
 0x321   : > { %v13273_v34 = vrot.slane %v2307_v59, 7  ;;  %v9151_v43 = vpop.f32.mrb[8].mxu1 }
 0x322   : > { %v13279_v16 = vld [vmem:[#allocation2 + $0x8] sm:$0xff]  ;;  %v9152_v24 = vpop.f32.mrb[9].mxu1 }
 0x323   : > { %v13281_v23 = vld [vmem:[#allocation2 + $0x8] sm:$0xfe]  ;;  %v2499_v41 = vshrl.u32 %v13279_v16, 16  ;;  %v2502_v7 = vshll.u32 %v13279_v16, 16  ;;  %v13287_v8 = vsel %vm2316_vm12, %v2317_v52, %v13273_v34  ;;  %v9154_v40 = vpop.f32.mrb[10].mxu1  ;;  %v9153_v32 = vadd.f32 %v9152_v24, %v9151_v43 }
 0x324   : > { %v2821_v44 = vld [vmem:[#allocation2 + $0x8] sm:$0xe0]  ;;  %2333 = vst [vmem:[#allocation2 + $0x10] sm:$0xff] %v13287_v8  ;;  %v9155_v51 = vpop.f32.mrb[11].mxu1  ;;  %v13300_v56 = vshrl.u32 %v13287_v8, 16  ;;  %v13303_v38 = vshll.u32 %v13287_v8, 16 }
 0x325   : > { %v2829_v42 = vshrl.u32 %v2821_v44, 16  ;;  %v2832_v15 = vshll.u32 %v2821_v44, 16  ;;  %v2925_v31 = vld [vmem:[#allocation2 + $0x8] sm:$0xc0]  ;;  %v2501_v49 = vrot.slane %v2499_v41, 3  ;;  %v2504_v6 = vrot.slane %v2502_v7, 4 }
 0x326   : > { %v13291_v50 = vld [vmem:[#allocation2 + $0x8] sm:$0xc0]  ;;  %v2605_v58 = vrot.slane %v2499_v41, 4  ;;  %v2608_v60 = vrot.slane %v2502_v7, 5  ;;  %v2933_v55 = vshrl.u32 %v2925_v31, 16  ;;  %v2936_v36 = vshll.u32 %v2925_v31, 16 }
 0x327   : > { %v13295_v52 = vrot.slane %v2829_v42, 5  ;;  %v13297_v63 = vrot.slane %v2832_v15, 6  ;;  %v9156_v47 = vadd.f32 %v9155_v51, %v9154_v40  ;;  %v2567_v62 = vrot.slane %v13279_v16, 4  ;;  %v10662_v16 = vld [vmem:[#allocation8 + $0x148] sm:$0xff]  }
 0x328   : > { %v2505_v37 = vor.u32 %v2504_v6, %v2501_v49  ;;  %v13307_v48 = vrot.slane %v2933_v55, 6  ;;  %v13309_v39 = vrot.slane %v2936_v36, 7  ;;  %v2569_v31 = vrot.slane %v13287_v8, 4 }
 0x329   : > { %v9157_v0 = vpop.f32.mrb[12].mxu1  ;;  %v2308_v35 = vpack.c.bf16 %v9156_v47, %v9153_v32  ;;  %v2568_v24 = vsel %vm2565_vm13, %v2566_v33, %v2567_v62  ;;  %v2669_v49 = vrot.slane %v2502_v7, 1  ;;  %v2674_v55 = vrot.slane %v13303_v38, 1  ;;  %v13320_v33 = vld [vmem:[#allocation2 + $0x8] sm:$0xfe] }
 0x32a   : > { %v9158_v54 = vpop.f32.mrb[13].mxu1  ;;  %v2506_v44 = vsel %vm2489_vm14, %v2497_v45, %v2505_v37  ;;  %3510 = vmatprep.mubr.bf16.mxu0 %v2568_v24  ;;  %v2609_v32 = vor.u32 %v2608_v60, %v2605_v58  ;;  %v2510_v36 = vrot.slane %v13300_v56, 3  ;;  %v2570_v47 = vsel %vm2565_vm13, %v2567_v62, %v2569_v31  ;;  %v10658_v60 = vld [vmem:[#allocation8 + $0x180] sm:$0xff]   ;;  %v10665_v62 = vld [vmem:[#allocation8 + $0x150] sm:$0xff]  }
 0x32b   : > { %v9159_v42 = vadd.f32 %v9158_v54, %v9157_v0  ;;  %v9160_v15 = vpop.f32.mrb[14].mxu1  ;;  %v2320_v6 = vrot.slane %v2308_v35, 7  ;;  %3511 = vmatmul.mubr.bf16.vlgmr.msra.gmra.mrb[32].mxu0 %v2506_v44  ;;  %v2670_v40 = vor.u32 %v2669_v49, %v2499_v41  ;;  %v2513_v0 = vrot.slane %v13303_v38, 4  ;;  %v10664_v54 = vld [vmem:[#allocation8 + $0x108] sm:$0xff]   ;;  %2583 = vst [vmem:[#allocation4 + $0x50] sm:$0xff] %v2570_v47 }
 0x32c   : > { %v9161_v51 = vpop.f32.mrb[15].mxu1  ;;  %9262 = vmatpush3.bf16.msra.mxu0 %v10660_v53  ;;  %3518 = vmatprep.mubr.bf16.mxu0 %v2570_v47  ;;  %v2610_v58 = vsel %vm2593_vm15, %v2601_v57, %v2609_v32  ;;  %v2678_v35 = vor.u32 %v13300_v56, %v2674_v55  ;;  %v2614_v24 = vrot.slane %v13300_v56, 4  ;;  %v2617_v57 = vrot.slane %v13303_v38, 5 }
 0x32d   : > { %v9162_v45 = vadd.f32 %v9161_v51, %v9160_v15  ;;  %v13326_v7 = vsel %vm2316_vm12, %v13273_v34, %v2320_v6  ;;  %9263 = vmatprep.subr.bf16.mxu0 %v10662_v16  ;;  %v2675_v53 = vsel %vm2663_vm2, %v2670_v40, %v2674_v55  ;;  %v2514_v44 = vor.u32 %v2513_v0, %v2510_v36  ;;  %v10661_v15 = vld [vmem:[#allocation8 + $0x1c8] sm:$0xff]  }
 0x32e   : > { %2334 = vst [vmem:[#allocation2 + $0x18] sm:$0xff] %v13326_v7  ;;  %v2571_v34 = vrot.slane %v13326_v7, 4  ;;  %3583 = vmatprep.mubr.bf16.mxu1 %v2675_v53  ;;  %v13335_v49 = vshll.u32 %v13326_v7, 16  ;;  %v13339_v16 = vshrl.u32 %v13326_v7, 16  ;;  %v2759_v51 = vshrl.u32 %v13320_v33, 16  ;;  %v10663_v0 = vld [vmem:[#allocation8 + $0x188] sm:$0xff]  }
 0x32f   : > { %v2309_v41 = vpack.c.bf16 %v9162_v45, %v9159_v42  ;;  %3584 = vmatmul.mubr.bf16.vlgmr.msra.gmra.mrb[20].mxu1 %v2610_v58  ;;  %v2515_v40 = vsel %vm2489_vm14, %v2505_v37, %v2514_v44  ;;  %v2762_v36 = vshll.u32 %v13320_v33, 16  ;;  %v2618_v43 = vor.u32 %v2617_v57, %v2614_v24  ;;  %v10667_v58 = vld [vmem:[#allocation8 + $0x110] sm:$0xff]  }
 0x330   : > { %v2572_v55 = vsel %vm2565_vm13, %v2569_v31, %v2571_v34  ;;  %9264 = vmatpush3.bf16.msra.mxu0 %v10664_v54  ;;  %9308 = vmatpush3.bf16.msra.mxu1 %v10658_v60  ;;  %2549 = vst [vmem:[#allocation4 + $0x48] sm:$0xff] %v2515_v40  ;;  %v2682_v53 = vrot.slane %v13335_v49, 1  ;;  %v2519_v59 = vrot.slane %v13339_v16, 3  ;;  %v10666_v54 = vld [vmem:[#allocation8 + $0x1d0] sm:$0xff]   ;;  %v10669_v60 = vld [vmem:[#allocation8 + $0x158] sm:$0xff]   ;;  %v2623_v46 = vrot.slane %v13339_v16, 4 }
 0x331   : > { %v13342_v47 = vrot.slane %v2309_v41, 7  ;;  %v9163_v42 = vpop.f32.mrb[16].mxu1  ;;  %v2522_v41 = vrot.slane %v13335_v49, 4  ;;  %9265 = vmatprep.subr.bf16.mxu0 %v10665_v62  ;;  %9309 = vmatprep.subr.bf16.mxu1 %v10661_v15  ;;  %v2626_v24 = vrot.slane %v13335_v49, 5  ;;  %v2619_v22 = vsel %vm2593_vm15, %v2609_v32, %v2618_v43  ;;  %v10668_v32 = vld [vmem:[#allocation8 + $0x190] sm:$0xff]  }
 0x332   : > { %v9164_v45 = vpop.f32.mrb[17].mxu1  ;;  %v2683_v62 = vsel %vm2663_vm2, %v2678_v35, %v2682_v53  ;;  %2653 = vst [vmem:[#allocation4 + $0x58] sm:$0xff] %v2619_v22  ;;  %v2686_v15 = vor.u32 %v2682_v53, %v13339_v16  ;;  %v15608_v5 = vrot.slane %v13300_v56, 6 }
 0x333   : > { %v13352_v37 = vsel %vm2316_vm12, %v2320_v6, %v13342_v47  ;;  %v9165_v31 = vadd.f32 %v9164_v45, %v9163_v42  ;;  %v9166_v33 = vpop.f32.mrb[18].mxu1  ;;  %3519 = vmatmul.mubr.bf16.gmra.mrb[36].mxu0 %v2515_v40  ;;  %v2523_v61 = vor.u32 %v2522_v41, %v2519_v59  ;;  %2714 = vst [vmem:[#allocation4 + $0x60] sm:$0xff] %v2683_v62  ;;  %v10670_v40 = vld [vmem:[#allocation8 + $0x118] sm:$0xff]   ;;  %v2761_v41 = vrot.slane %v2759_v51, 1 }
 0x334   : > { %2335 = vst [vmem:[#allocation2 + $0x20] sm:$0xff] %v13352_v37  ;;  %v9167_v57 = vpop.f32.mrb[19].mxu1  ;;  %v15137_v6 = vrot.slane %v13352_v37, 4  ;;  %3526 = vmatprep.mubr.bf16.mxu0 %v2572_v55  ;;  %3591 = vmatprep.mubr.bf16.mxu1 %v2683_v62  ;;  %v13362_v45 = vshll.u32 %v13352_v37, 16  ;;  %v2627_v30 = vor.u32 %v2626_v24, %v2623_v46  ;;  %v13369_v55 = vshrl.u32 %v13352_v37, 16  ;;  %v10673_v24 = vld [vmem:[#allocation8 + $0x160] sm:$0xff]  }
 0x335   : > { %v9168_v42 = vadd.f32 %v9167_v57, %v9166_v33  ;;  %9310 = vmatpush3.bf16.msra.mxu1 %v10663_v0  ;;  %v2524_v35 = vsel %vm2489_vm14, %v2514_v44, %v2523_v61  ;;  %9266 = vmatpush3.bf16.msra.mxu0 %v10667_v58  ;;  %v10671_v33 = vld [vmem:[#allocation8 + $0x1d8] sm:$0xff]   ;;  %v2764_v62 = vrot.slane %v2762_v36, 2  ;;  %v2772_v36 = vrot.slane %v13303_v38, 2 }
 0x336   : > { %v2574_v59 = vsel %vm2565_vm13, %v2571_v34, %v15137_v6  ;;  %9311 = vmatprep.subr.bf16.mxu1 %v10666_v54  ;;  %9267 = vmatprep.subr.bf16.mxu0 %v10669_v60  ;;  %v2690_v46 = vrot.slane %v13362_v45, 1  ;;  %v13373_v0 = vsel %vm2593_vm15, %v2618_v43, %v2627_v30  ;;  %v2531_v44 = vrot.slane %v13362_v45, 4  ;;  %v10672_v43 = vld [vmem:[#allocation8 + $0x198] sm:$0xff]   ;;  %v10674_v6 = vld [vmem:[#allocation8 + $0x120] sm:$0xff]  }
 0x337   : > { %v2310_v53 = vpack.c.bf16 %v9168_v42, %v9165_v31  ;;  %v2528_v58 = vrot.slane %v13369_v55, 3  ;;  %v2632_v34 = vrot.slane %v13369_v55, 4  ;;  %v2635_v57 = vrot.slane %v13362_v45, 5  ;;  %3592 = vmatmul.mubr.bf16.gmra.mrb[24].mxu1 %v2619_v22  ;;  %v10675_v22 = vld [vmem:[#allocation8 + $0x1e0] sm:$0xff]  }
 0x338   : > { %v2691_v54 = vsel %vm2663_vm2, %v2686_v15, %v2690_v46  ;;  %v2769_v60 = vrot.slane %v13300_v56, 1  ;;  %v2765_v21 = vor.u32 %v2764_v62, %v2761_v41  ;;  %v10677_v15 = vld [vmem:[#allocation8 + $0x168] sm:$0xff]   ;;  %v2905_v41 = vrot.slane %v13287_v8, 6 }
 0x339   : > { %v2324_v31 = vrot.slane %v2310_v53, 7  ;;  %9312 = vmatpush3.bf16.msra.mxu1 %v10668_v32  ;;  %9268 = vmatpush3.bf16.msra.mxu0 %v10670_v40  ;;  %v13382_v42 = vor.u32 %v2531_v44, %v2528_v58  ;;  %v13384_v14 = vor.u32 %v2635_v57, %v2632_v34  ;;  %v15602_v32 = vrot.slane %v13287_v8, 1 }
 0x33a   : > { %9313 = vmatprep.subr.bf16.mxu1 %v10671_v33  ;;  %3599 = vmatprep.mubr.bf16.mxu1 %v2691_v54  ;;  %v15603_v40 = vrot.slane %v13281_v23, 1  ;;  %v2778_v58 = vrot.slane %v13339_v16, 1  ;;  %v2694_v33 = vor.u32 %v2690_v46, %v13369_v55  ;;  %v2773_v57 = vor.u32 %v2772_v36, %v2769_v60  ;;  %v10676_v46 = vld [vmem:[#allocation8 + $0x1a0] sm:$0xff]  }
 0x33b   : > { %v13389_v53 = vsel %vm2316_vm12, %v13342_v47, %v2324_v31  ;;  %2337 = vst [vmem:[#allocation2 + $0x30] sm:$0x1] %v2324_v31  ;;  %3527 = vmatmul.mubr.bf16.gmra.mrb[40].mxu0 %v2524_v35  ;;  %v2533_v47 = vsel %vm2489_vm14, %v2523_v61, %v13382_v42  ;;  %9269 = vmatprep.subr.bf16.mxu0 %v10673_v24  ;;  %v15604_v62 = vrot.slane %v13291_v50, 6  ;;  %v2781_v61 = vrot.slane %v13335_v49, 2  ;;  %v10678_v24 = vld [vmem:[#allocation8 + $0x128] sm:$0xff]  }
 0x33c   : > { %v13396_v44 = vsel %vm15144_vm4, %v15603_v40, %v15602_v32  ;;  %2336 = vst [vmem:[#allocation2 + $0x28] sm:$0xff] %v13389_v53  ;;  %v13405_v34 = vshll.u32 %v13389_v53, 16  ;;  %v13409_v23 = vsel %vm2593_vm15, %v2627_v30, %v13384_v14  ;;  %3534 = vmatprep.mubr.bf16.mxu0 %v2574_v59  ;;  %v2835_v35 = vor.u32 %v13297_v63, %v13295_v52  ;;  %v10679_v32 = vld [vmem:[#allocation8 + $0x1e8] sm:$0xff]  }
 0x33d   : > { %v13414_v31 = vsel %vm2903_vm5, %v15604_v62, %v2905_v41  ;;  %9314 = vmatpush3.bf16.msra.mxu1 %v10672_v43  ;;  %9270 = vmatpush3.bf16.msra.mxu0 %v10674_v6  ;;  %v15605_v59 = vrot.slane %v13300_v56, 5  ;;  %v15606_v50 = vrot.slane %v13303_v38, 6  ;;  %v15138_v60 = vrot.slane %v13326_v7, 1  ;;  %v13432_v6 = vld [vmem:[%s10958_s25 + $0x80] sm:$0xff]  ;;  %v13435_v43 = vld [vmem:[%s10958_s25 + $0x88] sm:$0xff] }
 0x33e   : > { %v2698_v30 = vrot.slane %v13405_v34, 1  ;;  %v15139_v36 = vrot.slane %v13326_v7, 6  ;;  %9315 = vmatprep.subr.bf16.mxu1 %v10675_v22  ;;  %9271 = vmatprep.subr.bf16.mxu0 %v10677_v15  ;;  %v13429_v52 = vsel %vm15143_vm9, %v2765_v21, %v2773_v57  ;;  %v2782_v63 = vor.u32 %v2781_v61, %v2778_v58  ;;  %v10680_v22 = vld [vmem:[#allocation8 + $0x170] sm:$0xff]  }
 0x33f   : > { %v13424_v54 = vor.u32 %v15606_v50, %v15605_v59  ;;  %v2787_v40 = vrot.slane %v13369_v55, 1  ;;  %v2790_v62 = vrot.slane %v13362_v45, 2  ;;  %v2939_v59 = vor.u32 %v13309_v39, %v13307_v48  ;;  %3600 = vmatmul.mubr.bf16.gmra.mrb[28].mxu1 %v13373_v0  ;;  %v10681_v48 = vld [vmem:[#allocation8 + $0x1a8] sm:$0xff]   ;;  %v10682_v39 = vld [vmem:[#allocation8 + $0x130] sm:$0xff]  }
 0x340   : > { %v2699_v50 = vsel %vm2663_vm2, %v2694_v33, %v2698_v30  ;;  %v15607_v21 = vrot.slane %v13287_v8, 1  ;;  %v13455_v61 = vshrl.u32 %v13389_v53, 16  ;;  %v10683_v33 = vld [vmem:[#allocation8 + $0x178] sm:$0xff]   ;;  %v13458_v51 = vsel %vm15143_vm9, %v2773_v57, %v2782_v63 }
 0x341   : > { %v13444_v15 = vsel %vm2827_vm6, %v2835_v35, %v13424_v54  ;;  %v13464_v8 = vsel %vm2903_vm5, %v2905_v41, %v15139_v36  ;;  %v13466_v35 = vor.u32 %v2790_v62, %v2787_v40  ;;  %9316 = vmatpush3.bf16.msra.mxu1 %v10676_v46  ;;  %9272 = vmatpush3.bf16.msra.mxu0 %v10678_v24  ;;  %v15609_v41 = vrot.slane %v13303_v38, 7  ;;  %v10684_v46 = vld [vmem:[#allocation8 + $0x1f0] sm:$0xff]  }
 0x342   : > { %v13451_v58 = vsel %vm15144_vm4, %v15607_v21, %v15138_v60  ;;  %v2662_v21 = vld [vmem:[#allocation2 + $0x30] sm:$0x1]  ;;  %2817 = vst [vmem:[#allocation4 + $0x70] sm:$0xff] %v13458_v51  ;;  %2921 = vst [vmem:[#allocation4 + $0x80] sm:$0xff] %v13464_v8  ;;  %3607 = vmatprep.mubr.bf16.mxu1 %v2699_v50  ;;  %9317 = vmatprep.subr.bf16.mxu1 %v10679_v32  ;;  %v2848_v57 = vrot.slane %v13339_v16, 5 }
 0x343   : > { %2748 = vst [vmem:[#allocation4 + $0x68] sm:$0xff] %v13451_v58  ;;  %v13468_v0 = vld [vmem:[#allocation2 + $0x30] sm:$0x1]  ;;  %v13478_v36 = vor.u32 %v15609_v41, %v15608_v5  ;;  %v2488_v40 = vld [vmem:[#allocation2 + $0x28] sm:$0xf]  ;;  %v2704_v62 = vshll.u32 %v2662_v21, 16  ;;  %v13483_v24 = vsel %vm15143_vm9, %v2782_v63, %v13466_v35  ;;  %3535 = vmatmul.mubr.bf16.gmra.mrb[44].mxu0 %v2533_v47  ;;  %v2702_v5 = vor.u32 %v13455_v61, %v2698_v30 }
 0x344   : > { %v2757_v60 = vld [vmem:[#allocation2 + $0x30] sm:$0x3]  ;;  %v2592_v13 = vld [vmem:[#allocation2 + $0x28] sm:$0x1f]  ;;  %9273 = vmatprep.subr.bf16.mxu0 %v10680_v22  ;;  %v2535_v28 = vshrl.u32 %v2488_v40, 16 }
 0x345   : > { %v2803_v20 = vshrl.u32 %v2757_v60, 16  ;;  %v2806_v56 = vshll.u32 %v2757_v60, 16  ;;  %v2826_v4 = vld [vmem:[#allocation2 + $0x30] sm:$0x3f]  ;;  %v13491_v32 = vsel %vm2931_vm7, %v2939_v59, %v13478_v36  ;;  %v2558_v3 = vld [vmem:[#allocation2 + $0x28] sm:$0xf]  ;;  %9318 = vmatpush3.bf16.msra.mxu1 %v10681_v48  ;;  %9274 = vmatpush3.bf16.msra.mxu0 %v10682_v39 }
 0x346   : > { %v13486_v38 = vld [vmem:[#allocation2 + $0x30] sm:$0x3f]  ;;  %v2873_v50 = vshrl.u32 %v2826_v4, 16  ;;  %v2876_v63 = vshll.u32 %v2826_v4, 16  ;;  %v2575_v59 = vrot.slane %v2558_v3, 4  ;;  %v2537_v27 = vrot.slane %v2535_v28, 3  ;;  %9275 = vmatprep.subr.bf16.mxu0 %v10683_v33  ;;  %9319 = vmatprep.subr.bf16.mxu1 %v10684_v46 }
 0x347   : > { %v10685_v21 = vld [vmem:[#allocation8 + $0x138] sm:$0xff]   ;;  %v13494_v12 = vrot.slane %v2803_v20, 1  ;;  %v13496_v60 = vrot.slane %v2806_v56, 2  ;;  %v10686_v4 = vld [vmem:[#allocation8 + $0x1b0] sm:$0xff]   ;;  %v2538_v56 = vshll.u32 %v2488_v40, 16  ;;  %v2706_v11 = vrot.slane %v2704_v62, 1  ;;  %3608 = vmatmul.mubr.bf16.gmra.mrb[32].mxu1 %v13409_v23 }
 0x348   : > { %v2930_v29 = vld [vmem:[#allocation2 + $0x30] sm:$0x7f]  ;;  %v13498_v30 = vrot.slane %v2873_v50, 5  ;;  %v13500_v22 = vrot.slane %v2876_v63, 6  ;;  %v2639_v39 = vshrl.u32 %v2592_v13, 16  ;;  %v2642_v50 = vshll.u32 %v2592_v13, 16 }
 0x349   : > { %v2977_v19 = vshrl.u32 %v2930_v29, 16  ;;  %v2980_v47 = vshll.u32 %v2930_v29, 16  ;;  %v15610_v29 = vrot.slane %v13352_v37, 4  ;;  %v2851_v3 = vrot.slane %v13335_v49, 6  ;;  %9276 = vmatpush3.bf16.msra.mxu0 %v10685_v21  ;;  %9320 = vmatpush3.bf16.msra.mxu1 %v10686_v4  ;;  %v10688_v63 = vld [vmem:[#allocation8 + $0x1b8] sm:$0xff]  }
 0x34a   : > { %v2540_v28 = vrot.slane %v2538_v56, 4  ;;  %v2736_v33 = vrot.slane %v13352_v37, 1  ;;  %v2909_v40 = vrot.slane %v13352_v37, 6  ;;  %v2641_v62 = vrot.slane %v2639_v39, 4  ;;  %9321 = vmatprep.subr.bf16.mxu1 %v10687_v18 }
 0x34b   : > { %v13502_v41 = vrot.slane %v2977_v19, 6  ;;  %v13504_v20 = vrot.slane %v2980_v47, 7  ;;  %v2576_v48 = vsel %vm2565_vm13, %v15610_v29, %v2575_v59  ;;  %v2707_v19 = vsel %vm2663_vm2, %v2702_v5, %v2706_v11 }
 0x34c   : > { %3542 = vmatprep.mubr.bf16.mxu0 %v2576_v48  ;;  %3615 = vmatprep.mubr.bf16.mxu1 %v2707_v19  ;;  %v2644_v46 = vrot.slane %v2642_v50, 5  ;;  %v2852_v47 = vor.u32 %v2851_v3, %v2848_v57  ;;  %v2796_v23 = vrot.slane %v13455_v61, 1  ;;  %v2541_v13 = vor.u32 %v2540_v28, %v2537_v27 }
 0x34d   : > { %v15147_v59 = vmov 0.0   ;;  %v15611_v11 = vrot.slane %v13326_v7, 1  ;;  %v15612_v37 = vrot.slane %v13326_v7, 6  ;;  %v2799_v4 = vrot.slane %v13405_v34, 2  ;;  %9322 = vmatpush3.bf16.msra.mxu1 %v10688_v63 }
 0x34e   : > { %10285 = vmatprep.subr.bf16.mxu0 %v15147_v59  ;;  %v2645_v57 = vor.u32 %v2644_v46, %v2641_v62  ;;  %v13529_v27 = vsel %vm2827_vm6, %v13424_v54, %v2852_v47  ;;  %v2857_v18 = vrot.slane %v13369_v55, 5  ;;  %v2860_v56 = vrot.slane %v13362_v45, 6 }
 0x34f   : > { %v13519_v5 = vsel %vm15144_vm4, %v15611_v11, %v2736_v33  ;;  %v13524_v21 = vsel %vm2903_vm5, %v15612_v37, %v2909_v40  ;;  %v2542_v29 = vsel %vm2489_vm14, %v13382_v42, %v2541_v13  ;;  %2887 = vst [vmem:[#allocation4 + $0x78] sm:$0xff] %v13529_v27  ;;  %v2800_v7 = vor.u32 %v2799_v4, %v2796_v23  ;;  %v10689_v11 = vld [vmem:[#allocation8 + $0x200] sm:$0xff]   ;;  %v3871_v37 = vld [vmem:[%s10958_s25 + $0x90] sm:$0xff] }
 0x350   : > { %v2738_v48 = vrot.slane %v13389_v53, 1  ;;  %v2911_v39 = vrot.slane %v13389_v53, 6  ;;  %3543 = vmatmul.mubr.bf16.gmra.mrb[48].mxu0 %v2542_v29  ;;  %v2646_v50 = vsel %vm2593_vm15, %v13384_v14, %v2645_v57  ;;  %v2861_v54 = vor.u32 %v2860_v56, %v2857_v18  ;;  %v3872_v4 = vld [vmem:[%s10958_s25 + $0x98] sm:$0xff]  ;;  %v3855_v18 = vld [vmem:[%s10958_s25 + $0x10] sm:$0xff] }
 0x351   : > { %v2809_v3 = vor.u32 %v13496_v60, %v13494_v12  ;;  %v2866_v28 = vrot.slane %v13455_v61, 5  ;;  %3656 = vmatprep.mubr.bf16.mxu0 %v13429_v52  ;;  %v15613_v42 = vpack.c.bf16 %v13435_v43, %v13432_v6  ;;  %v13549_v53 = vsel %vm15143_vm9, %v13466_v35, %v2800_v7  ;;  %3616 = vmatmul.mubr.bf16.gmra.mrb[36].mxu1 %v2646_v50  ;;  %v3856_v56 = vld [vmem:[%s10958_s25 + $0x18] sm:$0xff]  ;;  %v3857_v50 = vld [vmem:[%s10958_s25 + $0x20] sm:$0xff] }
 0x352   : > { %v13552_v14 = vsel %vm15144_vm4, %v2736_v33, %v2738_v48  ;;  %v13555_v19 = vsel %vm2903_vm5, %v2909_v40, %v2911_v39  ;;  %v2869_v12 = vrot.slane %v13405_v34, 6  ;;  %v13559_v52 = vsel %vm2827_vm6, %v2852_v47, %v2861_v54  ;;  %3729 = vmatprep.mubr.bf16.mxu1 %v13414_v31  ;;  %v3854_v47 = vld [vmem:[%s10958_s25 + $0x8] sm:$0xff] }
 0x353   : > { %9366 = vmatprep.subr.bf16.mxu1 %v15613_v42  ;;  %v13562_v6 = vsel %vm15143_vm9, %v2800_v7, %v2809_v3  ;;  %v15614_v43 = vrot.slane %v13468_v0, 1  ;;  %v15615_v60 = vrot.slane %v13486_v38, 6  ;;  %v2879_v62 = vor.u32 %v13500_v22, %v13498_v30  ;;  %v3853_v0 = vld [vmem:[%s10958_s25] sm:$0xff]  ;;  %v3874_v7 = vld [vmem:[%s10958_s25 + $0xa8] sm:$0xff]  ;;  %v3875_v3 = vld [vmem:[%s10958_s25 + $0xb0] sm:$0xff] }
 0x354   : > { %v2870_v40 = vor.u32 %v2869_v12, %v2866_v28  ;;  %v2952_v46 = vrot.slane %v13339_v16, 6  ;;  %v2955_v63 = vrot.slane %v13335_v49, 7  ;;  %v2961_v23 = vrot.slane %v13369_v55, 6  ;;  %v3876_v28 = vld [vmem:[%s10958_s25 + $0xb8] sm:$0xff]  ;;  %v3859_v42 = vld [vmem:[%s10958_s25 + $0x30] sm:$0xff] }
 0x355   : > { %v13567_v35 = vsel %vm15144_vm4, %v2738_v48, %v15614_v43  ;;  %v13572_v33 = vsel %vm2903_vm5, %v2911_v39, %v15615_v60  ;;  %v2964_v13 = vrot.slane %v13362_v45, 7  ;;  %v2970_v38 = vrot.slane %v13455_v61, 6  ;;  %v3860_v12 = vld [vmem:[%s10958_s25 + $0x38] sm:$0xff]  ;;  %v3877_v60 = vld [vmem:[%s10958_s25 + $0xc0] sm:$0xff] }
 0x356   : > { %v2973_v31 = vrot.slane %v13405_v34, 7  ;;  %v13588_v30 = vsel %vm2827_vm6, %v2861_v54, %v2870_v40  ;;  %v13591_v49 = vsel %vm2827_vm6, %v2870_v40, %v2879_v62  ;;  %v2956_v16 = vor.u32 %v2955_v63, %v2952_v46  ;;  %v10691_v54 = vld [vmem:[#allocation8 + $0x210] sm:$0xff]   ;;  %v10692_v43 = vld [vmem:[#allocation8 + $0x218] sm:$0xff]   ;;  %v3861_v46 = vld [vmem:[%s10958_s25 + $0x40] sm:$0xff] }
 0x357   : > { %v2983_v55 = vor.u32 %v13504_v20, %v13502_v41  ;;  %v2965_v45 = vor.u32 %v2964_v13, %v2961_v23  ;;  %v3885_v22 = vpack.c.bf16 %v3854_v47, %v3853_v0  ;;  %v3894_v57 = vpack.c.bf16 %v3872_v4, %v3871_v37  ;;  %v3878_v40 = vld [vmem:[%s10958_s25 + $0xc8] sm:$0xff]  ;;  %v10693_v63 = vld [vmem:[#allocation8 + $0x220] sm:$0xff]   ;;  %v3879_v0 = vld [vmem:[%s10958_s25 + $0xd0] sm:$0xff] }
 0x358   : > { %v2974_v61 = vor.u32 %v2973_v31, %v2970_v38  ;;  %v13597_v34 = vsel %vm2931_vm7, %v13478_v36, %v2956_v16  ;;  %3657 = vmatmul.mubr.bf16.vlgmr.msra.gmra.mrb[52].mxu0 %v13396_v44  ;;  %v10690_v44 = vld [vmem:[#allocation8 + $0x208] sm:$0xff]   ;;  %v3886_v48 = vpack.c.bf16 %v3856_v56, %v3855_v18  ;;  %v3897_v62 = vpack.c.bf16 %v3878_v40, %v3877_v60  ;;  %v3880_v47 = vld [vmem:[%s10958_s25 + $0xd8] sm:$0xff]  ;;  %v3863_v23 = vld [vmem:[%s10958_s25 + $0x50] sm:$0xff] }
 0x359   : > { %2991 = vst [vmem:[#allocation4 + $0x88] sm:$0xff] %v13597_v34  ;;  %v13604_v29 = vsel %vm2931_vm7, %v2956_v16, %v2965_v45  ;;  %3664 = vmatprep.mubr.bf16.mxu0 %v13458_v51  ;;  %10286 = vmatpush3.bf16.msra.mxu0 %v10689_v11  ;;  %v3873_v36 = vld [vmem:[%s10958_s25 + $0xa0] sm:$0xff]  ;;  %v3858_v51 = vld [vmem:[%s10958_s25 + $0x28] sm:$0xff]  ;;  %v3864_v13 = vld [vmem:[%s10958_s25 + $0x58] sm:$0xff] }
 0x35a   : > { %v13607_v41 = vsel %vm2931_vm7, %v2965_v45, %v2974_v61  ;;  %v13610_v20 = vsel %vm2931_vm7, %v2974_v61, %v2983_v55  ;;  %3730 = vmatmul.mubr.bf16.vlgmr.msra.gmra.mrb[40].mxu1 %v13444_v15  ;;  %10287 = vmatprep.subr.bf16.mxu0 %v15147_v59  ;;  %v3895_v39 = vpack.c.bf16 %v3874_v7, %v3873_v36  ;;  %v10694_v38 = vld [vmem:[#allocation8 + $0x228] sm:$0xff]   ;;  %v10695_v16 = vld [vmem:[#allocation8 + $0x230] sm:$0xff]   ;;  %v3884_v45 = vld [vmem:[%s10958_s25 + $0xf8] sm:$0xff] }
 0x35b   : > { %9367 = vmatpush3.bf16.msra.mxu1 %v3885_v22  ;;  %3737 = vmatprep.mubr.bf16.mxu1 %v13464_v8  ;;  %v3887_v15 = vpack.c.bf16 %v3858_v51, %v3857_v50  ;;  %v3896_v8 = vpack.c.bf16 %v3876_v28, %v3875_v3  ;;  %v3881_v31 = vld [vmem:[%s10958_s25 + $0xe0] sm:$0xff]  ;;  %v3882_v11 = vld [vmem:[%s10958_s25 + $0xe8] sm:$0xff]  ;;  %v3883_v55 = vld [vmem:[%s10958_s25 + $0xf0] sm:$0xff] }
 0x35c   : > { %9368 = vmatprep.subr.bf16.mxu1 %v3894_v57  ;;  %v3899_v37 = vpack.c.bf16 %v3882_v11, %v3881_v31  ;;  %v3865_v4 = vld [vmem:[%s10958_s25 + $0x60] sm:$0xff]  ;;  %v3867_v61 = vld [vmem:[%s10958_s25 + $0x70] sm:$0xff]  ;;  %v3868_v22 = vld [vmem:[%s10958_s25 + $0x78] sm:$0xff] }
 0x35d   : > { %10288 = vmatpush3.bf16.msra.mxu0 %v10690_v44  ;;  %v10696_v57 = vld [vmem:[#allocation8 + $0x238] sm:$0xff]   ;;  %v3892_v18 = vpack.c.bf16 %v3868_v22, %v3867_v61  ;;  %v10709_v56 = vld [vmem:[%s15600_s6 + $0x44] ss:$8 sps:$4 sm:$0xff]   ;;  %v15616_v44 = vmov 65535  }
 0x35e   : > { %10289 = vmatprep.subr.bf16.mxu0 %v15147_v59  ;;  %v4055_v36 = vsel %vm2316_vm12, 4294967295, %v15616_v44 }
 0x35f   : > { %9369 = vmatpush3.bf16.msra.mxu1 %v3886_v48  ;;  %v4056_v7 = vsel %vm2903_vm5, %v4055_v36, 0 }
 0x360   : > { %3665 = vmatmul.mubr.bf16.gmra.mrb[56].mxu0 %v13451_v58  ;;  %9370 = vmatprep.subr.bf16.mxu1 %v3895_v39  ;;  %v3888_v58 = vpack.c.bf16 %v3860_v12, %v3859_v42 }
 0x361   : > { %3672 = vmatprep.mubr.bf16.mxu0 %v13483_v24  ;;  %10290 = vmatpush3.bf16.msra.mxu0 %v10691_v54  ;;  %v3862_v24 = vld [vmem:[%s10958_s25 + $0x48] sm:$0xff] }
 0x362   : > { %3738 = vmatmul.mubr.bf16.gmra.mrb[44].mxu1 %v13529_v27  ;;  %10291 = vmatprep.subr.bf16.mxu0 %v15147_v59  ;;  %v3889_v27 = vpack.c.bf16 %v3862_v24, %v3861_v46 }
 0x363   : > { %3745 = vmatprep.mubr.bf16.mxu1 %v13524_v21  ;;  %9371 = vmatpush3.bf16.msra.mxu1 %v3887_v15  ;;  %v3898_v21 = vpack.c.bf16 %v3880_v47, %v3879_v0 }
 0x364   : > { %9372 = vmatprep.subr.bf16.mxu1 %v3896_v8 }
 0x365   : > { %10292 = vmatpush3.bf16.msra.mxu0 %v10692_v43 }
 0x366   : > { %10293 = vmatprep.subr.bf16.mxu0 %v15147_v59 }
 0x367   : > { %9373 = vmatpush3.bf16.msra.mxu1 %v3888_v58 }
 0x368   : > { %3673 = vmatmul.mubr.bf16.gmra.mrb[60].mxu0 %v13519_v5  ;;  %9374 = vmatprep.subr.bf16.mxu1 %v3897_v62  ;;  %v3890_v5 = vpack.c.bf16 %v3864_v13, %v3863_v23 }
 0x369   : > { %3680 = vmatprep.mubr.bf16.mxu0 %v13549_v53  ;;  %10294 = vmatpush3.bf16.msra.mxu0 %v10693_v63  ;;  %v3866_v53 = vld [vmem:[%s10958_s25 + $0x68] sm:$0xff] }
 0x36a   : > { %3746 = vmatmul.mubr.bf16.gmra.mrb[48].mxu1 %v13559_v52  ;;  %10295 = vmatprep.subr.bf16.mxu0 %v15147_v59  ;;  %v3891_v52 = vpack.c.bf16 %v3866_v53, %v3865_v4 }
 0x36b   : > { %3753 = vmatprep.mubr.bf16.mxu1 %v13555_v19  ;;  %9375 = vmatpush3.bf16.msra.mxu1 %v3889_v27  ;;  %v3900_v19 = vpack.c.bf16 %v3884_v45, %v3883_v55 }
 0x36c   : > { %9376 = vmatprep.subr.bf16.mxu1 %v3898_v21 }
 0x36d   : > { %10296 = vmatpush3.bf16.msra.mxu0 %v10694_v38 }
 0x36e   : > { %10297 = vmatprep.subr.bf16.mxu0 %v15147_v59 }
 0x36f   : > { %9377 = vmatpush3.bf16.msra.mxu1 %v3890_v5 }
 0x370   : > { %3681 = vmatmul.mubr.bf16.gmra.mrb[64].mxu0 %v13552_v14  ;;  %9378 = vmatprep.subr.bf16.mxu1 %v3899_v37  ;;  %v10699_v14 = vld [vmem:[%s15600_s6 + $0x4] ss:$8 sps:$4 sm:$0xff]  }
 0x371   : > { %3688 = vmatprep.mubr.bf16.mxu0 %v13562_v6  ;;  %10298 = vmatpush3.bf16.msra.mxu0 %v10695_v16  ;;  %v10697_v6 = vld [vmem:[%s15600_s6] ss:$8 sps:$4 sm:$0xff]  }
 0x372   : > { %3754 = vmatmul.mubr.bf16.gmra.mrb[52].mxu1 %v13588_v30  ;;  %10299 = vmatprep.subr.bf16.mxu0 %v15147_v59  ;;  %v10703_v30 = vld [vmem:[%s15600_s6 + $0x24] ss:$8 sps:$4 sm:$0xff]  }
 0x373   : > { %3761 = vmatprep.mubr.bf16.mxu1 %v13572_v33  ;;  %9379 = vmatpush3.bf16.msra.mxu1 %v3891_v52  ;;  %v10700_v33 = vld [vmem:[%s15600_s6 + $0x14] ss:$8 sps:$4 sm:$0xff]  }
 0x374   : > { %9380 = vmatprep.subr.bf16.mxu1 %v3900_v19 }
 0x375   : > { %10300 = vmatpush3.bf16.msra.mxu0 %v10696_v57 }
 0x376   : > { %10321 = vmatprep.subr.bf16.mxu0 %v15147_v59 }
 0x377   : > { %9381 = vmatpush3.bf16.msra.mxu1 %v3892_v18 }
 0x378   : > { %3689 = vmatmul.mubr.bf16.gmra.mrb[68].mxu0 %v13567_v35  ;;  %v10702_v35 = vld [vmem:[%s15600_s6 + $0x10] ss:$8 sps:$4 sm:$0xff]   ;;  %9418 = vmatprep.subr.bf16.mxu1 %v11003_v9 }
 0x379   : > { %10301 = vmatprep.mubr.msk.bf16.mxu0 %vm15141_vm8, %v15147_v59 }
 0x37a   : > { %3762 = vmatmul.mubr.bf16.gmra.mrb[56].mxu1 %v13591_v49  ;;  %v10706_v49 = vld [vmem:[%s15600_s6 + $0x34] ss:$8 sps:$4 sm:$0xff]  }
 0x37b   : > { %3983 = vmatprep.mubr.bf16.mxu1 %v10699_v14 }
 0x380   : > { %10302 = vmatmul.mubr.bf16.vlgmr.msra.gmra.mrb[72].mxu0 %v13491_v32  ;;  %v10705_v32 = vld [vmem:[%s15600_s6 + $0x20] ss:$8 sps:$4 sm:$0xff]  }
 0x381   : > { %10305 = vmatprep.mubr.msk.bf16.mxu0 %vm15141_vm8, %v15147_v59 }
 0x382   : > { %3984 = vmatmul.mubr.bf16.vlgmr.msra.gmra.mrb[60].mxu1 %v10697_v6 }
 0x383   : > { %3991 = vmatprep.mubr.bf16.mxu1 %v10700_v33 }
 0x388   : > { %10306 = vmatmul.mubr.bf16.gmra.mrb[76].mxu0 %v13597_v34  ;;  %v10708_v34 = vld [vmem:[%s15600_s6 + $0x30] ss:$8 sps:$4 sm:$0xff]  }
 0x389   : > { %10309 = vmatprep.mubr.msk.bf16.mxu0 %vm15141_vm8, %v15147_v59 }
 0x38a   : > { %3992 = vmatmul.mubr.bf16.gmra.mrb[64].mxu1 %v10702_v35 }
 0x38b   : > { %3999 = vmatprep.mubr.bf16.mxu1 %v10703_v30 }
 0x390   : > { %10310 = vmatmul.mubr.bf16.gmra.mrb[80].mxu0 %v13604_v29  ;;  %v10711_v29 = vld [vmem:[%s15600_s6 + $0x40] ss:$8 sps:$4 sm:$0xff]  }
 0x391   : > { %10313 = vmatprep.mubr.msk.bf16.mxu0 %vm15141_vm8, %v15147_v59 }
 0x392   : > { %4000 = vmatmul.mubr.bf16.gmra.mrb[68].mxu1 %v10705_v32 }
 0x393   : > { %4007 = vmatprep.mubr.bf16.mxu1 %v10706_v49 }
 0x398   : > { %10314 = vmatmul.mubr.bf16.gmra.mrb[84].mxu0 %v13607_v41  ;;  %v4029_v41 = vld [vmem:[%s15076_s8] sm:$0x3] }
 0x399   : > { %10317 = vmatprep.mubr.msk.bf16.mxu0 %vm15141_vm8, %v15147_v59  ;;  %v4058_v48 = vand.u32 %v4056_v7, %v4029_v41 }
 0x39a   : > { %4008 = vmatmul.mubr.bf16.gmra.mrb[72].mxu1 %v10708_v34 }
 0x39b   : > { %4015 = vmatprep.mubr.bf16.mxu1 %v10709_v56  ;;  %10322 = vmatpush3.bf16.msra.mxu0 %v4058_v48 }
 0x39c   : > { %9464 = vmatprep.subr.bf16.mxu0 %v11083_v25 }
 0x3a0   : > { %10318 = vmatmul.mubr.bf16.gmra.mrb[88].mxu0 %v13610_v20  ;;  %v13717_v20 = vld [vmem:[%s15075_s7] ss:$0 sm:$0xff] }
 0x3a1   : > { %10323 = vmatprep.mubr.msk.bf16.mxu0 %vm15141_vm8, %v15147_v59 }
 0x3a2   : > { %4016 = vmatmul.mubr.bf16.gmra.mrb[76].mxu1 %v10711_v29 }
 0x3fe   : > { %v9185_v39 = vpop.f32.mrb[32].mxu0 }
 0x3ff   : > { %v9186_v50 = vpop.f32.mrb[33].mxu0 }
 0x400   : > { %v9187_v51 = vadd.f32 %v9186_v50, %v9185_v39  ;;  %v9188_v54 = vpop.f32.mrb[34].mxu0 }
 0x401   : > { %v9189_v3 = vpop.f32.mrb[35].mxu0 }
 0x402   : > { %v9190_v28 = vadd.f32 %v9189_v3, %v9188_v54  ;;  %v3513_v15 = vadd.f32 %v9187_v51, %v13717_v20  ;;  %v9231_v8 = vpop.f32.mrb[20].mxu1 }
 0x403   : > { %v9232_v42 = vpop.f32.mrb[21].mxu1 }
 0x404   : > { %v3516_v12 = vadd.f32 %v9190_v28, %v13717_v20  ;;  %v9233_v43 = vadd.f32 %v9232_v42, %v9231_v8  ;;  %v9234_v60 = vpop.f32.mrb[22].mxu1 }
 0x405   : > { %v9235_v58 = vpop.f32.mrb[23].mxu1 }
 0x406   : > { %v9191_v40 = vpop.f32.mrb[36].mxu0  ;;  %v13721_v62 = vadd.f32 %v9233_v43, %v3513_v15  ;;  %v9236_v24 = vadd.f32 %v9235_v58, %v9234_v60 }
 0x407   : > { %v9192_v46 = vpop.f32.mrb[37].mxu0 }
 0x408   : > { %v9193_v63 = vadd.f32 %v9192_v46, %v9191_v40  ;;  %v9194_v0 = vpop.f32.mrb[38].mxu0  ;;  %v13723_v47 = vadd.f32 %v9236_v24, %v3516_v12 }
 0x409   : > { %v9195_v27 = vpop.f32.mrb[39].mxu0 }
 0x40a   : > { %v9196_v21 = vadd.f32 %v9195_v27, %v9194_v0  ;;  %v3521_v23 = vadd.f32 %v9193_v63, %v13717_v20  ;;  %v9237_v13 = vpop.f32.mrb[24].mxu1 }
 0x40b   : > { %v9238_v38 = vpop.f32.mrb[25].mxu1 }
 0x40c   : > { %v3524_v31 = vadd.f32 %v9196_v21, %v13717_v20  ;;  %v9239_v11 = vadd.f32 %v9238_v38, %v9237_v13  ;;  %v9240_v5 = vpop.f32.mrb[26].mxu1 }
 0x40d   : > { %v9241_v4 = vpop.f32.mrb[27].mxu1 }
 0x40e   : > { %v9197_v37 = vpop.f32.mrb[40].mxu0  ;;  %v13727_v53 = vadd.f32 %v9239_v11, %v3521_v23  ;;  %v9242_v55 = vadd.f32 %v9241_v4, %v9240_v5 }
 0x40f   : > { %v9198_v16 = vpop.f32.mrb[41].mxu0 }
 0x410   : > { %v9199_v45 = vadd.f32 %v9198_v16, %v9197_v37  ;;  %v9200_v52 = vpop.f32.mrb[42].mxu0  ;;  %v13729_v19 = vadd.f32 %v9242_v55, %v3524_v31 }
 0x411   : > { %v9201_v61 = vpop.f32.mrb[43].mxu0 }
 0x412   : > { %v9202_v22 = vadd.f32 %v9201_v61, %v9200_v52  ;;  %v3529_v57 = vadd.f32 %v9199_v45, %v13717_v20  ;;  %v9243_v18 = vpop.f32.mrb[28].mxu1 }
 0x413   : > { %v9244_v14 = vpop.f32.mrb[29].mxu1 }
 0x414   : > { %v3532_v6 = vadd.f32 %v9202_v22, %v13717_v20  ;;  %v9245_v33 = vadd.f32 %v9244_v14, %v9243_v18  ;;  %v9246_v35 = vpop.f32.mrb[30].mxu1 }
 0x415   : > { %v9247_v32 = vpop.f32.mrb[31].mxu1 }
 0x416   : > { %v9203_v30 = vpop.f32.mrb[44].mxu0  ;;  %v13733_v49 = vadd.f32 %v9245_v33, %v3529_v57  ;;  %v9248_v56 = vadd.f32 %v9247_v32, %v9246_v35 }
 0x417   : > { %v9204_v34 = vpop.f32.mrb[45].mxu0 }
 0x418   : > { %v9205_v29 = vadd.f32 %v9204_v34, %v9203_v30  ;;  %v9206_v44 = vpop.f32.mrb[46].mxu0  ;;  %v13735_v36 = vadd.f32 %v9248_v56, %v3532_v6 }
 0x419   : > { %v9207_v41 = vpop.f32.mrb[47].mxu0 }
 0x41a   : > { %v9208_v7 = vadd.f32 %v9207_v41, %v9206_v44  ;;  %v3537_v48 = vadd.f32 %v9205_v29, %v13717_v20  ;;  %v9249_v39 = vpop.f32.mrb[32].mxu1 }
 0x41b   : > { %v9250_v50 = vpop.f32.mrb[33].mxu1 }
 0x41c   : > { %v3540_v51 = vadd.f32 %v9208_v7, %v13717_v20  ;;  %v9251_v54 = vadd.f32 %v9250_v50, %v9249_v39  ;;  %v9252_v3 = vpop.f32.mrb[34].mxu1 }
 0x41d   : > { %v9253_v28 = vpop.f32.mrb[35].mxu1 }
 0x41e   : > { %v13739_v15 = vadd.f32 %v9251_v54, %v3537_v48  ;;  %v9254_v8 = vadd.f32 %v9253_v28, %v9252_v3 }
 0x420   : > { %v13741_v12 = vadd.f32 %v9254_v8, %v3540_v51 }
 0x423   : > { %v9209_v42 = vpop.f32.mrb[48].mxu0 }
 0x424   : > { %v9210_v43 = vpop.f32.mrb[49].mxu0  ;;  %v9255_v58 = vpop.f32.mrb[36].mxu1 }
 0x425   : > { %v9211_v60 = vadd.f32 %v9210_v43, %v9209_v42  ;;  %v9212_v40 = vpop.f32.mrb[50].mxu0  ;;  %v9256_v24 = vpop.f32.mrb[37].mxu1 }
 0x426   : > { %v9213_v46 = vpop.f32.mrb[51].mxu0  ;;  %v9257_v27 = vadd.f32 %v9256_v24, %v9255_v58  ;;  %v9258_v21 = vpop.f32.mrb[38].mxu1 }
 0x427   : > { %v3545_v63 = vadd.f32 %v9211_v60, %v13717_v20  ;;  %v9214_v0 = vadd.f32 %v9213_v46, %v9212_v40  ;;  %v9259_v23 = vpop.f32.mrb[39].mxu1 }
 0x428   : > { %v9260_v31 = vadd.f32 %v9259_v23, %v9258_v21 }
 0x429   : > { %v3548_v13 = vadd.f32 %v9214_v0, %v13717_v20  ;;  %v13745_v38 = vadd.f32 %v9257_v27, %v3545_v63 }
 0x42b   : > { %v9277_v11 = vpop.f32.mrb[52].mxu0  ;;  %v13747_v5 = vadd.f32 %v9260_v31, %v3548_v13 }
 0x42c   : > { %v9278_v37 = vpop.f32.mrb[53].mxu0 }
 0x42d   : > { %v9279_v4 = vadd.f32 %v9278_v37, %v9277_v11  ;;  %v9280_v16 = vpop.f32.mrb[54].mxu0  ;;  %v9323_v55 = vpop.f32.mrb[40].mxu1 }
 0x42e   : > { %v9281_v45 = vpop.f32.mrb[55].mxu0  ;;  %v9324_v52 = vpop.f32.mrb[41].mxu1 }
 0x42f   : > { %v3659_v61 = vadd.f32 %v9279_v4, %v13721_v62  ;;  %v9282_v22 = vadd.f32 %v9281_v45, %v9280_v16  ;;  %v9325_v57 = vadd.f32 %v9324_v52, %v9323_v55  ;;  %v9326_v18 = vpop.f32.mrb[42].mxu1 }
 0x430   : > { %v9327_v14 = vpop.f32.mrb[43].mxu1 }
 0x431   : > { %v3662_v20 = vadd.f32 %v9282_v22, %v13723_v47  ;;  %v13751_v6 = vadd.f32 %v9325_v57, %v3659_v61  ;;  %v9328_v33 = vadd.f32 %v9327_v14, %v9326_v18 }
 0x433   : > { %v9283_v35 = vpop.f32.mrb[56].mxu0  ;;  %v13753_v30 = vadd.f32 %v9328_v33, %v3662_v20 }
 0x434   : > { %v9284_v32 = vpop.f32.mrb[57].mxu0 }
 0x435   : > { %v9285_v34 = vadd.f32 %v9284_v32, %v9283_v35  ;;  %v9286_v56 = vpop.f32.mrb[58].mxu0  ;;  %v9329_v29 = vpop.f32.mrb[44].mxu1 }
 0x436   : > { %v9287_v44 = vpop.f32.mrb[59].mxu0  ;;  %v9330_v41 = vpop.f32.mrb[45].mxu1 }
 0x437   : > { %v3667_v62 = vadd.f32 %v9285_v34, %v13727_v53  ;;  %v9288_v7 = vadd.f32 %v9287_v44, %v9286_v56  ;;  %v9331_v48 = vadd.f32 %v9330_v41, %v9329_v29  ;;  %v9332_v39 = vpop.f32.mrb[46].mxu1 }
 0x438   : > { %v9333_v50 = vpop.f32.mrb[47].mxu1 }
 0x439   : > { %v3670_v47 = vadd.f32 %v9288_v7, %v13729_v19  ;;  %v13757_v51 = vadd.f32 %v9331_v48, %v3667_v62  ;;  %v9334_v54 = vadd.f32 %v9333_v50, %v9332_v39 }
 0x43b   : > { %v9289_v3 = vpop.f32.mrb[60].mxu0  ;;  %v13759_v28 = vadd.f32 %v9334_v54, %v3670_v47 }
 0x43c   : > { %v9290_v8 = vpop.f32.mrb[61].mxu0 }
 0x43d   : > { %v9291_v42 = vadd.f32 %v9290_v8, %v9289_v3  ;;  %v9292_v43 = vpop.f32.mrb[62].mxu0  ;;  %v9335_v60 = vpop.f32.mrb[48].mxu1 }
 0x43e   : > { %v9293_v40 = vpop.f32.mrb[63].mxu0  ;;  %v9336_v58 = vpop.f32.mrb[49].mxu1 }
 0x43f   : > { %v3675_v53 = vadd.f32 %v9291_v42, %v13733_v49  ;;  %v9294_v46 = vadd.f32 %v9293_v40, %v9292_v43  ;;  %v9337_v24 = vadd.f32 %v9336_v58, %v9335_v60  ;;  %v9338_v63 = vpop.f32.mrb[50].mxu1 }
 0x440   : > { %v9339_v0 = vpop.f32.mrb[51].mxu1 }
 0x441   : > { %v3678_v19 = vadd.f32 %v9294_v46, %v13735_v36  ;;  %v13763_v27 = vadd.f32 %v9337_v24, %v3675_v53  ;;  %v9340_v21 = vadd.f32 %v9339_v0, %v9338_v63 }
 0x443   : > { %v9295_v23 = vpop.f32.mrb[64].mxu0  ;;  %v13765_v13 = vadd.f32 %v9340_v21, %v3678_v19 }
 0x444   : > { %v9296_v31 = vpop.f32.mrb[65].mxu0 }
 0x445   : > { %v9297_v11 = vadd.f32 %v9296_v31, %v9295_v23  ;;  %v9298_v37 = vpop.f32.mrb[66].mxu0  ;;  %v9341_v4 = vpop.f32.mrb[52].mxu1 }
 0x446   : > { %v9299_v16 = vpop.f32.mrb[67].mxu0  ;;  %v9342_v55 = vpop.f32.mrb[53].mxu1 }
 0x447   : > { %v3683_v49 = vadd.f32 %v9297_v11, %v13739_v15  ;;  %v9300_v45 = vadd.f32 %v9299_v16, %v9298_v37  ;;  %v9343_v52 = vadd.f32 %v9342_v55, %v9341_v4  ;;  %v9344_v61 = vpop.f32.mrb[54].mxu1 }
 0x448   : > { %v9345_v22 = vpop.f32.mrb[55].mxu1 }
 0x449   : > { %v3686_v36 = vadd.f32 %v9300_v45, %v13741_v12  ;;  %v13769_v57 = vadd.f32 %v9343_v52, %v3683_v49  ;;  %v9346_v18 = vadd.f32 %v9345_v22, %v9344_v61 }
 0x44b   : > { %v9301_v14 = vpop.f32.mrb[68].mxu0  ;;  %v13771_v20 = vadd.f32 %v9346_v18, %v3686_v36 }
 0x44c   : > { %v9302_v33 = vpop.f32.mrb[69].mxu0 }
 0x44d   : > { %v9303_v35 = vadd.f32 %v9302_v33, %v9301_v14  ;;  %v9304_v32 = vpop.f32.mrb[70].mxu0  ;;  %v9347_v34 = vpop.f32.mrb[56].mxu1 }
 0x44e   : > { %v9305_v56 = vpop.f32.mrb[71].mxu0  ;;  %v9348_v29 = vpop.f32.mrb[57].mxu1 }
 0x44f   : > { %v3691_v15 = vadd.f32 %v9303_v35, %v13745_v38  ;;  %v9306_v44 = vadd.f32 %v9305_v56, %v9304_v32  ;;  %v9349_v41 = vadd.f32 %v9348_v29, %v9347_v34  ;;  %v9350_v62 = vpop.f32.mrb[58].mxu1  ;;  %v13795_v32 = vld [vmem:[%s15077_s9] ss:$0 sm:$0xff] }
 0x450   : > { %v9351_v7 = vpop.f32.mrb[59].mxu1  ;;  %v10527_v34 = vadd.f32 %v13795_v32, %v13751_v6 }
 0x451   : > { %v3694_v12 = vadd.f32 %v9306_v44, %v13747_v5  ;;  %v13775_v48 = vadd.f32 %v9349_v41, %v3691_v15  ;;  %v9352_v39 = vadd.f32 %v9351_v7, %v9350_v62  ;;  %v10529_v44 = vadd.f32 %v13795_v32, %v13753_v30 }
 0x453   : > { %v13777_v50 = vadd.f32 %v9352_v39, %v3694_v12 }
 0x455   : > { %v9382_v47 = vpop.f32.mrb[60].mxu1 }
 0x456   : > { %v9383_v54 = vpop.f32.mrb[61].mxu1 }
 0x457   : > { %v9384_v3 = vadd.f32 %v9383_v54, %v9382_v47  ;;  %v9385_v8 = vpop.f32.mrb[62].mxu1  ;;  %v10531_v47 = vadd.f32 %v13795_v32, %v13757_v51 }
 0x458   : > { %v9386_v42 = vpop.f32.mrb[63].mxu1 }
 0x459   : > { %v9387_v43 = vadd.f32 %v9386_v42, %v9385_v8  ;;  %v10533_v42 = vadd.f32 %v13795_v32, %v13759_v28  ;;  %v10535_v28 = vadd.f32 %v13795_v32, %v13763_v27 }
 0x45b   : > { %v4024_v60 = vpack.c.bf16 %v9387_v43, %v9384_v3  ;;  %v4164_v43 = vld [vmem:[#allocation2 + $0x8] sm:$0x3e] }
 0x45d   : > { %v9388_v38 = vpop.f32.mrb[64].mxu1  ;;  %10324 = vmatmul.mubr.msk.bf16.vlgmr.msra.gmra.mrb[72].mxu0 %vm4037_vm10, %v4024_v60  ;;  %v4174_v60 = vld [vmem:[#allocation2 + $0x8] sm:$0xc0] }
 0x45e   : > { %v9389_v40 = vpop.f32.mrb[65].mxu1  ;;  %10327 = vmatprep.mubr.msk.bf16.mxu0 %vm15141_vm8, %v15147_v59 }
 0x45f   : > { %v9390_v5 = vadd.f32 %v9389_v40, %v9388_v38  ;;  %v9391_v58 = vpop.f32.mrb[66].mxu1 }
 0x460   : > { %v9392_v53 = vpop.f32.mrb[67].mxu1 }
 0x461   : > { %v9393_v46 = vadd.f32 %v9392_v53, %v9391_v58 }
 0x463   : > { %v4025_v24 = vpack.c.bf16 %v9393_v46, %v9390_v5 }
 0x465   : > { %v9394_v63 = vpop.f32.mrb[68].mxu1  ;;  %10328 = vmatmul.mubr.msk.bf16.gmra.mrb[76].mxu0 %vm4037_vm10, %v4025_v24 }
 0x466   : > { %v9395_v0 = vpop.f32.mrb[69].mxu1  ;;  %10331 = vmatprep.mubr.msk.bf16.mxu0 %vm15141_vm8, %v15147_v59 }
 0x467   : > { %v9396_v19 = vadd.f32 %v9395_v0, %v9394_v63  ;;  %v9397_v21 = vpop.f32.mrb[70].mxu1 }
 0x468   : > { %v9398_v23 = vpop.f32.mrb[71].mxu1 }
 0x469   : > { %v9399_v31 = vadd.f32 %v9398_v23, %v9397_v21  ;;  %v10537_v23 = vadd.f32 %v13795_v32, %v13765_v13 }
 0x46b   : > { %v4026_v11 = vpack.c.bf16 %v9399_v31, %v9396_v19  ;;  %v4185_v31 = vld [vmem:[#allocation2 + $0x10] sm:$0xf8] }
 0x46d   : > { %v9400_v37 = vpop.f32.mrb[72].mxu1  ;;  %10332 = vmatmul.mubr.msk.bf16.gmra.mrb[80].mxu0 %vm4037_vm10, %v4026_v11 }
 0x46e   : > { %v9401_v4 = vpop.f32.mrb[73].mxu1  ;;  %10335 = vmatprep.mubr.msk.bf16.mxu0 %vm15141_vm8, %v15147_v59 }
 0x46f   : > { %v9402_v16 = vadd.f32 %v9401_v4, %v9400_v37  ;;  %v9403_v55 = vpop.f32.mrb[74].mxu1  ;;  %v4179_v4 = vld [vmem:[#allocation2 + $0x10] sm:$0x7] }
 0x470   : > { %v9404_v49 = vpop.f32.mrb[75].mxu1 }
 0x471   : > { %v9405_v45 = vadd.f32 %v9404_v49, %v9403_v55 }
 0x473   : > { %v4027_v52 = vpack.c.bf16 %v9405_v45, %v9402_v16 }
 0x475   : > { %v9406_v61 = vpop.f32.mrb[76].mxu1  ;;  %10336 = vmatmul.mubr.msk.bf16.gmra.mrb[84].mxu0 %vm4037_vm10, %v4027_v52 }
 0x476   : > { %v9407_v22 = vpop.f32.mrb[77].mxu1  ;;  %10339 = vmatprep.mubr.msk.bf16.mxu0 %vm15141_vm8, %v15147_v59  ;;  %vm4172_vm8 = vsmask.f32 7962 }
 0x477   : > { %v9408_v36 = vadd.f32 %v9407_v22, %v9406_v61  ;;  %v9409_v18 = vpop.f32.mrb[78].mxu1  ;;  %vm4173_vm4 = vmand %vm4171_vm1, %vm4172_vm8  ;;  %vm4183_vm1 = vsmask.f32 7438  ;;  %vm15146_vm8 = vcmask 1042432   ;;  %v10539_v61 = vadd.f32 %v13795_v32, %v13769_v57  ;;  %v4195_v57 = vld [vmem:[#allocation2 + $0x18] sm:$0x1f] }
 0x478   : > { %v9410_v14 = vpop.f32.mrb[79].mxu1 }
 0x479   : > { %v9411_v33 = vadd.f32 %v9410_v14, %v9409_v18 }
 0x47b   : > { %v4028_v35 = vpack.c.bf16 %v9411_v33, %v9408_v36 }
 0x47d   : > { %10340 = vmatmul.mubr.msk.bf16.gmra.mrb[88].mxu0 %vm4037_vm10, %v4028_v35  ;;  %vm4162_vm10 = vsmask.f32 5382  ;;  %v10541_v35 = vadd.f32 %v13795_v32, %v13771_v20 }
 0x47e   : > { %vm4163_vm9 = vmand %vm4161_vm11, %vm4162_vm10  ;;  %vm4193_vm10 = vsmask.f32 4354 }
 0x47f   : > { %vm4184_vm11 = vmand %vm1784_vm3, %vm4183_vm1  ;;  %vm15145_vm3 = vcmask 1047557  }
 0x530   : > { %v4094_v56 = vpop.f32.mrb[72].mxu0 }
 0x531   : > { %v13799_v29 = vadd.f32 %v10527_v34, %v4094_v56  ;;  %v10325_v15 = vpop.f32.mrb[73].mxu0  ;;  %v4206_v34 = vld [vmem:[#allocation2 + $0x18] sm:$0xe0] }
 0x532   : > { %v4097_v41 = vpop.f32.mrb[74].mxu0 }
 0x533   : > { %v13803_v62 = vadd.f32 %v10529_v44, %v4097_v41  ;;  %v10326_v7 = vpop.f32.mrb[75].mxu0  ;;  %v4143_v12 = vmax.f32 %v13799_v29, 0.0 }
 0x535   : > { %v4144_v39 = vmax.f32 %v13803_v62, 0.0 }
 0x537   : > { %v4153_v6 = vpack.c.bf16 %v4144_v39, %v4143_v12 }
 0x538   : > { %v4102_v54 = vpop.f32.mrb[76].mxu0 }
 0x539   : > { %v4159_v30 = vrot.slane %v4153_v6, 7  ;;  %v13809_v3 = vadd.f32 %v10531_v47, %v4102_v54  ;;  %v10329_v8 = vpop.f32.mrb[77].mxu0  ;;  %v10543_v54 = vadd.f32 %v13795_v32, %v13775_v48  ;;  %v10545_v48 = vadd.f32 %v13795_v32, %v13777_v50 }
 0x53a   : > { %v4105_v38 = vpop.f32.mrb[78].mxu0 }
 0x53b   : > { %v4165_v40 = vsel %vm4163_vm9, %v4159_v30, %v4164_v43  ;;  %v4175_v5 = vsel %vm4173_vm4, %v4159_v30, %v4174_v60  ;;  %v13813_v58 = vadd.f32 %v10533_v42, %v4105_v38  ;;  %v10330_v53 = vpop.f32.mrb[79].mxu0  ;;  %v4145_v51 = vmax.f32 %v13809_v3, 0.0  ;;  %vm4178_vm9 = vmand %vm15146_vm8, %vm2827_vm6 }
 0x53c   : > { %4166 = vst [vmem:[#allocation2 + $0x8] sm:$0x3e] %v4165_v40  ;;  %4176 = vst [vmem:[#allocation2 + $0x8] sm:$0xc0] %v4175_v5  ;;  %vm4204_vm4 = vsmask.f32 7958 }
 0x53d   : > { %v4146_v46 = vmax.f32 %v13813_v58, 0.0  ;;  %vm4205_vm1 = vmand %vm15145_vm3, %vm4204_vm4  ;;  %vm4224_vm4 = vcmask 1047559   ;;  %v15625_v43 = vmov 0  ;;  %v4217_v40 = vld [vmem:[#allocation2 + $0x20] sm:$0x7c] }
 0x53e   : > { %v4227_v5 = vld [vmem:[#allocation2 + $0x20] sm:$0x80]  ;;  %vm4230_vm8 = vmand %vm2565_vm13, %vm2593_vm15 }
 0x53f   : > { %v4154_v24 = vpack.c.bf16 %v4146_v46, %v4145_v51  ;;  %v4210_v46 = vld [vmem:[#allocation2 + $0x20] sm:$0x3] }
 0x540   : > { %v4110_v63 = vpop.f32.mrb[80].mxu0 }
 0x541   : > { %v4168_v0 = vrot.slane %v4154_v24, 7  ;;  %v13822_v19 = vadd.f32 %v10535_v28, %v4110_v63  ;;  %v10333_v21 = vpop.f32.mrb[81].mxu0 }
 0x542   : > { %v4113_v11 = vpop.f32.mrb[82].mxu0 }
 0x543   : > { %v4169_v37 = vsel %vm2316_vm12, %v4159_v30, %v4168_v0  ;;  %v4186_v16 = vsel %vm4184_vm11, %v4168_v0, %v4185_v31  ;;  %v13827_v27 = vadd.f32 %v10537_v23, %v4113_v11  ;;  %v10334_v55 = vpop.f32.mrb[83].mxu0  ;;  %v4147_v45 = vmax.f32 %v13822_v19, 0.0  ;;  %vm13835_vm11 = vmand %vm1957_vm0, %vm4193_vm10  ;;  %v4238_v11 = vld [vmem:[#allocation2 + $0x28] sm:$0xf0] }
 0x544   : > { %v4180_v49 = vsel %vm4178_vm9, %v4169_v37, %v4179_v4  ;;  %4187 = vst [vmem:[#allocation2 + $0x10] sm:$0xf8] %v4186_v16  ;;  %vm4214_vm0 = vcmask 1046530   ;;  %vm4215_vm9 = vsmask.f32 6410  ;;  %v15622_v30 = vmov 0 }
 0x545   : > { %4181 = vst [vmem:[#allocation2 + $0x10] sm:$0x7] %v4180_v49  ;;  %v4148_v52 = vmax.f32 %v13827_v27, 0.0  ;;  %vm4225_vm10 = vsmask.f32 7966  ;;  %vm13850_vm3 = vmand %vm4214_vm0, %vm4215_vm9  ;;  %vm4235_vm0 = vcmask 1047556  }
 0x546   : > { %vm4236_vm9 = vsmask.f32 7954  ;;  %v4243_v37 = vld [vmem:[#allocation2 + $0x30] sm:$0x1]  ;;  %v4231_v16 = vld [vmem:[#allocation2 + $0x28] sm:$0xf] }
 0x547   : > { %v4155_v13 = vpack.c.bf16 %v4148_v52, %v4147_v45 }
 0x548   : > { %v4118_v22 = vpop.f32.mrb[84].mxu0 }
 0x549   : > { %v4189_v18 = vrot.slane %v4155_v13, 7  ;;  %v13839_v14 = vadd.f32 %v10539_v61, %v4118_v22  ;;  %v10337_v33 = vpop.f32.mrb[85].mxu0 }
 0x54a   : > { %v4121_v56 = vpop.f32.mrb[86].mxu0 }
 0x54b   : > { %v4190_v15 = vsel %vm2316_vm12, %v4168_v0, %v4189_v18  ;;  %v4207_v44 = vsel %vm4205_vm1, %v4189_v18, %v4206_v34  ;;  %v13844_v41 = vadd.f32 %v10541_v35, %v4121_v56  ;;  %v10338_v7 = vpop.f32.mrb[87].mxu0  ;;  %v4149_v39 = vmax.f32 %v13839_v14, 0.0  ;;  %vm13856_vm1 = vmand %vm4224_vm4, %vm4225_vm10 }
 0x54c   : > { %v4196_v12 = vsel %vm13835_vm11, %v4190_v15, %v4195_v57  ;;  %4208 = vst [vmem:[#allocation2 + $0x18] sm:$0xe0] %v4207_v44  ;;  %v15623_v30 = vsel %vm13856_vm1, 4294967295, %v15622_v30  ;;  %vm13862_vm11 = vmand %vm2903_vm5, %vm2931_vm7  ;;  %vm15157_vm4 = vsmask.f32 256 }
 0x54d   : > { %15619 = vst [vmem:[#allocation449_spill] sm:$0xff] %v13844_v41  ;;  %4197 = vst [vmem:[#allocation2 + $0x18] sm:$0x1f] %v4196_v12  ;;  %v4150_v20 = vmax.f32 %v13844_v41, 0.0  ;;  %v15626_v43 = vsel %vm13862_vm11, 4294967295, %v15625_v43 }
 0x54e   : > { %15624 = vst [vmem:[#allocation450_spill] sm:$0xff] %v15623_v30  ;;  %15627 = vst [vmem:[#allocation451_spill] sm:$0xff] %v15626_v43 }
 0x54f   : > { %v4156_v6 = vpack.c.bf16 %v4150_v20, %v4149_v39  ;;  %vm4242_vm10 = vmand %vm2316_vm12, %vm15157_vm4 }
 0x550   : > { %v4126_v8 = vpop.f32.mrb[88].mxu0 }
 0x551   : > { %v4199_v42 = vrot.slane %v4156_v6, 7  ;;  %v13866_v60 = vadd.f32 %v10543_v54, %v4126_v8  ;;  %v10341_v38 = vpop.f32.mrb[89].mxu0 }
 0x552   : > { %v4129_v53 = vpop.f32.mrb[90].mxu0 }
 0x553   : > { %15628 = vst [vmem:[#allocation452_spill] sm:$0xff] %v13866_v60  ;;  %v4200_v51 = vsel %vm2316_vm12, %v4189_v18, %v4199_v42  ;;  %v4218_v24 = vsel %vm13850_vm3, %v4199_v42, %v4217_v40  ;;  %v4228_v28 = vsel %vm13856_vm1, %v4199_v42, %v4227_v5  ;;  %v10342_v63 = vpop.f32.mrb[91].mxu0  ;;  %v13877_v21 = vadd.f32 %v10545_v48, %v4129_v53  ;;  %vm4237_vm3 = vmand %vm4235_vm0, %vm4236_vm9 }
 0x554   : > { %v4211_v0 = vsel %vm13862_vm11, %v4200_v51, %v4210_v46  ;;  %4219 = vst [vmem:[#allocation2 + $0x20] sm:$0x7c] %v4218_v24  ;;  %4229 = vst [vmem:[#allocation2 + $0x20] sm:$0x80] %v4228_v28  ;;  %v4151_v50 = vmax.f32 %v13866_v60, 0.0 }
 0x555   : > { %15629 = vst [vmem:[#allocation453_spill] sm:$0xff] %v13877_v21  ;;  %4212 = vst [vmem:[#allocation2 + $0x20] sm:$0x3] %v4211_v0  ;;  %v4152_v32 = vmax.f32 %v13877_v21, 0.0 }
 0x557   : > { %v4157_v23 = vpack.c.bf16 %v4152_v32, %v4151_v50 }
 0x559   : > { %v4221_v31 = vrot.slane %v4157_v23, 7 }
 0x55b   : > { %v4222_v4 = vsel %vm2316_vm12, %v4199_v42, %v4221_v31  ;;  %v4239_v55 = vsel %vm4237_vm3, %v4221_v31, %v4238_v11  ;;  %v4244_v49 = vsel %vm4242_vm10, %v4221_v31, %v4243_v37 }
 0x55c   : > { %v4232_v45 = vsel %vm4230_vm8, %v4222_v4, %v4231_v16  ;;  %4240 = vst [vmem:[#allocation2 + $0x28] sm:$0xf0] %v4239_v55  ;;  %4245 = vst [vmem:[#allocation2 + $0x30] sm:$0x1] %v4244_v49 }
 0x55d   : > { %4233 = vst [vmem:[#allocation2 + $0x28] sm:$0xf] %v4232_v45 }
 0x55e   : > { %10760 = dma.done.wait [#allocation6], 9216 }
 0x55f   : > { %10761 = vsyncadd [#allocation6], 4294958080  ;;  %9419 = vmatpush3.bf16.msra.mxu1 %v10963_v1  ;;  %9465 = vmatpush3.bf16.msra.mxu0 %v11043_v17  ;;  %v15630_v52 = vld [vmem:[#allocation36_spill] sm:$0xff]  ;;  %v15631_v13 = vld [vmem:[#allocation30_spill] sm:$0xff]  ;;  %vm15661_vm8 = vsmask.f32 6400 }
 0x560   : > { %9420 = vmatprep.subr.bf16.mxu1 %v11008_v10  ;;  %9466 = vmatprep.subr.bf16.mxu0 %v11088_v26  ;;  %v15632_v61 = vld [vmem:[#allocation43_spill] sm:$0xff]  ;;  %v4392_v9 = vld [vmem:[#allocation2] sm:$0xf0]  ;;  %v4393_v25 = vld [vmem:[#allocation2 + $0x8] sm:$0xff]  ;;  %s15705_s25 = sld [smem:[#allocation457_spill]] }
 0x561   : > { %v4323_v22 = vld [vmem:[#allocation2] sm:$0xf8]  ;;  %v4404_v36 = vrot.slane %v4392_v9, 4  ;;  %v4405_v18 = vrot.slane %v4393_v25, 4  ;;  %v13896_v17 = vld [vmem:[#allocation2 + $0x10] sm:$0xff]  ;;  %v15633_v10 = vld [vmem:[#allocation24_spill] sm:$0xff] }
 0x562   : > { %v4330_v1 = vshrl.u32 %v4323_v22, 16  ;;  %v4333_v33 = vshll.u32 %v4323_v22, 16  ;;  %v15634_v26 = vld [vmem:[#allocation37_spill] sm:$0xff]  ;;  %v4341_v35 = vshll.u32 %v4393_v25, 16  ;;  %v13901_v34 = vshll.u32 %v13896_v17, 16  ;;  %v15635_v57 = vld [vmem:[#allocation31_spill] sm:$0xff]  ;;  %vm15667_vm9 = vmmov %vm15661_vm8 }
 0x563   : > { %9421 = vmatpush3.bf16.msra.mxu1 %v10968_v2  ;;  %9467 = vmatpush3.bf16.msra.mxu0 %v15630_v52  ;;  %v4338_v2 = vshrl.u32 %v4393_v25, 16  ;;  %v13904_v56 = vshrl.u32 %v13896_v17, 16  ;;  %v4425_v15 = vld [vmem:[#allocation2] sm:$0xf0]  ;;  %v15636_v44 = vld [vmem:[#allocation44_spill] sm:$0xff]  ;;  %v4406_v7 = vsel %vm2565_vm13, %v4404_v36, %v4405_v18  ;;  %v15638_v48 = vld [vmem:[#allocation38_spill] sm:$0xff] }
 0x564   : > { %9422 = vmatprep.subr.bf16.mxu1 %v15631_v13  ;;  %9468 = vmatprep.subr.bf16.mxu0 %v15632_v61  ;;  %v4332_v12 = vrot.slane %v4330_v1, 3  ;;  %v4335_v39 = vrot.slane %v4333_v33, 4  ;;  %v4432_v20 = vshrl.u32 %v4425_v15, 16  ;;  %v4343_v47 = vrot.slane %v4341_v35, 4  ;;  %v15637_v53 = vld [vmem:[#allocation25_spill] sm:$0xff]  ;;  %v13913_v63 = vld [vmem:[#allocation2 + $0x18] sm:$0xff]  ;;  %vm15671_vm10 = vmmov %vm15661_vm8 }
 0x565   : > { %4910 = vmatprep.mubr.bf16.mxu1 %v4406_v7  ;;  %v4340_v6 = vrot.slane %v4338_v2, 3  ;;  %v4505_v54 = vrot.slane %v4341_v35, 1  ;;  %v4510_v8 = vrot.slane %v13901_v34, 1  ;;  %v4435_v40 = vshll.u32 %v4425_v15, 16  ;;  %v15639_v0 = vld [vmem:[#allocation32_spill] sm:$0xff]  ;;  %v15640_v50 = vld [vmem:[#allocation45_spill] sm:$0xff] }
 0x566   : > { %v4336_v42 = vor.u32 %v4335_v39, %v4332_v12  ;;  %v4434_v38 = vrot.slane %v4432_v20, 4  ;;  %v4442_v5 = vrot.slane %v4338_v2, 4  ;;  %v4445_v24 = vrot.slane %v4341_v35, 5  ;;  %v13920_v37 = vld [vmem:[#allocation2 + $0x20] sm:$0xff]  ;;  %v15641_v9 = vld [vmem:[#allocation26_spill] sm:$0xff]  ;;  %v15642_v25 = vld [vmem:[#allocation39_spill] sm:$0xff] }
 0x567   : > { %9423 = vmatpush3.bf16.msra.mxu1 %v15633_v10  ;;  %9469 = vmatpush3.bf16.msra.mxu0 %v15634_v26  ;;  %v4344_v51 = vor.u32 %v4343_v47, %v4340_v6  ;;  %v4506_v46 = vor.u32 %v4505_v54, %v4338_v2  ;;  %v4407_v28 = vrot.slane %v13896_v17, 4  ;;  %v4437_v32 = vrot.slane %v4435_v40, 5  ;;  %v15643_v33 = vld [vmem:[#allocation33_spill] sm:$0xff]  ;;  %v15644_v10 = vld [vmem:[#allocation46_spill] sm:$0xff]  ;;  %v15675_v30 = vld [vmem:[#allocation52_spill] sm:$0xff] }
 0x568   : > { %9424 = vmatprep.subr.bf16.mxu1 %v15635_v57  ;;  %9470 = vmatprep.subr.bf16.mxu0 %v15636_v44  ;;  %v4349_v23 = vrot.slane %v13904_v56, 3  ;;  %v4352_v31 = vrot.slane %v13901_v34, 4  ;;  %v4514_v11 = vor.u32 %v13904_v56, %v4510_v8  ;;  %v4446_v55 = vor.u32 %v4445_v24, %v4442_v5  ;;  %v13960_v39 = vld [vmem:[#allocation2 + $0x28] sm:$0xff]  ;;  %v4661_v43 = vld [vmem:[#allocation2 + $0x30] sm:$0x3f] }
 0x569   : > { %v13923_v4 = vsel %vm2489_vm14, %v4336_v42, %v4344_v51  ;;  %v4511_v16 = vsel %vm2663_vm2, %v4506_v46, %v4510_v8  ;;  %v13927_v49 = vsel %vm2565_vm13, %v4405_v18, %v4407_v28  ;;  %v4438_v45 = vor.u32 %v4437_v32, %v4434_v38  ;;  %v15645_v8 = vld [vmem:[#allocation27_spill] sm:$0xff]  ;;  %v15646_v42 = vld [vmem:[#allocation40_spill] sm:$0xff]  ;;  %v4328_v32 = vld [vmem:[#allocation2 + $0x28] sm:$0xf] }
 0x56a   : > { %4983 = vmatprep.mubr.bf16.mxu0 %v4511_v16  ;;  %4421 = vst [vmem:[#allocation4 + $0x50] sm:$0xff] %v13927_v49  ;;  %v4353_v52 = vor.u32 %v4352_v31, %v4349_v23  ;;  %v13931_v13 = vshll.u32 %v13913_v63, 16  ;;  %v4451_v61 = vrot.slane %v13904_v56, 4  ;;  %v4454_v22 = vrot.slane %v13901_v34, 5 }
 0x56b   : > { %9425 = vmatpush3.bf16.msra.mxu1 %v15637_v53  ;;  %9471 = vmatpush3.bf16.msra.mxu0 %v15638_v48  ;;  %v4409_v36 = vrot.slane %v13913_v63, 4  ;;  %v13939_v18 = vshrl.u32 %v13913_v63, 16  ;;  %v13942_v1 = vshll.u32 %v13920_v37, 16  ;;  %v13947_v26 = vsel %vm2593_vm15, %v4438_v45, %v4446_v55  ;;  %v15647_v48 = vld [vmem:[#allocation34_spill] sm:$0xff] }
 0x56c   : > { %9426 = vmatprep.subr.bf16.mxu1 %v15639_v0  ;;  %9472 = vmatprep.subr.bf16.mxu0 %v15640_v50  ;;  %v13950_v2 = vsel %vm2489_vm14, %v4344_v51, %v4353_v52  ;;  %v4518_v35 = vrot.slane %v13931_v13, 1  ;;  %v4361_v15 = vrot.slane %v13931_v13, 4  ;;  %v4455_v57 = vor.u32 %v4454_v22, %v4451_v61  ;;  %v15648_v51 = vld [vmem:[#allocation47_spill] sm:$0xff]  ;;  %v4397_v50 = vld [vmem:[#allocation2 + $0x28] sm:$0xf]  ;;  %v15649_v22 = vld [vmem:[#allocation28_spill] sm:$0xff] }
 0x56d   : > { %4388 = vst [vmem:[#allocation4 + $0x48] sm:$0xff] %v13950_v2  ;;  %v13956_v44 = vsel %vm2565_vm13, %v4407_v28, %v4409_v36  ;;  %v4358_v7 = vrot.slane %v13939_v18, 3  ;;  %v4526_v12 = vrot.slane %v13942_v1, 1  ;;  %v4460_v47 = vrot.slane %v13939_v18, 4 }
 0x56e   : > { %v13963_v20 = vsel %vm2663_vm2, %v4514_v11, %v4518_v35  ;;  %v4522_v6 = vor.u32 %v4518_v35, %v13939_v18  ;;  %v4463_v54 = vrot.slane %v13931_v13, 5  ;;  %v13972_v38 = vsel %vm2593_vm15, %v4446_v55, %v4455_v57  ;;  %v4499_v55 = vld [vmem:[#allocation2 + $0x30] sm:$0x1] }
 0x56f   : > { %9427 = vmatpush3.bf16.msra.mxu1 %v15641_v9  ;;  %9473 = vmatpush3.bf16.msra.mxu0 %v15642_v25  ;;  %4550 = vst [vmem:[#allocation4 + $0x60] sm:$0xff] %v13963_v20  ;;  %v4362_v40 = vor.u32 %v4361_v15, %v4358_v7  ;;  %v4411_v5 = vrot.slane %v13920_v37, 4  ;;  %v13976_v53 = vshrl.u32 %v13920_v37, 16  ;;  %4490 = vst [vmem:[#allocation4 + $0x58] sm:$0xff] %v13972_v38  ;;  %v4370_v28 = vrot.slane %v13942_v1, 4  ;;  %v15651_v7 = vld [vmem:[#allocation35_spill] sm:$0xff] }
 0x570   : > { %9428 = vmatprep.subr.bf16.mxu1 %v15643_v33  ;;  %9474 = vmatprep.subr.bf16.mxu0 %v15644_v10  ;;  %v13982_v46 = vsel %vm2663_vm2, %v4522_v6, %v4526_v12  ;;  %v4464_v24 = vor.u32 %v4463_v54, %v4460_v47  ;;  %v13986_v0 = vshll.u32 %v13960_v39, 16  ;;  %v4472_v25 = vrot.slane %v13942_v1, 5  ;;  %v4430_v15 = vld [vmem:[#allocation2 + $0x28] sm:$0x1f] }
 0x571   : > { %v13989_v23 = vsel %vm2489_vm14, %v4353_v52, %v4362_v40  ;;  %v13992_v31 = vsel %vm2565_vm13, %v4409_v36, %v4411_v5  ;;  %v4367_v11 = vrot.slane %v13976_v53, 3  ;;  %v4530_v16 = vor.u32 %v4526_v12, %v13976_v53  ;;  %v15650_v52 = vld [vmem:[#allocation41_spill] sm:$0xff]  ;;  %v15652_v12 = vld [vmem:[#allocation48_spill] sm:$0xff] }
 0x572   : > { %v13997_v45 = vsel %vm2593_vm15, %v4455_v57, %v4464_v24  ;;  %v4534_v61 = vrot.slane %v13986_v0, 1  ;;  %v4469_v9 = vrot.slane %v13976_v53, 4  ;;  %v4413_v33 = vrot.slane %v4397_v50, 4 }
 0x573   : > { %9429 = vmatpush3.bf16.msra.mxu1 %v15645_v8  ;;  %9475 = vmatpush3.bf16.msra.mxu0 %v15646_v42  ;;  %v4371_v36 = vor.u32 %v4370_v28, %v4367_v11  ;;  %v4374_v10 = vshrl.u32 %v4328_v32, 16  ;;  %v4377_v35 = vshll.u32 %v4328_v32, 16  ;;  %v14010_v47 = vshrl.u32 %v13960_v39, 16  ;;  %v4587_v8 = vld [vmem:[#allocation2 + $0x8] sm:$0xfe] }
 0x574   : > { %9430 = vmatprep.subr.bf16.mxu1 %v15647_v48  ;;  %9476 = vmatprep.subr.bf16.mxu0 %v15648_v51  ;;  %v14007_v57 = vsel %vm2663_vm2, %v4530_v16, %v4534_v61  ;;  %v4473_v6 = vor.u32 %v4472_v25, %v4469_v9  ;;  %v4540_v54 = vshll.u32 %v4499_v55, 16  ;;  %v14016_v48 = vsel %vm2565_vm13, %v4411_v5, %v4413_v33  ;;  %v4554_v9 = vld [vmem:[#allocation2 + $0x8] sm:$0xfe]  ;;  %v15653_v25 = vld [vmem:[#allocation29_spill] sm:$0xff] }
 0x575   : > { %v14013_v42 = vsel %vm2489_vm14, %v4362_v40, %v4371_v36  ;;  %v4376_v51 = vrot.slane %v4374_v10, 3  ;;  %v4379_v28 = vrot.slane %v4377_v35, 4  ;;  %v4538_v32 = vor.u32 %v14010_v47, %v4534_v61  ;;  %v15654_v55 = vld [vmem:[#allocation42_spill] sm:$0xff]  ;;  %v15655_v33 = vld [vmem:[#allocation57_spill] sm:$0xff] }
 0x576   : > { %v14019_v50 = vsel %vm2593_vm15, %v4464_v24, %v4473_v6  ;;  %v4542_v11 = vrot.slane %v4540_v54, 1  ;;  %v4476_v16 = vshrl.u32 %v4430_v15, 16  ;;  %v4479_v40 = vshll.u32 %v4430_v15, 16  ;;  %v4725_v5 = vld [vmem:[#allocation2 + $0x8] sm:$0xc0]  ;;  %v15656_v10 = vld [vmem:[#allocation73_spill] sm:$0xff] }
 0x577   : > { %9431 = vmatpush3.bf16.msra.mxu1 %v15649_v22  ;;  %9477 = vmatpush3.bf16.msra.mxu0 %v15650_v52  ;;  %v4380_v22 = vor.u32 %v4379_v28, %v4376_v51  ;;  %v4594_v52 = vshrl.u32 %v4587_v8, 16  ;;  %v4604_v35 = vrot.slane %v13904_v56, 1  ;;  %v4656_v54 = vld [vmem:[#allocation2 + $0x8] sm:$0xe0]  ;;  %v4707_v60 = vshrl.u32 %v4661_v43, 16 }
 0x578   : > { %9432 = vmatprep.subr.bf16.mxu1 %v15651_v7  ;;  %9478 = vmatprep.subr.bf16.mxu0 %v15652_v12  ;;  %v4597_v7 = vshll.u32 %v4587_v8, 16  ;;  %v14027_v24 = vsel %vm2663_vm2, %v4538_v32, %v4542_v11  ;;  %v4478_v61 = vrot.slane %v4476_v16, 4  ;;  %v4607_v12 = vrot.slane %v13901_v34, 2  ;;  %v15657_v16 = vld [vmem:[#allocation49_spill] sm:$0xff] }
 0x579   : > { %v4481_v15 = vrot.slane %v4479_v40, 5  ;;  %v4596_v51 = vrot.slane %v4594_v52, 1  ;;  %v4567_v32 = vrot.slane %v13896_v17, 1  ;;  %v4737_v11 = vrot.slane %v4725_v5, 6  ;;  %v15658_v40 = vld [vmem:[#allocation58_spill] sm:$0xff] }
 0x57a   : > { %v4599_v8 = vrot.slane %v4597_v7, 2  ;;  %v4608_v28 = vor.u32 %v4607_v12, %v4604_v35  ;;  %vm15659_vm2 = vcmask 1046528   ;;  %v4676_v52 = vrot.slane %v13901_v34, 6  ;;  %v15660_v7 = vld [vmem:[#allocation65_spill] sm:$0xff] }
 0x57b   : > { %9433 = vmatpush3.bf16.msra.mxu1 %v15653_v25  ;;  %9479 = vmatpush3.bf16.msra.mxu0 %v15654_v55  ;;  %v14032_v25 = vsel %vm2489_vm14, %v4371_v36, %v4380_v22  ;;  %v4566_v55 = vrot.slane %v4554_v9, 1  ;;  %v4738_v36 = vrot.slane %v13896_v17, 6  ;;  %v4663_v22 = vshrl.u32 %v4656_v54, 16  ;;  %vm15666_vm0 = vmmov %vm15659_vm2 }
 0x57c   : > { %9510 = vmatprep.subr.bf16.mxu1 %v15655_v33  ;;  %9556 = vmatprep.subr.bf16.mxu0 %v15656_v10  ;;  %v4482_v33 = vor.u32 %v4481_v15, %v4478_v61  ;;  %v4600_v10 = vor.u32 %v4599_v8, %v4596_v51  ;;  %v4673_v9 = vrot.slane %v13904_v56, 5  ;;  %v15662_v61 = vld [vmem:[#allocation74_spill] sm:$0xff]  ;;  %v4616_v15 = vrot.slane %v13931_v13, 2  ;;  %vm15669_vm3 = vmmov %vm15666_vm0 }
 0x57d   : > { %v4665_v5 = vrot.slane %v4663_v22, 5  ;;  %v15663_v51 = vld [vmem:[#allocation50_spill] sm:$0xff]  ;;  %v4740_v8 = vrot.slane %v13913_v63, 6  ;;  %v4622_v22 = vrot.slane %v13976_v53, 1  ;;  %v4710_v41 = vshll.u32 %v4661_v43, 16 }
 0x57e   : > { %4911 = vmatmul.mubr.bf16.vlgmr.msra.gmra.mrb[80].mxu1 %v13923_v4  ;;  %4984 = vmatmul.mubr.bf16.vlgmr.msra.gmra.mrb[92].mxu0 %v13947_v26  ;;  %v14043_v4 = vsel %vm15659_vm2, %v4566_v55, %v4567_v32  ;;  %v4666_v26 = vshll.u32 %v4656_v54, 16  ;;  %v14052_v17 = vsel %vm15661_vm8, %v4600_v10, %v4608_v28  ;;  %v4677_v12 = vor.u32 %v4676_v52, %v4673_v9  ;;  %vm15676_vm2 = vmmov %vm15666_vm0 }
 0x57f   : > { %9511 = vmatpush3.bf16.msra.mxu1 %v15657_v16  ;;  %4918 = vmatprep.mubr.bf16.mxu1 %v13927_v49  ;;  %v14049_v49 = vsel %vm2593_vm15, %v4473_v6, %v4482_v33  ;;  %v4613_v54 = vrot.slane %v13939_v18, 1  ;;  %v4569_v6 = vrot.slane %v13913_v63, 1  ;;  %v4682_v55 = vrot.slane %v13939_v18, 5  ;;  %v15664_v16 = vld [vmem:[#allocation59_spill] sm:$0xff] }
 0x580   : > { %4991 = vmatprep.mubr.bf16.mxu0 %v13963_v20  ;;  %9512 = vmatprep.subr.bf16.mxu1 %v15658_v40  ;;  %v14055_v20 = vsel %vm2903_vm5, %v4737_v11, %v4738_v36  ;;  %v4668_v35 = vrot.slane %v4666_v26, 6  ;;  %v4685_v11 = vrot.slane %v13931_v13, 6  ;;  %v4625_v40 = vrot.slane %v13942_v1, 2  ;;  %v15665_v26 = vld [vmem:[#allocation66_spill] sm:$0xff] }
 0x581   : > { %9557 = vmatpush3.bf16.msra.mxu0 %v15660_v7  ;;  %v4617_v10 = vor.u32 %v4616_v15, %v4613_v54  ;;  %v14070_v9 = vsel %vm15666_vm0, %v4567_v32, %v4569_v6  ;;  %v14073_v52 = vsel %vm2903_vm5, %v4738_v36, %v4740_v8  ;;  %v4571_v7 = vrot.slane %v13920_v37, 1  ;;  %v4592_v15 = vld [vmem:[#allocation2 + $0x30] sm:$0x3] }
 0x582   : > { %9558 = vmatprep.subr.bf16.mxu0 %v15662_v61  ;;  %v4669_v33 = vor.u32 %v4668_v35, %v4665_v5  ;;  %v4686_v63 = vor.u32 %v4685_v11, %v4682_v55  ;;  %4583 = vst [vmem:[#allocation4 + $0x68] sm:$0xff] %v14070_v9  ;;  %4754 = vst [vmem:[#allocation4 + $0x80] sm:$0xff] %v14073_v52  ;;  %v4626_v32 = vor.u32 %v4625_v40, %v4622_v22  ;;  %v15668_v35 = vld [vmem:[#allocation51_spill] sm:$0xff]  ;;  %v4559_v55 = vld [vmem:[#allocation2 + $0x30] sm:$0x1] }
 0x583   : > { %9513 = vmatpush3.bf16.msra.mxu1 %v15663_v51  ;;  %v14082_v61 = vsel %vm15667_vm9, %v4608_v28, %v4617_v10  ;;  %v4742_v36 = vrot.slane %v13920_v37, 6  ;;  %v4691_v28 = vrot.slane %v13976_v53, 5  ;;  %v4694_v54 = vrot.slane %v13942_v1, 6  ;;  %v15670_v37 = vld [vmem:[#allocation75_spill] sm:$0xff]  ;;  %v15672_v11 = vld [vmem:[#allocation60_spill] sm:$0xff]  ;;  %vm15681_vm9 = vmmov %vm15661_vm8 }
 0x584   : > { %9514 = vmatprep.subr.bf16.mxu1 %v15664_v16  ;;  %v14079_v5 = vsel %vm2827_vm6, %v4669_v33, %v4677_v12  ;;  %4652 = vst [vmem:[#allocation4 + $0x70] sm:$0xff] %v14082_v61  ;;  %v4631_v51 = vrot.slane %v14010_v47, 1  ;;  %v15673_v16 = vld [vmem:[#allocation67_spill] sm:$0xff]  ;;  %v4573_v33 = vrot.slane %v13960_v39, 1  ;;  %v4744_v22 = vrot.slane %v13960_v39, 6 }
 0x585   : > { %9559 = vmatpush3.bf16.msra.mxu0 %v15665_v26  ;;  %v4730_v40 = vld [vmem:[#allocation2 + $0x30] sm:$0x3f]  ;;  %v15674_v26 = vld [vmem:[#allocation76_spill] sm:$0xff]  ;;  %v4641_v59 = vshll.u32 %v4592_v15, 16  ;;  %v4775_v43 = vrot.slane %v13904_v56, 6  ;;  %v4787_v56 = vrot.slane %v13931_v13, 7 }
 0x586   : > { %4919 = vmatmul.mubr.bf16.gmra.mrb[84].mxu1 %v13950_v2  ;;  %4992 = vmatmul.mubr.bf16.gmra.mrb[96].mxu0 %v13972_v38  ;;  %v14091_v2 = vsel %vm2827_vm6, %v4677_v12, %v4686_v63  ;;  %v14094_v38 = vsel %vm15669_vm3, %v4569_v6, %v4571_v7  ;;  %v14105_v12 = vsel %vm2903_vm5, %v4740_v8, %v4742_v36  ;;  %v4634_v6 = vrot.slane %v13986_v0, 2  ;;  %vm15706_vm3 = vmmov %vm15666_vm0 }
 0x587   : > { %4926 = vmatprep.mubr.bf16.mxu1 %v13956_v44  ;;  %9515 = vmatpush3.bf16.msra.mxu1 %v15668_v35  ;;  %4721 = vst [vmem:[#allocation4 + $0x78] sm:$0xff] %v14091_v2  ;;  %v14102_v44 = vsel %vm15671_vm10, %v4617_v10, %v4626_v32  ;;  %v4700_v10 = vrot.slane %v14010_v47, 5  ;;  %v4703_v35 = vrot.slane %v13986_v0, 6  ;;  %v14124_v39 = vsel %vm2903_vm5, %v4742_v36, %v4744_v22 }
 0x588   : > { %4999 = vmatprep.mubr.bf16.mxu0 %v13982_v46  ;;  %9560 = vmatprep.subr.bf16.mxu0 %v15670_v37  ;;  %v4695_v46 = vor.u32 %v4694_v54, %v4691_v28  ;;  %v4635_v8 = vor.u32 %v4634_v6, %v4631_v51  ;;  %v4638_v37 = vshrl.u32 %v4592_v15, 16  ;;  %v14121_v28 = vsel %vm15676_vm2, %v4571_v7, %v4573_v33 }
 0x589   : > { %9516 = vmatprep.subr.bf16.mxu1 %v15672_v11  ;;  %9561 = vmatpush3.bf16.msra.mxu0 %v15673_v16  ;;  %v4575_v54 = vrot.slane %v4559_v55, 1  ;;  %v4758_v16 = vld [vmem:[#allocation2 + $0x8] sm:$0xc0]  ;;  %v4704_v15 = vor.u32 %v4703_v35, %v4700_v10  ;;  %v4643_v21 = vrot.slane %v4641_v59, 2  ;;  %v4746_v7 = vrot.slane %v4730_v40, 6 }
 0x58a   : > { %9562 = vmatprep.subr.bf16.mxu0 %v15674_v26  ;;  %v14118_v11 = vsel %vm2827_vm6, %v4686_v63, %v4695_v46  ;;  %v15677_v26 = vld [vmem:[#allocation61_spill] sm:$0xff]  ;;  %v14128_v51 = vsel %vm15661_vm8, %v4626_v32, %v4635_v8  ;;  %v4640_v6 = vrot.slane %v4638_v37, 1  ;;  %v4765_v55 = vshrl.u32 %v4758_v16, 16  ;;  %v4763_v37 = vld [vmem:[#allocation2 + $0x30] sm:$0x7f] }
 0x58b   : > { %9517 = vmatpush3.bf16.msra.mxu1 %v15675_v30  ;;  %v15678_v30 = vld [vmem:[#allocation68_spill] sm:$0xff]  ;;  %v14132_v63 = vsel %vm15666_vm0, %v4573_v33, %v4575_v54  ;;  %v14137_v36 = vsel %vm2827_vm6, %v4695_v46, %v4704_v15  ;;  %v4768_v10 = vshll.u32 %v4758_v16, 16  ;;  %v14142_v59 = vsel %vm2903_vm5, %v4744_v22, %v4746_v7  ;;  %v15683_v22 = vld [vmem:[#allocation62_spill] sm:$0xff] }
 0x58c   : > { %9518 = vmatprep.subr.bf16.mxu1 %v15677_v26  ;;  %v4644_v32 = vor.u32 %v4643_v21, %v4640_v6  ;;  %v4709_v33 = vrot.slane %v4707_v60, 5  ;;  %v4712_v40 = vrot.slane %v4710_v41, 6  ;;  %v4767_v21 = vrot.slane %v4765_v55, 6  ;;  %v15684_v16 = vld [vmem:[#allocation78_spill] sm:$0xff] }
 0x58d   : > { %9563 = vmatpush3.bf16.msra.mxu0 %v15678_v30  ;;  %v4770_v35 = vrot.slane %v4768_v10, 7  ;;  %v4784_v41 = vrot.slane %v13939_v18, 6  ;;  %v4793_v54 = vrot.slane %v13976_v53, 6  ;;  %v4796_v6 = vrot.slane %v13942_v1, 7  ;;  %v15685_v18 = vld [vmem:[#allocation54_spill] sm:$0xff] }
 0x58e   : > { %4927 = vmatmul.mubr.bf16.gmra.mrb[88].mxu1 %v13989_v23  ;;  %5000 = vmatmul.mubr.bf16.gmra.mrb[100].mxu0 %v13997_v45  ;;  %v15679_v23 = vld [vmem:[#allocation53_spill] sm:$0xff]  ;;  %v14148_v46 = vsel %vm15681_vm9, %v4635_v8, %v4644_v32  ;;  %v4713_v60 = vor.u32 %v4712_v40, %v4709_v33  ;;  %v4805_v32 = vrot.slane %v13986_v0, 7  ;;  %v4809_v55 = vshrl.u32 %v4763_v37, 16  ;;  %v15686_v33 = vld [vmem:[#allocation70_spill] sm:$0xff]  ;;  %v15687_v40 = vld [vmem:[#allocation63_spill] sm:$0xff] }
 0x58f   : > { %4934 = vmatprep.mubr.bf16.mxu1 %v13992_v31  ;;  %5007 = vmatprep.mubr.bf16.mxu0 %v14007_v57  ;;  %v15680_v45 = vld [vmem:[#allocation77_spill] sm:$0xff]  ;;  %v4778_v31 = vrot.slane %v13901_v34, 7  ;;  %v4771_v8 = vor.u32 %v4770_v35, %v4767_v21  ;;  %v4802_v34 = vrot.slane %v14010_v47, 6  ;;  %v4788_v7 = vor.u32 %v4787_v56, %v4784_v41  ;;  %v15689_v21 = vld [vmem:[#allocation79_spill] sm:$0xff] }
 0x590   : > { %9519 = vmatpush3.bf16.msra.mxu1 %v15679_v23  ;;  %9564 = vmatprep.subr.bf16.mxu0 %v15680_v45  ;;  %v15682_v57 = vld [vmem:[#allocation69_spill] sm:$0xff]  ;;  %v14160_v30 = vsel %vm2827_vm6, %v4704_v15, %v4713_v60  ;;  %v4797_v53 = vor.u32 %v4796_v6, %v4793_v54  ;;  %v4812_v10 = vshll.u32 %v4763_v37, 16  ;;  %v4811_v15 = vrot.slane %v4809_v55, 6  ;;  %v15688_v45 = vld [vmem:[#allocation55_spill] sm:$0xff]  ;;  %v15697_v60 = vld [vmem:[#allocation82_spill] sm:$0xff] }
 0x591   : > { %9565 = vmatpush3.bf16.msra.mxu0 %v15682_v57  ;;  %9520 = vmatprep.subr.bf16.mxu1 %v15683_v22  ;;  %v4779_v26 = vor.u32 %v4778_v31, %v4775_v43  ;;  %v4806_v47 = vor.u32 %v4805_v32, %v4802_v34  ;;  %v15690_v31 = vld [vmem:[#allocation71_spill] sm:$0xff]  ;;  %v15693_v57 = vld [vmem:[#allocation56_spill] sm:$0xff]  ;;  %v15696_v22 = vld [vmem:[#allocation81_spill] sm:$0xff]  ;;  %vm15704_vm5 = vmmov 0   ;;  %vm5269_vm6 = vcmask 654336  }
 0x592   : > { %9566 = vmatprep.subr.bf16.mxu0 %v15684_v16  ;;  %v4798_v0 = vsel %vm2931_vm7, %v4788_v7, %v4797_v53  ;;  %v4814_v43 = vrot.slane %v4812_v10, 7 }
 0x593   : > { %v14165_v13 = vsel %vm2931_vm7, %v4771_v8, %v4779_v26  ;;  %v4789_v1 = vsel %vm2931_vm7, %v4779_v26, %v4788_v7  ;;  %v4807_v23 = vsel %vm2931_vm7, %v4797_v53, %v4806_v47 }
 0x594   : > { %9521 = vmatpush3.bf16.msra.mxu1 %v15685_v18  ;;  %4823 = vst [vmem:[#allocation4 + $0x88] sm:$0xff] %v4789_v1  ;;  %v4815_v35 = vor.u32 %v4814_v43, %v4811_v15 }
 0x595   : > { %9567 = vmatpush3.bf16.msra.mxu0 %v15686_v33  ;;  %9522 = vmatprep.subr.bf16.mxu1 %v15687_v40 }
 0x596   : > { %4935 = vmatmul.mubr.bf16.gmra.mrb[92].mxu1 %v14013_v42  ;;  %5008 = vmatmul.mubr.bf16.gmra.mrb[104].mxu0 %v14019_v50  ;;  %v15691_v42 = vld [vmem:[#allocation64_spill] sm:$0xff]  ;;  %v4816_v37 = vsel %vm2931_vm7, %v4806_v47, %v4815_v35 }
 0x597   : > { %4942 = vmatprep.mubr.bf16.mxu1 %v14016_v48  ;;  %5015 = vmatprep.mubr.bf16.mxu0 %v14027_v24  ;;  %v15692_v50 = vld [vmem:[#allocation80_spill] sm:$0xff]  ;;  %v15695_v24 = vmov 0.0  }
 0x598   : > { %9523 = vmatpush3.bf16.msra.mxu1 %v15688_v45  ;;  %9568 = vmatprep.subr.bf16.mxu0 %v15689_v21  ;;  %v15694_v48 = vld [vmem:[#allocation72_spill] sm:$0xff] }
 0x599   : > { %9569 = vmatpush3.bf16.msra.mxu0 %v15690_v31  ;;  %9524 = vmatprep.subr.bf16.mxu1 %v15691_v42 }
 0x59a   : > { %9570 = vmatprep.subr.bf16.mxu0 %v15692_v50 }
 0x59c   : > { %9525 = vmatpush3.bf16.msra.mxu1 %v15693_v57 }
 0x59d   : > { %9571 = vmatpush3.bf16.msra.mxu0 %v15694_v48  ;;  %10343 = vmatprep.subr.bf16.mxu1 %v15695_v24 }
 0x59e   : > { %4943 = vmatmul.mubr.bf16.gmra.mrb[96].mxu1 %v14032_v25  ;;  %5016 = vmatmul.mubr.bf16.gmra.mrb[108].mxu0 %v14049_v49  ;;  %v15698_v25 = vld [vmem:[#allocation83_spill] sm:$0xff]  ;;  %v15700_v49 = vld [vmem:[#allocation85_spill] sm:$0xff] }
 0x59f   : > { %5056 = vmatprep.mubr.bf16.mxu1 %v14052_v17  ;;  %5129 = vmatprep.mubr.bf16.mxu0 %v14055_v20  ;;  %v15701_v17 = vld [vmem:[#allocation86_spill] sm:$0xff]  ;;  %v15702_v20 = vld [vmem:[#allocation87_spill] sm:$0xff] }
 0x5a6   : > { %5057 = vmatmul.mubr.bf16.vlgmr.msra.gmra.mrb[100].mxu1 %v14043_v4  ;;  %5130 = vmatmul.mubr.bf16.vlgmr.msra.gmra.mrb[112].mxu0 %v14079_v5  ;;  %v15699_v4 = vld [vmem:[#allocation84_spill] sm:$0xff] }
 0x5a7   : > { %10344 = vmatpush3.bf16.msra.mxu1 %v15696_v22  ;;  %5064 = vmatprep.mubr.bf16.mxu1 %v14082_v61 }
 0x5a8   : > { %5137 = vmatprep.mubr.bf16.mxu0 %v14073_v52  ;;  %10345 = vmatprep.subr.bf16.mxu1 %v15695_v24  ;;  %v10712_v52 = vld [vmem:[%s15705_s25] sm:$0xff]  }
 0x5ab   : > { %10346 = vmatpush3.bf16.msra.mxu1 %v15697_v60 }
 0x5ac   : > { %10347 = vmatprep.subr.bf16.mxu1 %v15695_v24 }
 0x5ae   : > { %5065 = vmatmul.mubr.bf16.gmra.mrb[104].mxu1 %v14070_v9  ;;  %5138 = vmatmul.mubr.bf16.gmra.mrb[116].mxu0 %v14091_v2  ;;  %v15703_v9 = vld [vmem:[#allocation88_spill] sm:$0xff] }
 0x5af   : > { %5072 = vmatprep.mubr.bf16.mxu1 %v14102_v44  ;;  %10348 = vmatpush3.bf16.msra.mxu1 %v15698_v25  ;;  %v14240_v2 = vld [vmem:[%s15078_s10] ss:$0 sm:$0xff] }
 0x5b0   : > { %5145 = vmatprep.mubr.bf16.mxu0 %v14105_v12  ;;  %10349 = vmatprep.subr.bf16.mxu1 %v15695_v24 }
 0x5b3   : > { %10350 = vmatpush3.bf16.msra.mxu1 %v15699_v4 }
 0x5b4   : > { %10351 = vmatprep.subr.bf16.mxu1 %v15695_v24 }
 0x5b6   : > { %5073 = vmatmul.mubr.bf16.gmra.mrb[108].mxu1 %v14094_v38  ;;  %5146 = vmatmul.mubr.bf16.gmra.mrb[120].mxu0 %v14118_v11 }
 0x5b7   : > { %5080 = vmatprep.mubr.bf16.mxu1 %v14128_v51  ;;  %5153 = vmatprep.mubr.bf16.mxu0 %v14124_v39 }
 0x5b8   : > { %10352 = vmatpush3.bf16.msra.mxu1 %v15700_v49 }
 0x5b9   : > { %10353 = vmatprep.subr.bf16.mxu1 %v15695_v24 }
 0x5bc   : > { %10354 = vmatpush3.bf16.msra.mxu1 %v15701_v17 }
 0x5bd   : > { %10355 = vmatprep.subr.bf16.mxu1 %v15695_v24 }
 0x5be   : > { %5081 = vmatmul.mubr.bf16.gmra.mrb[112].mxu1 %v14121_v28  ;;  %5154 = vmatmul.mubr.bf16.gmra.mrb[124].mxu0 %v14137_v36 }
 0x5bf   : > { %5088 = vmatprep.mubr.bf16.mxu1 %v14148_v46  ;;  %5161 = vmatprep.mubr.bf16.mxu0 %v14142_v59 }
 0x5c0   : > { %10356 = vmatpush3.bf16.msra.mxu1 %v15702_v20 }
 0x5c1   : > { %10357 = vmatprep.subr.bf16.mxu1 %v15695_v24 }
 0x5c4   : > { %10358 = vmatpush3.bf16.msra.mxu1 %v15703_v9 }
 0x5c6   : > { %5089 = vmatmul.mubr.bf16.gmra.mrb[116].mxu1 %v14132_v63  ;;  %5162 = vmatmul.mubr.bf16.gmra.mrb[128].mxu0 %v14160_v30 }
 0x5c7   : > { %10359 = vmatprep.mubr.msk.bf16.mxu1 %vm15704_vm5, %v15695_v24  ;;  %10389 = vmatprep.mubr.msk.bf16.mxu0 %vm5269_vm6, %v10712_v52 }
 0x5ce   : > { %10360 = vmatmul.mubr.bf16.vlgmr.msra.gmra.mrb[120].mxu1 %v14165_v13 }
 0x5cf   : > { %10363 = vmatprep.mubr.msk.bf16.mxu1 %vm15704_vm5, %v15695_v24 }
 0x5d6   : > { %10364 = vmatmul.mubr.bf16.gmra.mrb[124].mxu1 %v4789_v1 }
 0x5d7   : > { %10367 = vmatprep.mubr.msk.bf16.mxu1 %vm15704_vm5, %v15695_v24 }
 0x5de   : > { %10368 = vmatmul.mubr.bf16.gmra.mrb[128].mxu1 %v4798_v0 }
 0x5df   : > { %10371 = vmatprep.mubr.msk.bf16.mxu1 %vm15704_vm5, %v15695_v24 }
 0x5e6   : > { %10372 = vmatmul.mubr.bf16.gmra.mrb[132].mxu1 %v4807_v23 }
 0x5e7   : > { %10375 = vmatprep.mubr.msk.bf16.mxu1 %vm15704_vm5, %v15695_v24 }
 0x5ee   : > { %10376 = vmatmul.mubr.bf16.gmra.mrb[136].mxu1 %v4816_v37 }
 0x651   : > { %v9434_v5 = vpop.f32.mrb[80].mxu1  ;;  %v9480_v61 = vpop.f32.mrb[92].mxu0 }
 0x652   : > { %v9435_v38 = vpop.f32.mrb[81].mxu1  ;;  %v9481_v44 = vpop.f32.mrb[93].mxu0 }
 0x653   : > { %v9436_v12 = vadd.f32 %v9435_v38, %v9434_v5  ;;  %v9437_v11 = vpop.f32.mrb[82].mxu1  ;;  %v9482_v28 = vadd.f32 %v9481_v44, %v9480_v61  ;;  %v9483_v39 = vpop.f32.mrb[94].mxu0 }
 0x654   : > { %v9438_v51 = vpop.f32.mrb[83].mxu1  ;;  %v9484_v63 = vpop.f32.mrb[95].mxu0 }
 0x655   : > { %v4913_v36 = vadd.f32 %v9436_v12, %v14240_v2  ;;  %v9439_v59 = vadd.f32 %v9438_v51, %v9437_v11  ;;  %v9485_v46 = vadd.f32 %v9484_v63, %v9483_v39 }
 0x657   : > { %v4916_v41 = vadd.f32 %v9439_v59, %v14240_v2  ;;  %v14244_v56 = vadd.f32 %v9482_v28, %v4913_v36 }
 0x659   : > { %v14246_v54 = vadd.f32 %v9485_v46, %v4916_v41  ;;  %v9440_v16 = vpop.f32.mrb[84].mxu1  ;;  %v9486_v8 = vpop.f32.mrb[96].mxu0 }
 0x65a   : > { %v9441_v26 = vpop.f32.mrb[85].mxu1  ;;  %v9487_v6 = vpop.f32.mrb[97].mxu0 }
 0x65b   : > { %v9442_v34 = vadd.f32 %v9441_v26, %v9440_v16  ;;  %v9443_v30 = vpop.f32.mrb[86].mxu1  ;;  %v9488_v7 = vadd.f32 %v9487_v6, %v9486_v8  ;;  %v9489_v32 = vpop.f32.mrb[98].mxu0 }
 0x65c   : > { %v9444_v55 = vpop.f32.mrb[87].mxu1  ;;  %v9490_v18 = vpop.f32.mrb[99].mxu0 }
 0x65d   : > { %v4921_v13 = vadd.f32 %v9442_v34, %v14240_v2  ;;  %v9445_v53 = vadd.f32 %v9444_v55, %v9443_v30  ;;  %v9491_v10 = vadd.f32 %v9490_v18, %v9489_v32 }
 0x65f   : > { %v4924_v33 = vadd.f32 %v9445_v53, %v14240_v2  ;;  %v14250_v40 = vadd.f32 %v9488_v7, %v4921_v13 }
 0x661   : > { %v14252_v1 = vadd.f32 %v9491_v10, %v4924_v33  ;;  %v9446_v47 = vpop.f32.mrb[88].mxu1  ;;  %v9492_v15 = vpop.f32.mrb[100].mxu0 }
 0x662   : > { %v9447_v0 = vpop.f32.mrb[89].mxu1  ;;  %v9493_v43 = vpop.f32.mrb[101].mxu0 }
 0x663   : > { %v9448_v23 = vadd.f32 %v9447_v0, %v9446_v47  ;;  %v9449_v45 = vpop.f32.mrb[90].mxu1  ;;  %v9494_v21 = vadd.f32 %v9493_v43, %v9492_v15  ;;  %v9495_v35 = vpop.f32.mrb[102].mxu0 }
 0x664   : > { %v9450_v31 = vpop.f32.mrb[91].mxu1  ;;  %v9496_v42 = vpop.f32.mrb[103].mxu0 }
 0x665   : > { %v4929_v50 = vadd.f32 %v9448_v23, %v14240_v2  ;;  %v9451_v37 = vadd.f32 %v9450_v31, %v9449_v45  ;;  %v9497_v57 = vadd.f32 %v9496_v42, %v9495_v35 }
 0x667   : > { %v4932_v48 = vadd.f32 %v9451_v37, %v14240_v2  ;;  %v14256_v24 = vadd.f32 %v9494_v21, %v4929_v50 }
 0x669   : > { %v14258_v22 = vadd.f32 %v9497_v57, %v4932_v48  ;;  %v9452_v60 = vpop.f32.mrb[92].mxu1  ;;  %v9498_v25 = vpop.f32.mrb[104].mxu0 }
 0x66a   : > { %v9453_v4 = vpop.f32.mrb[93].mxu1  ;;  %v9499_v49 = vpop.f32.mrb[105].mxu0 }
 0x66b   : > { %v9454_v17 = vadd.f32 %v9453_v4, %v9452_v60  ;;  %v9455_v20 = vpop.f32.mrb[94].mxu1  ;;  %v9500_v9 = vadd.f32 %v9499_v49, %v9498_v25  ;;  %v9501_v52 = vpop.f32.mrb[106].mxu0 }
 0x66c   : > { %v9456_v5 = vpop.f32.mrb[95].mxu1  ;;  %v9502_v61 = vpop.f32.mrb[107].mxu0 }
 0x66d   : > { %v4937_v38 = vadd.f32 %v9454_v17, %v14240_v2  ;;  %v9457_v44 = vadd.f32 %v9456_v5, %v9455_v20  ;;  %v9503_v12 = vadd.f32 %v9502_v61, %v9501_v52 }
 0x66f   : > { %v4940_v11 = vadd.f32 %v9457_v44, %v14240_v2  ;;  %v14262_v28 = vadd.f32 %v9500_v9, %v4937_v38 }
 0x671   : > { %v14264_v39 = vadd.f32 %v9503_v12, %v4940_v11  ;;  %v9458_v51 = vpop.f32.mrb[96].mxu1  ;;  %v9504_v63 = vpop.f32.mrb[108].mxu0 }
 0x672   : > { %v9459_v36 = vpop.f32.mrb[97].mxu1  ;;  %v9505_v59 = vpop.f32.mrb[109].mxu0 }
 0x673   : > { %v9460_v46 = vadd.f32 %v9459_v36, %v9458_v51  ;;  %v9461_v41 = vpop.f32.mrb[98].mxu1  ;;  %v9506_v16 = vadd.f32 %v9505_v59, %v9504_v63  ;;  %v9507_v8 = vpop.f32.mrb[110].mxu0 }
 0x674   : > { %v9462_v26 = vpop.f32.mrb[99].mxu1  ;;  %v9508_v6 = vpop.f32.mrb[111].mxu0 }
 0x675   : > { %v4945_v34 = vadd.f32 %v9460_v46, %v14240_v2  ;;  %v9463_v30 = vadd.f32 %v9462_v26, %v9461_v41  ;;  %v9509_v7 = vadd.f32 %v9508_v6, %v9507_v8 }
 0x677   : > { %v4948_v32 = vadd.f32 %v9463_v30, %v14240_v2  ;;  %v14268_v55 = vadd.f32 %v9506_v16, %v4945_v34 }
 0x679   : > { %v14270_v18 = vadd.f32 %v9509_v7, %v4948_v32  ;;  %v9526_v13 = vpop.f32.mrb[100].mxu1  ;;  %v9572_v53 = vpop.f32.mrb[112].mxu0 }
 0x67a   : > { %v9527_v10 = vpop.f32.mrb[101].mxu1  ;;  %v9573_v33 = vpop.f32.mrb[113].mxu0 }
 0x67b   : > { %v9528_v47 = vadd.f32 %v9527_v10, %v9526_v13  ;;  %v9529_v15 = vpop.f32.mrb[102].mxu1  ;;  %v9574_v0 = vadd.f32 %v9573_v33, %v9572_v53  ;;  %v9575_v43 = vpop.f32.mrb[114].mxu0 }
 0x67c   : > { %v9530_v23 = vpop.f32.mrb[103].mxu1  ;;  %v9576_v45 = vpop.f32.mrb[115].mxu0 }
 0x67d   : > { %v5059_v21 = vadd.f32 %v9528_v47, %v14244_v56  ;;  %v9531_v35 = vadd.f32 %v9530_v23, %v9529_v15  ;;  %v9577_v31 = vadd.f32 %v9576_v45, %v9575_v43 }
 0x67f   : > { %v5062_v2 = vadd.f32 %v9531_v35, %v14246_v54  ;;  %v14274_v42 = vadd.f32 %v9574_v0, %v5059_v21 }
 0x681   : > { %v9532_v50 = vpop.f32.mrb[104].mxu1  ;;  %v9578_v37 = vpop.f32.mrb[116].mxu0  ;;  %v14276_v57 = vadd.f32 %v9577_v31, %v5062_v2 }
 0x682   : > { %v9533_v48 = vpop.f32.mrb[105].mxu1  ;;  %v9579_v60 = vpop.f32.mrb[117].mxu0 }
 0x683   : > { %v9534_v25 = vadd.f32 %v9533_v48, %v9532_v50  ;;  %v9535_v4 = vpop.f32.mrb[106].mxu1  ;;  %v9580_v49 = vadd.f32 %v9579_v60, %v9578_v37  ;;  %v9581_v17 = vpop.f32.mrb[118].mxu0 }
 0x684   : > { %v9536_v20 = vpop.f32.mrb[107].mxu1  ;;  %v9582_v9 = vpop.f32.mrb[119].mxu0 }
 0x685   : > { %v5067_v56 = vadd.f32 %v9534_v25, %v14250_v40  ;;  %v9537_v52 = vadd.f32 %v9536_v20, %v9535_v4  ;;  %v9583_v5 = vadd.f32 %v9582_v9, %v9581_v17 }
 0x687   : > { %v5070_v54 = vadd.f32 %v9537_v52, %v14252_v1  ;;  %v5140_v61 = vadd.f32 %v9580_v49, %v5067_v56 }
 0x689   : > { %v9538_v38 = vpop.f32.mrb[108].mxu1  ;;  %v9584_v44 = vpop.f32.mrb[120].mxu0  ;;  %v5143_v12 = vadd.f32 %v9583_v5, %v5070_v54 }
 0x68a   : > { %v9539_v11 = vpop.f32.mrb[109].mxu1  ;;  %v9585_v51 = vpop.f32.mrb[121].mxu0 }
 0x68b   : > { %v9540_v63 = vadd.f32 %v9539_v11, %v9538_v38  ;;  %v9541_v36 = vpop.f32.mrb[110].mxu1  ;;  %v9586_v59 = vadd.f32 %v9585_v51, %v9584_v44  ;;  %v9587_v46 = vpop.f32.mrb[122].mxu0 }
 0x68c   : > { %v9542_v41 = vpop.f32.mrb[111].mxu1  ;;  %v9588_v16 = vpop.f32.mrb[123].mxu0 }
 0x68d   : > { %v5075_v8 = vadd.f32 %v9540_v63, %v14256_v24  ;;  %v9543_v26 = vadd.f32 %v9542_v41, %v9541_v36  ;;  %v9589_v40 = vadd.f32 %v9588_v16, %v9587_v46 }
 0x68f   : > { %v5078_v6 = vadd.f32 %v9543_v26, %v14258_v22  ;;  %v5148_v34 = vadd.f32 %v9586_v59, %v5075_v8 }
 0x691   : > { %v9544_v1 = vpop.f32.mrb[112].mxu1  ;;  %v9590_v30 = vpop.f32.mrb[124].mxu0  ;;  %v5151_v7 = vadd.f32 %v9589_v40, %v5078_v6 }
 0x692   : > { %v9545_v32 = vpop.f32.mrb[113].mxu1  ;;  %v9591_v13 = vpop.f32.mrb[125].mxu0 }
 0x693   : > { %v9546_v53 = vadd.f32 %v9545_v32, %v9544_v1  ;;  %v9547_v10 = vpop.f32.mrb[114].mxu1  ;;  %v9592_v33 = vadd.f32 %v9591_v13, %v9590_v30  ;;  %v9593_v47 = vpop.f32.mrb[126].mxu0 }
 0x694   : > { %v9548_v15 = vpop.f32.mrb[115].mxu1  ;;  %v9594_v0 = vpop.f32.mrb[127].mxu0 }
 0x695   : > { %v5083_v43 = vadd.f32 %v9546_v53, %v14262_v28  ;;  %v9549_v23 = vadd.f32 %v9548_v15, %v9547_v10  ;;  %v9595_v24 = vadd.f32 %v9594_v0, %v9593_v47 }
 0x697   : > { %v5086_v45 = vadd.f32 %v9549_v23, %v14264_v39  ;;  %v5156_v21 = vadd.f32 %v9592_v33, %v5083_v43 }
 0x699   : > { %v9550_v22 = vpop.f32.mrb[116].mxu1  ;;  %v9596_v35 = vpop.f32.mrb[128].mxu0  ;;  %v5159_v31 = vadd.f32 %v9595_v24, %v5086_v45 }
 0x69a   : > { %v9551_v2 = vpop.f32.mrb[117].mxu1  ;;  %v9597_v50 = vpop.f32.mrb[129].mxu0 }
 0x69b   : > { %v9552_v37 = vadd.f32 %v9551_v2, %v9550_v22  ;;  %v9553_v48 = vpop.f32.mrb[118].mxu1  ;;  %v9598_v60 = vadd.f32 %v9597_v50, %v9596_v35  ;;  %v9599_v25 = vpop.f32.mrb[130].mxu0 }
 0x69c   : > { %v9554_v4 = vpop.f32.mrb[119].mxu1  ;;  %v9600_v49 = vpop.f32.mrb[131].mxu0 }
 0x69d   : > { %v5091_v17 = vadd.f32 %v9552_v37, %v14268_v55  ;;  %v9555_v20 = vadd.f32 %v9554_v4, %v9553_v48  ;;  %v9601_v28 = vadd.f32 %v9600_v49, %v9599_v25 }
 0x69f   : > { %v5094_v9 = vadd.f32 %v9555_v20, %v14270_v18  ;;  %v5164_v56 = vadd.f32 %v9598_v60, %v5091_v17 }
 0x6a1   : > { %v5204_v39 = vpop.f32.mrb[120].mxu1  ;;  %v5167_v52 = vadd.f32 %v9601_v28, %v5094_v9 }
 0x6a2   : > { %v5205_v5 = vadd.f32 %v5204_v39, %v14274_v42  ;;  %v10361_v54 = vpop.f32.mrb[121].mxu1  ;;  %v15708_v39 = vld [vmem:[#allocation113_spill] sm:$0xff] }
 0x6a3   : > { %v5207_v38 = vpop.f32.mrb[122].mxu1 }
 0x6a4   : > { %v5208_v44 = vadd.f32 %v5207_v38, %v14276_v57  ;;  %v10362_v11 = vpop.f32.mrb[123].mxu1  ;;  %v5243_v51 = vmax.f32 %v5205_v5, 0.0 }
 0x6a6   : > { %v5244_v63 = vmax.f32 %v5208_v44, 0.0 }
 0x6a8   : > { %v5253_v36 = vpack.c.bf16 %v5244_v63, %v5243_v51 }
 0x6a9   : > { %v5212_v59 = vpop.f32.mrb[124].mxu1 }
 0x6aa   : > { %v5213_v46 = vadd.f32 %v5212_v59, %v5140_v61  ;;  %v10365_v55 = vpop.f32.mrb[125].mxu1  ;;  %10379 = vmatprep.subr.bf16.mxu0 %v5253_v36 }
 0x6ab   : > { %v5215_v41 = vpop.f32.mrb[126].mxu1  ;;  %10380 = vmatpush3.bf16.msra.mxu0 %v5253_v36 }
 0x6ac   : > { %v5216_v18 = vadd.f32 %v5215_v41, %v5143_v12  ;;  %v10366_v16 = vpop.f32.mrb[127].mxu1  ;;  %v5245_v8 = vmax.f32 %v5213_v46, 0.0 }
 0x6ae   : > { %v5246_v26 = vmax.f32 %v5216_v18, 0.0 }
 0x6b0   : > { %v5254_v40 = vpack.c.bf16 %v5246_v26, %v5245_v8 }
 0x6b1   : > { %v5220_v42 = vpop.f32.mrb[128].mxu1 }
 0x6b2   : > { %v5221_v6 = vadd.f32 %v5220_v42, %v5148_v34  ;;  %v10369_v1 = vpop.f32.mrb[129].mxu1  ;;  %10381 = vmatprep.subr.bf16.mxu0 %v5254_v40 }
 0x6b3   : > { %v5223_v57 = vpop.f32.mrb[130].mxu1  ;;  %10382 = vmatpush3.bf16.msra.mxu0 %v5254_v40 }
 0x6b4   : > { %v5224_v30 = vadd.f32 %v5223_v57, %v5151_v7  ;;  %v10370_v32 = vpop.f32.mrb[131].mxu1  ;;  %v5247_v13 = vmax.f32 %v5221_v6, 0.0 }
 0x6b6   : > { %v5248_v53 = vmax.f32 %v5224_v30, 0.0 }
 0x6b8   : > { %v5255_v61 = vpack.c.bf16 %v5248_v53, %v5247_v13 }
 0x6b9   : > { %v5228_v10 = vpop.f32.mrb[132].mxu1 }
 0x6ba   : > { %v5229_v33 = vadd.f32 %v5228_v10, %v5156_v21  ;;  %v10373_v47 = vpop.f32.mrb[133].mxu1  ;;  %10383 = vmatprep.subr.bf16.mxu0 %v5255_v61 }
 0x6bb   : > { %v5231_v12 = vpop.f32.mrb[134].mxu1  ;;  %10384 = vmatpush3.bf16.msra.mxu0 %v5255_v61 }
 0x6bc   : > { %v5232_v15 = vadd.f32 %v5231_v12, %v5159_v31  ;;  %v10374_v0 = vpop.f32.mrb[135].mxu1  ;;  %v5249_v43 = vmax.f32 %v5229_v33, 0.0  ;;  %v10713_v31 = vld [vmem:[%s15705_s25 + $0x8] ss:$0 sps:$4 sm:$0xff]  }
 0x6be   : > { %v5250_v23 = vmax.f32 %v5232_v15, 0.0 }
 0x6c0   : > { %v5256_v34 = vpack.c.bf16 %v5250_v23, %v5249_v43 }
 0x6c1   : > { %v5236_v24 = vpop.f32.mrb[136].mxu1 }
 0x6c2   : > { %v5237_v45 = vadd.f32 %v5236_v24, %v5164_v56  ;;  %v10377_v22 = vpop.f32.mrb[137].mxu1  ;;  %10385 = vmatprep.subr.bf16.mxu0 %v5256_v34  ;;  %v15707_v56 = vld [vmem:[#allocation97_spill] sm:$0xff] }
 0x6c3   : > { %v5239_v7 = vpop.f32.mrb[138].mxu1  ;;  %10386 = vmatpush3.bf16.msra.mxu0 %v5256_v34  ;;  %9622 = vmatprep.subr.bf16.mxu1 %v15707_v56 }
 0x6c4   : > { %v5240_v35 = vadd.f32 %v5239_v7, %v5167_v52  ;;  %v10378_v2 = vpop.f32.mrb[139].mxu1  ;;  %v5251_v50 = vmax.f32 %v5237_v45, 0.0 }
 0x6c6   : > { %v5252_v37 = vmax.f32 %v5240_v35, 0.0 }
 0x6c8   : > { %v5257_v21 = vpack.c.bf16 %v5252_v37, %v5251_v50 }
 0x6ca   : > { %10387 = vmatprep.subr.bf16.mxu0 %v5257_v21 }
 0x6cb   : > { %10388 = vmatpush3.bf16.msra.mxu0 %v5257_v21 }
 0x6cc   : > { %9650 = vmatprep.subr.bf16.mxu0 %v15708_v39 }
 0x6ce   : > { %10390 = vmatmul.mubr.msk.bf16.vlgmr.msra.gmra.mrb[132].mxu0 %vm5269_vm6, %v10713_v31 }
 0x7a1   : > { %v10391_v48 = vpop.f32.mrb[132].mxu0 }
 0x7a2   : > { %v5325_v60 = vpack.c.bf16 %v10391_v48, %v10391_v48  ;;  %v5310_v25 = vpop.f32.mrb[133].mxu0 }
 0x7a3   : > { %v10392_v4 = vpop.f32.mrb[134].mxu0 }
 0x7a4   : > { %v5329_v49 = vrot.slane %v5325_v60, 1  ;;  %v5313_v17 = vpop.f32.mrb[135].mxu0 }
 0x7a5   : > { %v5324_v20 = vpack.c.bf16 %v5313_v17, %v5310_v25 }
 0x7a6   : > { %5336 = vst [vmem:[#allocation3 + $0x10] sm:$0x7] %v5329_v49 }
 0x7a7   : > { %v5328_v28 = vrot.slane %v5324_v20, 1 }
 0x7a9   : > { %v5330_v9 = vsel %vm15706_vm3, %v5328_v28, %v5329_v49  ;;  %5334 = vst [vmem:[#allocation3] sm:$0x80] %v5328_v28 }
 0x7aa   : > { %5335 = vst [vmem:[#allocation3 + $0x8] sm:$0xff] %v5330_v9 }
 0x7ab   : > { %10762 = dma.done.wait [#allocation6 + $0x1], 9216 }
 0x7ac   : > { %10763 = vsyncadd [#allocation6 + $0x1], 4294958080  ;;  %v15709_v52 = vld [vmem:[#allocation89_spill] sm:$0xff]  ;;  %v15711_v54 = vld [vmem:[#allocation98_spill] sm:$0xff]  ;;  %vm15729_vm10 = vcmask 1045504   ;;  %vm6081_vm9 = vcmask 1044482  }
 0x7ad   : > { %9623 = vmatpush3.bf16.msra.mxu1 %v15709_v52  ;;  %v15710_v5 = vld [vmem:[#allocation105_spill] sm:$0xff]  ;;  %v15712_v38 = vld [vmem:[#allocation114_spill] sm:$0xff]  ;;  %v15715_v51 = vld [vmem:[#allocation99_spill] sm:$0xff]  ;;  %vm6097_vm0 = vsmask.f32 2306  ;;  %vm15784_vm3 = vcmask 1042432  }
 0x7ae   : > { %9651 = vmatpush3.bf16.msra.mxu0 %v15710_v5  ;;  %9624 = vmatprep.subr.bf16.mxu1 %v15711_v54  ;;  %v15713_v44 = vld [vmem:[#allocation90_spill] sm:$0xff]  ;;  %v15716_v63 = vld [vmem:[#allocation115_spill] sm:$0xff]  ;;  %v15719_v32 = vld [vmem:[#allocation100_spill] sm:$0xff]  ;;  %vm6082_vm5 = vsmask.f32 4362 }
 0x7af   : > { %9652 = vmatprep.subr.bf16.mxu0 %v15712_v38  ;;  %v15714_v11 = vld [vmem:[#allocation106_spill] sm:$0xff]  ;;  %v15717_v26 = vld [vmem:[#allocation91_spill] sm:$0xff]  ;;  %v15720_v13 = vld [vmem:[#allocation116_spill] sm:$0xff] }
 0x7b0   : > { %v5435_v36 = vld [vmem:[#allocation3] sm:$0xf0]  ;;  %v15718_v40 = vld [vmem:[#allocation107_spill] sm:$0xff]  ;;  %v5477_v47 = vld [vmem:[#allocation3 + $0x10] sm:$0x7] }
 0x7b1   : > { %9625 = vmatpush3.bf16.msra.mxu1 %v15713_v44  ;;  %v14303_v59 = vld [vmem:[#allocation3 + $0x8] sm:$0xff]  ;;  %v5475_v46 = vld [vmem:[#allocation3] sm:$0xc0]  ;;  %v5439_v55 = vrot.slane %v5435_v36, 4  ;;  %v5448_v23 = vld [vmem:[#allocation3 + $0x10] sm:$0x1] }
 0x7b2   : > { %9653 = vmatpush3.bf16.msra.mxu0 %v15714_v11  ;;  %9626 = vmatprep.subr.bf16.mxu1 %v15715_v51  ;;  %v5440_v41 = vrot.slane %v14303_v59, 4  ;;  %v5479_v18 = vshrl.u32 %v5475_v46, 16  ;;  %v5482_v16 = vshll.u32 %v5475_v46, 16  ;;  %v5412_v8 = vld [vmem:[#allocation3] sm:$0xf8]  ;;  %v14309_v42 = vshrl.u32 %v14303_v59, 16  ;;  %vm15738_vm2 = vmmov %vm15661_vm8 }
 0x7b3   : > { %9654 = vmatprep.subr.bf16.mxu0 %v15716_v63  ;;  %v14312_v6 = vshll.u32 %v14303_v59, 16  ;;  %v5415_v1 = vshrl.u32 %v5412_v8, 16  ;;  %v5418_v57 = vshll.u32 %v5412_v8, 16  ;;  %v5446_v30 = vld [vmem:[#allocation3] sm:$0xf0]  ;;  %v15723_v60 = vld [vmem:[#allocation101_spill] sm:$0xff] }
 0x7b4   : > { %v5441_v53 = vsel %vm2565_vm13, %v5439_v55, %v5440_v41  ;;  %5445 = vst [vmem:[#allocation4 + $0x50] sm:$0xf] %v5440_v41  ;;  %v5481_v61 = vrot.slane %v5479_v18, 6  ;;  %v5484_v10 = vrot.slane %v5482_v16, 7  ;;  %v5450_v33 = vshrl.u32 %v5446_v30, 16  ;;  %v15721_v35 = vld [vmem:[#allocation92_spill] sm:$0xff] }
 0x7b5   : > { %9627 = vmatpush3.bf16.msra.mxu1 %v15717_v26  ;;  %5665 = vmatprep.mubr.bf16.mxu1 %v5441_v53  ;;  %v5489_v12 = vrot.slane %v14309_v42, 6  ;;  %v5492_v15 = vrot.slane %v14312_v6, 7  ;;  %v5417_v0 = vrot.slane %v5415_v1, 3  ;;  %v5420_v43 = vrot.slane %v5418_v57, 4  ;;  %v5523_v7 = vld [vmem:[#allocation3] sm:$0x80] }
 0x7b6   : > { %9655 = vmatpush3.bf16.msra.mxu0 %v15718_v40  ;;  %9628 = vmatprep.subr.bf16.mxu1 %v15719_v32  ;;  %v5485_v34 = vor.u32 %v5484_v10, %v5481_v61  ;;  %v5425_v24 = vrot.slane %v14309_v42, 3  ;;  %v5428_v45 = vrot.slane %v14312_v6, 4  ;;  %v5452_v22 = vrot.slane %v5450_v33, 4  ;;  %v15722_v2 = vld [vmem:[#allocation108_spill] sm:$0xff]  ;;  %v5573_v48 = vld [vmem:[#allocation3 + $0x8] sm:$0xfc] }
 0x7b7   : > { %9656 = vmatprep.subr.bf16.mxu0 %v15720_v13  ;;  %v5493_v50 = vor.u32 %v5492_v15, %v5489_v12  ;;  %v5421_v37 = vor.u32 %v5420_v43, %v5417_v0  ;;  %v5453_v21 = vshll.u32 %v5446_v30, 16  ;;  %v5460_v31 = vrot.slane %v14309_v42, 4  ;;  %v15724_v25 = vld [vmem:[#allocation117_spill] sm:$0xff]  ;;  %v5508_v5 = vld [vmem:[#allocation3] sm:$0x80]  ;;  %v15727_v8 = vld [vmem:[#allocation102_spill] sm:$0xff] }
 0x7b8   : > { %v5429_v4 = vor.u32 %v5428_v45, %v5425_v24  ;;  %v5463_v49 = vrot.slane %v14312_v6, 5  ;;  %v5496_v17 = vshrl.u32 %v5477_v47, 16  ;;  %v5499_v20 = vshll.u32 %v5477_v47, 16  ;;  %v5574_v28 = vld [vmem:[#allocation3 + $0x10] sm:$0x3f]  ;;  %v15732_v24 = vld [vmem:[#allocation103_spill] sm:$0xff] }
 0x7b9   : > { %9629 = vmatpush3.bf16.msra.mxu1 %v15721_v35  ;;  %v5494_v9 = vsel %vm2931_vm7, %v5485_v34, %v5493_v50  ;;  %v5455_v56 = vrot.slane %v5453_v21, 5  ;;  %v5467_v39 = vshll.u32 %v5448_v23, 16  ;;  %v5527_v52 = vshrl.u32 %v5523_v7, 16  ;;  %v5550_v51 = vld [vmem:[#allocation3 + $0x8] sm:$0xfe]  ;;  %v15728_v26 = vld [vmem:[#allocation118_spill] sm:$0xff] }
 0x7ba   : > { %9657 = vmatpush3.bf16.msra.mxu0 %v15722_v2  ;;  %9630 = vmatprep.subr.bf16.mxu1 %v15723_v60  ;;  %v14329_v54 = vsel %vm2489_vm14, %v5421_v37, %v5429_v4  ;;  %5434 = vst [vmem:[#allocation4 + $0x48] sm:$0xf] %v5429_v4  ;;  %v5464_v38 = vor.u32 %v5463_v49, %v5460_v31  ;;  %v5498_v44 = vrot.slane %v5496_v17, 6  ;;  %v5501_v11 = vrot.slane %v5499_v20, 7  ;;  %v15725_v63 = vld [vmem:[#allocation93_spill] sm:$0xff]  ;;  %v15730_v0 = vld [vmem:[#allocation94_spill] sm:$0xff] }
 0x7bb   : > { %9658 = vmatprep.subr.bf16.mxu0 %v15724_v25  ;;  %5713 = vmatprep.mubr.bf16.mxu0 %v5494_v9  ;;  %v15726_v36 = vld [vmem:[#allocation109_spill] sm:$0xff]  ;;  %v5456_v46 = vor.u32 %v5455_v56, %v5452_v22  ;;  %v5469_v55 = vrot.slane %v5467_v39, 5  ;;  %v5529_v41 = vrot.slane %v5527_v52, 7  ;;  %v5533_v18 = vrot.slane %v14309_v42, 7  ;;  %v15731_v43 = vld [vmem:[#allocation110_spill] sm:$0xff]  ;;  %v15733_v45 = vld [vmem:[#allocation119_spill] sm:$0xff] }
 0x7bc   : > { %v5551_v16 = vld [vmem:[#allocation3 + $0x10] sm:$0x3f]  ;;  %v5502_v40 = vor.u32 %v5501_v11, %v5498_v44  ;;  %v5578_v1 = vrot.slane %v5573_v48, 2  ;;  %v5579_v57 = vrot.slane %v5574_v28, 2  ;;  %v5514_v30 = vrot.slane %v5508_v5, 7  ;;  %v15734_v60 = vld [vmem:[#allocation95_spill] sm:$0xff] }
 0x7bd   : > { %9631 = vmatpush3.bf16.msra.mxu1 %v15725_v63  ;;  %v5525_v32 = vld [vmem:[#allocation3 + $0x10] sm:$0xf]  ;;  %v5465_v13 = vsel %vm2593_vm15, %v5456_v46, %v5464_v38  ;;  %v5470_v53 = vsel %vm2593_vm15, %v5464_v38, %v5469_v55  ;;  %v5536_v61 = vor.u32 %v5533_v18, %v14312_v6  ;;  %v5515_v10 = vrot.slane %v14303_v59, 7  ;;  %v15735_v25 = vld [vmem:[#allocation111_spill] sm:$0xff]  ;;  %v15736_v17 = vld [vmem:[#allocation104_spill] sm:$0xff] }
 0x7be   : > { %9659 = vmatpush3.bf16.msra.mxu0 %v15726_v36  ;;  %9632 = vmatprep.subr.bf16.mxu1 %v15727_v8  ;;  %v5503_v42 = vsel %vm2931_vm7, %v5493_v50, %v5502_v40  ;;  %5474 = vst [vmem:[#allocation4 + $0x58] sm:$0xf] %v5470_v53  ;;  %v5580_v33 = vsel %vm15729_vm10, %v5578_v1, %v5579_v57  ;;  %5584 = vst [vmem:[#allocation4 + $0x80] sm:$0xf] %v5579_v57  ;;  %v5553_v47 = vshrl.u32 %v5550_v51, 16  ;;  %v15737_v20 = vld [vmem:[#allocation120_spill] sm:$0xff] }
 0x7bf   : > { %9660 = vmatprep.subr.bf16.mxu0 %v15728_v26  ;;  %v5556_v12 = vshll.u32 %v5550_v51, 16  ;;  %v5510_v15 = vld [vmem:[#allocation3 + $0x10] sm:$0x7]  ;;  %5507 = vst [vmem:[#allocation4 + $0x60] sm:$0xf] %v5503_v42  ;;  %v5537_v23 = vsel %vm15157_vm4, %v5529_v41, %v5536_v61  ;;  %v14346_v6 = vsel %vm2316_vm12, %v5514_v30, %v5515_v10  ;;  %v5561_v59 = vshrl.u32 %v5551_v16, 16  ;;  %vm14468_vm10 = vmand %vm15784_vm3, %vm6097_vm0 }
 0x7c0   : > { %v5564_v34 = vshll.u32 %v5551_v16, 16  ;;  %v5555_v22 = vrot.slane %v5553_v47, 1  ;;  %v5539_v35 = vshrl.u32 %v5525_v32, 16  ;;  %v5542_v2 = vshll.u32 %v5525_v32, 16  ;;  %v15739_v39 = vld [vmem:[#allocation96_spill] sm:$0xff]  ;;  %v15741_v5 = vld [vmem:[#allocation129_spill] sm:$0xff] }
 0x7c1   : > { %9633 = vmatpush3.bf16.msra.mxu1 %v15730_v0  ;;  %v5558_v7 = vrot.slane %v5556_v12, 2  ;;  %v5563_v50 = vrot.slane %v5561_v59, 1  ;;  %v5517_v21 = vrot.slane %v5510_v15, 7  ;;  %v15740_v52 = vld [vmem:[#allocation112_spill] sm:$0xff]  ;;  %v15742_v38 = vld [vmem:[#allocation145_spill] sm:$0xff]  ;;  %v15745_v36 = vld [vmem:[#allocation130_spill] sm:$0xff] }
 0x7c2   : > { %9661 = vmatpush3.bf16.msra.mxu0 %v15731_v43  ;;  %9634 = vmatprep.subr.bf16.mxu1 %v15732_v24  ;;  %v5566_v37 = vrot.slane %v5564_v34, 2  ;;  %v5541_v48 = vrot.slane %v5539_v35, 7  ;;  %v5619_v44 = vld [vmem:[#allocation4 + $0x50] sm:$0xf]  ;;  %v15746_v46 = vld [vmem:[#allocation146_spill] sm:$0xff]  ;;  %v15750_v8 = vld [vmem:[#allocation147_spill] sm:$0xff]  ;;  %v5876_v24 = vpack.c.bf16 %v13803_v62, %v13799_v29  ;;  %v5878_v29 = vpack.c.bf16 %v13827_v27, %v13822_v19 }
 0x7c3   : > { %9662 = vmatprep.subr.bf16.mxu0 %v15733_v45  ;;  %v5559_v31 = vor.u32 %v5558_v7, %v5555_v22  ;;  %v5518_v49 = vsel %vm2316_vm12, %v5515_v10, %v5517_v21  ;;  %v15743_v51 = vld [vmem:[#allocation121_spill] sm:$0xff]  ;;  %v15747_v55 = vld [vmem:[#allocation122_spill] sm:$0xff]  ;;  %v15751_v26 = vld [vmem:[#allocation123_spill] sm:$0xff]  ;;  %v5877_v7 = vpack.c.bf16 %v13813_v58, %v13809_v3  ;;  %vm15156_vm8 = vsmask.f32 5376 }
 0x7c4   : > { %v5567_v4 = vor.u32 %v5566_v37, %v5563_v50  ;;  %v5544_v28 = vor.u32 %v5542_v2, %v5541_v48  ;;  %5522 = vst [vmem:[#allocation4 + $0x68] sm:$0xf] %v5518_v49  ;;  %v15744_v63 = vld [vmem:[#allocation137_spill] sm:$0xff]  ;;  %v15748_v41 = vld [vmem:[#allocation138_spill] sm:$0xff]  ;;  %v15752_v40 = vld [vmem:[#allocation139_spill] sm:$0xff]  ;;  %vm15794_vm0 = vcmask 1046528  }
 0x7c5   : > { %9635 = vmatpush3.bf16.msra.mxu1 %v15734_v60  ;;  %v5620_v16 = vld [vmem:[#allocation4 + $0x58] sm:$0xf]  ;;  %v15753_v1 = vld [vmem:[#allocation132_spill] sm:$0xff]  ;;  %v15766_v0 = vld [vmem:[#allocation151_spill] sm:$0xff] }
 0x7c6   : > { %9663 = vmatpush3.bf16.msra.mxu0 %v15735_v25  ;;  %9636 = vmatprep.subr.bf16.mxu1 %v15736_v17  ;;  %v5568_v9 = vsel %vm15738_vm2, %v5559_v31, %v5567_v4  ;;  %5572 = vst [vmem:[#allocation4 + $0x78] sm:$0xf] %v5567_v4  ;;  %v5545_v56 = vsel %vm15157_vm4, %v5533_v18, %v5544_v28  ;;  %v5621_v11 = vld [vmem:[#allocation4 + $0x60] sm:$0xf]  ;;  %v5618_v18 = vld [vmem:[#allocation4 + $0x48] sm:$0xf]  ;;  %vm14472_vm2 = vmand %vm6081_vm9, %vm6082_vm5 }
 0x7c7   : > { %9664 = vmatprep.subr.bf16.mxu0 %v15737_v20  ;;  %5549 = vst [vmem:[#allocation4 + $0x70] sm:$0xf] %v5545_v56  ;;  %v15754_v57 = vld [vmem:[#allocation148_spill] sm:$0xff]  ;;  %v15758_v53 = vld [vmem:[#allocation149_spill] sm:$0xff]  ;;  %v15761_v42 = vld [vmem:[#allocation134_spill] sm:$0xff] }
 0x7c8   : > { %v15755_v30 = vld [vmem:[#allocation124_spill] sm:$0xff]  ;;  %v15759_v61 = vld [vmem:[#allocation125_spill] sm:$0xff]  ;;  %v15762_v47 = vld [vmem:[#allocation150_spill] sm:$0xff] }
 0x7c9   : > { %9637 = vmatpush3.bf16.msra.mxu1 %v15739_v39  ;;  %v15756_v32 = vld [vmem:[#allocation140_spill] sm:$0xff]  ;;  %v15760_v10 = vld [vmem:[#allocation141_spill] sm:$0xff]  ;;  %v15763_v12 = vld [vmem:[#allocation126_spill] sm:$0xff] }
 0x7ca   : > { %9665 = vmatpush3.bf16.msra.mxu0 %v15740_v52  ;;  %9678 = vmatprep.subr.bf16.mxu1 %v15741_v5  ;;  %v15764_v15 = vld [vmem:[#allocation142_spill] sm:$0xff]  ;;  %v15767_v43 = vld [vmem:[#allocation127_spill] sm:$0xff]  ;;  %v15769_v59 = vld [vmem:[#allocation136_spill] sm:$0xff] }
 0x7cb   : > { %9706 = vmatprep.subr.bf16.mxu0 %v15742_v38  ;;  %v15770_v34 = vld [vmem:[#allocation152_spill] sm:$0xff]  ;;  %v15773_v2 = vld [vmem:[#allocation153_spill] sm:$0xff]  ;;  %v5625_v50 = vld [vmem:[#allocation4 + $0x80] sm:$0xf] }
 0x7cc   : > { %5666 = vmatmul.mubr.bf16.vlgmr.msra.gmra.mrb[140].mxu1 %v14329_v54  ;;  %v15749_v54 = vld [vmem:[#allocation131_spill] sm:$0xff]  ;;  %v15771_v45 = vld [vmem:[#allocation128_spill] sm:$0xff]  ;;  %v15774_v62 = vld [vmem:[#allocation154_spill] sm:$0xff] }
 0x7cd   : > { %5714 = vmatmul.mubr.bf16.vlgmr.msra.gmra.mrb[136].mxu0 %v5465_v13  ;;  %9679 = vmatpush3.bf16.msra.mxu1 %v15743_v51  ;;  %v15757_v13 = vld [vmem:[#allocation133_spill] sm:$0xff]  ;;  %v15772_v22 = vld [vmem:[#allocation144_spill] sm:$0xff]  ;;  %v15778_v48 = vld [vmem:[#allocation155_spill] sm:$0xff] }
 0x7ce   : > { %9707 = vmatpush3.bf16.msra.mxu0 %v15744_v63  ;;  %9680 = vmatprep.subr.bf16.mxu1 %v15745_v36  ;;  %v5623_v35 = vld [vmem:[#allocation4 + $0x70] sm:$0xf]  ;;  %v5622_v3 = vld [vmem:[#allocation4 + $0x68] sm:$0xf]  ;;  %v5624_v58 = vld [vmem:[#allocation4 + $0x78] sm:$0xf] }
 0x7cf   : > { %9708 = vmatprep.subr.bf16.mxu0 %v15746_v46  ;;  %5673 = vmatprep.mubr.bf16.mxu1 %v5619_v44  ;;  %v10714_v37 = vld [vmem:[%s15705_s25] sm:$0xff]   ;;  %v15781_v4 = vld [vmem:[#allocation158_spill] sm:$0xff]  ;;  %v15782_v49 = vld [vmem:[#allocation159_spill] sm:$0xff] }
 0x7d0   : > { %5721 = vmatprep.mubr.bf16.mxu0 %v5621_v11  ;;  %v15776_v19 = vld [vmem:[#allocation452_spill] sm:$0xff]  ;;  %v15777_v27 = vld [vmem:[#allocation453_spill] sm:$0xff] }
 0x7d1   : > { %9681 = vmatpush3.bf16.msra.mxu1 %v15747_v55  ;;  %v5880_v31 = vpack.c.bf16 %v15777_v27, %v15776_v19  ;;  %v15779_v60 = vld [vmem:[#allocation156_spill] sm:$0xff]  ;;  %v15780_v25 = vld [vmem:[#allocation157_spill] sm:$0xff] }
 0x7d2   : > { %9709 = vmatpush3.bf16.msra.mxu0 %v15748_v41  ;;  %9682 = vmatprep.subr.bf16.mxu1 %v15749_v54  ;;  %v15783_v17 = vld [vmem:[#allocation160_spill] sm:$0xff]  ;;  %v5586_v20 = vld [vmem:[#allocation3 + $0x10] sm:$0x7f]  ;;  %v5585_v28 = vld [vmem:[#allocation3 + $0x8] sm:$0xfc] }
 0x7d3   : > { %9710 = vmatprep.subr.bf16.mxu0 %v15750_v8  ;;  %v5600_v56 = vshll.u32 %v5586_v20, 16  ;;  %v5589_v39 = vshrl.u32 %v5585_v28, 16  ;;  %v5592_v52 = vshll.u32 %v5585_v28, 16  ;;  %v10716_v5 = vld [vmem:[%s15080_s12] sm:$0xff]   ;;  %v10717_v55 = vld [vmem:[%s15080_s12 + $0x8] sm:$0xff]  }
 0x7d4   : > { %5674 = vmatmul.mubr.bf16.gmra.mrb[144].mxu1 %v5618_v18  ;;  %v10718_v18 = vld [vmem:[%s15080_s12 + $0x10] sm:$0xff]   ;;  %v10720_v54 = vld [vmem:[%s15080_s12 + $0x20] sm:$0xff]   ;;  %v10721_v8 = vld [vmem:[%s15080_s12 + $0x28] sm:$0xff]  }
 0x7d5   : > { %5722 = vmatmul.mubr.bf16.gmra.mrb[140].mxu0 %v5620_v16  ;;  %9683 = vmatpush3.bf16.msra.mxu1 %v15751_v26  ;;  %v5602_v44 = vrot.slane %v5600_v56, 3  ;;  %v5591_v11 = vrot.slane %v5589_v39, 2  ;;  %v5594_v51 = vrot.slane %v5592_v52, 3  ;;  %v10719_v16 = vld [vmem:[%s15080_s12 + $0x18] sm:$0xff]   ;;  %v10722_v26 = vld [vmem:[%s15080_s12 + $0x30] sm:$0xff]  }
 0x7d6   : > { %9711 = vmatpush3.bf16.msra.mxu0 %v15752_v40  ;;  %9684 = vmatprep.subr.bf16.mxu1 %v15753_v1  ;;  %v10723_v40 = vld [vmem:[%s15080_s12 + $0x38] sm:$0xff]  }
 0x7d7   : > { %9712 = vmatprep.subr.bf16.mxu0 %v15754_v57  ;;  %5761 = vmatprep.mubr.bf16.mxu1 %v5537_v23  ;;  %v15768_v23 = vld [vmem:[#allocation143_spill] sm:$0xff]  ;;  %v5595_v36 = vor.u32 %v5594_v51, %v5591_v11 }
 0x7d8   : > { %5809 = vmatprep.mubr.bf16.mxu0 %v5580_v33  ;;  %v15765_v33 = vld [vmem:[#allocation135_spill] sm:$0xff] }
 0x7d9   : > { %9685 = vmatpush3.bf16.msra.mxu1 %v15755_v30  ;;  %v9077_v30 = vld [vmem:[%s15079_s11] ss:$0 sm:$0xff] }
 0x7da   : > { %9713 = vmatpush3.bf16.msra.mxu0 %v15756_v32  ;;  %9686 = vmatprep.subr.bf16.mxu1 %v15757_v13 }
 0x7db   : > { %9714 = vmatprep.subr.bf16.mxu0 %v15758_v53 }
 0x7dd   : > { %9687 = vmatpush3.bf16.msra.mxu1 %v15759_v61 }
 0x7de   : > { %9715 = vmatpush3.bf16.msra.mxu0 %v15760_v10  ;;  %9688 = vmatprep.subr.bf16.mxu1 %v15761_v42 }
 0x7df   : > { %9716 = vmatprep.subr.bf16.mxu0 %v15762_v47 }
 0x7e1   : > { %9689 = vmatpush3.bf16.msra.mxu1 %v15763_v12 }
 0x7e2   : > { %9717 = vmatpush3.bf16.msra.mxu0 %v15764_v15  ;;  %9690 = vmatprep.subr.bf16.mxu1 %v15765_v33 }
 0x7e3   : > { %9718 = vmatprep.subr.bf16.mxu0 %v15766_v0 }
 0x7e5   : > { %9691 = vmatpush3.bf16.msra.mxu1 %v15767_v43 }
 0x7e6   : > { %9719 = vmatpush3.bf16.msra.mxu0 %v15768_v23  ;;  %9692 = vmatprep.subr.bf16.mxu1 %v15769_v59 }
 0x7e7   : > { %9720 = vmatprep.subr.bf16.mxu0 %v15770_v34 }
 0x7e9   : > { %9693 = vmatpush3.bf16.msra.mxu1 %v15771_v45 }
 0x7ea   : > { %9721 = vmatpush3.bf16.msra.mxu0 %v15772_v22  ;;  %10393 = vmatprep.subr.bf16.mxu1 %v15773_v2 }
 0x7eb   : > { %10413 = vmatprep.subr.bf16.mxu0 %v5876_v24 }
 0x7ec   : > { %5762 = vmatmul.mubr.bf16.vlgmr.msra.gmra.mrb[148].mxu1 %v14346_v6  ;;  %v15775_v6 = vld [vmem:[#allocation449_spill] sm:$0xff] }
 0x7ed   : > { %5810 = vmatmul.mubr.bf16.vlgmr.msra.gmra.mrb[144].mxu0 %v5568_v9  ;;  %5769 = vmatprep.mubr.bf16.mxu1 %v5623_v35  ;;  %v5879_v21 = vpack.c.bf16 %v15775_v6, %v13839_v14  ;;  %v10715_v14 = vld [vmem:[%s15705_s25 + $0x8] ss:$0 sps:$4 sm:$0xff]   ;;  %v5597_v9 = vshrl.u32 %v5586_v20, 16 }
 0x7ee   : > { %10414 = vmatpush3.bf16.msra.mxu0 %v5876_v24  ;;  %5817 = vmatprep.mubr.bf16.mxu0 %v5625_v50 }
 0x7ef   : > { %10415 = vmatprep.subr.bf16.mxu0 %v5877_v7  ;;  %10394 = vmatpush3.bf16.msra.mxu1 %v15773_v2  ;;  %v5599_v38 = vrot.slane %v5597_v9, 2 }
 0x7f0   : > { %10395 = vmatprep.subr.bf16.mxu1 %v15774_v62 }
 0x7f1   : > { %v5603_v63 = vor.u32 %v5602_v44, %v5599_v38 }
 0x7f2   : > { %10416 = vmatpush3.bf16.msra.mxu0 %v5877_v7 }
 0x7f3   : > { %10417 = vmatprep.subr.bf16.mxu0 %v5878_v29  ;;  %10396 = vmatpush3.bf16.msra.mxu1 %v15774_v62  ;;  %5608 = vst [vmem:[#allocation4 + $0x88] sm:$0xf] %v5603_v63  ;;  %v5604_v46 = vsel %vm15156_vm8, %v5595_v36, %v5603_v63  ;;  %vm15789_vm8 = vcmask 1047557  }
 0x7f4   : > { %5770 = vmatmul.mubr.bf16.gmra.mrb[152].mxu1 %v5622_v3  ;;  %10397 = vmatprep.subr.bf16.mxu1 %v15778_v48 }
 0x7f5   : > { %5818 = vmatmul.mubr.bf16.gmra.mrb[148].mxu0 %v5624_v58  ;;  %10409 = vmatprep.mubr.bf16.mxu1 %v5604_v46 }
 0x7f6   : > { %10418 = vmatpush3.bf16.msra.mxu0 %v5878_v29  ;;  %10423 = vmatprep.mubr.msk.bf16.mxu0 %vm5269_vm6, %v10714_v37 }
 0x7f7   : > { %10419 = vmatprep.subr.bf16.mxu0 %v5879_v21  ;;  %10398 = vmatpush3.bf16.msra.mxu1 %v15778_v48 }
 0x7f8   : > { %10399 = vmatprep.subr.bf16.mxu1 %v15779_v60 }
 0x7fa   : > { %10420 = vmatpush3.bf16.msra.mxu0 %v5879_v21  ;;  %v5626_v41 = vld [vmem:[#allocation4 + $0x88] sm:$0xf] }
 0x7fb   : > { %10421 = vmatprep.subr.bf16.mxu0 %v5880_v31  ;;  %10400 = vmatpush3.bf16.msra.mxu1 %v15779_v60 }
 0x7fc   : > { %10401 = vmatprep.subr.bf16.mxu1 %v15780_v25 }
 0x7fe   : > { %10422 = vmatpush3.bf16.msra.mxu0 %v5880_v31 }
 0x7ff   : > { %10402 = vmatpush3.bf16.msra.mxu1 %v15780_v25 }
 0x800   : > { %10403 = vmatprep.subr.bf16.mxu1 %v15781_v4 }
 0x801   : > { %10424 = vmatmul.mubr.msk.bf16.vlgmr.msra.gmra.mrb[152].mxu0 %vm5269_vm6, %v10715_v14  ;;  %vm6091_vm6 = vsmask.f32 7446 }
 0x802   : > { %vm14477_vm4 = vmand %vm15789_vm8, %vm6091_vm6 }
 0x803   : > { %10404 = vmatpush3.bf16.msra.mxu1 %v15781_v4 }
 0x804   : > { %10405 = vmatprep.subr.bf16.mxu1 %v15782_v49 }
 0x807   : > { %10406 = vmatpush3.bf16.msra.mxu1 %v15782_v49 }
 0x808   : > { %10407 = vmatprep.subr.bf16.mxu1 %v15783_v17 }
 0x80b   : > { %10408 = vmatpush3.bf16.msra.mxu1 %v15783_v17 }
 0x80c   : > { %10427 = vmatprep.subr.bf16.mxu1 %v10716_v5 }
 0x80e   : > { %10410 = vmatmul.mubr.bf16.vlgmr.msra.gmra.mrb[156].mxu1 %v5626_v41 }
 0x80f   : > { %10428 = vmatpush3.bf16.msra.mxu1 %v10716_v5 }
 0x810   : > { %10429 = vmatprep.subr.bf16.mxu1 %v10717_v55 }
 0x813   : > { %10430 = vmatpush3.bf16.msra.mxu1 %v10717_v55 }
 0x814   : > { %10431 = vmatprep.subr.bf16.mxu1 %v10718_v18 }
 0x817   : > { %10432 = vmatpush3.bf16.msra.mxu1 %v10718_v18 }
 0x818   : > { %10433 = vmatprep.subr.bf16.mxu1 %v10719_v16 }
 0x81b   : > { %10434 = vmatpush3.bf16.msra.mxu1 %v10719_v16 }
 0x81c   : > { %10435 = vmatprep.subr.bf16.mxu1 %v10720_v54 }
 0x81f   : > { %10436 = vmatpush3.bf16.msra.mxu1 %v10720_v54 }
 0x820   : > { %10437 = vmatprep.subr.bf16.mxu1 %v10721_v8 }
 0x823   : > { %10438 = vmatpush3.bf16.msra.mxu1 %v10721_v8 }
 0x824   : > { %10439 = vmatprep.subr.bf16.mxu1 %v10722_v26 }
 0x827   : > { %10440 = vmatpush3.bf16.msra.mxu1 %v10722_v26 }
 0x828   : > { %10441 = vmatprep.subr.bf16.mxu1 %v10723_v40 }
 0x82b   : > { %10442 = vmatpush3.bf16.msra.mxu1 %v10723_v40  ;;  %v9082_v40 = vld [vmem:[%s15081_s13] ss:$0 sm:$0xff] }
 0x89f   : > { %v9638_v1 = vpop.f32.mrb[140].mxu1 }
 0x8a0   : > { %v9666_v57 = vpop.f32.mrb[136].mxu0  ;;  %v9639_v32 = vpop.f32.mrb[141].mxu1 }
 0x8a1   : > { %v9667_v13 = vpop.f32.mrb[137].mxu0  ;;  %v9640_v53 = vadd.f32 %v9639_v32, %v9638_v1  ;;  %v9641_v10 = vpop.f32.mrb[142].mxu1 }
 0x8a2   : > { %v9668_v61 = vadd.f32 %v9667_v13, %v9666_v57  ;;  %v9669_v42 = vpop.f32.mrb[138].mxu0  ;;  %v9642_v47 = vpop.f32.mrb[143].mxu1 }
 0x8a3   : > { %v9670_v12 = vpop.f32.mrb[139].mxu0  ;;  %v5668_v15 = vadd.f32 %v9640_v53, %v9077_v30  ;;  %v9643_v33 = vadd.f32 %v9642_v47, %v9641_v10 }
 0x8a4   : > { %v9671_v0 = vadd.f32 %v9670_v12, %v9669_v42 }
 0x8a5   : > { %v5716_v43 = vadd.f32 %v9668_v61, %v5668_v15  ;;  %v5671_v23 = vadd.f32 %v9643_v33, %v9077_v30 }
 0x8a7   : > { %v5719_v59 = vadd.f32 %v9671_v0, %v5671_v23  ;;  %v9644_v34 = vpop.f32.mrb[144].mxu1  ;;  %v6099_v23 = vld [vmem:[#allocation3 + $0x10] sm:$0x7] }
 0x8a8   : > { %v9672_v24 = vpop.f32.mrb[140].mxu0  ;;  %v9645_v45 = vpop.f32.mrb[145].mxu1 }
 0x8a9   : > { %v9673_v22 = vpop.f32.mrb[141].mxu0  ;;  %v9646_v7 = vadd.f32 %v9645_v45, %v9644_v34  ;;  %v9647_v50 = vpop.f32.mrb[146].mxu1  ;;  %v6075_v34 = vld [vmem:[#allocation3] sm:$0x80]  ;;  %v6078_v45 = vld [vmem:[#allocation3 + $0x8] sm:$0x3] }
 0x8aa   : > { %v9674_v35 = vadd.f32 %v9673_v22, %v9672_v24  ;;  %v9675_v2 = vpop.f32.mrb[142].mxu0  ;;  %v9648_v62 = vpop.f32.mrb[147].mxu1  ;;  %v6093_v50 = vld [vmem:[#allocation3 + $0x8] sm:$0xe0] }
 0x8ab   : > { %v9676_v29 = vpop.f32.mrb[143].mxu0  ;;  %v5676_v3 = vadd.f32 %v9646_v7, %v9077_v30  ;;  %v6084_v7 = vld [vmem:[#allocation3 + $0x8] sm:$0x1c] }
 0x8ad   : > { %v5724_v58 = vadd.f32 %v9674_v35, %v5676_v3 }
 0x8bf   : > { %v9694_v37 = vpop.f32.mrb[148].mxu1 }
 0x8c0   : > { %v9722_v6 = vpop.f32.mrb[144].mxu0  ;;  %v9695_v21 = vpop.f32.mrb[149].mxu1 }
 0x8c1   : > { %v9723_v19 = vpop.f32.mrb[145].mxu0  ;;  %v9696_v27 = vadd.f32 %v9695_v21, %v9694_v37  ;;  %v9697_v48 = vpop.f32.mrb[150].mxu1 }
 0x8c2   : > { %v9724_v31 = vadd.f32 %v9723_v19, %v9722_v6  ;;  %v9725_v60 = vpop.f32.mrb[146].mxu0  ;;  %v9698_v14 = vpop.f32.mrb[151].mxu1 }
 0x8c3   : > { %v9726_v25 = vpop.f32.mrb[147].mxu0  ;;  %v5764_v4 = vadd.f32 %v9696_v27, %v5716_v43  ;;  %v9699_v49 = vadd.f32 %v9698_v14, %v9697_v48  ;;  %v15795_v27 = vld [vmem:[#allocation169_spill] sm:$0xff] }
 0x8c4   : > { %v9727_v17 = vadd.f32 %v9726_v25, %v9725_v60  ;;  %9761 = vmatprep.subr.bf16.mxu0 %v15795_v27 }
 0x8c5   : > { %v5767_v20 = vadd.f32 %v9699_v49, %v5719_v59  ;;  %v5812_v28 = vadd.f32 %v9724_v31, %v5764_v4  ;;  %v15796_v31 = vld [vmem:[#allocation185_spill] sm:$0xff] }
 0x8c6   : > { %9789 = vmatprep.subr.bf16.mxu1 %v15796_v31 }
 0x8c7   : > { %v5815_v9 = vadd.f32 %v9727_v17, %v5767_v20  ;;  %v9700_v56 = vpop.f32.mrb[152].mxu1 }
 0x8c8   : > { %v9728_v39 = vpop.f32.mrb[148].mxu0  ;;  %v9701_v52 = vpop.f32.mrb[153].mxu1 }
 0x8c9   : > { %v9729_v5 = vpop.f32.mrb[149].mxu0  ;;  %v9702_v38 = vadd.f32 %v9701_v52, %v9700_v56  ;;  %v9703_v51 = vpop.f32.mrb[154].mxu1  ;;  %v10551_v53 = vadd.f32 %v9082_v40, %v5815_v9 }
 0x8ca   : > { %v9730_v44 = vadd.f32 %v9729_v5, %v9728_v39  ;;  %v9731_v11 = vpop.f32.mrb[150].mxu0  ;;  %v9704_v36 = vpop.f32.mrb[155].mxu1 }
 0x8cb   : > { %v9732_v63 = vpop.f32.mrb[151].mxu0  ;;  %v5772_v46 = vadd.f32 %v9702_v38, %v5724_v58 }
 0x8cd   : > { %v5820_v55 = vadd.f32 %v9730_v44, %v5772_v46 }
 0x8d4   : > { %v10425_v41 = vpop.f32.mrb[152].mxu0 }
 0x8d5   : > { %v5929_v18 = vpop.f32.mrb[153].mxu0  ;;  %v5944_v26 = vpack.c.bf16 %v10425_v41, %v10425_v41 }
 0x8d6   : > { %v10426_v16 = vpop.f32.mrb[154].mxu0 }
 0x8d7   : > { %v5932_v54 = vpop.f32.mrb[155].mxu0 }
 0x8d8   : > { %v5943_v8 = vpack.c.bf16 %v5932_v54, %v5929_v18 }
 0x8da   : > { %10443 = vmatprep.mubr.bf16.mxu1 %v5943_v8 }
 0x8db   : > { %10444 = vmatmul.mubr.bf16.vlgmr.msra.gmra.mrb[156].mxu1 %v5944_v26 }
 0x9ae   : > { %v10445_v1 = vpop.f32.mrb[156].mxu1 }
 0x9af   : > { %v10547_v57 = vadd.f32 %v10445_v1, %v5820_v55  ;;  %v6050_v30 = vpop.f32.mrb[157].mxu1 }
 0x9b0   : > { %v10549_v32 = vadd.f32 %v6050_v30, %v5812_v28  ;;  %v10446_v13 = vpop.f32.mrb[158].mxu1 }
 0x9b1   : > { %v14458_v61 = vadd.f32 %v10547_v57, %v9082_v40  ;;  %v6053_v10 = vpop.f32.mrb[159].mxu1 }
 0x9b2   : > { %v14460_v42 = vadd.f32 %v10549_v32, %v9082_v40  ;;  %v14462_v47 = vadd.f32 %v10551_v53, %v6053_v10 }
 0x9b3   : > { %v6069_v12 = vmax.f32 %v14458_v61, 0.0 }
 0x9b4   : > { %v6067_v15 = vmax.f32 %v14460_v42, 0.0  ;;  %v6068_v33 = vmax.f32 %v14462_v47, 0.0 }
 0x9b5   : > { %v6071_v0 = vpack.c.bf16 %v6069_v12, %v6069_v12 }
 0x9b6   : > { %v6070_v59 = vpack.c.bf16 %v6068_v33, %v6067_v15 }
 0x9b7   : > { %v6088_v24 = vrot.slane %v6071_v0, 1 }
 0x9b8   : > { %v6073_v35 = vrot.slane %v6070_v59, 1 }
 0x9b9   : > { %v6100_v29 = vsel %vm14468_vm10, %v6088_v24, %v6099_v23 }
 0x9ba   : > { %6101 = vst [vmem:[#allocation3 + $0x10] sm:$0x7] %v6100_v29  ;;  %v6076_v3 = vsel %vm13856_vm1, %v6073_v35, %v6075_v34  ;;  %v6079_v37 = vsel %vm13862_vm11, %v6073_v35, %v6078_v45  ;;  %v6085_v6 = vsel %vm14472_vm2, %v6073_v35, %v6084_v7  ;;  %v6089_v21 = vsel %vm15794_vm0, %v6073_v35, %v6088_v24 }
 0x9bb   : > { %6077 = vst [vmem:[#allocation3] sm:$0x80] %v6076_v3  ;;  %6080 = vst [vmem:[#allocation3 + $0x8] sm:$0x3] %v6079_v37  ;;  %v6094_v19 = vsel %vm14477_vm4, %v6089_v21, %v6093_v50 }
 0x9bc   : > { %6086 = vst [vmem:[#allocation3 + $0x8] sm:$0x1c] %v6085_v6  ;;  %6095 = vst [vmem:[#allocation3 + $0x8] sm:$0xe0] %v6094_v19 }
 0x9bd   : > { %10764 = dma.done.wait [#allocation6 + $0x2], 9216 }
 0x9be   : > { %10765 = vsyncadd [#allocation6 + $0x2], 4294958080  ;;  %v15797_v48 = vld [vmem:[#allocation161_spill] sm:$0xff]  ;;  %v15799_v14 = vld [vmem:[#allocation170_spill] sm:$0xff]  ;;  %vm15819_vm8 = vsmask.f32 256 }
 0x9bf   : > { %9762 = vmatpush3.bf16.msra.mxu0 %v15797_v48  ;;  %v15798_v60 = vld [vmem:[#allocation177_spill] sm:$0xff]  ;;  %v15800_v25 = vld [vmem:[#allocation186_spill] sm:$0xff]  ;;  %v15803_v17 = vld [vmem:[#allocation171_spill] sm:$0xff]  ;;  %vm15820_vm9 = vcmask 1045504   ;;  %vm15827_vm5 = vsmask.f32 6400 }
 0x9c0   : > { %9790 = vmatpush3.bf16.msra.mxu1 %v15798_v60  ;;  %9763 = vmatprep.subr.bf16.mxu0 %v15799_v14  ;;  %v15801_v4 = vld [vmem:[#allocation162_spill] sm:$0xff]  ;;  %v15804_v20 = vld [vmem:[#allocation187_spill] sm:$0xff]  ;;  %v15807_v18 = vld [vmem:[#allocation172_spill] sm:$0xff]  ;;  %vm15833_vm3 = vsmask.f32 5376 }
 0x9c1   : > { %9791 = vmatprep.subr.bf16.mxu1 %v15800_v25  ;;  %v15802_v49 = vld [vmem:[#allocation178_spill] sm:$0xff]  ;;  %v15805_v11 = vld [vmem:[#allocation163_spill] sm:$0xff]  ;;  %v15808_v16 = vld [vmem:[#allocation188_spill] sm:$0xff] }
 0x9c2   : > { %v6200_v28 = vld [vmem:[#allocation3] sm:$0xf0]  ;;  %v15806_v51 = vld [vmem:[#allocation179_spill] sm:$0xff]  ;;  %v6242_v1 = vld [vmem:[#allocation3 + $0x10] sm:$0x7] }
 0x9c3   : > { %9764 = vmatpush3.bf16.msra.mxu0 %v15801_v4  ;;  %v14502_v9 = vld [vmem:[#allocation3 + $0x8] sm:$0xff]  ;;  %v6177_v56 = vld [vmem:[#allocation3] sm:$0xf8]  ;;  %v6204_v39 = vrot.slane %v6200_v28, 4  ;;  %v6213_v53 = vld [vmem:[#allocation3 + $0x10] sm:$0x1] }
 0x9c4   : > { %9792 = vmatpush3.bf16.msra.mxu1 %v15802_v49  ;;  %9765 = vmatprep.subr.bf16.mxu0 %v15803_v17  ;;  %v6205_v52 = vrot.slane %v14502_v9, 4  ;;  %v6180_v5 = vshrl.u32 %v6177_v56, 16  ;;  %v6183_v38 = vshll.u32 %v6177_v56, 16  ;;  %v6240_v44 = vld [vmem:[#allocation3] sm:$0xc0]  ;;  %v14508_v63 = vshrl.u32 %v14502_v9, 16  ;;  %vm15828_vm6 = vmmov %vm15819_vm8 }
 0x9c5   : > { %9793 = vmatprep.subr.bf16.mxu1 %v15804_v20  ;;  %v14511_v36 = vshll.u32 %v14502_v9, 16  ;;  %v6244_v46 = vshrl.u32 %v6240_v44, 16  ;;  %v6247_v55 = vshll.u32 %v6240_v44, 16  ;;  %v6211_v41 = vld [vmem:[#allocation3] sm:$0xf0]  ;;  %v15811_v35 = vld [vmem:[#allocation173_spill] sm:$0xff] }
 0x9c6   : > { %v6206_v54 = vsel %vm2565_vm13, %v6204_v39, %v6205_v52  ;;  %6210 = vst [vmem:[#allocation4 + $0x50] sm:$0xf] %v6205_v52  ;;  %v6182_v8 = vrot.slane %v6180_v5, 3  ;;  %v6185_v26 = vrot.slane %v6183_v38, 4  ;;  %v6215_v40 = vshrl.u32 %v6211_v41, 16  ;;  %v15809_v23 = vld [vmem:[#allocation164_spill] sm:$0xff] }
 0x9c7   : > { %9766 = vmatpush3.bf16.msra.mxu0 %v15805_v11  ;;  %6428 = vmatprep.mubr.bf16.mxu0 %v6206_v54  ;;  %v6190_v57 = vrot.slane %v14508_v63, 3  ;;  %v6193_v30 = vrot.slane %v14511_v36, 4  ;;  %v6246_v32 = vrot.slane %v6244_v46, 6  ;;  %v6249_v13 = vrot.slane %v6247_v55, 7  ;;  %v6288_v0 = vld [vmem:[#allocation3] sm:$0x80] }
 0x9c8   : > { %9794 = vmatpush3.bf16.msra.mxu1 %v15806_v51  ;;  %9767 = vmatprep.subr.bf16.mxu0 %v15807_v18  ;;  %v6186_v10 = vor.u32 %v6185_v26, %v6182_v8  ;;  %v6254_v12 = vrot.slane %v14508_v63, 6  ;;  %v6257_v15 = vrot.slane %v14511_v36, 7  ;;  %v6217_v33 = vrot.slane %v6215_v40, 4  ;;  %v15810_v59 = vld [vmem:[#allocation180_spill] sm:$0xff]  ;;  %v15812_v50 = vld [vmem:[#allocation189_spill] sm:$0xff]  ;;  %v15815_v44 = vld [vmem:[#allocation174_spill] sm:$0xff] }
 0x9c9   : > { %9795 = vmatprep.subr.bf16.mxu1 %v15808_v16  ;;  %v6194_v34 = vor.u32 %v6193_v30, %v6190_v57  ;;  %v6250_v24 = vor.u32 %v6249_v13, %v6246_v32  ;;  %v6218_v45 = vshll.u32 %v6211_v41, 16  ;;  %v6225_v7 = vrot.slane %v14508_v63, 4  ;;  %v6273_v21 = vld [vmem:[#allocation3] sm:$0x80]  ;;  %v6338_v60 = vld [vmem:[#allocation3 + $0x8] sm:$0xfc] }
 0x9ca   : > { %v6258_v29 = vor.u32 %v6257_v15, %v6254_v12  ;;  %v6228_v3 = vrot.slane %v14511_v36, 5  ;;  %v6261_v37 = vshrl.u32 %v6242_v1, 16  ;;  %v6264_v6 = vshll.u32 %v6242_v1, 16  ;;  %v6339_v17 = vld [vmem:[#allocation3 + $0x10] sm:$0x3f] }
 0x9cb   : > { %9768 = vmatpush3.bf16.msra.mxu0 %v15809_v23  ;;  %v14527_v19 = vsel %vm2489_vm14, %v6186_v10, %v6194_v34  ;;  %6199 = vst [vmem:[#allocation4 + $0x48] sm:$0xf] %v6194_v34  ;;  %v6220_v27 = vrot.slane %v6218_v45, 5  ;;  %v6232_v31 = vshll.u32 %v6213_v53, 16  ;;  %v6292_v48 = vshrl.u32 %v6288_v0, 16  ;;  %v15813_v20 = vld [vmem:[#allocation165_spill] sm:$0xff] }
 0x9cc   : > { %9796 = vmatpush3.bf16.msra.mxu1 %v15810_v59  ;;  %9769 = vmatprep.subr.bf16.mxu0 %v15811_v35  ;;  %v6259_v14 = vsel %vm2931_vm7, %v6250_v24, %v6258_v29  ;;  %v6229_v25 = vor.u32 %v6228_v3, %v6225_v7  ;;  %v6263_v4 = vrot.slane %v6261_v37, 6  ;;  %v6266_v49 = vrot.slane %v6264_v6, 7  ;;  %v15814_v28 = vld [vmem:[#allocation181_spill] sm:$0xff]  ;;  %v15816_v11 = vld [vmem:[#allocation190_spill] sm:$0xff]  ;;  %v15821_v0 = vld [vmem:[#allocation175_spill] sm:$0xff] }
 0x9cd   : > { %9797 = vmatprep.subr.bf16.mxu1 %v15812_v50  ;;  %v6221_v56 = vor.u32 %v6220_v27, %v6217_v33  ;;  %v6234_v39 = vrot.slane %v6232_v31, 5  ;;  %v6294_v52 = vrot.slane %v6292_v48, 7  ;;  %v6298_v5 = vrot.slane %v14508_v63, 7  ;;  %v6315_v38 = vld [vmem:[#allocation3 + $0x8] sm:$0xfe]  ;;  %6476 = vmatprep.mubr.bf16.mxu1 %v6259_v14  ;;  %v15817_v13 = vld [vmem:[#allocation166_spill] sm:$0xff] }
 0x9ce   : > { %v6267_v51 = vor.u32 %v6266_v49, %v6263_v4  ;;  %v6279_v46 = vrot.slane %v6273_v21, 7  ;;  %v6280_v55 = vrot.slane %v14502_v9, 7  ;;  %v6342_v41 = vrot.slane %v6338_v60, 2  ;;  %v6316_v18 = vld [vmem:[#allocation3 + $0x10] sm:$0x3f]  ;;  %v15822_v23 = vld [vmem:[#allocation191_spill] sm:$0xff] }
 0x9cf   : > { %9770 = vmatpush3.bf16.msra.mxu0 %v15813_v20  ;;  %v6230_v16 = vsel %vm2593_vm15, %v6221_v56, %v6229_v25  ;;  %v6235_v54 = vsel %vm2593_vm15, %v6229_v25, %v6234_v39  ;;  %v6301_v8 = vor.u32 %v6298_v5, %v14511_v36  ;;  %v6343_v26 = vrot.slane %v6339_v17, 2  ;;  %v6290_v63 = vld [vmem:[#allocation3 + $0x10] sm:$0xf]  ;;  %v6349_v32 = vld [vmem:[#allocation3 + $0x8] sm:$0xfc]  ;;  %v15823_v27 = vld [vmem:[#allocation167_spill] sm:$0xff] }
 0x9d0   : > { %9798 = vmatpush3.bf16.msra.mxu1 %v15814_v28  ;;  %9771 = vmatprep.subr.bf16.mxu0 %v15815_v44  ;;  %v6268_v40 = vsel %vm2931_vm7, %v6258_v29, %v6267_v51  ;;  %6239 = vst [vmem:[#allocation4 + $0x58] sm:$0xf] %v6235_v54  ;;  %v14541_v1 = vsel %vm2316_vm12, %v6279_v46, %v6280_v55  ;;  %v6318_v57 = vshrl.u32 %v6315_v38, 16  ;;  %v6321_v30 = vshll.u32 %v6315_v38, 16  ;;  %v6275_v9 = vld [vmem:[#allocation3 + $0x10] sm:$0x7] }
 0x9d1   : > { %9799 = vmatprep.subr.bf16.mxu1 %v15816_v11  ;;  %v15818_v53 = vld [vmem:[#allocation182_spill] sm:$0xff]  ;;  %6272 = vst [vmem:[#allocation4 + $0x60] sm:$0xf] %v6268_v40  ;;  %v14546_v10 = vsel %vm15819_vm8, %v6294_v52, %v6301_v8  ;;  %v14549_v36 = vsel %vm15820_vm9, %v6342_v41, %v6343_v26  ;;  %6348 = vst [vmem:[#allocation4 + $0x80] sm:$0xf] %v6343_v26  ;;  %v6326_v12 = vshrl.u32 %v6316_v18, 16 }
 0x9d2   : > { %v6329_v15 = vshll.u32 %v6316_v18, 16  ;;  %v6350_v33 = vld [vmem:[#allocation3 + $0x10] sm:$0x7f]  ;;  %v6320_v59 = vrot.slane %v6318_v57, 1  ;;  %v6323_v34 = vrot.slane %v6321_v30, 2  ;;  %v6304_v24 = vshrl.u32 %v6290_v63, 16 }
 0x9d3   : > { %9772 = vmatpush3.bf16.msra.mxu0 %v15817_v13  ;;  %v6307_v45 = vshll.u32 %v6290_v63, 16  ;;  %v6328_v7 = vrot.slane %v6326_v12, 1  ;;  %v6282_v50 = vrot.slane %v6275_v9, 7  ;;  %v6352_v29 = vshrl.u32 %v6349_v32, 16  ;;  %v15824_v31 = vld [vmem:[#allocation183_spill] sm:$0xff]  ;;  %v15825_v4 = vld [vmem:[#allocation176_spill] sm:$0xff] }
 0x9d4   : > { %9800 = vmatpush3.bf16.msra.mxu1 %v15818_v53  ;;  %9773 = vmatprep.subr.bf16.mxu0 %v15821_v0  ;;  %v6331_v35 = vrot.slane %v6329_v15, 2  ;;  %v6324_v3 = vor.u32 %v6323_v34, %v6320_v59  ;;  %v6306_v37 = vrot.slane %v6304_v24, 7  ;;  %v6355_v6 = vshll.u32 %v6349_v32, 16  ;;  %v15826_v49 = vld [vmem:[#allocation192_spill] sm:$0xff]  ;;  %v15831_v46 = vld [vmem:[#allocation201_spill] sm:$0xff]  ;;  %v15836_v26 = vld [vmem:[#allocation202_spill] sm:$0xff] }
 0x9d5   : > { %9801 = vmatprep.subr.bf16.mxu1 %v15822_v23  ;;  %v6360_v21 = vshrl.u32 %v6350_v33, 16  ;;  %v6283_v60 = vsel %vm2316_vm12, %v6280_v55, %v6282_v50  ;;  %v6354_v14 = vrot.slane %v6352_v29, 2  ;;  %v6363_v25 = vshll.u32 %v6350_v33, 16  ;;  %v15829_v44 = vld [vmem:[#allocation168_spill] sm:$0xff]  ;;  %v15832_v55 = vld [vmem:[#allocation217_spill] sm:$0xff]  ;;  %v15837_v63 = vld [vmem:[#allocation218_spill] sm:$0xff] }
 0x9d6   : > { %v6332_v48 = vor.u32 %v6331_v35, %v6328_v7  ;;  %v6309_v17 = vor.u32 %v6307_v45, %v6306_v37  ;;  %6287 = vst [vmem:[#allocation4 + $0x68] sm:$0xf] %v6283_v60  ;;  %v6357_v20 = vrot.slane %v6355_v6, 3  ;;  %v15830_v11 = vld [vmem:[#allocation184_spill] sm:$0xff]  ;;  %v15835_v8 = vld [vmem:[#allocation209_spill] sm:$0xff]  ;;  %v15838_v40 = vld [vmem:[#allocation194_spill] sm:$0xff] }
 0x9d7   : > { %9774 = vmatpush3.bf16.msra.mxu0 %v15823_v27  ;;  %v6362_v28 = vrot.slane %v6360_v21, 2  ;;  %v6365_v39 = vrot.slane %v6363_v25, 3  ;;  %v6382_v18 = vld [vmem:[#allocation4 + $0x50] sm:$0xf]  ;;  %v15839_v57 = vld [vmem:[#allocation210_spill] sm:$0xff]  ;;  %v15842_v32 = vld [vmem:[#allocation195_spill] sm:$0xff] }
 0x9d8   : > { %9802 = vmatpush3.bf16.msra.mxu1 %v15824_v31  ;;  %9775 = vmatprep.subr.bf16.mxu0 %v15825_v4  ;;  %v6333_v56 = vsel %vm15827_vm5, %v6324_v3, %v6332_v48  ;;  %6337 = vst [vmem:[#allocation4 + $0x78] sm:$0xf] %v6332_v48  ;;  %v6310_v52 = vsel %vm15828_vm6, %v6298_v5, %v6309_v17  ;;  %v6384_v54 = vld [vmem:[#allocation4 + $0x60] sm:$0xf]  ;;  %v15834_v5 = vld [vmem:[#allocation193_spill] sm:$0xff]  ;;  %v15844_v53 = vld [vmem:[#allocation204_spill] sm:$0xff] }
 0x9d9   : > { %9803 = vmatprep.subr.bf16.mxu1 %v15826_v49  ;;  %v6358_v38 = vor.u32 %v6357_v20, %v6354_v14  ;;  %6314 = vst [vmem:[#allocation4 + $0x70] sm:$0xf] %v6310_v52  ;;  %v6366_v51 = vor.u32 %v6365_v39, %v6362_v28  ;;  %v6381_v30 = vld [vmem:[#allocation4 + $0x48] sm:$0xf]  ;;  %v6383_v9 = vld [vmem:[#allocation4 + $0x58] sm:$0xf] }
 0x9da   : > { %v15843_v13 = vld [vmem:[#allocation211_spill] sm:$0xff]  ;;  %v15845_v12 = vld [vmem:[#allocation220_spill] sm:$0xff]  ;;  %v15848_v0 = vld [vmem:[#allocation205_spill] sm:$0xff] }
 0x9db   : > { %9776 = vmatpush3.bf16.msra.mxu0 %v15829_v44  ;;  %v6367_v41 = vsel %vm15833_vm3, %v6358_v38, %v6366_v51  ;;  %6371 = vst [vmem:[#allocation4 + $0x88] sm:$0xf] %v6366_v51  ;;  %v15846_v15 = vld [vmem:[#allocation196_spill] sm:$0xff]  ;;  %v15849_v23 = vld [vmem:[#allocation221_spill] sm:$0xff]  ;;  %v15852_v24 = vld [vmem:[#allocation206_spill] sm:$0xff] }
 0x9dc   : > { %9804 = vmatpush3.bf16.msra.mxu1 %v15830_v11  ;;  %9817 = vmatprep.subr.bf16.mxu0 %v15831_v46  ;;  %v15847_v33 = vld [vmem:[#allocation212_spill] sm:$0xff]  ;;  %v15850_v59 = vld [vmem:[#allocation197_spill] sm:$0xff]  ;;  %v15853_v45 = vld [vmem:[#allocation222_spill] sm:$0xff] }
 0x9dd   : > { %9845 = vmatprep.subr.bf16.mxu1 %v15832_v55  ;;  %v15851_v34 = vld [vmem:[#allocation213_spill] sm:$0xff]  ;;  %v15854_v7 = vld [vmem:[#allocation198_spill] sm:$0xff]  ;;  %v15857_v35 = vld [vmem:[#allocation223_spill] sm:$0xff] }
 0x9de   : > { %6429 = vmatmul.mubr.bf16.vlgmr.msra.gmra.mrb[156].mxu0 %v14527_v19  ;;  %v15840_v19 = vld [vmem:[#allocation203_spill] sm:$0xff]  ;;  %v15860_v3 = vld [vmem:[#allocation208_spill] sm:$0xff]  ;;  %v15864_v27 = vld [vmem:[#allocation225_spill] sm:$0xff] }
 0x9df   : > { %6477 = vmatmul.mubr.bf16.vlgmr.msra.gmra.mrb[160].mxu1 %v6230_v16  ;;  %9818 = vmatpush3.bf16.msra.mxu0 %v15834_v5  ;;  %v15841_v16 = vld [vmem:[#allocation219_spill] sm:$0xff]  ;;  %v15861_v37 = vld [vmem:[#allocation224_spill] sm:$0xff]  ;;  %v15865_v60 = vld [vmem:[#allocation226_spill] sm:$0xff] }
 0x9e0   : > { %9846 = vmatpush3.bf16.msra.mxu1 %v15835_v8  ;;  %9819 = vmatprep.subr.bf16.mxu0 %v15836_v26  ;;  %v15858_v50 = vld [vmem:[#allocation199_spill] sm:$0xff]  ;;  %v15862_v6 = vld [vmem:[#allocation200_spill] sm:$0xff]  ;;  %v6387_v25 = vld [vmem:[#allocation4 + $0x78] sm:$0xf] }
 0x9e1   : > { %9847 = vmatprep.subr.bf16.mxu1 %v15837_v63  ;;  %6436 = vmatprep.mubr.bf16.mxu0 %v6382_v18  ;;  %v15859_v29 = vld [vmem:[#allocation215_spill] sm:$0xff]  ;;  %v15863_v21 = vld [vmem:[#allocation216_spill] sm:$0xff]  ;;  %v15869_v17 = vld [vmem:[#allocation230_spill] sm:$0xff] }
 0x9e2   : > { %6484 = vmatprep.mubr.bf16.mxu1 %v6384_v54  ;;  %v6386_v31 = vld [vmem:[#allocation4 + $0x70] sm:$0xf]  ;;  %v6388_v48 = vld [vmem:[#allocation4 + $0x80] sm:$0xf]  ;;  %v6385_v14 = vld [vmem:[#allocation4 + $0x68] sm:$0xf] }
 0x9e3   : > { %9820 = vmatpush3.bf16.msra.mxu0 %v15838_v40  ;;  %v15866_v4 = vld [vmem:[#allocation227_spill] sm:$0xff]  ;;  %v15867_v49 = vld [vmem:[#allocation228_spill] sm:$0xff] }
 0x9e4   : > { %9848 = vmatpush3.bf16.msra.mxu1 %v15839_v57  ;;  %9821 = vmatprep.subr.bf16.mxu0 %v15840_v19  ;;  %v15870_v20 = vld [vmem:[#allocation231_spill] sm:$0xff]  ;;  %v15871_v28 = vld [vmem:[#allocation232_spill] sm:$0xff] }
 0x9e5   : > { %9849 = vmatprep.subr.bf16.mxu1 %v15841_v16  ;;  %v9091_v38 = vld [vmem:[%s15082_s14] ss:$0 sm:$0xff] }
 0x9e6   : > { %6437 = vmatmul.mubr.bf16.gmra.mrb[160].mxu0 %v6381_v30 }
 0x9e7   : > { %6485 = vmatmul.mubr.bf16.gmra.mrb[164].mxu1 %v6383_v9  ;;  %9822 = vmatpush3.bf16.msra.mxu0 %v15842_v32 }
 0x9e8   : > { %9850 = vmatpush3.bf16.msra.mxu1 %v15843_v13  ;;  %9823 = vmatprep.subr.bf16.mxu0 %v15844_v53 }
 0x9e9   : > { %9851 = vmatprep.subr.bf16.mxu1 %v15845_v12  ;;  %6524 = vmatprep.mubr.bf16.mxu0 %v14546_v10  ;;  %v15855_v10 = vld [vmem:[#allocation214_spill] sm:$0xff] }
 0x9ea   : > { %6572 = vmatprep.mubr.bf16.mxu1 %v14549_v36  ;;  %v15856_v36 = vld [vmem:[#allocation207_spill] sm:$0xff] }
 0x9eb   : > { %9824 = vmatpush3.bf16.msra.mxu0 %v15846_v15 }
 0x9ec   : > { %9852 = vmatpush3.bf16.msra.mxu1 %v15847_v33  ;;  %9825 = vmatprep.subr.bf16.mxu0 %v15848_v0 }
 0x9ed   : > { %9853 = vmatprep.subr.bf16.mxu1 %v15849_v23 }
 0x9ef   : > { %9826 = vmatpush3.bf16.msra.mxu0 %v15850_v59 }
 0x9f0   : > { %9854 = vmatpush3.bf16.msra.mxu1 %v15851_v34  ;;  %9827 = vmatprep.subr.bf16.mxu0 %v15852_v24 }
 0x9f1   : > { %9855 = vmatprep.subr.bf16.mxu1 %v15853_v45 }
 0x9f3   : > { %9828 = vmatpush3.bf16.msra.mxu0 %v15854_v7 }
 0x9f4   : > { %9856 = vmatpush3.bf16.msra.mxu1 %v15855_v10  ;;  %9829 = vmatprep.subr.bf16.mxu0 %v15856_v36 }
 0x9f5   : > { %9857 = vmatprep.subr.bf16.mxu1 %v15857_v35 }
 0x9f7   : > { %9830 = vmatpush3.bf16.msra.mxu0 %v15858_v50 }
 0x9f8   : > { %9858 = vmatpush3.bf16.msra.mxu1 %v15859_v29  ;;  %9831 = vmatprep.subr.bf16.mxu0 %v15860_v3 }
 0x9f9   : > { %9859 = vmatprep.subr.bf16.mxu1 %v15861_v37 }
 0x9fb   : > { %9832 = vmatpush3.bf16.msra.mxu0 %v15862_v6 }
 0x9fc   : > { %9860 = vmatpush3.bf16.msra.mxu1 %v15863_v21  ;;  %10447 = vmatprep.subr.bf16.mxu0 %v15864_v27 }
 0x9fe   : > { %6525 = vmatmul.mubr.bf16.vlgmr.msra.gmra.mrb[164].mxu0 %v14541_v1  ;;  %v15868_v1 = vld [vmem:[#allocation229_spill] sm:$0xff] }
 0x9ff   : > { %6573 = vmatmul.mubr.bf16.vlgmr.msra.gmra.mrb[168].mxu1 %v6333_v56  ;;  %10448 = vmatpush3.bf16.msra.mxu0 %v15864_v27  ;;  %v6389_v56 = vld [vmem:[#allocation4 + $0x88] sm:$0xf] }
 0xa00   : > { %6532 = vmatprep.mubr.bf16.mxu0 %v6386_v31  ;;  %10449 = vmatprep.subr.bf16.mxu0 %v15865_v60 }
 0xa01   : > { %6580 = vmatprep.mubr.bf16.mxu1 %v6388_v48 }
 0xa03   : > { %10450 = vmatpush3.bf16.msra.mxu0 %v15865_v60 }
 0xa04   : > { %10451 = vmatprep.subr.bf16.mxu0 %v15866_v4 }
 0xa06   : > { %6533 = vmatmul.mubr.bf16.gmra.mrb[168].mxu0 %v6385_v14 }
 0xa07   : > { %6581 = vmatmul.mubr.bf16.gmra.mrb[172].mxu1 %v6387_v25  ;;  %10452 = vmatpush3.bf16.msra.mxu0 %v15866_v4 }
 0xa08   : > { %10463 = vmatprep.mubr.bf16.mxu0 %v6367_v41  ;;  %10453 = vmatprep.subr.bf16.mxu0 %v15867_v49 }
 0xa0b   : > { %10454 = vmatpush3.bf16.msra.mxu0 %v15867_v49 }
 0xa0c   : > { %10455 = vmatprep.subr.bf16.mxu0 %v15868_v1 }
 0xa0f   : > { %10456 = vmatpush3.bf16.msra.mxu0 %v15868_v1 }
 0xa10   : > { %10457 = vmatprep.subr.bf16.mxu0 %v15869_v17 }
 0xa13   : > { %10458 = vmatpush3.bf16.msra.mxu0 %v15869_v17 }
 0xa14   : > { %10459 = vmatprep.subr.bf16.mxu0 %v15870_v20 }
 0xa17   : > { %10460 = vmatpush3.bf16.msra.mxu0 %v15870_v20 }
 0xa18   : > { %10461 = vmatprep.subr.bf16.mxu0 %v15871_v28 }
 0xa1b   : > { %10462 = vmatpush3.bf16.msra.mxu0 %v15871_v28 }
 0xa1e   : > { %10464 = vmatmul.mubr.bf16.vlgmr.msra.gmra.mrb[172].mxu0 %v6389_v56 }
 0xab1   : > { %v9777_v39 = vpop.f32.mrb[156].mxu0 }
 0xab2   : > { %v9805_v52 = vpop.f32.mrb[160].mxu1  ;;  %v9778_v44 = vpop.f32.mrb[157].mxu0 }
 0xab3   : > { %v9806_v11 = vpop.f32.mrb[161].mxu1  ;;  %v9779_v51 = vadd.f32 %v9778_v44, %v9777_v39  ;;  %v9780_v46 = vpop.f32.mrb[158].mxu0 }
 0xab4   : > { %v9807_v55 = vadd.f32 %v9806_v11, %v9805_v52  ;;  %v9808_v41 = vpop.f32.mrb[162].mxu1  ;;  %v9781_v18 = vpop.f32.mrb[159].mxu0 }
 0xab5   : > { %v9809_v54 = vpop.f32.mrb[163].mxu1  ;;  %v6431_v5 = vadd.f32 %v9779_v51, %v9091_v38  ;;  %v9782_v8 = vadd.f32 %v9781_v18, %v9780_v46 }
 0xab6   : > { %v9810_v26 = vadd.f32 %v9809_v54, %v9808_v41  ;;  %v6661_v54 = vld [vmem:[#allocation3 + $0x10] sm:$0x7] }
 0xab7   : > { %v6434_v63 = vadd.f32 %v9782_v8, %v9091_v38  ;;  %v6479_v40 = vadd.f32 %v9807_v55, %v6431_v5 }
 0xab9   : > { %v6482_v57 = vadd.f32 %v9810_v26, %v6434_v63  ;;  %v9783_v30 = vpop.f32.mrb[160].mxu0 }
 0xaba   : > { %v9811_v9 = vpop.f32.mrb[164].mxu1  ;;  %v9784_v19 = vpop.f32.mrb[161].mxu0 }
 0xabb   : > { %v9812_v16 = vpop.f32.mrb[165].mxu1  ;;  %v9785_v32 = vadd.f32 %v9784_v19, %v9783_v30  ;;  %v9786_v13 = vpop.f32.mrb[162].mxu0  ;;  %v6647_v30 = vld [vmem:[#allocation3 + $0x8] sm:$0x3] }
 0xabc   : > { %v9813_v53 = vadd.f32 %v9812_v16, %v9811_v9  ;;  %v9814_v12 = vpop.f32.mrb[166].mxu1  ;;  %v9787_v15 = vpop.f32.mrb[163].mxu0  ;;  %v6650_v9 = vld [vmem:[#allocation3 + $0x8] sm:$0x1c]  ;;  %v6657_v16 = vld [vmem:[#allocation3 + $0x8] sm:$0xe0] }
 0xabd   : > { %v9815_v33 = vpop.f32.mrb[167].mxu1  ;;  %v6439_v0 = vadd.f32 %v9785_v32, %v9091_v38 }
 0xabe   : > { %v15872_v33 = vld [vmem:[#allocation241_spill] sm:$0xff] }
 0xabf   : > { %v6487_v23 = vadd.f32 %v9813_v53, %v6439_v0  ;;  %9883 = vmatprep.subr.bf16.mxu1 %v15872_v33  ;;  %v15873_v0 = vld [vmem:[#allocation257_spill] sm:$0xff] }
 0xac0   : > { %9911 = vmatprep.subr.bf16.mxu0 %v15873_v0 }
 0xad1   : > { %v9833_v59 = vpop.f32.mrb[164].mxu0 }
 0xad2   : > { %v9861_v34 = vpop.f32.mrb[168].mxu1  ;;  %v9834_v24 = vpop.f32.mrb[165].mxu0 }
 0xad3   : > { %v9862_v45 = vpop.f32.mrb[169].mxu1  ;;  %v9835_v7 = vadd.f32 %v9834_v24, %v9833_v59  ;;  %v9836_v10 = vpop.f32.mrb[166].mxu0 }
 0xad4   : > { %v9863_v36 = vadd.f32 %v9862_v45, %v9861_v34  ;;  %v9864_v35 = vpop.f32.mrb[170].mxu1  ;;  %v9837_v50 = vpop.f32.mrb[167].mxu0 }
 0xad5   : > { %v9865_v29 = vpop.f32.mrb[171].mxu1  ;;  %v6527_v3 = vadd.f32 %v9835_v7, %v6479_v40  ;;  %v9838_v37 = vadd.f32 %v9837_v50, %v9836_v10 }
 0xad6   : > { %v9866_v6 = vadd.f32 %v9865_v29, %v9864_v35 }
 0xad7   : > { %v6530_v21 = vadd.f32 %v9838_v37, %v6482_v57  ;;  %v6575_v27 = vadd.f32 %v9863_v36, %v6527_v3  ;;  %v6644_v57 = vld [vmem:[#allocation3] sm:$0x80] }
 0xad9   : > { %v9839_v31 = vpop.f32.mrb[168].mxu0  ;;  %v6578_v60 = vadd.f32 %v9866_v6, %v6530_v21 }
 0xada   : > { %v9867_v48 = vpop.f32.mrb[172].mxu1  ;;  %v9840_v14 = vpop.f32.mrb[169].mxu0 }
 0xadb   : > { %v9868_v25 = vpop.f32.mrb[173].mxu1  ;;  %v9841_v4 = vadd.f32 %v9840_v14, %v9839_v31  ;;  %v9842_v1 = vpop.f32.mrb[170].mxu0 }
 0xadc   : > { %v9869_v49 = vadd.f32 %v9868_v25, %v9867_v48  ;;  %v9870_v17 = vpop.f32.mrb[174].mxu1  ;;  %v9843_v20 = vpop.f32.mrb[171].mxu0 }
 0xadd   : > { %v9871_v28 = vpop.f32.mrb[175].mxu1  ;;  %v6535_v56 = vadd.f32 %v9841_v4, %v6487_v23 }
 0xadf   : > { %v6583_v39 = vadd.f32 %v9869_v49, %v6535_v56 }
 0xaf1   : > { %v10465_v52 = vpop.f32.mrb[172].mxu0 }
 0xaf2   : > { %v6631_v38 = vadd.f32 %v10465_v52, %v6583_v39  ;;  %v6622_v44 = vpop.f32.mrb[173].mxu0 }
 0xaf3   : > { %v6623_v11 = vadd.f32 %v6622_v44, %v6575_v27  ;;  %v10466_v51 = vpop.f32.mrb[174].mxu0 }
 0xaf4   : > { %v6638_v46 = vmax.f32 %v6631_v38, 0.0  ;;  %v6625_v55 = vpop.f32.mrb[175].mxu0 }
 0xaf5   : > { %v6626_v41 = vadd.f32 %v6625_v55, %v6578_v60  ;;  %v6636_v5 = vmax.f32 %v6623_v11, 0.0 }
 0xaf6   : > { %v6640_v18 = vpack.c.bf16 %v6638_v46, %v6638_v46 }
 0xaf7   : > { %v6637_v8 = vmax.f32 %v6626_v41, 0.0 }
 0xaf8   : > { %v6654_v26 = vrot.slane %v6640_v18, 1 }
 0xaf9   : > { %v6639_v63 = vpack.c.bf16 %v6637_v8, %v6636_v5 }
 0xafa   : > { %v6662_v40 = vsel %vm14468_vm10, %v6654_v26, %v6661_v54 }
 0xafb   : > { %6663 = vst [vmem:[#allocation3 + $0x10] sm:$0x7] %v6662_v40  ;;  %v6642_v19 = vrot.slane %v6639_v63, 1 }
 0xafd   : > { %v6645_v32 = vsel %vm13856_vm1, %v6642_v19, %v6644_v57  ;;  %v6648_v13 = vsel %vm13862_vm11, %v6642_v19, %v6647_v30  ;;  %v6651_v53 = vsel %vm14472_vm2, %v6642_v19, %v6650_v9  ;;  %v6655_v12 = vsel %vm15794_vm0, %v6642_v19, %v6654_v26 }
 0xafe   : > { %6646 = vst [vmem:[#allocation3] sm:$0x80] %v6645_v32  ;;  %6649 = vst [vmem:[#allocation3 + $0x8] sm:$0x3] %v6648_v13  ;;  %v6658_v15 = vsel %vm14477_vm4, %v6655_v12, %v6657_v16 }
 0xaff   : > { %6652 = vst [vmem:[#allocation3 + $0x8] sm:$0x1c] %v6651_v53  ;;  %6659 = vst [vmem:[#allocation3 + $0x8] sm:$0xe0] %v6658_v15 }
 0xb00   : > { %10766 = dma.done.wait [#allocation6 + $0x3], 9216 }
 0xb01   : > { %10767 = vsyncadd [#allocation6 + $0x3], 4294958080  ;;  %v15874_v23 = vld [vmem:[#allocation233_spill] sm:$0xff]  ;;  %v15876_v34 = vld [vmem:[#allocation242_spill] sm:$0xff] }
 0xb02   : > { %9884 = vmatpush3.bf16.msra.mxu1 %v15874_v23  ;;  %v15875_v59 = vld [vmem:[#allocation249_spill] sm:$0xff]  ;;  %v15877_v24 = vld [vmem:[#allocation258_spill] sm:$0xff]  ;;  %v15880_v10 = vld [vmem:[#allocation243_spill] sm:$0xff] }
 0xb03   : > { %9912 = vmatpush3.bf16.msra.mxu0 %v15875_v59  ;;  %9885 = vmatprep.subr.bf16.mxu1 %v15876_v34  ;;  %v15878_v45 = vld [vmem:[#allocation234_spill] sm:$0xff]  ;;  %v15881_v36 = vld [vmem:[#allocation259_spill] sm:$0xff]  ;;  %v15884_v1 = vld [vmem:[#allocation244_spill] sm:$0xff] }
 0xb04   : > { %9913 = vmatprep.subr.bf16.mxu0 %v15877_v24  ;;  %v15879_v7 = vld [vmem:[#allocation250_spill] sm:$0xff]  ;;  %v15882_v31 = vld [vmem:[#allocation235_spill] sm:$0xff]  ;;  %v15885_v17 = vld [vmem:[#allocation260_spill] sm:$0xff] }
 0xb05   : > { %v6762_v35 = vld [vmem:[#allocation3] sm:$0xf0]  ;;  %v15883_v48 = vld [vmem:[#allocation251_spill] sm:$0xff]  ;;  %v6804_v52 = vld [vmem:[#allocation3 + $0x10] sm:$0x7] }
 0xb06   : > { %9886 = vmatpush3.bf16.msra.mxu1 %v15878_v45  ;;  %v14639_v50 = vld [vmem:[#allocation3 + $0x8] sm:$0xff]  ;;  %v6739_v29 = vld [vmem:[#allocation3] sm:$0xf8]  ;;  %v6766_v3 = vrot.slane %v6762_v35, 4  ;;  %v6775_v46 = vld [vmem:[#allocation3 + $0x10] sm:$0x1] }
 0xb07   : > { %9914 = vmatpush3.bf16.msra.mxu0 %v15879_v7  ;;  %9887 = vmatprep.subr.bf16.mxu1 %v15880_v10  ;;  %v6767_v37 = vrot.slane %v14639_v50, 4  ;;  %v6742_v6 = vshrl.u32 %v6739_v29, 16  ;;  %v6745_v21 = vshll.u32 %v6739_v29, 16  ;;  %v6802_v27 = vld [vmem:[#allocation3] sm:$0xc0]  ;;  %v14645_v60 = vshrl.u32 %v14639_v50, 16  ;;  %vm15896_vm8 = vmmov %vm15828_vm6 }
 0xb08   : > { %9915 = vmatprep.subr.bf16.mxu0 %v15881_v36  ;;  %v14648_v14 = vshll.u32 %v14639_v50, 16  ;;  %v6806_v25 = vshrl.u32 %v6802_v27, 16  ;;  %v6809_v4 = vshll.u32 %v6802_v27, 16  ;;  %v6773_v49 = vld [vmem:[#allocation3] sm:$0xf0]  ;;  %v15888_v9 = vld [vmem:[#allocation245_spill] sm:$0xff] }
 0xb09   : > { %v6768_v20 = vsel %vm2565_vm13, %v6766_v3, %v6767_v37  ;;  %6772 = vst [vmem:[#allocation4 + $0x50] sm:$0xf] %v6767_v37  ;;  %v6744_v28 = vrot.slane %v6742_v6, 3  ;;  %v6747_v56 = vrot.slane %v6745_v21, 4  ;;  %v6777_v39 = vshrl.u32 %v6773_v49, 16  ;;  %v15886_v8 = vld [vmem:[#allocation236_spill] sm:$0xff] }
 0xb0a   : > { %9888 = vmatpush3.bf16.msra.mxu1 %v15882_v31  ;;  %6990 = vmatprep.mubr.bf16.mxu1 %v6768_v20  ;;  %v6752_v38 = vrot.slane %v14645_v60, 3  ;;  %v6755_v44 = vrot.slane %v14648_v14, 4  ;;  %v6808_v11 = vrot.slane %v6806_v25, 6  ;;  %v6811_v51 = vrot.slane %v6809_v4, 7  ;;  %v6850_v5 = vld [vmem:[#allocation3] sm:$0x80] }
 0xb0b   : > { %9916 = vmatpush3.bf16.msra.mxu0 %v15883_v48  ;;  %9889 = vmatprep.subr.bf16.mxu1 %v15884_v1  ;;  %v6748_v55 = vor.u32 %v6747_v56, %v6744_v28  ;;  %v6816_v41 = vrot.slane %v14645_v60, 6  ;;  %v6819_v18 = vrot.slane %v14648_v14, 7  ;;  %v6779_v54 = vrot.slane %v6777_v39, 4  ;;  %v15887_v26 = vld [vmem:[#allocation252_spill] sm:$0xff]  ;;  %v15889_v19 = vld [vmem:[#allocation261_spill] sm:$0xff]  ;;  %v15892_v27 = vld [vmem:[#allocation246_spill] sm:$0xff] }
 0xb0c   : > { %9917 = vmatprep.subr.bf16.mxu0 %v15885_v17  ;;  %v6756_v63 = vor.u32 %v6755_v44, %v6752_v38  ;;  %v6812_v40 = vor.u32 %v6811_v51, %v6808_v11  ;;  %v6780_v57 = vshll.u32 %v6773_v49, 16  ;;  %v6787_v30 = vrot.slane %v14645_v60, 4  ;;  %v6835_v12 = vld [vmem:[#allocation3] sm:$0x80]  ;;  %v6900_v59 = vld [vmem:[#allocation3 + $0x8] sm:$0xfc] }
 0xb0d   : > { %v6820_v16 = vor.u32 %v6819_v18, %v6816_v41  ;;  %v6790_v32 = vrot.slane %v14648_v14, 5  ;;  %v6823_v13 = vshrl.u32 %v6804_v52, 16  ;;  %v6826_v53 = vshll.u32 %v6804_v52, 16  ;;  %v6901_v10 = vld [vmem:[#allocation3 + $0x10] sm:$0x3f] }
 0xb0e   : > { %9890 = vmatpush3.bf16.msra.mxu1 %v15886_v8  ;;  %v14664_v15 = vsel %vm2489_vm14, %v6748_v55, %v6756_v63  ;;  %6761 = vst [vmem:[#allocation4 + $0x48] sm:$0xf] %v6756_v63  ;;  %v6782_v33 = vrot.slane %v6780_v57, 5  ;;  %v6794_v0 = vshll.u32 %v6775_v46, 16  ;;  %v6854_v23 = vshrl.u32 %v6850_v5, 16  ;;  %v15890_v36 = vld [vmem:[#allocation237_spill] sm:$0xff] }
 0xb0f   : > { %9918 = vmatpush3.bf16.msra.mxu0 %v15887_v26  ;;  %9891 = vmatprep.subr.bf16.mxu1 %v15888_v9  ;;  %v6821_v34 = vsel %vm2931_vm7, %v6812_v40, %v6820_v16  ;;  %v6791_v24 = vor.u32 %v6790_v32, %v6787_v30  ;;  %v6825_v45 = vrot.slane %v6823_v13, 6  ;;  %v6828_v7 = vrot.slane %v6826_v53, 7  ;;  %v15891_v35 = vld [vmem:[#allocation253_spill] sm:$0xff]  ;;  %v15893_v31 = vld [vmem:[#allocation262_spill] sm:$0xff]  ;;  %v15897_v5 = vld [vmem:[#allocation247_spill] sm:$0xff] }
 0xb10   : > { %9919 = vmatprep.subr.bf16.mxu0 %v15889_v19  ;;  %v6783_v29 = vor.u32 %v6782_v33, %v6779_v54  ;;  %v6796_v3 = vrot.slane %v6794_v0, 5  ;;  %v6856_v37 = vrot.slane %v6854_v23, 7  ;;  %v6860_v6 = vrot.slane %v14645_v60, 7  ;;  %v6877_v21 = vld [vmem:[#allocation3 + $0x8] sm:$0xfe]  ;;  %7038 = vmatprep.mubr.bf16.mxu0 %v6821_v34  ;;  %v15894_v51 = vld [vmem:[#allocation238_spill] sm:$0xff] }
 0xb11   : > { %v6829_v48 = vor.u32 %v6828_v7, %v6825_v45  ;;  %v6841_v25 = vrot.slane %v6835_v12, 7  ;;  %v6842_v4 = vrot.slane %v14639_v50, 7  ;;  %v6904_v49 = vrot.slane %v6900_v59, 2  ;;  %v6878_v1 = vld [vmem:[#allocation3 + $0x10] sm:$0x3f]  ;;  %v15898_v8 = vld [vmem:[#allocation263_spill] sm:$0xff] }
 0xb12   : > { %9892 = vmatpush3.bf16.msra.mxu1 %v15890_v36  ;;  %v6792_v17 = vsel %vm2593_vm15, %v6783_v29, %v6791_v24  ;;  %v6797_v20 = vsel %vm2593_vm15, %v6791_v24, %v6796_v3  ;;  %v6863_v28 = vor.u32 %v6860_v6, %v14648_v14  ;;  %v6905_v56 = vrot.slane %v6901_v10, 2  ;;  %v6852_v60 = vld [vmem:[#allocation3 + $0x10] sm:$0xf]  ;;  %v6911_v11 = vld [vmem:[#allocation3 + $0x8] sm:$0xfc]  ;;  %v15899_v33 = vld [vmem:[#allocation239_spill] sm:$0xff] }
 0xb13   : > { %9920 = vmatpush3.bf16.msra.mxu0 %v15891_v35  ;;  %9893 = vmatprep.subr.bf16.mxu1 %v15892_v27  ;;  %v6830_v39 = vsel %vm2931_vm7, %v6820_v16, %v6829_v48  ;;  %6801 = vst [vmem:[#allocation4 + $0x58] sm:$0xf] %v6797_v20  ;;  %v14678_v52 = vsel %vm2316_vm12, %v6841_v25, %v6842_v4  ;;  %v6880_v38 = vshrl.u32 %v6877_v21, 16  ;;  %v6883_v44 = vshll.u32 %v6877_v21, 16  ;;  %v6837_v50 = vld [vmem:[#allocation3 + $0x10] sm:$0x7] }
 0xb14   : > { %9921 = vmatprep.subr.bf16.mxu0 %v15893_v31  ;;  %v15895_v46 = vld [vmem:[#allocation254_spill] sm:$0xff]  ;;  %6834 = vst [vmem:[#allocation4 + $0x60] sm:$0xf] %v6830_v39  ;;  %v14683_v55 = vsel %vm15896_vm8, %v6856_v37, %v6863_v28  ;;  %v14686_v14 = vsel %vm15820_vm9, %v6904_v49, %v6905_v56  ;;  %6910 = vst [vmem:[#allocation4 + $0x80] sm:$0xf] %v6905_v56  ;;  %v6888_v41 = vshrl.u32 %v6878_v1, 16 }
 0xb15   : > { %v6891_v18 = vshll.u32 %v6878_v1, 16  ;;  %v6912_v54 = vld [vmem:[#allocation3 + $0x10] sm:$0x7f]  ;;  %v6882_v26 = vrot.slane %v6880_v38, 1  ;;  %v6885_v63 = vrot.slane %v6883_v44, 2  ;;  %v6866_v40 = vshrl.u32 %v6852_v60, 16 }
 0xb16   : > { %9894 = vmatpush3.bf16.msra.mxu1 %v15894_v51  ;;  %v6869_v57 = vshll.u32 %v6852_v60, 16  ;;  %v6890_v30 = vrot.slane %v6888_v41, 1  ;;  %v6844_v19 = vrot.slane %v6837_v50, 7  ;;  %v6914_v16 = vshrl.u32 %v6911_v11, 16  ;;  %v15900_v0 = vld [vmem:[#allocation255_spill] sm:$0xff]  ;;  %v15901_v45 = vld [vmem:[#allocation248_spill] sm:$0xff] }
 0xb17   : > { %9922 = vmatpush3.bf16.msra.mxu0 %v15895_v46  ;;  %9895 = vmatprep.subr.bf16.mxu1 %v15897_v5  ;;  %v6893_v9 = vrot.slane %v6891_v18, 2  ;;  %v6886_v32 = vor.u32 %v6885_v63, %v6882_v26  ;;  %v6868_v13 = vrot.slane %v6866_v40, 7  ;;  %v6917_v53 = vshll.u32 %v6911_v11, 16  ;;  %v15902_v7 = vld [vmem:[#allocation264_spill] sm:$0xff]  ;;  %v15905_v25 = vld [vmem:[#allocation273_spill] sm:$0xff]  ;;  %v15909_v56 = vld [vmem:[#allocation274_spill] sm:$0xff] }
 0xb18   : > { %9923 = vmatprep.subr.bf16.mxu0 %v15898_v8  ;;  %v6922_v12 = vshrl.u32 %v6912_v54, 16  ;;  %v6845_v59 = vsel %vm2316_vm12, %v6842_v4, %v6844_v19  ;;  %v6916_v34 = vrot.slane %v6914_v16, 2  ;;  %v6925_v24 = vshll.u32 %v6912_v54, 16  ;;  %v15903_v27 = vld [vmem:[#allocation240_spill] sm:$0xff]  ;;  %v15906_v4 = vld [vmem:[#allocation289_spill] sm:$0xff]  ;;  %v15910_v60 = vld [vmem:[#allocation290_spill] sm:$0xff] }
 0xb19   : > { %v6894_v23 = vor.u32 %v6893_v9, %v6890_v30  ;;  %v6871_v10 = vor.u32 %v6869_v57, %v6868_v13  ;;  %6849 = vst [vmem:[#allocation4 + $0x68] sm:$0xf] %v6845_v59  ;;  %v6919_v36 = vrot.slane %v6917_v53, 3  ;;  %v15904_v31 = vld [vmem:[#allocation256_spill] sm:$0xff]  ;;  %v15908_v28 = vld [vmem:[#allocation281_spill] sm:$0xff]  ;;  %v15911_v39 = vld [vmem:[#allocation266_spill] sm:$0xff] }
 0xb1a   : > { %9896 = vmatpush3.bf16.msra.mxu1 %v15899_v33  ;;  %v6924_v35 = vrot.slane %v6922_v12, 2  ;;  %v6927_v3 = vrot.slane %v6925_v24, 3  ;;  %v6944_v1 = vld [vmem:[#allocation4 + $0x50] sm:$0xf]  ;;  %v15912_v38 = vld [vmem:[#allocation282_spill] sm:$0xff]  ;;  %v15915_v11 = vld [vmem:[#allocation267_spill] sm:$0xff] }
 0xb1b   : > { %9924 = vmatpush3.bf16.msra.mxu0 %v15900_v0  ;;  %9897 = vmatprep.subr.bf16.mxu1 %v15901_v45  ;;  %v6895_v29 = vsel %vm15827_vm5, %v6886_v32, %v6894_v23  ;;  %6899 = vst [vmem:[#allocation4 + $0x78] sm:$0xf] %v6894_v23  ;;  %v6872_v37 = vsel %vm15828_vm6, %v6860_v6, %v6871_v10  ;;  %v6946_v20 = vld [vmem:[#allocation4 + $0x60] sm:$0xf]  ;;  %v15907_v6 = vld [vmem:[#allocation265_spill] sm:$0xff]  ;;  %v15917_v46 = vld [vmem:[#allocation276_spill] sm:$0xff] }
 0xb1c   : > { %9925 = vmatprep.subr.bf16.mxu0 %v15902_v7  ;;  %v6920_v21 = vor.u32 %v6919_v36, %v6916_v34  ;;  %6876 = vst [vmem:[#allocation4 + $0x70] sm:$0xf] %v6872_v37  ;;  %v6928_v48 = vor.u32 %v6927_v3, %v6924_v35  ;;  %v6943_v44 = vld [vmem:[#allocation4 + $0x48] sm:$0xf]  ;;  %v6945_v50 = vld [vmem:[#allocation4 + $0x58] sm:$0xf] }
 0xb1d   : > { %v15916_v51 = vld [vmem:[#allocation283_spill] sm:$0xff]  ;;  %v15918_v41 = vld [vmem:[#allocation292_spill] sm:$0xff]  ;;  %v15921_v5 = vld [vmem:[#allocation277_spill] sm:$0xff] }
 0xb1e   : > { %9898 = vmatpush3.bf16.msra.mxu1 %v15903_v27  ;;  %v6929_v49 = vsel %vm15833_vm3, %v6920_v21, %v6928_v48  ;;  %6933 = vst [vmem:[#allocation4 + $0x88] sm:$0xf] %v6928_v48  ;;  %v15919_v18 = vld [vmem:[#allocation268_spill] sm:$0xff]  ;;  %v15922_v8 = vld [vmem:[#allocation293_spill] sm:$0xff]  ;;  %v15925_v40 = vld [vmem:[#allocation278_spill] sm:$0xff] }
 0xb1f   : > { %9926 = vmatpush3.bf16.msra.mxu0 %v15904_v31  ;;  %9939 = vmatprep.subr.bf16.mxu1 %v15905_v25  ;;  %v15920_v54 = vld [vmem:[#allocation284_spill] sm:$0xff]  ;;  %v15923_v26 = vld [vmem:[#allocation269_spill] sm:$0xff]  ;;  %v15926_v57 = vld [vmem:[#allocation294_spill] sm:$0xff] }
 0xb20   : > { %9967 = vmatprep.subr.bf16.mxu0 %v15906_v4  ;;  %v15924_v63 = vld [vmem:[#allocation285_spill] sm:$0xff]  ;;  %v15927_v30 = vld [vmem:[#allocation270_spill] sm:$0xff]  ;;  %v15930_v9 = vld [vmem:[#allocation295_spill] sm:$0xff] }
 0xb21   : > { %6991 = vmatmul.mubr.bf16.vlgmr.msra.gmra.mrb[176].mxu1 %v14664_v15  ;;  %v15913_v15 = vld [vmem:[#allocation275_spill] sm:$0xff]  ;;  %v15933_v32 = vld [vmem:[#allocation280_spill] sm:$0xff]  ;;  %v15937_v33 = vld [vmem:[#allocation297_spill] sm:$0xff] }
 0xb22   : > { %7039 = vmatmul.mubr.bf16.vlgmr.msra.gmra.mrb[176].mxu0 %v6792_v17  ;;  %9940 = vmatpush3.bf16.msra.mxu1 %v15907_v6  ;;  %v15914_v17 = vld [vmem:[#allocation291_spill] sm:$0xff]  ;;  %v15934_v13 = vld [vmem:[#allocation296_spill] sm:$0xff]  ;;  %v15938_v59 = vld [vmem:[#allocation298_spill] sm:$0xff] }
 0xb23   : > { %9968 = vmatpush3.bf16.msra.mxu0 %v15908_v28  ;;  %9941 = vmatprep.subr.bf16.mxu1 %v15909_v56  ;;  %v15931_v19 = vld [vmem:[#allocation271_spill] sm:$0xff]  ;;  %v15935_v53 = vld [vmem:[#allocation272_spill] sm:$0xff]  ;;  %v6949_v24 = vld [vmem:[#allocation4 + $0x78] sm:$0xf] }
 0xb24   : > { %9969 = vmatprep.subr.bf16.mxu0 %v15910_v60  ;;  %6998 = vmatprep.mubr.bf16.mxu1 %v6944_v1  ;;  %v15932_v16 = vld [vmem:[#allocation287_spill] sm:$0xff]  ;;  %v15936_v12 = vld [vmem:[#allocation288_spill] sm:$0xff]  ;;  %v15942_v10 = vld [vmem:[#allocation302_spill] sm:$0xff] }
 0xb25   : > { %7046 = vmatprep.mubr.bf16.mxu0 %v6946_v20  ;;  %v6948_v0 = vld [vmem:[#allocation4 + $0x70] sm:$0xf]  ;;  %v6950_v23 = vld [vmem:[#allocation4 + $0x80] sm:$0xf]  ;;  %v6947_v34 = vld [vmem:[#allocation4 + $0x68] sm:$0xf] }
 0xb26   : > { %9942 = vmatpush3.bf16.msra.mxu1 %v15911_v39  ;;  %v15939_v45 = vld [vmem:[#allocation299_spill] sm:$0xff]  ;;  %v15940_v7 = vld [vmem:[#allocation300_spill] sm:$0xff] }
 0xb27   : > { %9970 = vmatpush3.bf16.msra.mxu0 %v15912_v38  ;;  %9943 = vmatprep.subr.bf16.mxu1 %v15913_v15  ;;  %v15943_v36 = vld [vmem:[#allocation303_spill] sm:$0xff]  ;;  %v15944_v35 = vld [vmem:[#allocation304_spill] sm:$0xff] }
 0xb28   : > { %9971 = vmatprep.subr.bf16.mxu0 %v15914_v17  ;;  %v9092_v21 = vld [vmem:[%s15083_s15] ss:$0 sm:$0xff] }
 0xb29   : > { %6999 = vmatmul.mubr.bf16.gmra.mrb[180].mxu1 %v6943_v44 }
 0xb2a   : > { %7047 = vmatmul.mubr.bf16.gmra.mrb[180].mxu0 %v6945_v50  ;;  %9944 = vmatpush3.bf16.msra.mxu1 %v15915_v11 }
 0xb2b   : > { %9972 = vmatpush3.bf16.msra.mxu0 %v15916_v51  ;;  %9945 = vmatprep.subr.bf16.mxu1 %v15917_v46 }
 0xb2c   : > { %9973 = vmatprep.subr.bf16.mxu0 %v15918_v41  ;;  %7086 = vmatprep.mubr.bf16.mxu1 %v14683_v55  ;;  %v15928_v55 = vld [vmem:[#allocation286_spill] sm:$0xff] }
 0xb2d   : > { %7134 = vmatprep.mubr.bf16.mxu0 %v14686_v14  ;;  %v15929_v14 = vld [vmem:[#allocation279_spill] sm:$0xff] }
 0xb2e   : > { %9946 = vmatpush3.bf16.msra.mxu1 %v15919_v18 }
 0xb2f   : > { %9974 = vmatpush3.bf16.msra.mxu0 %v15920_v54  ;;  %9947 = vmatprep.subr.bf16.mxu1 %v15921_v5 }
 0xb30   : > { %9975 = vmatprep.subr.bf16.mxu0 %v15922_v8 }
 0xb32   : > { %9948 = vmatpush3.bf16.msra.mxu1 %v15923_v26 }
 0xb33   : > { %9976 = vmatpush3.bf16.msra.mxu0 %v15924_v63  ;;  %9949 = vmatprep.subr.bf16.mxu1 %v15925_v40 }
 0xb34   : > { %9977 = vmatprep.subr.bf16.mxu0 %v15926_v57 }
 0xb36   : > { %9950 = vmatpush3.bf16.msra.mxu1 %v15927_v30 }
 0xb37   : > { %9978 = vmatpush3.bf16.msra.mxu0 %v15928_v55  ;;  %9951 = vmatprep.subr.bf16.mxu1 %v15929_v14 }
 0xb38   : > { %9979 = vmatprep.subr.bf16.mxu0 %v15930_v9 }
 0xb3a   : > { %9952 = vmatpush3.bf16.msra.mxu1 %v15931_v19 }
 0xb3b   : > { %9980 = vmatpush3.bf16.msra.mxu0 %v15932_v16  ;;  %9953 = vmatprep.subr.bf16.mxu1 %v15933_v32 }
 0xb3c   : > { %9981 = vmatprep.subr.bf16.mxu0 %v15934_v13 }
 0xb3e   : > { %9954 = vmatpush3.bf16.msra.mxu1 %v15935_v53 }
 0xb3f   : > { %9982 = vmatpush3.bf16.msra.mxu0 %v15936_v12  ;;  %10467 = vmatprep.subr.bf16.mxu1 %v15937_v33 }
 0xb41   : > { %7087 = vmatmul.mubr.bf16.vlgmr.msra.gmra.mrb[184].mxu1 %v14678_v52  ;;  %v15941_v52 = vld [vmem:[#allocation301_spill] sm:$0xff] }
 0xb42   : > { %7135 = vmatmul.mubr.bf16.vlgmr.msra.gmra.mrb[184].mxu0 %v6895_v29  ;;  %10468 = vmatpush3.bf16.msra.mxu1 %v15937_v33  ;;  %v6951_v29 = vld [vmem:[#allocation4 + $0x88] sm:$0xf] }
 0xb43   : > { %7094 = vmatprep.mubr.bf16.mxu1 %v6948_v0  ;;  %10469 = vmatprep.subr.bf16.mxu1 %v15938_v59 }
 0xb44   : > { %7142 = vmatprep.mubr.bf16.mxu0 %v6950_v23 }
 0xb46   : > { %10470 = vmatpush3.bf16.msra.mxu1 %v15938_v59 }
 0xb47   : > { %10471 = vmatprep.subr.bf16.mxu1 %v15939_v45 }
 0xb49   : > { %7095 = vmatmul.mubr.bf16.gmra.mrb[188].mxu1 %v6947_v34 }
 0xb4a   : > { %7143 = vmatmul.mubr.bf16.gmra.mrb[188].mxu0 %v6949_v24  ;;  %10472 = vmatpush3.bf16.msra.mxu1 %v15939_v45 }
 0xb4b   : > { %10483 = vmatprep.mubr.bf16.mxu1 %v6929_v49  ;;  %10473 = vmatprep.subr.bf16.mxu1 %v15940_v7 }
 0xb4e   : > { %10474 = vmatpush3.bf16.msra.mxu1 %v15940_v7 }
 0xb4f   : > { %10475 = vmatprep.subr.bf16.mxu1 %v15941_v52 }
 0xb52   : > { %10476 = vmatpush3.bf16.msra.mxu1 %v15941_v52 }
 0xb53   : > { %10477 = vmatprep.subr.bf16.mxu1 %v15942_v10 }
 0xb56   : > { %10478 = vmatpush3.bf16.msra.mxu1 %v15942_v10 }
 0xb57   : > { %10479 = vmatprep.subr.bf16.mxu1 %v15943_v36 }
 0xb5a   : > { %10480 = vmatpush3.bf16.msra.mxu1 %v15943_v36 }
 0xb5b   : > { %10481 = vmatprep.subr.bf16.mxu1 %v15944_v35 }
 0xb5e   : > { %10482 = vmatpush3.bf16.msra.mxu1 %v15944_v35 }
 0xb61   : > { %10484 = vmatmul.mubr.bf16.vlgmr.msra.gmra.mrb[192].mxu1 %v6951_v29 }
 0xbf4   : > { %v9899_v3 = vpop.f32.mrb[176].mxu1 }
 0xbf5   : > { %v9927_v37 = vpop.f32.mrb[176].mxu0  ;;  %v9900_v27 = vpop.f32.mrb[177].mxu1 }
 0xbf6   : > { %v9928_v31 = vpop.f32.mrb[177].mxu0  ;;  %v9901_v48 = vadd.f32 %v9900_v27, %v9899_v3  ;;  %v9902_v25 = vpop.f32.mrb[178].mxu1 }
 0xbf7   : > { %v9929_v4 = vadd.f32 %v9928_v31, %v9927_v37  ;;  %v9930_v49 = vpop.f32.mrb[178].mxu0  ;;  %v9903_v1 = vpop.f32.mrb[179].mxu1 }
 0xbf8   : > { %v9931_v20 = vpop.f32.mrb[179].mxu0  ;;  %v6993_v6 = vadd.f32 %v9901_v48, %v9092_v21  ;;  %v9904_v28 = vadd.f32 %v9903_v1, %v9902_v25 }
 0xbf9   : > { %v9932_v56 = vadd.f32 %v9931_v20, %v9930_v49 }
 0xbfa   : > { %v6996_v60 = vadd.f32 %v9904_v28, %v9092_v21  ;;  %v7041_v39 = vadd.f32 %v9929_v4, %v6993_v6 }
 0xbfc   : > { %v7044_v38 = vadd.f32 %v9932_v56, %v6996_v60  ;;  %v9905_v44 = vpop.f32.mrb[180].mxu1  ;;  %v7226_v56 = vld [vmem:[#allocation3 + $0x10] sm:$0x7] }
 0xbfd   : > { %v9933_v50 = vpop.f32.mrb[180].mxu0  ;;  %v9906_v15 = vpop.f32.mrb[181].mxu1 }
 0xbfe   : > { %v9934_v17 = vpop.f32.mrb[181].mxu0  ;;  %v9907_v11 = vadd.f32 %v9906_v15, %v9905_v44  ;;  %v9908_v51 = vpop.f32.mrb[182].mxu1  ;;  %v7215_v15 = vld [vmem:[#allocation3 + $0x8] sm:$0x1c] }
 0xbff   : > { %v9935_v46 = vadd.f32 %v9934_v17, %v9933_v50  ;;  %v9936_v41 = vpop.f32.mrb[182].mxu0  ;;  %v9909_v18 = vpop.f32.mrb[183].mxu1  ;;  %v7209_v50 = vld [vmem:[#allocation3] sm:$0x80] }
 0xc00   : > { %v9937_v54 = vpop.f32.mrb[183].mxu0  ;;  %v7001_v5 = vadd.f32 %v9907_v11, %v9092_v21  ;;  %v7222_v11 = vld [vmem:[#allocation3 + $0x8] sm:$0xe0] }
 0xc01   : > { %v15945_v54 = vld [vmem:[#allocation313_spill] sm:$0xff] }
 0xc02   : > { %v7049_v8 = vadd.f32 %v9935_v46, %v7001_v5  ;;  %10005 = vmatprep.subr.bf16.mxu0 %v15945_v54  ;;  %v15946_v5 = vld [vmem:[#allocation329_spill] sm:$0xff] }
 0xc03   : > { %10033 = vmatprep.subr.bf16.mxu1 %v15946_v5 }
 0xc14   : > { %v9955_v26 = vpop.f32.mrb[184].mxu1 }
 0xc15   : > { %v9983_v63 = vpop.f32.mrb[184].mxu0  ;;  %v9956_v40 = vpop.f32.mrb[185].mxu1 }
 0xc16   : > { %v9984_v57 = vpop.f32.mrb[185].mxu0  ;;  %v9957_v30 = vadd.f32 %v9956_v40, %v9955_v26  ;;  %v9958_v55 = vpop.f32.mrb[186].mxu1 }
 0xc17   : > { %v9985_v14 = vadd.f32 %v9984_v57, %v9983_v63  ;;  %v9986_v9 = vpop.f32.mrb[186].mxu0  ;;  %v9959_v19 = vpop.f32.mrb[187].mxu1 }
 0xc18   : > { %v9987_v16 = vpop.f32.mrb[187].mxu0  ;;  %v7089_v32 = vadd.f32 %v9957_v30, %v7041_v39  ;;  %v9960_v13 = vadd.f32 %v9959_v19, %v9958_v55 }
 0xc19   : > { %v9988_v53 = vadd.f32 %v9987_v16, %v9986_v9 }
 0xc1a   : > { %v7092_v12 = vadd.f32 %v9960_v13, %v7044_v38  ;;  %v7137_v33 = vadd.f32 %v9985_v14, %v7089_v32 }
 0xc1c   : > { %v9961_v0 = vpop.f32.mrb[188].mxu1  ;;  %v7140_v59 = vadd.f32 %v9988_v53, %v7092_v12 }
 0xc1d   : > { %v9989_v23 = vpop.f32.mrb[188].mxu0  ;;  %v9962_v34 = vpop.f32.mrb[189].mxu1 }
 0xc1e   : > { %v9990_v24 = vpop.f32.mrb[189].mxu0  ;;  %v9963_v45 = vadd.f32 %v9962_v34, %v9961_v0  ;;  %v9964_v52 = vpop.f32.mrb[190].mxu1 }
 0xc1f   : > { %v9991_v7 = vadd.f32 %v9990_v24, %v9989_v23  ;;  %v9992_v10 = vpop.f32.mrb[190].mxu0  ;;  %v9965_v36 = vpop.f32.mrb[191].mxu1 }
 0xc20   : > { %v9993_v35 = vpop.f32.mrb[191].mxu0  ;;  %v7097_v29 = vadd.f32 %v9963_v45, %v7049_v8 }
 0xc22   : > { %v7145_v3 = vadd.f32 %v9991_v7, %v7097_v29 }
 0xc34   : > { %v10485_v37 = vpop.f32.mrb[192].mxu1 }
 0xc35   : > { %v7193_v21 = vadd.f32 %v10485_v37, %v7145_v3  ;;  %v7184_v27 = vpop.f32.mrb[193].mxu1 }
 0xc36   : > { %v7185_v31 = vadd.f32 %v7184_v27, %v7137_v33  ;;  %v10486_v48 = vpop.f32.mrb[194].mxu1 }
 0xc37   : > { %v14756_v25 = vadd.f32 %v14458_v61, %v7193_v21  ;;  %v7187_v4 = vpop.f32.mrb[195].mxu1 }
 0xc38   : > { %v14759_v49 = vadd.f32 %v14460_v42, %v7185_v31  ;;  %v7188_v1 = vadd.f32 %v7187_v4, %v7140_v59  ;;  %v7212_v42 = vld [vmem:[#allocation3 + $0x8] sm:$0x3] }
 0xc39   : > { %v7203_v20 = vmax.f32 %v14756_v25, 0.0 }
 0xc3a   : > { %v14763_v6 = vadd.f32 %v14462_v47, %v7188_v1  ;;  %v7201_v60 = vmax.f32 %v14759_v49, 0.0 }
 0xc3b   : > { %v7205_v28 = vpack.c.bf16 %v7203_v20, %v7203_v20 }
 0xc3c   : > { %v7202_v39 = vmax.f32 %v14763_v6, 0.0 }
 0xc3d   : > { %v7219_v38 = vrot.slane %v7205_v28, 1 }
 0xc3e   : > { %v7204_v44 = vpack.c.bf16 %v7202_v39, %v7201_v60 }
 0xc3f   : > { %v7227_v61 = vsel %vm14468_vm10, %v7219_v38, %v7226_v56 }
 0xc40   : > { %7228 = vst [vmem:[#allocation3 + $0x10] sm:$0x7] %v7227_v61  ;;  %v7207_v17 = vrot.slane %v7204_v44, 1 }
 0xc42   : > { %v7210_v47 = vsel %vm13856_vm1, %v7207_v17, %v7209_v50  ;;  %v7213_v51 = vsel %vm13862_vm11, %v7207_v17, %v7212_v42  ;;  %v7216_v46 = vsel %vm14472_vm2, %v7207_v17, %v7215_v15  ;;  %v7220_v41 = vsel %vm15794_vm0, %v7207_v17, %v7219_v38 }
 0xc43   : > { %7211 = vst [vmem:[#allocation3] sm:$0x80] %v7210_v47  ;;  %7214 = vst [vmem:[#allocation3 + $0x8] sm:$0x3] %v7213_v51  ;;  %v7223_v18 = vsel %vm14477_vm4, %v7220_v41, %v7222_v11 }
 0xc44   : > { %7217 = vst [vmem:[#allocation3 + $0x8] sm:$0x1c] %v7216_v46  ;;  %7224 = vst [vmem:[#allocation3 + $0x8] sm:$0xe0] %v7223_v18 }
 0xc45   : > { %10768 = dma.done.wait [#allocation6 + $0x4], 9216 }
 0xc46   : > { %10769 = vsyncadd [#allocation6 + $0x4], 4294958080  ;;  %v15947_v8 = vld [vmem:[#allocation305_spill] sm:$0xff]  ;;  %v15949_v63 = vld [vmem:[#allocation314_spill] sm:$0xff] }
 0xc47   : > { %10006 = vmatpush3.bf16.msra.mxu0 %v15947_v8  ;;  %v15948_v26 = vld [vmem:[#allocation321_spill] sm:$0xff]  ;;  %v15950_v40 = vld [vmem:[#allocation330_spill] sm:$0xff]  ;;  %v15953_v55 = vld [vmem:[#allocation315_spill] sm:$0xff] }
 0xc48   : > { %10034 = vmatpush3.bf16.msra.mxu1 %v15948_v26  ;;  %10007 = vmatprep.subr.bf16.mxu0 %v15949_v63  ;;  %v15951_v57 = vld [vmem:[#allocation306_spill] sm:$0xff]  ;;  %v15954_v14 = vld [vmem:[#allocation331_spill] sm:$0xff]  ;;  %v15957_v52 = vld [vmem:[#allocation316_spill] sm:$0xff] }
 0xc49   : > { %10035 = vmatprep.subr.bf16.mxu1 %v15950_v40  ;;  %v15952_v30 = vld [vmem:[#allocation322_spill] sm:$0xff]  ;;  %v15955_v0 = vld [vmem:[#allocation307_spill] sm:$0xff]  ;;  %v15958_v10 = vld [vmem:[#allocation332_spill] sm:$0xff] }
 0xc4a   : > { %v7327_v9 = vld [vmem:[#allocation3] sm:$0xf0]  ;;  %v15956_v23 = vld [vmem:[#allocation323_spill] sm:$0xff]  ;;  %v7369_v37 = vld [vmem:[#allocation3 + $0x10] sm:$0x7] }
 0xc4b   : > { %10008 = vmatpush3.bf16.msra.mxu0 %v15951_v57  ;;  %v14788_v19 = vld [vmem:[#allocation3 + $0x8] sm:$0xff]  ;;  %v7304_v16 = vld [vmem:[#allocation3] sm:$0xf8]  ;;  %v7331_v32 = vrot.slane %v7327_v9, 4  ;;  %v7340_v4 = vld [vmem:[#allocation3 + $0x10] sm:$0x1] }
 0xc4c   : > { %10036 = vmatpush3.bf16.msra.mxu1 %v15952_v30  ;;  %10009 = vmatprep.subr.bf16.mxu0 %v15953_v55  ;;  %v7332_v13 = vrot.slane %v14788_v19, 4  ;;  %v7307_v53 = vshrl.u32 %v7304_v16, 16  ;;  %v7310_v12 = vshll.u32 %v7304_v16, 16  ;;  %v7367_v33 = vld [vmem:[#allocation3] sm:$0xc0]  ;;  %v14794_v59 = vshrl.u32 %v14788_v19, 16  ;;  %vm15969_vm8 = vmmov %vm15828_vm6 }
 0xc4d   : > { %10037 = vmatprep.subr.bf16.mxu1 %v15954_v14  ;;  %v14797_v34 = vshll.u32 %v14788_v19, 16  ;;  %v7371_v24 = vshrl.u32 %v7367_v33, 16  ;;  %v7374_v45 = vshll.u32 %v7367_v33, 16  ;;  %v7338_v7 = vld [vmem:[#allocation3] sm:$0xf0]  ;;  %v15961_v15 = vld [vmem:[#allocation317_spill] sm:$0xff] }
 0xc4e   : > { %v7333_v36 = vsel %vm2565_vm13, %v7331_v32, %v7332_v13  ;;  %7337 = vst [vmem:[#allocation4 + $0x50] sm:$0xf] %v7332_v13  ;;  %v7309_v35 = vrot.slane %v7307_v53, 3  ;;  %v7312_v29 = vrot.slane %v7310_v12, 4  ;;  %v7342_v3 = vshrl.u32 %v7338_v7, 16  ;;  %v15959_v39 = vld [vmem:[#allocation308_spill] sm:$0xff] }
 0xc4f   : > { %10010 = vmatpush3.bf16.msra.mxu0 %v15955_v0  ;;  %7555 = vmatprep.mubr.bf16.mxu0 %v7333_v36  ;;  %v7317_v21 = vrot.slane %v14794_v59, 3  ;;  %v7320_v27 = vrot.slane %v14797_v34, 4  ;;  %v7373_v31 = vrot.slane %v7371_v24, 6  ;;  %v7376_v48 = vrot.slane %v7374_v45, 7  ;;  %v7415_v60 = vld [vmem:[#allocation3] sm:$0x80] }
 0xc50   : > { %10038 = vmatpush3.bf16.msra.mxu1 %v15956_v23  ;;  %10011 = vmatprep.subr.bf16.mxu0 %v15957_v52  ;;  %v7313_v1 = vor.u32 %v7312_v29, %v7309_v35  ;;  %v7381_v20 = vrot.slane %v14794_v59, 6  ;;  %v7384_v28 = vrot.slane %v14797_v34, 7  ;;  %v7344_v56 = vrot.slane %v7342_v3, 4  ;;  %v15960_v38 = vld [vmem:[#allocation324_spill] sm:$0xff]  ;;  %v15962_v17 = vld [vmem:[#allocation333_spill] sm:$0xff]  ;;  %v15965_v33 = vld [vmem:[#allocation318_spill] sm:$0xff] }
 0xc51   : > { %10039 = vmatprep.subr.bf16.mxu1 %v15958_v10  ;;  %v7321_v44 = vor.u32 %v7320_v27, %v7317_v21  ;;  %v7377_v61 = vor.u32 %v7376_v48, %v7373_v31  ;;  %v7345_v50 = vshll.u32 %v7338_v7, 16  ;;  %v7352_v42 = vrot.slane %v14794_v59, 4  ;;  %v7400_v41 = vld [vmem:[#allocation3] sm:$0x80]  ;;  %v7465_v26 = vld [vmem:[#allocation3 + $0x8] sm:$0xfc] }
 0xc52   : > { %v7385_v11 = vor.u32 %v7384_v28, %v7381_v20  ;;  %v7355_v47 = vrot.slane %v14797_v34, 5  ;;  %v7388_v51 = vshrl.u32 %v7369_v37, 16  ;;  %v7391_v46 = vshll.u32 %v7369_v37, 16  ;;  %v7466_v55 = vld [vmem:[#allocation3 + $0x10] sm:$0x3f] }
 0xc53   : > { %10012 = vmatpush3.bf16.msra.mxu0 %v15959_v39  ;;  %v14813_v18 = vsel %vm2489_vm14, %v7313_v1, %v7321_v44  ;;  %7326 = vst [vmem:[#allocation4 + $0x48] sm:$0xf] %v7321_v44  ;;  %v7347_v54 = vrot.slane %v7345_v50, 5  ;;  %v7359_v5 = vshll.u32 %v7340_v4, 16  ;;  %v7419_v8 = vshrl.u32 %v7415_v60, 16  ;;  %v15963_v14 = vld [vmem:[#allocation309_spill] sm:$0xff] }
 0xc54   : > { %10040 = vmatpush3.bf16.msra.mxu1 %v15960_v38  ;;  %10013 = vmatprep.subr.bf16.mxu0 %v15961_v15  ;;  %v7386_v63 = vsel %vm2931_vm7, %v7377_v61, %v7385_v11  ;;  %v7356_v40 = vor.u32 %v7355_v47, %v7352_v42  ;;  %v7390_v57 = vrot.slane %v7388_v51, 6  ;;  %v7393_v30 = vrot.slane %v7391_v46, 7  ;;  %v15964_v9 = vld [vmem:[#allocation325_spill] sm:$0xff]  ;;  %v15966_v0 = vld [vmem:[#allocation334_spill] sm:$0xff]  ;;  %v15970_v60 = vld [vmem:[#allocation319_spill] sm:$0xff] }
 0xc55   : > { %10041 = vmatprep.subr.bf16.mxu1 %v15962_v17  ;;  %v7348_v16 = vor.u32 %v7347_v54, %v7344_v56  ;;  %v7361_v32 = vrot.slane %v7359_v5, 5  ;;  %v7421_v13 = vrot.slane %v7419_v8, 7  ;;  %v7425_v53 = vrot.slane %v14794_v59, 7  ;;  %v7442_v12 = vld [vmem:[#allocation3 + $0x8] sm:$0xfe]  ;;  %7603 = vmatprep.mubr.bf16.mxu1 %v7386_v63  ;;  %v15967_v48 = vld [vmem:[#allocation310_spill] sm:$0xff] }
 0xc56   : > { %v7394_v23 = vor.u32 %v7393_v30, %v7390_v57  ;;  %v7406_v24 = vrot.slane %v7400_v41, 7  ;;  %v7407_v45 = vrot.slane %v14788_v19, 7  ;;  %v7469_v7 = vrot.slane %v7465_v26, 2  ;;  %v7443_v52 = vld [vmem:[#allocation3 + $0x10] sm:$0x3f]  ;;  %v15971_v39 = vld [vmem:[#allocation335_spill] sm:$0xff] }
 0xc57   : > { %10014 = vmatpush3.bf16.msra.mxu0 %v15963_v14  ;;  %v7357_v10 = vsel %vm2593_vm15, %v7348_v16, %v7356_v40  ;;  %v7362_v36 = vsel %vm2593_vm15, %v7356_v40, %v7361_v32  ;;  %v7428_v35 = vor.u32 %v7425_v53, %v14797_v34  ;;  %v7470_v29 = vrot.slane %v7466_v55, 2  ;;  %v7417_v59 = vld [vmem:[#allocation3 + $0x10] sm:$0xf]  ;;  %v7476_v31 = vld [vmem:[#allocation3 + $0x8] sm:$0xfc]  ;;  %v15972_v54 = vld [vmem:[#allocation311_spill] sm:$0xff] }
 0xc58   : > { %10042 = vmatpush3.bf16.msra.mxu1 %v15964_v9  ;;  %10015 = vmatprep.subr.bf16.mxu0 %v15965_v33  ;;  %v7395_v3 = vsel %vm2931_vm7, %v7385_v11, %v7394_v23  ;;  %7366 = vst [vmem:[#allocation4 + $0x58] sm:$0xf] %v7362_v36  ;;  %v14827_v37 = vsel %vm2316_vm12, %v7406_v24, %v7407_v45  ;;  %v7445_v21 = vshrl.u32 %v7442_v12, 16  ;;  %v7448_v27 = vshll.u32 %v7442_v12, 16  ;;  %v7402_v19 = vld [vmem:[#allocation3 + $0x10] sm:$0x7] }
 0xc59   : > { %10043 = vmatprep.subr.bf16.mxu1 %v15966_v0  ;;  %v15968_v4 = vld [vmem:[#allocation326_spill] sm:$0xff]  ;;  %7399 = vst [vmem:[#allocation4 + $0x60] sm:$0xf] %v7395_v3  ;;  %v14832_v1 = vsel %vm15969_vm8, %v7421_v13, %v7428_v35  ;;  %v14835_v34 = vsel %vm15820_vm9, %v7469_v7, %v7470_v29  ;;  %7475 = vst [vmem:[#allocation4 + $0x80] sm:$0xf] %v7470_v29  ;;  %v7453_v20 = vshrl.u32 %v7443_v52, 16 }
 0xc5a   : > { %v7456_v28 = vshll.u32 %v7443_v52, 16  ;;  %v7477_v56 = vld [vmem:[#allocation3 + $0x10] sm:$0x7f]  ;;  %v7447_v38 = vrot.slane %v7445_v21, 1  ;;  %v7450_v44 = vrot.slane %v7448_v27, 2  ;;  %v7431_v61 = vshrl.u32 %v7417_v59, 16 }
 0xc5b   : > { %10016 = vmatpush3.bf16.msra.mxu0 %v15967_v48  ;;  %v7434_v50 = vshll.u32 %v7417_v59, 16  ;;  %v7455_v42 = vrot.slane %v7453_v20, 1  ;;  %v7409_v17 = vrot.slane %v7402_v19, 7  ;;  %v7479_v11 = vshrl.u32 %v7476_v31, 16  ;;  %v15973_v5 = vld [vmem:[#allocation327_spill] sm:$0xff]  ;;  %v15974_v57 = vld [vmem:[#allocation320_spill] sm:$0xff] }
 0xc5c   : > { %10044 = vmatpush3.bf16.msra.mxu1 %v15968_v4  ;;  %10017 = vmatprep.subr.bf16.mxu0 %v15970_v60  ;;  %v7458_v15 = vrot.slane %v7456_v28, 2  ;;  %v7451_v47 = vor.u32 %v7450_v44, %v7447_v38  ;;  %v7433_v51 = vrot.slane %v7431_v61, 7  ;;  %v7482_v46 = vshll.u32 %v7476_v31, 16  ;;  %v15975_v30 = vld [vmem:[#allocation336_spill] sm:$0xff]  ;;  %v15978_v24 = vld [vmem:[#allocation345_spill] sm:$0xff]  ;;  %v15982_v29 = vld [vmem:[#allocation346_spill] sm:$0xff] }
 0xc5d   : > { %10045 = vmatprep.subr.bf16.mxu1 %v15971_v39  ;;  %v7487_v41 = vshrl.u32 %v7477_v56, 16  ;;  %v7410_v26 = vsel %vm2316_vm12, %v7407_v45, %v7409_v17  ;;  %v7481_v63 = vrot.slane %v7479_v11, 2  ;;  %v7490_v40 = vshll.u32 %v7477_v56, 16  ;;  %v15976_v33 = vld [vmem:[#allocation312_spill] sm:$0xff]  ;;  %v15979_v45 = vld [vmem:[#allocation361_spill] sm:$0xff]  ;;  %v15983_v59 = vld [vmem:[#allocation362_spill] sm:$0xff] }
 0xc5e   : > { %v7459_v8 = vor.u32 %v7458_v15, %v7455_v42  ;;  %v7436_v55 = vor.u32 %v7434_v50, %v7433_v51  ;;  %7414 = vst [vmem:[#allocation4 + $0x68] sm:$0xf] %v7410_v26  ;;  %v7484_v14 = vrot.slane %v7482_v46, 3  ;;  %v15977_v0 = vld [vmem:[#allocation328_spill] sm:$0xff]  ;;  %v15981_v35 = vld [vmem:[#allocation353_spill] sm:$0xff]  ;;  %v15984_v3 = vld [vmem:[#allocation338_spill] sm:$0xff] }
 0xc5f   : > { %10018 = vmatpush3.bf16.msra.mxu0 %v15972_v54  ;;  %v7489_v9 = vrot.slane %v7487_v41, 2  ;;  %v7492_v32 = vrot.slane %v7490_v40, 3  ;;  %v7509_v52 = vld [vmem:[#allocation4 + $0x50] sm:$0xf]  ;;  %v15985_v21 = vld [vmem:[#allocation354_spill] sm:$0xff]  ;;  %v15988_v31 = vld [vmem:[#allocation339_spill] sm:$0xff] }
 0xc60   : > { %10046 = vmatpush3.bf16.msra.mxu1 %v15973_v5  ;;  %10019 = vmatprep.subr.bf16.mxu0 %v15974_v57  ;;  %v7460_v16 = vsel %vm15827_vm5, %v7451_v47, %v7459_v8  ;;  %7464 = vst [vmem:[#allocation4 + $0x78] sm:$0xf] %v7459_v8  ;;  %v7437_v13 = vsel %vm15828_vm6, %v7425_v53, %v7436_v55  ;;  %v7511_v36 = vld [vmem:[#allocation4 + $0x60] sm:$0xf]  ;;  %v15980_v53 = vld [vmem:[#allocation337_spill] sm:$0xff]  ;;  %v15990_v4 = vld [vmem:[#allocation348_spill] sm:$0xff] }
 0xc61   : > { %10047 = vmatprep.subr.bf16.mxu1 %v15975_v30  ;;  %v7485_v12 = vor.u32 %v7484_v14, %v7481_v63  ;;  %7441 = vst [vmem:[#allocation4 + $0x70] sm:$0xf] %v7437_v13  ;;  %v7493_v23 = vor.u32 %v7492_v32, %v7489_v9  ;;  %v7508_v27 = vld [vmem:[#allocation4 + $0x48] sm:$0xf]  ;;  %v7510_v19 = vld [vmem:[#allocation4 + $0x58] sm:$0xf] }
 0xc62   : > { %v15989_v48 = vld [vmem:[#allocation355_spill] sm:$0xff]  ;;  %v15991_v20 = vld [vmem:[#allocation364_spill] sm:$0xff]  ;;  %v15994_v60 = vld [vmem:[#allocation349_spill] sm:$0xff] }
 0xc63   : > { %10020 = vmatpush3.bf16.msra.mxu0 %v15976_v33  ;;  %v7494_v7 = vsel %vm15833_vm3, %v7485_v12, %v7493_v23  ;;  %7498 = vst [vmem:[#allocation4 + $0x88] sm:$0xf] %v7493_v23  ;;  %v15992_v28 = vld [vmem:[#allocation340_spill] sm:$0xff]  ;;  %v15995_v39 = vld [vmem:[#allocation365_spill] sm:$0xff]  ;;  %v15998_v61 = vld [vmem:[#allocation350_spill] sm:$0xff] }
 0xc64   : > { %10048 = vmatpush3.bf16.msra.mxu1 %v15977_v0  ;;  %10061 = vmatprep.subr.bf16.mxu0 %v15978_v24  ;;  %v15993_v56 = vld [vmem:[#allocation356_spill] sm:$0xff]  ;;  %v15996_v38 = vld [vmem:[#allocation341_spill] sm:$0xff]  ;;  %v15999_v50 = vld [vmem:[#allocation366_spill] sm:$0xff] }
 0xc65   : > { %10089 = vmatprep.subr.bf16.mxu1 %v15979_v45  ;;  %v15997_v44 = vld [vmem:[#allocation357_spill] sm:$0xff]  ;;  %v16000_v42 = vld [vmem:[#allocation342_spill] sm:$0xff]  ;;  %v16003_v15 = vld [vmem:[#allocation367_spill] sm:$0xff] }
 0xc66   : > { %7556 = vmatmul.mubr.bf16.vlgmr.msra.gmra.mrb[192].mxu0 %v14813_v18  ;;  %v15986_v18 = vld [vmem:[#allocation347_spill] sm:$0xff]  ;;  %v16006_v47 = vld [vmem:[#allocation352_spill] sm:$0xff]  ;;  %v16010_v54 = vld [vmem:[#allocation369_spill] sm:$0xff] }
 0xc67   : > { %7604 = vmatmul.mubr.bf16.vlgmr.msra.gmra.mrb[196].mxu1 %v7357_v10  ;;  %10062 = vmatpush3.bf16.msra.mxu0 %v15980_v53  ;;  %v15987_v10 = vld [vmem:[#allocation363_spill] sm:$0xff]  ;;  %v16007_v51 = vld [vmem:[#allocation368_spill] sm:$0xff]  ;;  %v16011_v26 = vld [vmem:[#allocation370_spill] sm:$0xff] }
 0xc68   : > { %10090 = vmatpush3.bf16.msra.mxu1 %v15981_v35  ;;  %10063 = vmatprep.subr.bf16.mxu0 %v15982_v29  ;;  %v16004_v17 = vld [vmem:[#allocation343_spill] sm:$0xff]  ;;  %v16008_v46 = vld [vmem:[#allocation344_spill] sm:$0xff]  ;;  %v7514_v40 = vld [vmem:[#allocation4 + $0x78] sm:$0xf] }
 0xc69   : > { %10091 = vmatprep.subr.bf16.mxu1 %v15983_v59  ;;  %7563 = vmatprep.mubr.bf16.mxu0 %v7509_v52  ;;  %v16005_v11 = vld [vmem:[#allocation359_spill] sm:$0xff]  ;;  %v16009_v41 = vld [vmem:[#allocation360_spill] sm:$0xff]  ;;  %v16015_v55 = vld [vmem:[#allocation374_spill] sm:$0xff] }
 0xc6a   : > { %7611 = vmatprep.mubr.bf16.mxu1 %v7511_v36  ;;  %v7513_v5 = vld [vmem:[#allocation4 + $0x70] sm:$0xf]  ;;  %v7515_v8 = vld [vmem:[#allocation4 + $0x80] sm:$0xf]  ;;  %v7512_v63 = vld [vmem:[#allocation4 + $0x68] sm:$0xf] }
 0xc6b   : > { %10064 = vmatpush3.bf16.msra.mxu0 %v15984_v3  ;;  %v16012_v57 = vld [vmem:[#allocation371_spill] sm:$0xff]  ;;  %v16013_v30 = vld [vmem:[#allocation372_spill] sm:$0xff] }
 0xc6c   : > { %10092 = vmatpush3.bf16.msra.mxu1 %v15985_v21  ;;  %10065 = vmatprep.subr.bf16.mxu0 %v15986_v18  ;;  %v16016_v14 = vld [vmem:[#allocation375_spill] sm:$0xff]  ;;  %v16017_v9 = vld [vmem:[#allocation376_spill] sm:$0xff] }
 0xc6d   : > { %10093 = vmatprep.subr.bf16.mxu1 %v15987_v10  ;;  %v9093_v12 = vld [vmem:[%s15084_s16] ss:$0 sm:$0xff] }
 0xc6e   : > { %7564 = vmatmul.mubr.bf16.gmra.mrb[196].mxu0 %v7508_v27 }
 0xc6f   : > { %7612 = vmatmul.mubr.bf16.gmra.mrb[200].mxu1 %v7510_v19  ;;  %10066 = vmatpush3.bf16.msra.mxu0 %v15988_v31 }
 0xc70   : > { %10094 = vmatpush3.bf16.msra.mxu1 %v15989_v48  ;;  %10067 = vmatprep.subr.bf16.mxu0 %v15990_v4 }
 0xc71   : > { %10095 = vmatprep.subr.bf16.mxu1 %v15991_v20  ;;  %7651 = vmatprep.mubr.bf16.mxu0 %v14832_v1  ;;  %v16001_v1 = vld [vmem:[#allocation358_spill] sm:$0xff] }
 0xc72   : > { %7699 = vmatprep.mubr.bf16.mxu1 %v14835_v34  ;;  %v16002_v34 = vld [vmem:[#allocation351_spill] sm:$0xff] }
 0xc73   : > { %10068 = vmatpush3.bf16.msra.mxu0 %v15992_v28 }
 0xc74   : > { %10096 = vmatpush3.bf16.msra.mxu1 %v15993_v56  ;;  %10069 = vmatprep.subr.bf16.mxu0 %v15994_v60 }
 0xc75   : > { %10097 = vmatprep.subr.bf16.mxu1 %v15995_v39 }
 0xc77   : > { %10070 = vmatpush3.bf16.msra.mxu0 %v15996_v38 }
 0xc78   : > { %10098 = vmatpush3.bf16.msra.mxu1 %v15997_v44  ;;  %10071 = vmatprep.subr.bf16.mxu0 %v15998_v61 }
 0xc79   : > { %10099 = vmatprep.subr.bf16.mxu1 %v15999_v50 }
 0xc7b   : > { %10072 = vmatpush3.bf16.msra.mxu0 %v16000_v42 }
 0xc7c   : > { %10100 = vmatpush3.bf16.msra.mxu1 %v16001_v1  ;;  %10073 = vmatprep.subr.bf16.mxu0 %v16002_v34 }
 0xc7d   : > { %10101 = vmatprep.subr.bf16.mxu1 %v16003_v15 }
 0xc7f   : > { %10074 = vmatpush3.bf16.msra.mxu0 %v16004_v17 }
 0xc80   : > { %10102 = vmatpush3.bf16.msra.mxu1 %v16005_v11  ;;  %10075 = vmatprep.subr.bf16.mxu0 %v16006_v47 }
 0xc81   : > { %10103 = vmatprep.subr.bf16.mxu1 %v16007_v51 }
 0xc83   : > { %10076 = vmatpush3.bf16.msra.mxu0 %v16008_v46 }
 0xc84   : > { %10104 = vmatpush3.bf16.msra.mxu1 %v16009_v41  ;;  %10487 = vmatprep.subr.bf16.mxu0 %v16010_v54 }
 0xc86   : > { %7652 = vmatmul.mubr.bf16.vlgmr.msra.gmra.mrb[200].mxu0 %v14827_v37  ;;  %v16014_v37 = vld [vmem:[#allocation373_spill] sm:$0xff] }
 0xc87   : > { %7700 = vmatmul.mubr.bf16.vlgmr.msra.gmra.mrb[204].mxu1 %v7460_v16  ;;  %10488 = vmatpush3.bf16.msra.mxu0 %v16010_v54  ;;  %v7516_v16 = vld [vmem:[#allocation4 + $0x88] sm:$0xf] }
 0xc88   : > { %7659 = vmatprep.mubr.bf16.mxu0 %v7513_v5  ;;  %10489 = vmatprep.subr.bf16.mxu0 %v16011_v26 }
 0xc89   : > { %7707 = vmatprep.mubr.bf16.mxu1 %v7515_v8 }
 0xc8b   : > { %10490 = vmatpush3.bf16.msra.mxu0 %v16011_v26 }
 0xc8c   : > { %10491 = vmatprep.subr.bf16.mxu0 %v16012_v57 }
 0xc8e   : > { %7660 = vmatmul.mubr.bf16.gmra.mrb[204].mxu0 %v7512_v63 }
 0xc8f   : > { %7708 = vmatmul.mubr.bf16.gmra.mrb[208].mxu1 %v7514_v40  ;;  %10492 = vmatpush3.bf16.msra.mxu0 %v16012_v57 }
 0xc90   : > { %10503 = vmatprep.mubr.bf16.mxu0 %v7494_v7  ;;  %10493 = vmatprep.subr.bf16.mxu0 %v16013_v30 }
 0xc93   : > { %10494 = vmatpush3.bf16.msra.mxu0 %v16013_v30 }
 0xc94   : > { %10495 = vmatprep.subr.bf16.mxu0 %v16014_v37 }
 0xc97   : > { %10496 = vmatpush3.bf16.msra.mxu0 %v16014_v37 }
 0xc98   : > { %10497 = vmatprep.subr.bf16.mxu0 %v16015_v55 }
 0xc9b   : > { %10498 = vmatpush3.bf16.msra.mxu0 %v16015_v55 }
 0xc9c   : > { %10499 = vmatprep.subr.bf16.mxu0 %v16016_v14 }
 0xc9f   : > { %10500 = vmatpush3.bf16.msra.mxu0 %v16016_v14 }
 0xca0   : > { %10501 = vmatprep.subr.bf16.mxu0 %v16017_v9 }
 0xca3   : > { %10502 = vmatpush3.bf16.msra.mxu0 %v16017_v9 }
 0xca6   : > { %10504 = vmatmul.mubr.bf16.vlgmr.msra.gmra.mrb[208].mxu0 %v7516_v16 }
 0xd39   : > { %v10021_v32 = vpop.f32.mrb[192].mxu0 }
 0xd3a   : > { %v10049_v13 = vpop.f32.mrb[196].mxu1  ;;  %v10022_v33 = vpop.f32.mrb[193].mxu0 }
 0xd3b   : > { %v10050_v0 = vpop.f32.mrb[197].mxu1  ;;  %v10023_v23 = vadd.f32 %v10022_v33, %v10021_v32  ;;  %v10024_v24 = vpop.f32.mrb[194].mxu0 }
 0xd3c   : > { %v10051_v45 = vadd.f32 %v10050_v0, %v10049_v13  ;;  %v10052_v7 = vpop.f32.mrb[198].mxu1  ;;  %v10025_v52 = vpop.f32.mrb[195].mxu0 }
 0xd3d   : > { %v10053_v36 = vpop.f32.mrb[199].mxu1  ;;  %v7558_v53 = vadd.f32 %v10023_v23, %v9093_v12  ;;  %v10026_v35 = vadd.f32 %v10025_v52, %v10024_v24 }
 0xd3e   : > { %v10054_v29 = vadd.f32 %v10053_v36, %v10052_v7  ;;  %v7788_v36 = vld [vmem:[#allocation3 + $0x10] sm:$0x7] }
 0xd3f   : > { %v7561_v59 = vadd.f32 %v10026_v35, %v9093_v12  ;;  %v7606_v3 = vadd.f32 %v10051_v45, %v7558_v53 }
 0xd41   : > { %v7609_v21 = vadd.f32 %v10054_v29, %v7561_v59  ;;  %v10027_v27 = vpop.f32.mrb[196].mxu0 }
 0xd42   : > { %v10055_v19 = vpop.f32.mrb[200].mxu1  ;;  %v10028_v18 = vpop.f32.mrb[197].mxu0 }
 0xd43   : > { %v10056_v10 = vpop.f32.mrb[201].mxu1  ;;  %v10029_v31 = vadd.f32 %v10028_v18, %v10027_v27  ;;  %v10030_v48 = vpop.f32.mrb[198].mxu0  ;;  %v7774_v27 = vld [vmem:[#allocation3 + $0x8] sm:$0x3] }
 0xd44   : > { %v10057_v4 = vadd.f32 %v10056_v10, %v10055_v19  ;;  %v10058_v20 = vpop.f32.mrb[202].mxu1  ;;  %v10031_v28 = vpop.f32.mrb[199].mxu0  ;;  %v7777_v19 = vld [vmem:[#allocation3 + $0x8] sm:$0x1c]  ;;  %v7784_v10 = vld [vmem:[#allocation3 + $0x8] sm:$0xe0] }
 0xd45   : > { %v10059_v56 = vpop.f32.mrb[203].mxu1  ;;  %v7566_v60 = vadd.f32 %v10029_v31, %v9093_v12  ;;  %v16018_v28 = vld [vmem:[#allocation385_spill] sm:$0xff] }
 0xd46   : > { %10127 = vmatprep.subr.bf16.mxu1 %v16018_v28  ;;  %v16019_v56 = vld [vmem:[#allocation401_spill] sm:$0xff] }
 0xd47   : > { %v7614_v39 = vadd.f32 %v10057_v4, %v7566_v60  ;;  %10155 = vmatprep.subr.bf16.mxu0 %v16019_v56 }
 0xd59   : > { %v10077_v38 = vpop.f32.mrb[200].mxu0 }
 0xd5a   : > { %v10105_v44 = vpop.f32.mrb[204].mxu1  ;;  %v10078_v61 = vpop.f32.mrb[201].mxu0 }
 0xd5b   : > { %v10106_v50 = vpop.f32.mrb[205].mxu1  ;;  %v10079_v42 = vadd.f32 %v10078_v61, %v10077_v38  ;;  %v10080_v1 = vpop.f32.mrb[202].mxu0 }
 0xd5c   : > { %v10107_v34 = vadd.f32 %v10106_v50, %v10105_v44  ;;  %v10108_v15 = vpop.f32.mrb[206].mxu1  ;;  %v10081_v17 = vpop.f32.mrb[203].mxu0 }
 0xd5d   : > { %v10109_v11 = vpop.f32.mrb[207].mxu1  ;;  %v7654_v47 = vadd.f32 %v10079_v42, %v7606_v3  ;;  %v10082_v51 = vadd.f32 %v10081_v17, %v10080_v1 }
 0xd5e   : > { %v10110_v46 = vadd.f32 %v10109_v11, %v10108_v15 }
 0xd5f   : > { %v7657_v41 = vadd.f32 %v10082_v51, %v7609_v21  ;;  %v7702_v54 = vadd.f32 %v10107_v34, %v7654_v47  ;;  %v7771_v21 = vld [vmem:[#allocation3] sm:$0x80] }
 0xd61   : > { %v10083_v5 = vpop.f32.mrb[204].mxu0  ;;  %v7705_v26 = vadd.f32 %v10110_v46, %v7657_v41 }
 0xd62   : > { %v10111_v8 = vpop.f32.mrb[208].mxu1  ;;  %v10084_v63 = vpop.f32.mrb[205].mxu0 }
 0xd63   : > { %v10112_v40 = vpop.f32.mrb[209].mxu1  ;;  %v10085_v57 = vadd.f32 %v10084_v63, %v10083_v5  ;;  %v10086_v37 = vpop.f32.mrb[206].mxu0 }
 0xd64   : > { %v10113_v30 = vadd.f32 %v10112_v40, %v10111_v8  ;;  %v10114_v55 = vpop.f32.mrb[210].mxu1  ;;  %v10087_v14 = vpop.f32.mrb[207].mxu0 }
 0xd65   : > { %v10115_v9 = vpop.f32.mrb[211].mxu1  ;;  %v7662_v16 = vadd.f32 %v10085_v57, %v7614_v39 }
 0xd67   : > { %v7710_v32 = vadd.f32 %v10113_v30, %v7662_v16 }
 0xd79   : > { %v10505_v13 = vpop.f32.mrb[208].mxu0 }
 0xd7a   : > { %v7758_v12 = vadd.f32 %v10505_v13, %v7710_v32  ;;  %v7749_v33 = vpop.f32.mrb[209].mxu0 }
 0xd7b   : > { %v7750_v0 = vadd.f32 %v7749_v33, %v7702_v54  ;;  %v10506_v23 = vpop.f32.mrb[210].mxu0 }
 0xd7c   : > { %v7765_v24 = vmax.f32 %v7758_v12, 0.0  ;;  %v7752_v45 = vpop.f32.mrb[211].mxu0 }
 0xd7d   : > { %v7753_v7 = vadd.f32 %v7752_v45, %v7705_v26  ;;  %v7763_v53 = vmax.f32 %v7750_v0, 0.0 }
 0xd7e   : > { %v7767_v52 = vpack.c.bf16 %v7765_v24, %v7765_v24 }
 0xd7f   : > { %v7764_v35 = vmax.f32 %v7753_v7, 0.0 }
 0xd80   : > { %v7781_v29 = vrot.slane %v7767_v52, 1 }
 0xd81   : > { %v7766_v59 = vpack.c.bf16 %v7764_v35, %v7763_v53 }
 0xd82   : > { %v7789_v3 = vsel %vm14468_vm10, %v7781_v29, %v7788_v36 }
 0xd83   : > { %7790 = vst [vmem:[#allocation3 + $0x10] sm:$0x7] %v7789_v3  ;;  %v7769_v18 = vrot.slane %v7766_v59, 1 }
 0xd85   : > { %v7772_v31 = vsel %vm13856_vm1, %v7769_v18, %v7771_v21  ;;  %v7775_v48 = vsel %vm13862_vm11, %v7769_v18, %v7774_v27  ;;  %v7778_v4 = vsel %vm14472_vm2, %v7769_v18, %v7777_v19  ;;  %v7782_v20 = vsel %vm15794_vm0, %v7769_v18, %v7781_v29 }
 0xd86   : > { %7773 = vst [vmem:[#allocation3] sm:$0x80] %v7772_v31  ;;  %7776 = vst [vmem:[#allocation3 + $0x8] sm:$0x3] %v7775_v48  ;;  %v7785_v43 = vsel %vm14477_vm4, %v7782_v20, %v7784_v10 }
 0xd87   : > { %7779 = vst [vmem:[#allocation3 + $0x8] sm:$0x1c] %v7778_v4  ;;  %7786 = vst [vmem:[#allocation3 + $0x8] sm:$0xe0] %v7785_v43 }
 0xd88   : > { %10770 = dma.done.wait [#allocation6 + $0x5], 9216 }
 0xd89   : > { %10771 = vsyncadd [#allocation6 + $0x5], 4294958080  ;;  %v16020_v62 = vld [vmem:[#allocation377_spill] sm:$0xff]  ;;  %v16022_v22 = vld [vmem:[#allocation386_spill] sm:$0xff] }
 0xd8a   : > { %10128 = vmatpush3.bf16.msra.mxu1 %v16020_v62  ;;  %v16021_v58 = vld [vmem:[#allocation393_spill] sm:$0xff]  ;;  %v16023_v60 = vld [vmem:[#allocation402_spill] sm:$0xff]  ;;  %v16026_v2 = vld [vmem:[#allocation387_spill] sm:$0xff] }
 0xd8b   : > { %10156 = vmatpush3.bf16.msra.mxu0 %v16021_v58  ;;  %10129 = vmatprep.subr.bf16.mxu1 %v16022_v22  ;;  %v16024_v39 = vld [vmem:[#allocation378_spill] sm:$0xff]  ;;  %v16027_v44 = vld [vmem:[#allocation403_spill] sm:$0xff]  ;;  %v16030_v26 = vld [vmem:[#allocation388_spill] sm:$0xff] }
 0xd8c   : > { %10157 = vmatprep.subr.bf16.mxu0 %v16023_v60  ;;  %v16025_v38 = vld [vmem:[#allocation394_spill] sm:$0xff]  ;;  %v16028_v47 = vld [vmem:[#allocation379_spill] sm:$0xff]  ;;  %v16031_v63 = vld [vmem:[#allocation404_spill] sm:$0xff] }
 0xd8d   : > { %v7889_v61 = vld [vmem:[#allocation3] sm:$0xf0]  ;;  %v16029_v51 = vld [vmem:[#allocation395_spill] sm:$0xff]  ;;  %v7931_v55 = vld [vmem:[#allocation3 + $0x10] sm:$0x7] }
 0xd8e   : > { %10130 = vmatpush3.bf16.msra.mxu1 %v16024_v39  ;;  %v14925_v50 = vld [vmem:[#allocation3 + $0x8] sm:$0xff]  ;;  %v7866_v42 = vld [vmem:[#allocation3] sm:$0xf8]  ;;  %v7893_v1 = vrot.slane %v7889_v61, 4  ;;  %v7902_v13 = vld [vmem:[#allocation3 + $0x10] sm:$0x1] }
 0xd8f   : > { %10158 = vmatpush3.bf16.msra.mxu0 %v16025_v38  ;;  %10131 = vmatprep.subr.bf16.mxu1 %v16026_v2  ;;  %v7894_v34 = vrot.slane %v14925_v50, 4  ;;  %v7869_v15 = vshrl.u32 %v7866_v42, 16  ;;  %v7872_v17 = vshll.u32 %v7866_v42, 16  ;;  %v7929_v11 = vld [vmem:[#allocation3] sm:$0xc0]  ;;  %v14931_v46 = vshrl.u32 %v14925_v50, 16  ;;  %vm16056_vm1 = vmmov %vm15833_vm3 }
 0xd90   : > { %10159 = vmatprep.subr.bf16.mxu0 %v16027_v44  ;;  %v14934_v41 = vshll.u32 %v14925_v50, 16  ;;  %v7933_v54 = vshrl.u32 %v7929_v11, 16  ;;  %v7936_v5 = vshll.u32 %v7929_v11, 16  ;;  %v7900_v8 = vld [vmem:[#allocation3] sm:$0xf0]  ;;  %v16034_v29 = vld [vmem:[#allocation389_spill] sm:$0xff] }
 0xd91   : > { %v7895_v40 = vsel %vm2565_vm13, %v7893_v1, %v7894_v34  ;;  %7899 = vst [vmem:[#allocation4 + $0x50] sm:$0xf] %v7894_v34  ;;  %v7871_v57 = vrot.slane %v7869_v15, 3  ;;  %v7874_v30 = vrot.slane %v7872_v17, 4  ;;  %v7904_v37 = vshrl.u32 %v7900_v8, 16  ;;  %v16032_v45 = vld [vmem:[#allocation380_spill] sm:$0xff]  ;;  %vm16042_vm13 = vmmov %vm15828_vm6 }
 0xd92   : > { %10132 = vmatpush3.bf16.msra.mxu1 %v16028_v47  ;;  %8117 = vmatprep.mubr.bf16.mxu1 %v7895_v40  ;;  %v7879_v14 = vrot.slane %v14931_v46, 3  ;;  %v7882_v9 = vrot.slane %v14934_v41, 4  ;;  %v7935_v16 = vrot.slane %v7933_v54, 6  ;;  %v7938_v32 = vrot.slane %v7936_v5, 7  ;;  %v7977_v24 = vld [vmem:[#allocation3] sm:$0x80] }
 0xd93   : > { %10160 = vmatpush3.bf16.msra.mxu0 %v16029_v51  ;;  %10133 = vmatprep.subr.bf16.mxu1 %v16030_v26  ;;  %v7875_v12 = vor.u32 %v7874_v30, %v7871_v57  ;;  %v7943_v33 = vrot.slane %v14931_v46, 6  ;;  %v7946_v0 = vrot.slane %v14934_v41, 7  ;;  %v7906_v23 = vrot.slane %v7904_v37, 4  ;;  %v16033_v7 = vld [vmem:[#allocation396_spill] sm:$0xff]  ;;  %v16035_v59 = vld [vmem:[#allocation405_spill] sm:$0xff]  ;;  %v16038_v42 = vld [vmem:[#allocation390_spill] sm:$0xff] }
 0xd94   : > { %10161 = vmatprep.subr.bf16.mxu0 %v16031_v63  ;;  %v7883_v52 = vor.u32 %v7882_v9, %v7879_v14  ;;  %v7939_v36 = vor.u32 %v7938_v32, %v7935_v16  ;;  %v7907_v53 = vshll.u32 %v7900_v8, 16  ;;  %v7914_v35 = vrot.slane %v14931_v46, 4  ;;  %v7962_v18 = vld [vmem:[#allocation3] sm:$0x80]  ;;  %v8027_v20 = vld [vmem:[#allocation3 + $0x8] sm:$0xfc] }
 0xd95   : > { %v7947_v3 = vor.u32 %v7946_v0, %v7943_v33  ;;  %v7917_v21 = vrot.slane %v14934_v41, 5  ;;  %v7950_v27 = vshrl.u32 %v7931_v55, 16  ;;  %v7953_v19 = vshll.u32 %v7931_v55, 16  ;;  %v8028_v58 = vld [vmem:[#allocation3 + $0x10] sm:$0x3f] }
 0xd96   : > { %10134 = vmatpush3.bf16.msra.mxu1 %v16032_v45  ;;  %v14950_v10 = vsel %vm2489_vm14, %v7875_v12, %v7883_v52  ;;  %7888 = vst [vmem:[#allocation4 + $0x48] sm:$0xf] %v7883_v52  ;;  %v7909_v31 = vrot.slane %v7907_v53, 5  ;;  %v7921_v48 = vshll.u32 %v7902_v13, 16  ;;  %v7981_v4 = vshrl.u32 %v7977_v24, 16  ;;  %v16036_v22 = vld [vmem:[#allocation381_spill] sm:$0xff]  ;;  %vm16043_vm14 = vmmov %vm15820_vm9 }
 0xd97   : > { %10162 = vmatpush3.bf16.msra.mxu0 %v16033_v7  ;;  %10135 = vmatprep.subr.bf16.mxu1 %v16034_v29  ;;  %v7948_v43 = vsel %vm2931_vm7, %v7939_v36, %v7947_v3  ;;  %v7918_v28 = vor.u32 %v7917_v21, %v7914_v35  ;;  %v7952_v56 = vrot.slane %v7950_v27, 6  ;;  %v7955_v62 = vrot.slane %v7953_v19, 7  ;;  %v16037_v60 = vld [vmem:[#allocation397_spill] sm:$0xff]  ;;  %v16039_v1 = vld [vmem:[#allocation406_spill] sm:$0xff]  ;;  %v16044_v13 = vld [vmem:[#allocation391_spill] sm:$0xff] }
 0xd98   : > { %10163 = vmatprep.subr.bf16.mxu0 %v16035_v59  ;;  %v7910_v39 = vor.u32 %v7909_v31, %v7906_v23  ;;  %v7923_v38 = vrot.slane %v7921_v48, 5  ;;  %v7983_v2 = vrot.slane %v7981_v4, 7  ;;  %v7987_v44 = vrot.slane %v14931_v46, 7  ;;  %v8004_v61 = vld [vmem:[#allocation3 + $0x8] sm:$0xfe]  ;;  %8165 = vmatprep.mubr.bf16.mxu0 %v7948_v43  ;;  %v16040_v37 = vld [vmem:[#allocation382_spill] sm:$0xff] }
 0xd99   : > { %v7956_v34 = vor.u32 %v7955_v62, %v7952_v56  ;;  %v7968_v15 = vrot.slane %v7962_v18, 7  ;;  %v7969_v17 = vrot.slane %v14925_v50, 7  ;;  %v8031_v11 = vrot.slane %v8027_v20, 2  ;;  %v8005_v47 = vld [vmem:[#allocation3 + $0x10] sm:$0x3f]  ;;  %v16045_v12 = vld [vmem:[#allocation407_spill] sm:$0xff] }
 0xd9a   : > { %10136 = vmatpush3.bf16.msra.mxu1 %v16036_v22  ;;  %v7919_v51 = vsel %vm2593_vm15, %v7910_v39, %v7918_v28  ;;  %v7924_v54 = vsel %vm2593_vm15, %v7918_v28, %v7923_v38  ;;  %v7990_v5 = vor.u32 %v7987_v44, %v14934_v41  ;;  %v8032_v8 = vrot.slane %v8028_v58, 2  ;;  %v7979_v46 = vld [vmem:[#allocation3 + $0x10] sm:$0xf]  ;;  %v8038_v30 = vld [vmem:[#allocation3 + $0x8] sm:$0xfc]  ;;  %v16047_v21 = vld [vmem:[#allocation399_spill] sm:$0xff] }
 0xd9b   : > { %10164 = vmatpush3.bf16.msra.mxu0 %v16037_v60  ;;  %10137 = vmatprep.subr.bf16.mxu1 %v16038_v42  ;;  %v7957_v26 = vsel %vm2931_vm7, %v7947_v3, %v7956_v34  ;;  %7928 = vst [vmem:[#allocation4 + $0x58] sm:$0xf] %v7924_v54  ;;  %v14964_v63 = vsel %vm2316_vm12, %v7968_v15, %v7969_v17  ;;  %v8007_v40 = vshrl.u32 %v8004_v61, 16  ;;  %v8010_v57 = vshll.u32 %v8004_v61, 16  ;;  %v7964_v50 = vld [vmem:[#allocation3 + $0x10] sm:$0x7]  ;;  %vm16050_vm15 = vmmov %vm15827_vm5 }
 0xd9c   : > { %10165 = vmatprep.subr.bf16.mxu0 %v16039_v1  ;;  %v16041_v55 = vld [vmem:[#allocation398_spill] sm:$0xff]  ;;  %7961 = vst [vmem:[#allocation4 + $0x60] sm:$0xf] %v7957_v26  ;;  %v14969_v14 = vsel %vm16042_vm13, %v7983_v2, %v7990_v5  ;;  %v14972_v41 = vsel %vm16043_vm14, %v8031_v11, %v8032_v8  ;;  %8037 = vst [vmem:[#allocation4 + $0x80] sm:$0xf] %v8032_v8  ;;  %v8015_v9 = vshrl.u32 %v8005_v47, 16 }
 0xd9d   : > { %v8018_v16 = vshll.u32 %v8005_v47, 16  ;;  %v8039_v32 = vld [vmem:[#allocation3 + $0x10] sm:$0x7f]  ;;  %v8009_v33 = vrot.slane %v8007_v40, 1  ;;  %v8012_v0 = vrot.slane %v8010_v57, 2  ;;  %v7993_v23 = vshrl.u32 %v7979_v46, 16  ;;  %vm16051_vm7 = vmmov %vm15828_vm6 }
 0xd9e   : > { %10138 = vmatpush3.bf16.msra.mxu1 %v16040_v37  ;;  %v7996_v24 = vshll.u32 %v7979_v46, 16  ;;  %v8017_v45 = vrot.slane %v8015_v9, 1  ;;  %v7971_v52 = vrot.slane %v7964_v50, 7  ;;  %v8041_v36 = vshrl.u32 %v8038_v30, 16  ;;  %v16046_v3 = vld [vmem:[#allocation383_spill] sm:$0xff]  ;;  %v16048_v48 = vld [vmem:[#allocation392_spill] sm:$0xff] }
 0xd9f   : > { %10166 = vmatpush3.bf16.msra.mxu0 %v16041_v55  ;;  %10139 = vmatprep.subr.bf16.mxu1 %v16044_v13  ;;  %v8020_v7 = vrot.slane %v8018_v16, 2  ;;  %v8013_v53 = vor.u32 %v8012_v0, %v8009_v33  ;;  %v7995_v35 = vrot.slane %v7993_v23, 7  ;;  %v8044_v29 = vshll.u32 %v8038_v30, 16  ;;  %v16049_v4 = vld [vmem:[#allocation408_spill] sm:$0xff]  ;;  %v16054_v2 = vld [vmem:[#allocation417_spill] sm:$0xff]  ;;  %v16060_v11 = vld [vmem:[#allocation434_spill] sm:$0xff] }
 0xda0   : > { %10167 = vmatprep.subr.bf16.mxu0 %v16045_v12  ;;  %v8049_v59 = vshrl.u32 %v8039_v32, 16  ;;  %v7972_v19 = vsel %vm2316_vm12, %v7969_v17, %v7971_v52  ;;  %v8043_v18 = vrot.slane %v8041_v36, 2  ;;  %v8052_v31 = vshll.u32 %v8039_v32, 16  ;;  %v16052_v60 = vld [vmem:[#allocation384_spill] sm:$0xff]  ;;  %v16055_v61 = vld [vmem:[#allocation433_spill] sm:$0xff]  ;;  %v16059_v17 = vld [vmem:[#allocation418_spill] sm:$0xff] }
 0xda1   : > { %v8021_v27 = vor.u32 %v8020_v7, %v8017_v45  ;;  %v7998_v20 = vor.u32 %v7996_v24, %v7995_v35  ;;  %7976 = vst [vmem:[#allocation4 + $0x68] sm:$0xf] %v7972_v19  ;;  %v8046_v43 = vrot.slane %v8044_v29, 3  ;;  %v16053_v39 = vld [vmem:[#allocation400_spill] sm:$0xff]  ;;  %v16058_v15 = vld [vmem:[#allocation425_spill] sm:$0xff]  ;;  %v16061_v47 = vld [vmem:[#allocation410_spill] sm:$0xff] }
 0xda2   : > { %10140 = vmatpush3.bf16.msra.mxu1 %v16046_v3  ;;  %v8051_v28 = vrot.slane %v8049_v59, 2  ;;  %v8054_v62 = vrot.slane %v8052_v31, 3  ;;  %v8071_v1 = vld [vmem:[#allocation4 + $0x50] sm:$0xf]  ;;  %v16062_v54 = vld [vmem:[#allocation426_spill] sm:$0xff]  ;;  %v16065_v46 = vld [vmem:[#allocation411_spill] sm:$0xff] }
 0xda3   : > { %10168 = vmatpush3.bf16.msra.mxu0 %v16047_v21  ;;  %10141 = vmatprep.subr.bf16.mxu1 %v16048_v48  ;;  %v8022_v56 = vsel %vm16050_vm15, %v8013_v53, %v8021_v27  ;;  %8026 = vst [vmem:[#allocation4 + $0x78] sm:$0xf] %v8021_v27  ;;  %v7999_v58 = vsel %vm16051_vm7, %v7987_v44, %v7998_v20  ;;  %v8073_v34 = vld [vmem:[#allocation4 + $0x60] sm:$0xf]  ;;  %v16057_v44 = vld [vmem:[#allocation409_spill] sm:$0xff]  ;;  %v16067_v40 = vld [vmem:[#allocation420_spill] sm:$0xff] }
 0xda4   : > { %10169 = vmatprep.subr.bf16.mxu0 %v16049_v4  ;;  %v8047_v22 = vor.u32 %v8046_v43, %v8043_v18  ;;  %8003 = vst [vmem:[#allocation4 + $0x70] sm:$0xf] %v7999_v58  ;;  %v8055_v38 = vor.u32 %v8054_v62, %v8051_v28  ;;  %v8070_v5 = vld [vmem:[#allocation4 + $0x48] sm:$0xf]  ;;  %v8072_v8 = vld [vmem:[#allocation4 + $0x58] sm:$0xf] }
 0xda5   : > { %v16066_v26 = vld [vmem:[#allocation427_spill] sm:$0xff]  ;;  %v16068_v57 = vld [vmem:[#allocation436_spill] sm:$0xff]  ;;  %v16071_v37 = vld [vmem:[#allocation421_spill] sm:$0xff] }
 0xda6   : > { %10142 = vmatpush3.bf16.msra.mxu1 %v16052_v60  ;;  %v8056_v42 = vsel %vm16056_vm1, %v8047_v22, %v8055_v38  ;;  %8060 = vst [vmem:[#allocation4 + $0x88] sm:$0xf] %v8055_v38  ;;  %v16069_v50 = vld [vmem:[#allocation412_spill] sm:$0xff]  ;;  %v16072_v55 = vld [vmem:[#allocation437_spill] sm:$0xff]  ;;  %v16075_v32 = vld [vmem:[#allocation422_spill] sm:$0xff] }
 0xda7   : > { %10170 = vmatpush3.bf16.msra.mxu0 %v16053_v39  ;;  %10183 = vmatprep.subr.bf16.mxu1 %v16054_v2  ;;  %v16070_v30 = vld [vmem:[#allocation428_spill] sm:$0xff]  ;;  %v16073_v9 = vld [vmem:[#allocation413_spill] sm:$0xff]  ;;  %v16076_v13 = vld [vmem:[#allocation438_spill] sm:$0xff] }
 0xda8   : > { %10211 = vmatprep.subr.bf16.mxu0 %v16055_v61  ;;  %v16074_v16 = vld [vmem:[#allocation429_spill] sm:$0xff]  ;;  %v16077_v12 = vld [vmem:[#allocation414_spill] sm:$0xff]  ;;  %v16080_v33 = vld [vmem:[#allocation439_spill] sm:$0xff] }
 0xda9   : > { %8118 = vmatmul.mubr.bf16.vlgmr.msra.gmra.mrb[212].mxu1 %v14950_v10  ;;  %v16063_v10 = vld [vmem:[#allocation419_spill] sm:$0xff]  ;;  %v16083_v24 = vld [vmem:[#allocation424_spill] sm:$0xff]  ;;  %v16087_v36 = vld [vmem:[#allocation441_spill] sm:$0xff] }
 0xdaa   : > { %8166 = vmatmul.mubr.bf16.vlgmr.msra.gmra.mrb[212].mxu0 %v7919_v51  ;;  %10184 = vmatpush3.bf16.msra.mxu1 %v16057_v44  ;;  %v16064_v51 = vld [vmem:[#allocation435_spill] sm:$0xff]  ;;  %v16084_v45 = vld [vmem:[#allocation440_spill] sm:$0xff]  ;;  %v16088_v29 = vld [vmem:[#allocation442_spill] sm:$0xff] }
 0xdab   : > { %10212 = vmatpush3.bf16.msra.mxu0 %v16058_v15  ;;  %10185 = vmatprep.subr.bf16.mxu1 %v16059_v17  ;;  %v16081_v0 = vld [vmem:[#allocation415_spill] sm:$0xff]  ;;  %v16085_v7 = vld [vmem:[#allocation416_spill] sm:$0xff]  ;;  %v8076_v3 = vld [vmem:[#allocation4 + $0x78] sm:$0xf] }
 0xdac   : > { %10213 = vmatprep.subr.bf16.mxu0 %v16060_v11  ;;  %8125 = vmatprep.mubr.bf16.mxu1 %v8071_v1  ;;  %v16082_v23 = vld [vmem:[#allocation431_spill] sm:$0xff]  ;;  %v16086_v52 = vld [vmem:[#allocation432_spill] sm:$0xff]  ;;  %v16092_v19 = vld [vmem:[#allocation446_spill] sm:$0xff] }
 0xdad   : > { %8173 = vmatprep.mubr.bf16.mxu0 %v8073_v34  ;;  %v8075_v53 = vld [vmem:[#allocation4 + $0x70] sm:$0xf]  ;;  %v8077_v35 = vld [vmem:[#allocation4 + $0x80] sm:$0xf]  ;;  %v8074_v59 = vld [vmem:[#allocation4 + $0x68] sm:$0xf] }
 0xdae   : > { %10186 = vmatpush3.bf16.msra.mxu1 %v16061_v47  ;;  %v16089_v21 = vld [vmem:[#allocation443_spill] sm:$0xff]  ;;  %v16090_v27 = vld [vmem:[#allocation444_spill] sm:$0xff] }
 0xdaf   : > { %10214 = vmatpush3.bf16.msra.mxu0 %v16062_v54  ;;  %10187 = vmatprep.subr.bf16.mxu1 %v16063_v10  ;;  %v16093_v18 = vld [vmem:[#allocation447_spill] sm:$0xff]  ;;  %v16094_v31 = vld [vmem:[#allocation448_spill] sm:$0xff] }
 0xdb0   : > { %10215 = vmatprep.subr.bf16.mxu0 %v16064_v51  ;;  %v8078_v48 = vld [vmem:[#allocation4 + $0x88] sm:$0xf]  ;;  %v9094_v43 = vld [vmem:[%s15085_s17] ss:$0 sm:$0xff] }
 0xdb1   : > { %8126 = vmatmul.mubr.bf16.gmra.mrb[216].mxu1 %v8070_v5 }
 0xdb2   : > { %8174 = vmatmul.mubr.bf16.gmra.mrb[216].mxu0 %v8072_v8  ;;  %10188 = vmatpush3.bf16.msra.mxu1 %v16065_v46 }
 0xdb3   : > { %10216 = vmatpush3.bf16.msra.mxu0 %v16066_v26  ;;  %10189 = vmatprep.subr.bf16.mxu1 %v16067_v40 }
 0xdb4   : > { %10217 = vmatprep.subr.bf16.mxu0 %v16068_v57  ;;  %8213 = vmatprep.mubr.bf16.mxu1 %v14969_v14  ;;  %v16078_v14 = vld [vmem:[#allocation430_spill] sm:$0xff]  ;;  %v8328_v57 = vlaneseq }
 0xdb5   : > { %8261 = vmatprep.mubr.bf16.mxu0 %v14972_v41  ;;  %v16079_v41 = vld [vmem:[#allocation423_spill] sm:$0xff] }
 0xdb6   : > { %10190 = vmatpush3.bf16.msra.mxu1 %v16069_v50 }
 0xdb7   : > { %10218 = vmatpush3.bf16.msra.mxu0 %v16070_v30  ;;  %10191 = vmatprep.subr.bf16.mxu1 %v16071_v37  ;;  %v8329_v37 = vshrl.u32 %v8328_v57, 7 }
 0xdb8   : > { %10219 = vmatprep.subr.bf16.mxu0 %v16072_v55 }
 0xdba   : > { %10192 = vmatpush3.bf16.msra.mxu1 %v16073_v9 }
 0xdbb   : > { %10220 = vmatpush3.bf16.msra.mxu0 %v16074_v16  ;;  %10193 = vmatprep.subr.bf16.mxu1 %v16075_v32 }
 0xdbc   : > { %10221 = vmatprep.subr.bf16.mxu0 %v16076_v13 }
 0xdbe   : > { %10194 = vmatpush3.bf16.msra.mxu1 %v16077_v12 }
 0xdbf   : > { %10222 = vmatpush3.bf16.msra.mxu0 %v16078_v14  ;;  %10195 = vmatprep.subr.bf16.mxu1 %v16079_v41  ;;  %v8330_v14 = vadd.s32 8, %v8329_v37 }
 0xdc0   : > { %10223 = vmatprep.subr.bf16.mxu0 %v16080_v33 }
 0xdc2   : > { %10196 = vmatpush3.bf16.msra.mxu1 %v16081_v0 }
 0xdc3   : > { %10224 = vmatpush3.bf16.msra.mxu0 %v16082_v23  ;;  %10197 = vmatprep.subr.bf16.mxu1 %v16083_v24 }
 0xdc4   : > { %10225 = vmatprep.subr.bf16.mxu0 %v16084_v45  ;;  %v8331_v45 = vadd.s32 16, %v8329_v37 }
 0xdc6   : > { %10198 = vmatpush3.bf16.msra.mxu1 %v16085_v7 }
 0xdc7   : > { %10226 = vmatpush3.bf16.msra.mxu0 %v16086_v52  ;;  %10507 = vmatprep.subr.bf16.mxu1 %v16087_v36  ;;  %v15041_v7 = vmul.u32.u64.low 2863311531, %v8329_v37  ;;  %v15042_v52 = vmul.u32.u64.high 2863311531, %v8329_v37, %v15041_v7 }
 0xdc9   : > { %8214 = vmatmul.mubr.bf16.vlgmr.msra.gmra.mrb[220].mxu1 %v14964_v63  ;;  %v16091_v63 = vld [vmem:[#allocation445_spill] sm:$0xff] }
 0xdca   : > { %8262 = vmatmul.mubr.bf16.vlgmr.msra.gmra.mrb[220].mxu0 %v8022_v56  ;;  %10508 = vmatpush3.bf16.msra.mxu1 %v16087_v36 }
 0xdcb   : > { %8221 = vmatprep.mubr.bf16.mxu1 %v8075_v53  ;;  %10509 = vmatprep.subr.bf16.mxu1 %v16088_v29 }
 0xdcc   : > { %8269 = vmatprep.mubr.bf16.mxu0 %v8077_v35 }
 0xdce   : > { %10510 = vmatpush3.bf16.msra.mxu1 %v16088_v29  ;;  %v15044_v35 = vmul.u32.u64.low 2863311531, %v8330_v14  ;;  %v15045_v29 = vmul.u32.u64.high 2863311531, %v8330_v14, %v15044_v35 }
 0xdcf   : > { %10511 = vmatprep.subr.bf16.mxu1 %v16089_v21 }
 0xdd1   : > { %8222 = vmatmul.mubr.bf16.gmra.mrb[224].mxu1 %v8074_v59 }
 0xdd2   : > { %8270 = vmatmul.mubr.bf16.gmra.mrb[224].mxu0 %v8076_v3  ;;  %10512 = vmatpush3.bf16.msra.mxu1 %v16089_v21 }
 0xdd3   : > { %10523 = vmatprep.mubr.bf16.mxu1 %v8056_v42  ;;  %10513 = vmatprep.subr.bf16.mxu1 %v16090_v27 }
 0xdd6   : > { %10514 = vmatpush3.bf16.msra.mxu1 %v16090_v27 }
 0xdd7   : > { %10515 = vmatprep.subr.bf16.mxu1 %v16091_v63 }
 0xdda   : > { %10516 = vmatpush3.bf16.msra.mxu1 %v16091_v63 }
 0xddb   : > { %10517 = vmatprep.subr.bf16.mxu1 %v16092_v19 }
 0xdde   : > { %10518 = vmatpush3.bf16.msra.mxu1 %v16092_v19 }
 0xddf   : > { %10519 = vmatprep.subr.bf16.mxu1 %v16093_v18 }
 0xde2   : > { %10520 = vmatpush3.bf16.msra.mxu1 %v16093_v18  ;;  %v15047_v19 = vmul.u32.u64.low 2863311531, %v8331_v45  ;;  %v15048_v18 = vmul.u32.u64.high 2863311531, %v8331_v45, %v15047_v19 }
 0xde3   : > { %10521 = vmatprep.subr.bf16.mxu1 %v16094_v31 }
 0xde6   : > { %10522 = vmatpush3.bf16.msra.mxu1 %v16094_v31 }
 0xde9   : > { %10524 = vmatmul.mubr.bf16.vlgmr.msra.gmra.mrb[228].mxu1 %v8078_v48 }
 0xe7c   : > { %v10143_v4 = vpop.f32.mrb[212].mxu1 }
 0xe7d   : > { %v10171_v20 = vpop.f32.mrb[212].mxu0  ;;  %v10144_v28 = vpop.f32.mrb[213].mxu1 }
 0xe7e   : > { %v10172_v56 = vpop.f32.mrb[213].mxu0  ;;  %v10145_v62 = vadd.f32 %v10144_v28, %v10143_v4  ;;  %v10146_v58 = vpop.f32.mrb[214].mxu1 }
 0xe7f   : > { %v10173_v22 = vadd.f32 %v10172_v56, %v10171_v20  ;;  %v10174_v60 = vpop.f32.mrb[214].mxu0  ;;  %v10147_v39 = vpop.f32.mrb[215].mxu1 }
 0xe80   : > { %v10175_v38 = vpop.f32.mrb[215].mxu0  ;;  %v8120_v2 = vadd.f32 %v10145_v62, %v9094_v43  ;;  %v10148_v61 = vadd.f32 %v10147_v39, %v10146_v58  ;;  %v8338_v62 = vshrl.u32 %v15042_v52, 2 }
 0xe81   : > { %v10176_v42 = vadd.f32 %v10175_v38, %v10174_v60  ;;  %v8360_v60 = vshrl.u32 %v15048_v18, 2 }
 0xe82   : > { %v8123_v1 = vadd.f32 %v10148_v61, %v9094_v43  ;;  %v8168_v34 = vadd.f32 %v10173_v22, %v8120_v2  ;;  %v8349_v22 = vshrl.u32 %v15045_v29, 2  ;;  %v8339_v39 = vmul.u32 6, %v8338_v62 }
 0xe83   : > { %v8361_v2 = vmul.u32 6, %v8360_v60 }
 0xe84   : > { %v8171_v44 = vadd.f32 %v10176_v42, %v8123_v1  ;;  %v10149_v15 = vpop.f32.mrb[216].mxu1  ;;  %v8350_v38 = vmul.u32 6, %v8349_v22  ;;  %v8340_v61 = vsub.s32 %v8329_v37, %v8339_v39 }
 0xe85   : > { %v10177_v17 = vpop.f32.mrb[216].mxu0  ;;  %v10150_v11 = vpop.f32.mrb[217].mxu1  ;;  %v8362_v1 = vsub.s32 %v8331_v45, %v8361_v2  ;;  %v8414_v45 = vld [vmem:[#allocation7] sm:$0x1] }
 0xe86   : > { %v10178_v47 = vpop.f32.mrb[217].mxu0  ;;  %v10151_v54 = vadd.f32 %v10150_v11, %v10149_v15  ;;  %v10152_v5 = vpop.f32.mrb[218].mxu1  ;;  %v8351_v42 = vsub.s32 %v8330_v14, %v8350_v38  ;;  %vm8365_vm11 = vcmp.ne.s32.totalorder %v8340_v61, 0  ;;  %vm8368_vm4 = vcmp.lt.s32.totalorder %v8340_v61, 0 }
 0xe87   : > { %v10179_v8 = vadd.f32 %v10178_v47, %v10177_v17  ;;  %v10180_v10 = vpop.f32.mrb[218].mxu0  ;;  %v10153_v51 = vpop.f32.mrb[219].mxu1  ;;  %vm8371_vm8 = vmand %vm8368_vm4, %vm8365_vm11  ;;  %vm8367_vm9 = vcmp.ne.s32.totalorder %v8362_v1, 0  ;;  %vm8370_vm5 = vcmp.lt.s32.totalorder %v8362_v1, 0  ;;  %v8376_v15 = vadd.s32 6, %v8362_v1 }
 0xe88   : > { %v10181_v46 = vpop.f32.mrb[219].mxu0  ;;  %v8128_v26 = vadd.f32 %v10151_v54, %v9094_v43  ;;  %vm8366_vm10 = vcmp.ne.s32.totalorder %v8351_v42, 0  ;;  %vm8369_vm2 = vcmp.lt.s32.totalorder %v8351_v42, 0  ;;  %vm8373_vm3 = vmand %vm8370_vm5, %vm8367_vm9 }
 0xe89   : > { %vm8372_vm6 = vmand %vm8369_vm2, %vm8366_vm10  ;;  %v8379_v51 = vsel %vm8373_vm3, %v8376_v15, %v8362_v1  ;;  %vm8416_vm2 = vcmask 0  }
 0xe8a   : > { %v8176_v40 = vadd.f32 %v10179_v8, %v8128_v26  ;;  %vm8382_vm7 = vcmp.ge.s32.totalorder %v8379_v51, 1  ;;  %vm8385_vm1 = vcmp.le.s32.totalorder %v8379_v51, 4 }
 0xe8b   : > { %vm8388_vm10 = vmand %vm8382_vm7, %vm8385_vm1 }
 0xe9c   : > { %v10199_v50 = vpop.f32.mrb[220].mxu1 }
 0xe9d   : > { %v10227_v30 = vpop.f32.mrb[220].mxu0  ;;  %v10200_v55 = vpop.f32.mrb[221].mxu1 }
 0xe9e   : > { %v10228_v9 = vpop.f32.mrb[221].mxu0  ;;  %v10201_v16 = vadd.f32 %v10200_v55, %v10199_v50  ;;  %v10202_v32 = vpop.f32.mrb[222].mxu1 }
 0xe9f   : > { %v10229_v13 = vadd.f32 %v10228_v9, %v10227_v30  ;;  %v10230_v12 = vpop.f32.mrb[222].mxu0  ;;  %v10203_v41 = vpop.f32.mrb[223].mxu1 }
 0xea0   : > { %v10231_v33 = vpop.f32.mrb[223].mxu0  ;;  %v8216_v0 = vadd.f32 %v10201_v16, %v8168_v34  ;;  %v10204_v23 = vadd.f32 %v10203_v41, %v10202_v32  ;;  %v8374_v34 = vadd.s32 6, %v8340_v61 }
 0xea1   : > { %v10232_v24 = vadd.f32 %v10231_v33, %v10230_v12 }
 0xea2   : > { %v8219_v36 = vadd.f32 %v10204_v23, %v8171_v44  ;;  %v8264_v53 = vadd.f32 %v10229_v13, %v8216_v0  ;;  %v8375_v44 = vadd.s32 6, %v8351_v42  ;;  %v8377_v11 = vsel %vm8371_vm8, %v8374_v34, %v8340_v61  ;;  %v8409_v0 = vld [vmem:[%s15086_s18] sm:$0x1] }
 0xea3   : > { %vm8380_vm0 = vcmp.ge.s32.totalorder %v8377_v11, 1  ;;  %vm8383_vm13 = vcmp.le.s32.totalorder %v8377_v11, 4 }
 0xea4   : > { %v10205_v59 = vpop.f32.mrb[224].mxu1  ;;  %v8267_v21 = vadd.f32 %v10232_v24, %v8219_v36  ;;  %v8378_v47 = vsel %vm8372_vm6, %v8375_v44, %v8351_v42  ;;  %vm8386_vm11 = vmand %vm8380_vm0, %vm8383_vm13 }
 0xea5   : > { %v10233_v3 = vpop.f32.mrb[224].mxu0  ;;  %v10206_v27 = vpop.f32.mrb[225].mxu1  ;;  %vm8381_vm14 = vcmp.ge.s32.totalorder %v8378_v47, 1  ;;  %vm8384_vm15 = vcmp.le.s32.totalorder %v8378_v47, 4 }
 0xea6   : > { %v10234_v63 = vpop.f32.mrb[225].mxu0  ;;  %v10207_v31 = vadd.f32 %v10206_v27, %v10205_v59  ;;  %v10208_v4 = vpop.f32.mrb[226].mxu1  ;;  %vm8387_vm4 = vmand %vm8381_vm14, %vm8384_vm15 }
 0xea7   : > { %v10235_v48 = vadd.f32 %v10234_v63, %v10233_v3  ;;  %v10236_v20 = vpop.f32.mrb[226].mxu0  ;;  %v10209_v43 = vpop.f32.mrb[227].mxu1 }
 0xea8   : > { %v10237_v28 = vpop.f32.mrb[227].mxu0  ;;  %v8224_v56 = vadd.f32 %v10207_v31, %v8176_v40 }
 0xeaa   : > { %v8272_v58 = vadd.f32 %v10235_v48, %v8224_v56 }
 0xebc   : > { %v10525_v17 = vpop.f32.mrb[228].mxu1 }
 0xebd   : > { %v8320_v54 = vadd.f32 %v10525_v17, %v8272_v58  ;;  %v8311_v5 = vpop.f32.mrb[229].mxu1 }
 0xebe   : > { %v8312_v8 = vadd.f32 %v8311_v5, %v8264_v53  ;;  %v10526_v10 = vpop.f32.mrb[230].mxu1 }
 0xebf   : > { %v8314_v46 = vpop.f32.mrb[231].mxu1  ;;  %v8327_v26 = vadd.f32 %v8320_v54, %v14756_v25 }
 0xec0   : > { %v8325_v40 = vadd.f32 %v8312_v8, %v14759_v49  ;;  %v8315_v57 = vadd.f32 %v8314_v46, %v8267_v21 }
 0xec1   : > { %v8391_v37 = vmax.f32 %v8327_v26, 0.0 }
 0xec2   : > { %v8389_v50 = vmax.f32 %v8325_v40, 0.0  ;;  %v8326_v30 = vadd.f32 %v8315_v57, %v14763_v6 }
 0xec3   : > { %v8400_v13 = vsel %vm8388_vm10, %v8391_v37, 0.0 }
 0xec4   : > { %v8390_v55 = vmax.f32 %v8326_v30, 0.0  ;;  %v8398_v9 = vsel %vm8386_vm11, %v8389_v50, 0.0 }
 0xec6   : > { %v8399_v16 = vsel %vm8387_vm4, %v8390_v55, 0.0 }
 0xec7   : > { %v8401_v32 = vadd.f32 %v8399_v16, %v8398_v9 }
 0xec9   : > { %v8402_v25 = vadd.f32 %v8401_v32, %v8400_v13 }
 0xecb   : > { %v8403_v12 = vrot.slane %v8402_v25, 4 }
 0xecd   : > { %v8404_v49 = vadd.f32 %v8403_v12, %v8402_v25 }
 0xecf   : > { %v8405_v14 = vrot.slane %v8404_v49, 2 }
 0xed1   : > { %v8406_v41 = vadd.f32 %v8405_v14, %v8404_v49 }
 0xed3   : > { %v8407_v33 = vrot.slane %v8406_v41, 1 }
 0xed5   : > { %v8408_v6 = vadd.f32 %v8407_v33, %v8406_v41 }
 0xed7   : > { %v8410_v23 = vmul.f32 %v8409_v0, %v8408_v6 }
 0xed9   : > { %v8411_v24 = vsel %vm2316_vm12, %v8410_v23, 0.0 }
 0xeda   : > { %8412 = vadd.xlane.f32.xlu0 %v8411_v24 }
 0xf67   : > { %v8413_v7 = vpop.xlane.xlu0 %8412 }
 0xf68   : > { %v8415_v52 = vadd.f32 %v8414_v45, %v8413_v7 }
 0xf6a   : > { %8417 = vst.msk [vmem:[%s663_s19] sm:$0x1] %vm8416_vm2, %v8415_v52 }
 0xf6b PF: > { %s16095_s0 = sld [smem:[#allocation23_spill]] }
 0xf71   : > { %s34_s26 = sadd.s32 1, %s16095_s0  }
 0xf72   : > { %p31_p3 = scmp.ge.s32.totalorder %s34_s26, 4  }
 0xf74   :  { %33 = sbr.rel (!%p31_p3) target bundleno = 9 (0x9), region = 410 }
 0xf7b   :  { %8435 = vsyncpa [#allocation9], 1 }
 0xf7c   :  { %8437 = vsyncpa [#allocation9 + $0x1], 1 }
 0xf7d   :  { %8438 = vsyncmov [#allocation6] }
 0xf80   :  { %s8439_s4 = vpop.sfrf %8438 }
 0xf81   :  { %p9097_p5 = scmp.ne.s32.totalorder %s8439_s4, 0 }
 0xf83   :  { %8443 = shalt.err (%p9097_p5)  }
 0xf84   :  { %8445 = vsyncmov [#allocation6 + $0x1] }
 0xf87   :  { %s8446_s30 = vpop.sfrf %8445 }
 0xf88   :  { %p9098_p9 = scmp.ne.s32.totalorder %s8446_s30, 0 }
 0xf8a   :  { %8450 = shalt.err (%p9098_p9)  }
 0xf8b   :  { %8452 = vsyncmov [#allocation6 + $0x2] }
 0xf8e   :  { %s8453_s27 = vpop.sfrf %8452 }
 0xf8f   :  { %p9099_p10 = scmp.ne.s32.totalorder %s8453_s27, 0 }
 0xf91   :  { %8457 = shalt.err (%p9099_p10)  }
 0xf92   :  { %8459 = vsyncmov [#allocation6 + $0x3] }
 0xf95   :  { %s8460_s19 = vpop.sfrf %8459 }
 0xf96   :  { %p9100_p11 = scmp.ne.s32.totalorder %s8460_s19, 0 }
 0xf98   :  { %8464 = shalt.err (%p9100_p11)  }
 0xf99   :  { %8466 = vsyncmov [#allocation6 + $0x4] }
 0xf9c   :  { %s8467_s28 = vpop.sfrf %8466 }
 0xf9d   :  { %p9101_p12 = scmp.ne.s32.totalorder %s8467_s28, 0 }
 0xf9f   :  { %8471 = shalt.err (%p9101_p12)  }
 0xfa0   :  { %8473 = vsyncmov [#allocation6 + $0x5] }
 0xfa3   :  { %s8474_s7 = vpop.sfrf %8473 }
 0xfa4   :  { %p9102_p13 = scmp.ne.s32.totalorder %s8474_s7, 0 }
 0xfa6   :  { %8478 = shalt.err (%p9102_p13)  }

</bundles_post_ra>
